<compile_context>
chip_gen: v7x
topology: tpu7x:2x2x1
jax: 0.10.0
libtpu: 0.0.40
codegen_flags: <defaults>
</compile_context>

<pallas_src>
import functools

import jax
import jax.numpy as jnp
from jax.experimental import pallas as pl
from jax.experimental.pallas import tpu as pltpu


# Output-lane width per grouped-conv chunk (block-diagonal weights). 128 is
# lane-dense and matches v5e's 128-wide MXU; on v6e/v7x 256 would fill the wider
# MXU but doubles the zero-padded FLOPs, so 128 is the portable choice.
_GROUP_CHUNK_LANES = 128


# ----------------------------------------------------------------------------
# small helpers
# ----------------------------------------------------------------------------
def _round_up(x, m):
    return ((x + m - 1) // m) * m


def _pick_tile(dim, prefs):
    for t in prefs:
        if dim % t == 0:
            return t
    return dim  # full extent (always legal for BlockSpec)


def _pick_tile_m(mp):
    """M tile; ensure >= 2 grid steps when possible so both v7x TCs get work."""
    tm = _pick_tile(mp, (512, 256, 128))
    if mp // tm == 1 and mp % 16 == 0:
        tm = mp // 2
    return tm


# ----------------------------------------------------------------------------
# Pallas kernels
# ----------------------------------------------------------------------------
def _mm_bn_kernel(x_ref, w_ref, s_ref, b_ref, o_ref, acc_ref, *, relu):
    # multi-K-tile path: f32 accumulator scratch + init/finalize
    @pl.when(pl.program_id(2) == 0)
    def _():
        acc_ref[...] = jnp.zeros_like(acc_ref)

    acc_ref[...] += jnp.dot(x_ref[...], w_ref[...],
                            preferred_element_type=jnp.float32)

    @pl.when(pl.program_id(2) == pl.num_programs(2) - 1)
    def _():
        y = acc_ref[...] * s_ref[...] + b_ref[...]
        if relu:
            y = jnp.maximum(y, 0.0)
        o_ref[...] = y.astype(o_ref.dtype)


def _mm_bn_kernel_k1(x_ref, w_ref, s_ref, b_ref, o_ref, *, relu):
    # single-K-tile fast path: no scratch, no init/finalize
    y = jnp.dot(x_ref[...], w_ref[...], preferred_element_type=jnp.float32)
    y = y * s_ref[...] + b_ref[...]
    if relu:
        y = jnp.maximum(y, 0.0)
    o_ref[...] = y.astype(o_ref.dtype)


def _grouped_conv3_kernel(xg_ref, wbd_ref, s2_ref, b2_ref,
                          w3_ref, s3_ref, b3_ref, r_ref,
                          o_ref, h_ref, *, n_chunks, ck, cn):
    # xg:(tm, G*Kg)  wbd:(n_chunks, gpc*Kg, gpc*Cg)  s2/b2:(1, width)
    # w3:(width, tn) s3/b3:(1, tn)  r:(tm, tn)  o:(tm, tn)  h scratch:(tm, width)
    #
    # Grouped 3x3 conv (block-diagonal chunk matmuls, 128 output lanes each)
    # is computed once per M-tile (j == 0) into VMEM scratch `h`; the 1x1 conv3
    # + bn3 + residual + relu epilogue then runs per output-N tile from scratch.
    @pl.when(pl.program_id(1) == 0)
    def _():
        for c in range(n_chunks):
            acc = jnp.dot(xg_ref[:, c * ck:(c + 1) * ck], wbd_ref[c],
                          preferred_element_type=jnp.float32)
            y = acc * s2_ref[:, c * cn:(c + 1) * cn] + b2_ref[:, c * cn:(c + 1) * cn]
            h_ref[:, c * cn:(c + 1) * cn] = jnp.maximum(y, 0.0).astype(h_ref.dtype)

    acc3 = jnp.dot(h_ref[...], w3_ref[...], preferred_element_type=jnp.float32)
    y = acc3 * s3_ref[...] + b3_ref[...] + r_ref[...].astype(jnp.float32)
    o_ref[...] = jnp.maximum(y, 0.0).astype(o_ref.dtype)


def _maxpool_kernel(x_ref, o_ref):
    # x_ref: (9, tm, C) -> max over the 9 window taps
    o_ref[...] = jnp.max(x_ref[...], axis=0)


# ----------------------------------------------------------------------------
# Fused dense matmul + BN (+ReLU)
# ----------------------------------------------------------------------------
def matmul_bn_act(x2d, w2d, scale, bias, *, relu):
    M, K = x2d.shape
    _, N = w2d.shape

    Mp = _round_up(M, 8)
    if Mp != M:
        x2d = jnp.pad(x2d, ((0, Mp - M), (0, 0)))

    tm = _pick_tile_m(Mp)
    tn = _pick_tile(N, (256, 128))
    tk = _pick_tile(K, (512, 256, 128))
    kk = K // tk
    grid = (Mp // tm, N // tn, kk)

    x2d = x2d.astype(jnp.bfloat16)

    in_specs = [
        pl.BlockSpec((tm, tk), lambda i, j, k: (i, k)),
        pl.BlockSpec((tk, tn), lambda i, j, k: (k, j)),
        pl.BlockSpec((1, tn), lambda i, j, k: (0, j)),
        pl.BlockSpec((1, tn), lambda i, j, k: (0, j)),
    ]
    if kk == 1:
        kern = functools.partial(_mm_bn_kernel_k1, relu=relu)
        scratch = []
    else:
        kern = functools.partial(_mm_bn_kernel, relu=relu)
        scratch = [pltpu.VMEM((tm, tn), jnp.float32)]

    out = pl.pallas_call(
        kern,
        out_shape=jax.ShapeDtypeStruct((Mp, N), jnp.bfloat16),
        grid=grid,
        in_specs=in_specs,
        out_specs=pl.BlockSpec((tm, tn), lambda i, j, k: (i, j)),
        scratch_shapes=scratch,
        compiler_params=pltpu.CompilerParams(
            dimension_semantics=("parallel", "parallel", "arbitrary")),
    )(x2d, w2d, scale, bias)

    if Mp != M:
        out = out[:M]
    return out


# ----------------------------------------------------------------------------
# Conv wrappers (im2col in the wrapper, matmuls in Pallas)
# ----------------------------------------------------------------------------
def conv2d_bn(x_nhwc, p, *, stride, pad, relu):
    N, H, W, Cin = x_nhwc.shape
    kh, kw = p["ksize"]
    Cout = p["w2d"].shape[1]
    Ho = (H + 2 * pad - kh) // stride + 1
    Wo = (W + 2 * pad - kw) // stride + 1
    M = N * Ho * Wo

    if kh == 1 and kw == 1 and pad == 0:
        xs = x_nhwc[:, ::stride, ::stride, :] if stride > 1 else x_nhwc
        patches = xs.reshape(M, Cin)
    else:
        # TODO(synk): for large spatial inputs, gather the window taps inside the
        # kernel (tap grid axis / pl.ANY + manual DMA) instead of an HBM im2col.
        xp = jnp.pad(x_nhwc, ((0, 0), (pad, pad), (pad, pad), (0, 0)))
        taps = []
        for ky in range(kh):
            for kx in range(kw):
                taps.append(xp[:, ky:ky + (Ho - 1) * stride + 1:stride,
                                  kx:kx + (Wo - 1) * stride + 1:stride, :])
        patches = jnp.stack(taps, axis=3).reshape(M, kh * kw * Cin)

    Kw = p["w2d"].shape[0]
    if patches.shape[1] != Kw:        # stem: K padded to a 128-multiple at param time
        patches = jnp.pad(patches, ((0, 0), (0, Kw - patches.shape[1])))

    out2d = matmul_bn_act(patches, p["w2d"], p["scale"], p["bias"], relu=relu)
    return out2d.reshape(N, Ho, Wo, Cout)


def grouped_conv3_fused(x_nhwc, p2, p3, residual_nhwc, *, stride):
    """Fused: grouped 3x3 conv + BN + ReLU -> 1x1 conv + BN + residual + ReLU.

    The grouped-conv intermediate stays in VMEM scratch; each chunk is one
    block-diagonal matmul with 128 lane-dense output columns; the output is
    written directly as (M, Cout) (no masked partial stores, no post transpose).
    """
    N, H, W, Cin = x_nhwc.shape
    G = p2["groups"]
    Cin_g = Cin // G
    Ho = (H + 2 - 3) // stride + 1
    Wo = (W + 2 - 3) // stride + 1
    M = N * Ho * Wo

    # TODO(synk): at large spatial sizes, move the 9-tap gather into the kernel
    # instead of materializing the im2col patches in HBM.
    xp = jnp.pad(x_nhwc, ((0, 0), (1, 1), (1, 1), (0, 0)))
    taps = []
    for ky in range(3):
        for kx in range(3):
            t = xp[:, ky:ky + (Ho - 1) * stride + 1:stride,
                      kx:kx + (Wo - 1) * stride + 1:stride, :]
            taps.append(t.reshape(N, Ho, Wo, G, Cin_g))
    # group-major within each row, M stays the leading axis (no full transpose):
    # (N,Ho,Wo,G,9,Cin_g) -> (M, G*9*Cin_g)
    xg = jnp.stack(taps, axis=4).reshape(M, G * 9 * Cin_g).astype(jnp.bfloat16)

    nc, ck, cn = p2["wbd"].shape           # chunks, gpc*Kg, gpc*Cg
    width = p2["scale"].shape[1]
    Cout = p3["w2d"].shape[1]
    res2d = residual_nhwc.reshape(M, Cout).astype(jnp.bfloat16)

    Mp = _round_up(M, 8)
    if Mp != M:
        xg = jnp.pad(xg, ((0, Mp - M), (0, 0)))
        res2d = jnp.pad(res2d, ((0, Mp - M), (0, 0)))

    Kx = xg.shape[1]
    tm = _pick_tile_m(Mp)
    tn = _pick_tile(Cout, (256, 128))
    grid = (Mp // tm, Cout // tn)

    out = pl.pallas_call(
        functools.partial(_grouped_conv3_kernel, n_chunks=nc, ck=ck, cn=cn),
        out_shape=jax.ShapeDtypeStruct((Mp, Cout), jnp.bfloat16),
        grid=grid,
        in_specs=[
            pl.BlockSpec((tm, Kx), lambda i, j: (i, 0)),
            pl.BlockSpec((nc, ck, cn), lambda i, j: (0, 0, 0)),
            pl.BlockSpec((1, width), lambda i, j: (0, 0)),
            pl.BlockSpec((1, width), lambda i, j: (0, 0)),
            pl.BlockSpec((width, tn), lambda i, j: (0, j)),
            pl.BlockSpec((1, tn), lambda i, j: (0, j)),
            pl.BlockSpec((1, tn), lambda i, j: (0, j)),
            pl.BlockSpec((tm, tn), lambda i, j: (i, j)),
        ],
        out_specs=pl.BlockSpec((tm, tn), lambda i, j: (i, j)),
        scratch_shapes=[pltpu.VMEM((tm, width), jnp.bfloat16)],
        compiler_params=pltpu.CompilerParams(
            dimension_semantics=("parallel", "arbitrary")),
    )(xg, p2["wbd"], p2["scale"], p2["bias"],
      p3["w2d"], p3["scale"], p3["bias"], res2d)

    if Mp != M:
        out = out[:M]
    return out.reshape(N, Ho, Wo, Cout)


def maxpool_3x3_s2_p1(x_nhwc):
    N, H, W, C = x_nhwc.shape
    Ho = (H + 2 - 3) // 2 + 1
    Wo = (W + 2 - 3) // 2 + 1
    # TODO(synk): for large inputs, read the 9 shifted windows inside the kernel
    # instead of materializing the (9, M, C) stack in HBM (tiny at these shapes).
    xp = jnp.pad(x_nhwc, ((0, 0), (1, 1), (1, 1), (0, 0)),
                 constant_values=float("-inf"))
    taps = []
    for ky in range(3):
        for kx in range(3):
            taps.append(xp[:, ky:ky + (Ho - 1) * 2 + 1:2,
                              kx:kx + (Wo - 1) * 2 + 1:2, :])
    M = N * Ho * Wo
    stacked = jnp.stack(taps, axis=0).reshape(9, M, C)

    Mp = _round_up(M, 8)
    if Mp != M:
        stacked = jnp.pad(stacked, ((0, 0), (0, Mp - M), (0, 0)),
                          constant_values=float("-inf"))
    tm = _pick_tile_m(Mp)

    out = pl.pallas_call(
        _maxpool_kernel,
        out_shape=jax.ShapeDtypeStruct((Mp, C), x_nhwc.dtype),
        grid=(Mp // tm,),
        in_specs=[pl.BlockSpec((9, tm, C), lambda i: (0, i, 0))],
        out_specs=pl.BlockSpec((tm, C), lambda i: (i, 0)),
        compiler_params=pltpu.CompilerParams(dimension_semantics=("parallel",)),
    )(stacked)
    return out[:M].reshape(N, Ho, Wo, C)


# ----------------------------------------------------------------------------
# Parameters (deterministic synthetic init; BN folded into scale/bias; weights
# pre-transformed to matmul layout, block-diagonalized and cast to bf16 ONCE)
# ----------------------------------------------------------------------------
class KeyGen:
    def __init__(self, seed):
        self._key = jax.random.PRNGKey(seed)

    def __call__(self):
        self._key, sub = jax.random.split(self._key)
        return sub


def _folded_bn(kg, cout, bn_eps=1e-5):
    gamma = 1.0 + 0.1 * jax.random.normal(kg(), (cout,), jnp.float32)
    beta = 0.1 * jax.random.normal(kg(), (cout,), jnp.float32)
    mean = 0.1 * jax.random.normal(kg(), (cout,), jnp.float32)
    var = 0.5 + jax.random.uniform(kg(), (cout,), jnp.float32)
    scale = gamma * jax.lax.rsqrt(var + bn_eps)
    bias = beta - mean * scale
    return scale, bias


def make_conv_bn(kg, cin, cout, k):
    w = 0.05 * jax.random.normal(kg(), (cout, cin, k, k), jnp.float32)
    scale, bias = _folded_bn(kg, cout)
    # OIHW -> (kh, kw, Cin, Cout) -> (kh*kw*Cin, Cout), matching patch ordering
    w2d = jnp.transpose(w, (2, 3, 1, 0)).reshape(k * k * cin, cout)
    kdim = k * k * cin
    if k > 1 and kdim % 128 != 0:
        # pad the contraction dim to a 128-multiple (clean MXU lanes for the stem)
        w2d = jnp.pad(w2d, ((0, _round_up(kdim, 128) - kdim), (0, 0)))
    return {"w2d": w2d.astype(jnp.bfloat16),
            "scale": scale.reshape(1, cout),
            "bias": bias.reshape(1, cout),
            "ksize": (k, k)}


def make_grouped_conv_bn(kg, cin, cout, groups, k=3):
    cin_g = cin // groups
    cg = cout // groups
    kgdim = k * k * cin_g
    w = 0.05 * jax.random.normal(kg(), (cout, cin_g, k, k), jnp.float32)
    scale, bias = _folded_bn(kg, cout)
    # compact per-group weights: (G, Cg, Cin_g, kh, kw) -> (G, kh*kw*Cin_g, Cg)
    wg = (w.reshape(groups, cg, cin_g, k, k)
           .transpose(0, 3, 4, 2, 1)
           .reshape(groups, kgdim, cg))
    # block-diagonal chunks: gpc groups per chunk so the chunk has 128 output lanes
    gpc = max(1, min(groups, _GROUP_CHUNK_LANES // cg))
    while groups % gpc:
        gpc -= 1
    nc = groups // gpc
    wgc = wg.reshape(nc, gpc, kgdim, cg)
    eye = jnp.eye(gpc, dtype=jnp.float32)
    wbd = (jnp.einsum("cgkd,gh->cgkhd", wgc, eye)
              .reshape(nc, gpc * kgdim, gpc * cg)
              .astype(jnp.bfloat16))
    return {"wbd": wbd, "groups": groups,
            "scale": scale.reshape(1, cout), "bias": bias.reshape(1, cout)}


def make_layer(kg, inplanes, planes, blocks, stride, groups=32, base_width=4):
    width = int(planes * (base_width / 64.0)) * groups
    out_planes = planes * 4
    layer = []
    for b in range(blocks):
        cin = inplanes if b == 0 else out_planes
        s = stride if b == 0 else 1
        blk = {
            "conv1": make_conv_bn(kg, cin, width, 1),
            "conv2": make_grouped_conv_bn(kg, width, width, groups, 3),
            "conv3": make_conv_bn(kg, width, out_planes, 1),
            "stride": s,
        }
        if b == 0:
            blk["down"] = make_conv_bn(kg, cin, out_planes, 1)
        layer.append(blk)
    return layer


def make_params(seed=0):
    kg = KeyGen(seed)
    return {
        "stem": make_conv_bn(kg, 3, 64, 7),
        "layer1": make_layer(kg, 64, 64, 3, 1),
        "layer2": make_layer(kg, 256, 128, 4, 2),
        "layer3": make_layer(kg, 512, 256, 6, 2),
    }


# ----------------------------------------------------------------------------
# Forward
# ----------------------------------------------------------------------------
def bottleneck_forward(x, blk):
    identity = x
    out = conv2d_bn(x, blk["conv1"], stride=1, pad=0, relu=True)
    if "down" in blk:
        identity = conv2d_bn(x, blk["down"], stride=blk["stride"], pad=0, relu=False)
    # grouped 3x3 + bn2 + relu + conv3 + bn3 + residual + relu in ONE pallas_call
    return grouped_conv3_fused(out, blk["conv2"], blk["conv3"], identity,
                               stride=blk["stride"])


def resnext50_encoder(params, x_nchw):
    # NCHW in -> NHWC bf16 internally -> NCHW f32 out
    x = jnp.transpose(x_nchw, (0, 2, 3, 1)).astype(jnp.bfloat16)
    x = conv2d_bn(x, params["stem"], stride=2, pad=3, relu=True)   # conv1+bn1+relu
    x = maxpool_3x3_s2_p1(x)                                       # maxpool
    for name in ("layer1", "layer2", "layer3"):
        for blk in params[name]:
            x = bottleneck_forward(x, blk)
    return jnp.transpose(x, (0, 3, 1, 2)).astype(jnp.float32)


# ----------------------------------------------------------------------------
if __name__ == "__main__":
    params = make_params(seed=0)

    key = jax.random.PRNGKey(0)
    x = jax.random.normal(key, (2, 3, 32, 32), jnp.float32)   # NCHW, 3-channel

    apply_fn = jax.jit(functools.partial(resnext50_encoder, params))
    out = jax.block_until_ready(apply_fn(x))

    assert out.shape == (2, 1024, 2, 2), out.shape
    assert bool(jnp.all(jnp.isfinite(out)))
    print("KERNEL_OK")
</pallas_src>

<mosaic_0001>
module attributes {stable_mosaic.version = 11 : i64} {
  func.func @_mm_bn_kernel_k1(%arg0: i32, %arg1: i32, %arg2: i32, %arg3: memref<256x256xbf16, #tpu.memory_space<vmem>>, %arg4: memref<256x64xbf16, #tpu.memory_space<vmem>>, %arg5: memref<1x64xf32, #tpu.memory_space<vmem>>, %arg6: memref<1x64xf32, #tpu.memory_space<vmem>>, %arg7: memref<256x64xbf16, #tpu.memory_space<vmem>>) attributes {dimension_semantics = [#tpu.dimension_semantics<parallel>, #tpu.dimension_semantics<parallel>, #tpu.dimension_semantics<arbitrary>], iteration_bounds = array<i64: 2, 1, 1>, scalar_prefetch = 0 : i64, scratch_operands = 0 : i64, tpu.core_type = #tpu.core_type<tc>, window_params = [{transform_indices = @transform_0, window_bounds = array<i64: 256, 256>}, {transform_indices = @transform_1, window_bounds = array<i64: 256, 64>}, {transform_indices = @transform_2, window_bounds = array<i64: 1, 64>}, {transform_indices = @transform_3, window_bounds = array<i64: 1, 64>}, {transform_indices = @transform_4, window_bounds = array<i64: 256, 64>}]} {
    %c0 = arith.constant 0 : index
    %c0_0 = arith.constant 0 : index
    %0 = vector.load %arg3[%c0, %c0_0] : memref<256x256xbf16, #tpu.memory_space<vmem>>, vector<256x256xbf16>
    %c0_1 = arith.constant 0 : index
    %c0_2 = arith.constant 0 : index
    %1 = vector.load %arg4[%c0_1, %c0_2] : memref<256x64xbf16, #tpu.memory_space<vmem>>, vector<256x64xbf16>
    %cst = arith.constant dense<0.000000e+00> : vector<256x64xf32>
    %2 = tpu.matmul %0, %1, %cst {dimension_numbers = #tpu.dot_dimension_numbers<[1], [0], [0], [1], [0, 0, 1, 1], [], []>} : vector<256x256xbf16>, vector<256x64xbf16>, vector<256x64xf32> -> vector<256x64xf32>
    %c0_3 = arith.constant 0 : index
    %c0_4 = arith.constant 0 : index
    %3 = vector.load %arg5[%c0_3, %c0_4] : memref<1x64xf32, #tpu.memory_space<vmem>>, vector<1x64xf32>
    %4 = vector.broadcast %3 : vector<1x64xf32> to vector<256x64xf32>
    %5 = arith.mulf %2, %4 : vector<256x64xf32>
    %c0_5 = arith.constant 0 : index
    %c0_6 = arith.constant 0 : index
    %6 = vector.load %arg6[%c0_5, %c0_6] : memref<1x64xf32, #tpu.memory_space<vmem>>, vector<1x64xf32>
    %7 = vector.broadcast %6 : vector<1x64xf32> to vector<256x64xf32>
    %8 = arith.addf %5, %7 : vector<256x64xf32>
    %cst_7 = arith.constant 0.000000e+00 : f32
    %9 = vector.broadcast %cst_7 : f32 to vector<256x64xf32>
    %10 = arith.maximumf %8, %9 : vector<256x64xf32>
    %11 = arith.truncf %10 : vector<256x64xf32> to vector<256x64xbf16>
    %c0_8 = arith.constant 0 : index
    %c0_9 = arith.constant 0 : index
    %12 = vector.load %arg7[%c0_8, %c0_9] : memref<256x64xbf16, #tpu.memory_space<vmem>>, vector<256x64xbf16>
    tpu.vector_store %arg7[%c0_8, %c0_9], %11 {strides = array<i32>} : memref<256x64xbf16, #tpu.memory_space<vmem>>, vector<256x64xbf16>,
    return
  }
  func.func @transform_0(%arg0: i32, %arg1: i32, %arg2: i32) -> (i32, i32) {
    %c0_i32 = arith.constant 0 : i32
    return %arg0, %arg2 : i32, i32
  }
  func.func @transform_1(%arg0: i32, %arg1: i32, %arg2: i32) -> (i32, i32) {
    %c0_i32 = arith.constant 0 : i32
    return %arg2, %arg1 : i32, i32
  }
  func.func @transform_2(%arg0: i32, %arg1: i32, %arg2: i32) -> (i32, i32) {
    %c0_i32 = arith.constant 0 : i32
    %c0_i32_0 = arith.constant 0 : i32
    return %c0_i32, %arg1 : i32, i32
  }
  func.func @transform_3(%arg0: i32, %arg1: i32, %arg2: i32) -> (i32, i32) {
    %c0_i32 = arith.constant 0 : i32
    %c0_i32_0 = arith.constant 0 : i32
    return %c0_i32, %arg1 : i32, i32
  }
  func.func @transform_4(%arg0: i32, %arg1: i32, %arg2: i32) -> (i32, i32) {
    %c0_i32 = arith.constant 0 : i32
    return %arg0, %arg1 : i32, i32
  }
}

module attributes {stable_mosaic.version = 11 : i64} {
  func.func @_mm_bn_kernel_k1(%arg0: i32, %arg1: i32, %arg2: i32, %arg3: memref<64x64xbf16, #tpu.memory_space<vmem>>, %arg4: memref<64x128xbf16, #tpu.memory_space<vmem>>, %arg5: memref<1x128xf32, #tpu.memory_space<vmem>>, %arg6: memref<1x128xf32, #tpu.memory_space<vmem>>, %arg7: memref<64x128xbf16, #tpu.memory_space<vmem>>) attributes {dimension_semantics = [#tpu.dimension_semantics<parallel>, #tpu.dimension_semantics<parallel>, #tpu.dimension_semantics<arbitrary>], iteration_bounds = array<i64: 2, 1, 1>, scalar_prefetch = 0 : i64, scratch_operands = 0 : i64, tpu.core_type = #tpu.core_type<tc>, window_params = [{transform_indices = @transform_0, window_bounds = array<i64: 64, 64>}, {transform_indices = @transform_1, window_bounds = array<i64: 64, 128>}, {transform_indices = @transform_2, window_bounds = array<i64: 1, 128>}, {transform_indices = @transform_3, window_bounds = array<i64: 1, 128>}, {transform_indices = @transform_4, window_bounds = array<i64: 64, 128>}]} {
    %c0 = arith.constant 0 : index
    %c0_0 = arith.constant 0 : index
    %0 = vector.load %arg3[%c0, %c0_0] : memref<64x64xbf16, #tpu.memory_space<vmem>>, vector<64x64xbf16>
    %c0_1 = arith.constant 0 : index
    %c0_2 = arith.constant 0 : index
    %1 = vector.load %arg4[%c0_1, %c0_2] : memref<64x128xbf16, #tpu.memory_space<vmem>>, vector<64x128xbf16>
    %cst = arith.constant dense<0.000000e+00> : vector<64x128xf32>
    %2 = tpu.matmul %0, %1, %cst {dimension_numbers = #tpu.dot_dimension_numbers<[1], [0], [0], [1], [0, 0, 1, 1], [], []>} : vector<64x64xbf16>, vector<64x128xbf16>, vector<64x128xf32> -> vector<64x128xf32>
    %c0_3 = arith.constant 0 : index
    %c0_4 = arith.constant 0 : index
    %3 = vector.load %arg5[%c0_3, %c0_4] : memref<1x128xf32, #tpu.memory_space<vmem>>, vector<1x128xf32>
    %4 = vector.broadcast %3 : vector<1x128xf32> to vector<64x128xf32>
    %5 = arith.mulf %2, %4 : vector<64x128xf32>
    %c0_5 = arith.constant 0 : index
    %c0_6 = arith.constant 0 : index
    %6 = vector.load %arg6[%c0_5, %c0_6] : memref<1x128xf32, #tpu.memory_space<vmem>>, vector<1x128xf32>
    %7 = vector.broadcast %6 : vector<1x128xf32> to vector<64x128xf32>
    %8 = arith.addf %5, %7 : vector<64x128xf32>
    %cst_7 = arith.constant 0.000000e+00 : f32
    %9 = vector.broadcast %cst_7 : f32 to vector<64x128xf32>
    %10 = arith.maximumf %8, %9 : vector<64x128xf32>
    %11 = arith.truncf %10 : vector<64x128xf32> to vector<64x128xbf16>
    %c0_8 = arith.constant 0 : index
    %c0_9 = arith.constant 0 : index
    %12 = vector.load %arg7[%c0_8, %c0_9] : memref<64x128xbf16, #tpu.memory_space<vmem>>, vector<64x128xbf16>
    tpu.vector_store %arg7[%c0_8, %c0_9], %11 {strides = array<i32>} : memref<64x128xbf16, #tpu.memory_space<vmem>>, vector<64x128xbf16>,
    return
  }
  func.func @transform_0(%arg0: i32, %arg1: i32, %arg2: i32) -> (i32, i32) {
    %c0_i32 = arith.constant 0 : i32
    return %arg0, %arg2 : i32, i32
  }
  func.func @transform_1(%arg0: i32, %arg1: i32, %arg2: i32) -> (i32, i32) {
    %c0_i32 = arith.constant 0 : i32
    return %arg2, %arg1 : i32, i32
  }
  func.func @transform_2(%arg0: i32, %arg1: i32, %arg2: i32) -> (i32, i32) {
    %c0_i32 = arith.constant 0 : i32
    %c0_i32_0 = arith.constant 0 : i32
    return %c0_i32, %arg1 : i32, i32
  }
  func.func @transform_3(%arg0: i32, %arg1: i32, %arg2: i32) -> (i32, i32) {
    %c0_i32 = arith.constant 0 : i32
    %c0_i32_0 = arith.constant 0 : i32
    return %c0_i32, %arg1 : i32, i32
  }
  func.func @transform_4(%arg0: i32, %arg1: i32, %arg2: i32) -> (i32, i32) {
    %c0_i32 = arith.constant 0 : i32
    return %arg0, %arg1 : i32, i32
  }
}

module attributes {stable_mosaic.version = 11 : i64} {
  func.func @_maxpool_kernel(%arg0: i32, %arg1: memref<9x64x64xbf16, #tpu.memory_space<vmem>>, %arg2: memref<64x64xbf16, #tpu.memory_space<vmem>>) attributes {dimension_semantics = [#tpu.dimension_semantics<parallel>], iteration_bounds = array<i64: 2>, scalar_prefetch = 0 : i64, scratch_operands = 0 : i64, tpu.core_type = #tpu.core_type<tc>, window_params = [{transform_indices = @transform_0, window_bounds = array<i64: 9, 64, 64>}, {transform_indices = @transform_1, window_bounds = array<i64: 64, 64>}]} {
    %c0 = arith.constant 0 : index
    %c0_0 = arith.constant 0 : index
    %c0_1 = arith.constant 0 : index
    %0 = vector.load %arg1[%c0, %c0_0, %c0_1] : memref<9x64x64xbf16, #tpu.memory_space<vmem>>, vector<9x64x64xbf16>
    %cst = arith.constant dense<0xFF80> : vector<64x64xbf16>
    %1 = vector.multi_reduction <maximumf>, %0, %cst [0] : vector<9x64x64xbf16> to vector<64x64xbf16>
    %c0_2 = arith.constant 0 : index
    %c0_3 = arith.constant 0 : index
    %2 = vector.load %arg2[%c0_2, %c0_3] : memref<64x64xbf16, #tpu.memory_space<vmem>>, vector<64x64xbf16>
    tpu.vector_store %arg2[%c0_2, %c0_3], %1 {strides = array<i32>} : memref<64x64xbf16, #tpu.memory_space<vmem>>, vector<64x64xbf16>,
    return
  }
  func.func @transform_0(%arg0: i32) -> (i32, i32, i32) {
    %c0_i32 = arith.constant 0 : i32
    %c0_i32_0 = arith.constant 0 : i32
    %c0_i32_1 = arith.constant 0 : i32
    return %c0_i32, %arg0, %c0_i32_0 : i32, i32, i32
  }
  func.func @transform_1(%arg0: i32) -> (i32, i32) {
    %c0_i32 = arith.constant 0 : i32
    %c0_i32_0 = arith.constant 0 : i32
    return %arg0, %c0_i32 : i32, i32
  }
}

module attributes {stable_mosaic.version = 11 : i64} {
  func.func @_mm_bn_kernel_k1(%arg0: i32, %arg1: i32, %arg2: i32, %arg3: memref<64x64xbf16, #tpu.memory_space<vmem>>, %arg4: memref<64x256xbf16, #tpu.memory_space<vmem>>, %arg5: memref<1x256xf32, #tpu.memory_space<vmem>>, %arg6: memref<1x256xf32, #tpu.memory_space<vmem>>, %arg7: memref<64x256xbf16, #tpu.memory_space<vmem>>) attributes {dimension_semantics = [#tpu.dimension_semantics<parallel>, #tpu.dimension_semantics<parallel>, #tpu.dimension_semantics<arbitrary>], iteration_bounds = array<i64: 2, 1, 1>, scalar_prefetch = 0 : i64, scratch_operands = 0 : i64, tpu.core_type = #tpu.core_type<tc>, window_params = [{transform_indices = @transform_0, window_bounds = array<i64: 64, 64>}, {transform_indices = @transform_1, window_bounds = array<i64: 64, 256>}, {transform_indices = @transform_2, window_bounds = array<i64: 1, 256>}, {transform_indices = @transform_3, window_bounds = array<i64: 1, 256>}, {transform_indices = @transform_4, window_bounds = array<i64: 64, 256>}]} {
    %c0 = arith.constant 0 : index
    %c0_0 = arith.constant 0 : index
    %0 = vector.load %arg3[%c0, %c0_0] : memref<64x64xbf16, #tpu.memory_space<vmem>>, vector<64x64xbf16>
    %c0_1 = arith.constant 0 : index
    %c0_2 = arith.constant 0 : index
    %1 = vector.load %arg4[%c0_1, %c0_2] : memref<64x256xbf16, #tpu.memory_space<vmem>>, vector<64x256xbf16>
    %cst = arith.constant dense<0.000000e+00> : vector<64x256xf32>
    %2 = tpu.matmul %0, %1, %cst {dimension_numbers = #tpu.dot_dimension_numbers<[1], [0], [0], [1], [0, 0, 1, 1], [], []>} : vector<64x64xbf16>, vector<64x256xbf16>, vector<64x256xf32> -> vector<64x256xf32>
    %c0_3 = arith.constant 0 : index
    %c0_4 = arith.constant 0 : index
    %3 = vector.load %arg5[%c0_3, %c0_4] : memref<1x256xf32, #tpu.memory_space<vmem>>, vector<1x256xf32>
    %4 = vector.broadcast %3 : vector<1x256xf32> to vector<64x256xf32>
    %5 = arith.mulf %2, %4 : vector<64x256xf32>
    %c0_5 = arith.constant 0 : index
    %c0_6 = arith.constant 0 : index
    %6 = vector.load %arg6[%c0_5, %c0_6] : memref<1x256xf32, #tpu.memory_space<vmem>>, vector<1x256xf32>
    %7 = vector.broadcast %6 : vector<1x256xf32> to vector<64x256xf32>
    %8 = arith.addf %5, %7 : vector<64x256xf32>
    %9 = arith.truncf %8 : vector<64x256xf32> to vector<64x256xbf16>
    %c0_7 = arith.constant 0 : index
    %c0_8 = arith.constant 0 : index
    %10 = vector.load %arg7[%c0_7, %c0_8] : memref<64x256xbf16, #tpu.memory_space<vmem>>, vector<64x256xbf16>
    tpu.vector_store %arg7[%c0_7, %c0_8], %9 {strides = array<i32>} : memref<64x256xbf16, #tpu.memory_space<vmem>>, vector<64x256xbf16>,
    return
  }
  func.func @transform_0(%arg0: i32, %arg1: i32, %arg2: i32) -> (i32, i32) {
    %c0_i32 = arith.constant 0 : i32
    return %arg0, %arg2 : i32, i32
  }
  func.func @transform_1(%arg0: i32, %arg1: i32, %arg2: i32) -> (i32, i32) {
    %c0_i32 = arith.constant 0 : i32
    return %arg2, %arg1 : i32, i32
  }
  func.func @transform_2(%arg0: i32, %arg1: i32, %arg2: i32) -> (i32, i32) {
    %c0_i32 = arith.constant 0 : i32
    %c0_i32_0 = arith.constant 0 : i32
    return %c0_i32, %arg1 : i32, i32
  }
  func.func @transform_3(%arg0: i32, %arg1: i32, %arg2: i32) -> (i32, i32) {
    %c0_i32 = arith.constant 0 : i32
    %c0_i32_0 = arith.constant 0 : i32
    return %c0_i32, %arg1 : i32, i32
  }
  func.func @transform_4(%arg0: i32, %arg1: i32, %arg2: i32) -> (i32, i32) {
    %c0_i32 = arith.constant 0 : i32
    return %arg0, %arg1 : i32, i32
  }
}

module attributes {stable_mosaic.version = 11 : i64} {
  func.func @_grouped_conv3_kernel(%arg0: i32, %arg1: i32, %arg2: memref<64x1152xbf16, #tpu.memory_space<vmem>>, %arg3: memref<1x1152x128xbf16, #tpu.memory_space<vmem>>, %arg4: memref<1x128xf32, #tpu.memory_space<vmem>>, %arg5: memref<1x128xf32, #tpu.memory_space<vmem>>, %arg6: memref<128x256xbf16, #tpu.memory_space<vmem>>, %arg7: memref<1x256xf32, #tpu.memory_space<vmem>>, %arg8: memref<1x256xf32, #tpu.memory_space<vmem>>, %arg9: memref<64x256xbf16, #tpu.memory_space<vmem>>, %arg10: memref<64x256xbf16, #tpu.memory_space<vmem>>, %arg11: memref<64x128xbf16, #tpu.memory_space<vmem>>) attributes {dimension_semantics = [#tpu.dimension_semantics<parallel>, #tpu.dimension_semantics<arbitrary>], iteration_bounds = array<i64: 2, 1>, scalar_prefetch = 0 : i64, scratch_operands = 1 : i64, tpu.core_type = #tpu.core_type<tc>, window_params = [{transform_indices = @transform_0, window_bounds = array<i64: 64, 1152>}, {pipeline_mode = #tpu.pipeline_mode<synchronous>, transform_indices = @transform_1, window_bounds = array<i64: 1, 1152, 128>}, {pipeline_mode = #tpu.pipeline_mode<synchronous>, transform_indices = @transform_2, window_bounds = array<i64: 1, 128>}, {pipeline_mode = #tpu.pipeline_mode<synchronous>, transform_indices = @transform_3, window_bounds = array<i64: 1, 128>}, {transform_indices = @transform_4, window_bounds = array<i64: 128, 256>}, {transform_indices = @transform_5, window_bounds = array<i64: 1, 256>}, {transform_indices = @transform_6, window_bounds = array<i64: 1, 256>}, {transform_indices = @transform_7, window_bounds = array<i64: 64, 256>}, {transform_indices = @transform_8, window_bounds = array<i64: 64, 256>}]} {
    %c0_i32 = arith.constant 0 : i32
    %0 = arith.cmpi eq, %arg1, %c0_i32 : i32
    %1 = arith.extui %0 : i1 to i32
    %c0_i32_0 = arith.constant 0 : i32
    %2 = arith.cmpi ne, %1, %c0_i32_0 : i32
    scf.if %2 {
      %c0_13 = arith.constant 0 : index
      %c0_14 = arith.constant 0 : index
      %19 = vector.load %arg2[%c0_13, %c0_14] : memref<64x1152xbf16, #tpu.memory_space<vmem>>, vector<64x1152xbf16>
      %c0_15 = arith.constant 0 : index
      %c0_16 = arith.constant 0 : index
      %c0_17 = arith.constant 0 : index
      %20 = vector.load %arg3[%c0_15, %c0_16, %c0_17] : memref<1x1152x128xbf16, #tpu.memory_space<vmem>>, vector<1x1152x128xbf16>
      %21 = vector.shape_cast %20 : vector<1x1152x128xbf16> to vector<1152x128xbf16>
      %cst_18 = arith.constant dense<0.000000e+00> : vector<64x128xf32>
      %22 = tpu.matmul %19, %21, %cst_18 {dimension_numbers = #tpu.dot_dimension_numbers<[1], [0], [0], [1], [0, 0, 1, 1], [], []>} : vector<64x1152xbf16>, vector<1152x128xbf16>, vector<64x128xf32> -> vector<64x128xf32>
      %c0_19 = arith.constant 0 : index
      %c0_20 = arith.constant 0 : index
      %23 = vector.load %arg4[%c0_19, %c0_20] : memref<1x128xf32, #tpu.memory_space<vmem>>, vector<1x128xf32>
      %24 = vector.broadcast %23 : vector<1x128xf32> to vector<64x128xf32>
      %25 = arith.mulf %22, %24 : vector<64x128xf32>
      %c0_21 = arith.constant 0 : index
      %c0_22 = arith.constant 0 : index
      %26 = vector.load %arg5[%c0_21, %c0_22] : memref<1x128xf32, #tpu.memory_space<vmem>>, vector<1x128xf32>
      %27 = vector.broadcast %26 : vector<1x128xf32> to vector<64x128xf32>
      %28 = arith.addf %25, %27 : vector<64x128xf32>
      %cst_23 = arith.constant 0.000000e+00 : f32
      %29 = vector.broadcast %cst_23 : f32 to vector<64x128xf32>
      %30 = arith.maximumf %28, %29 : vector<64x128xf32>
      %31 = arith.truncf %30 : vector<64x128xf32> to vector<64x128xbf16>
      %c0_24 = arith.constant 0 : index
      %c0_25 = arith.constant 0 : index
      %32 = vector.load %arg11[%c0_24, %c0_25] : memref<64x128xbf16, #tpu.memory_space<vmem>>, vector<64x128xbf16>
      tpu.vector_store %arg11[%c0_24, %c0_25], %31 {strides = array<i32>} : memref<64x128xbf16, #tpu.memory_space<vmem>>, vector<64x128xbf16>,
    } else {
    }
    %c0 = arith.constant 0 : index
    %c0_1 = arith.constant 0 : index
    %3 = vector.load %arg11[%c0, %c0_1] : memref<64x128xbf16, #tpu.memory_space<vmem>>, vector<64x128xbf16>
    %c0_2 = arith.constant 0 : index
    %c0_3 = arith.constant 0 : index
    %4 = vector.load %arg6[%c0_2, %c0_3] : memref<128x256xbf16, #tpu.memory_space<vmem>>, vector<128x256xbf16>
    %cst = arith.constant dense<0.000000e+00> : vector<64x256xf32>
    %5 = tpu.matmul %3, %4, %cst {dimension_numbers = #tpu.dot_dimension_numbers<[1], [0], [0], [1], [0, 0, 1, 1], [], []>} : vector<64x128xbf16>, vector<128x256xbf16>, vector<64x256xf32> -> vector<64x256xf32>
    %c0_4 = arith.constant 0 : index
    %c0_5 = arith.constant 0 : index
    %6 = vector.load %arg7[%c0_4, %c0_5] : memref<1x256xf32, #tpu.memory_space<vmem>>, vector<1x256xf32>
    %7 = vector.broadcast %6 : vector<1x256xf32> to vector<64x256xf32>
    %8 = arith.mulf %5, %7 : vector<64x256xf32>
    %c0_6 = arith.constant 0 : index
    %c0_7 = arith.constant 0 : index
    %9 = vector.load %arg8[%c0_6, %c0_7] : memref<1x256xf32, #tpu.memory_space<vmem>>, vector<1x256xf32>
    %10 = vector.broadcast %9 : vector<1x256xf32> to vector<64x256xf32>
    %11 = arith.addf %8, %10 : vector<64x256xf32>
    %c0_8 = arith.constant 0 : index
    %c0_9 = arith.constant 0 : index
    %12 = vector.load %arg9[%c0_8, %c0_9] : memref<64x256xbf16, #tpu.memory_space<vmem>>, vector<64x256xbf16>
    %13 = arith.extf %12 : vector<64x256xbf16> to vector<64x256xf32>
    %14 = arith.addf %11, %13 : vector<64x256xf32>
    %cst_10 = arith.constant 0.000000e+00 : f32
    %15 = vector.broadcast %cst_10 : f32 to vector<64x256xf32>
    %16 = arith.maximumf %14, %15 : vector<64x256xf32>
    %17 = arith.truncf %16 : vector<64x256xf32> to vector<64x256xbf16>
    %c0_11 = arith.constant 0 : index
    %c0_12 = arith.constant 0 : index
    %18 = vector.load %arg10[%c0_11, %c0_12] : memref<64x256xbf16, #tpu.memory_space<vmem>>, vector<64x256xbf16>
    tpu.vector_store %arg10[%c0_11, %c0_12], %17 {strides = array<i32>} : memref<64x256xbf16, #tpu.memory_space<vmem>>, vector<64x256xbf16>,
    return
  }
  func.func @transform_0(%arg0: i32, %arg1: i32) -> (i32, i32) {
    %c0_i32 = arith.constant 0 : i32
    %c0_i32_0 = arith.constant 0 : i32
    return %arg0, %c0_i32 : i32, i32
  }
  func.func @transform_1(%arg0: i32, %arg1: i32) -> (i32, i32, i32) {
    %c0_i32 = arith.constant 0 : i32
    %c0_i32_0 = arith.constant 0 : i32
    %c0_i32_1 = arith.constant 0 : i32
    %c0_i32_2 = arith.constant 0 : i32
    return %c0_i32, %c0_i32_0, %c0_i32_1 : i32, i32, i32
  }
  func.func @transform_2(%arg0: i32, %arg1: i32) -> (i32, i32) {
    %c0_i32 = arith.constant 0 : i32
    %c0_i32_0 = arith.constant 0 : i32
    %c0_i32_1 = arith.constant 0 : i32
    return %c0_i32, %c0_i32_0 : i32, i32
  }
  func.func @transform_3(%arg0: i32, %arg1: i32) -> (i32, i32) {
    %c0_i32 = arith.constant 0 : i32
    %c0_i32_0 = arith.constant 0 : i32
    %c0_i32_1 = arith.constant 0 : i32
    return %c0_i32, %c0_i32_0 : i32, i32
  }
  func.func @transform_4(%arg0: i32, %arg1: i32) -> (i32, i32) {
    %c0_i32 = arith.constant 0 : i32
    %c0_i32_0 = arith.constant 0 : i32
    return %c0_i32, %arg1 : i32, i32
  }
  func.func @transform_5(%arg0: i32, %arg1: i32) -> (i32, i32) {
    %c0_i32 = arith.constant 0 : i32
    %c0_i32_0 = arith.constant 0 : i32
    return %c0_i32, %arg1 : i32, i32
  }
  func.func @transform_6(%arg0: i32, %arg1: i32) -> (i32, i32) {
    %c0_i32 = arith.constant 0 : i32
    %c0_i32_0 = arith.constant 0 : i32
    return %c0_i32, %arg1 : i32, i32
  }
  func.func @transform_7(%arg0: i32, %arg1: i32) -> (i32, i32) {
    %c0_i32 = arith.constant 0 : i32
    return %arg0, %arg1 : i32, i32
  }
  func.func @transform_8(%arg0: i32, %arg1: i32) -> (i32, i32) {
    %c0_i32 = arith.constant 0 : i32
    return %arg0, %arg1 : i32, i32
  }
}

module attributes {stable_mosaic.version = 11 : i64} {
  func.func @_mm_bn_kernel_k1(%arg0: i32, %arg1: i32, %arg2: i32, %arg3: memref<64x256xbf16, #tpu.memory_space<vmem>>, %arg4: memref<256x128xbf16, #tpu.memory_space<vmem>>, %arg5: memref<1x128xf32, #tpu.memory_space<vmem>>, %arg6: memref<1x128xf32, #tpu.memory_space<vmem>>, %arg7: memref<64x128xbf16, #tpu.memory_space<vmem>>) attributes {dimension_semantics = [#tpu.dimension_semantics<parallel>, #tpu.dimension_semantics<parallel>, #tpu.dimension_semantics<arbitrary>], iteration_bounds = array<i64: 2, 1, 1>, scalar_prefetch = 0 : i64, scratch_operands = 0 : i64, tpu.core_type = #tpu.core_type<tc>, window_params = [{transform_indices = @transform_0, window_bounds = array<i64: 64, 256>}, {transform_indices = @transform_1, window_bounds = array<i64: 256, 128>}, {transform_indices = @transform_2, window_bounds = array<i64: 1, 128>}, {transform_indices = @transform_3, window_bounds = array<i64: 1, 128>}, {transform_indices = @transform_4, window_bounds = array<i64: 64, 128>}]} {
    %c0 = arith.constant 0 : index
    %c0_0 = arith.constant 0 : index
    %0 = vector.load %arg3[%c0, %c0_0] : memref<64x256xbf16, #tpu.memory_space<vmem>>, vector<64x256xbf16>
    %c0_1 = arith.constant 0 : index
    %c0_2 = arith.constant 0 : index
    %1 = vector.load %arg4[%c0_1, %c0_2] : memref<256x128xbf16, #tpu.memory_space<vmem>>, vector<256x128xbf16>
    %cst = arith.constant dense<0.000000e+00> : vector<64x128xf32>
    %2 = tpu.matmul %0, %1, %cst {dimension_numbers = #tpu.dot_dimension_numbers<[1], [0], [0], [1], [0, 0, 1, 1], [], []>} : vector<64x256xbf16>, vector<256x128xbf16>, vector<64x128xf32> -> vector<64x128xf32>
    %c0_3 = arith.constant 0 : index
    %c0_4 = arith.constant 0 : index
    %3 = vector.load %arg5[%c0_3, %c0_4] : memref<1x128xf32, #tpu.memory_space<vmem>>, vector<1x128xf32>
    %4 = vector.broadcast %3 : vector<1x128xf32> to vector<64x128xf32>
    %5 = arith.mulf %2, %4 : vector<64x128xf32>
    %c0_5 = arith.constant 0 : index
    %c0_6 = arith.constant 0 : index
    %6 = vector.load %arg6[%c0_5, %c0_6] : memref<1x128xf32, #tpu.memory_space<vmem>>, vector<1x128xf32>
    %7 = vector.broadcast %6 : vector<1x128xf32> to vector<64x128xf32>
    %8 = arith.addf %5, %7 : vector<64x128xf32>
    %cst_7 = arith.constant 0.000000e+00 : f32
    %9 = vector.broadcast %cst_7 : f32 to vector<64x128xf32>
    %10 = arith.maximumf %8, %9 : vector<64x128xf32>
    %11 = arith.truncf %10 : vector<64x128xf32> to vector<64x128xbf16>
    %c0_8 = arith.constant 0 : index
    %c0_9 = arith.constant 0 : index
    %12 = vector.load %arg7[%c0_8, %c0_9] : memref<64x128xbf16, #tpu.memory_space<vmem>>, vector<64x128xbf16>
    tpu.vector_store %arg7[%c0_8, %c0_9], %11 {strides = array<i32>} : memref<64x128xbf16, #tpu.memory_space<vmem>>, vector<64x128xbf16>,
    return
  }
  func.func @transform_0(%arg0: i32, %arg1: i32, %arg2: i32) -> (i32, i32) {
    %c0_i32 = arith.constant 0 : i32
    return %arg0, %arg2 : i32, i32
  }
  func.func @transform_1(%arg0: i32, %arg1: i32, %arg2: i32) -> (i32, i32) {
    %c0_i32 = arith.constant 0 : i32
    return %arg2, %arg1 : i32, i32
  }
  func.func @transform_2(%arg0: i32, %arg1: i32, %arg2: i32) -> (i32, i32) {
    %c0_i32 = arith.constant 0 : i32
    %c0_i32_0 = arith.constant 0 : i32
    return %c0_i32, %arg1 : i32, i32
  }
  func.func @transform_3(%arg0: i32, %arg1: i32, %arg2: i32) -> (i32, i32) {
    %c0_i32 = arith.constant 0 : i32
    %c0_i32_0 = arith.constant 0 : i32
    return %c0_i32, %arg1 : i32, i32
  }
  func.func @transform_4(%arg0: i32, %arg1: i32, %arg2: i32) -> (i32, i32) {
    %c0_i32 = arith.constant 0 : i32
    return %arg0, %arg1 : i32, i32
  }
}

module attributes {stable_mosaic.version = 11 : i64} {
  func.func @_mm_bn_kernel_k1(%arg0: i32, %arg1: i32, %arg2: i32, %arg3: memref<64x256xbf16, #tpu.memory_space<vmem>>, %arg4: memref<256x256xbf16, #tpu.memory_space<vmem>>, %arg5: memref<1x256xf32, #tpu.memory_space<vmem>>, %arg6: memref<1x256xf32, #tpu.memory_space<vmem>>, %arg7: memref<64x256xbf16, #tpu.memory_space<vmem>>) attributes {dimension_semantics = [#tpu.dimension_semantics<parallel>, #tpu.dimension_semantics<parallel>, #tpu.dimension_semantics<arbitrary>], iteration_bounds = array<i64: 2, 1, 1>, scalar_prefetch = 0 : i64, scratch_operands = 0 : i64, tpu.core_type = #tpu.core_type<tc>, window_params = [{transform_indices = @transform_0, window_bounds = array<i64: 64, 256>}, {transform_indices = @transform_1, window_bounds = array<i64: 256, 256>}, {transform_indices = @transform_2, window_bounds = array<i64: 1, 256>}, {transform_indices = @transform_3, window_bounds = array<i64: 1, 256>}, {transform_indices = @transform_4, window_bounds = array<i64: 64, 256>}]} {
    %c0 = arith.constant 0 : index
    %c0_0 = arith.constant 0 : index
    %0 = vector.load %arg3[%c0, %c0_0] : memref<64x256xbf16, #tpu.memory_space<vmem>>, vector<64x256xbf16>
    %c0_1 = arith.constant 0 : index
    %c0_2 = arith.constant 0 : index
    %1 = vector.load %arg4[%c0_1, %c0_2] : memref<256x256xbf16, #tpu.memory_space<vmem>>, vector<256x256xbf16>
    %cst = arith.constant dense<0.000000e+00> : vector<64x256xf32>
    %2 = tpu.matmul %0, %1, %cst {dimension_numbers = #tpu.dot_dimension_numbers<[1], [0], [0], [1], [0, 0, 1, 1], [], []>} : vector<64x256xbf16>, vector<256x256xbf16>, vector<64x256xf32> -> vector<64x256xf32>
    %c0_3 = arith.constant 0 : index
    %c0_4 = arith.constant 0 : index
    %3 = vector.load %arg5[%c0_3, %c0_4] : memref<1x256xf32, #tpu.memory_space<vmem>>, vector<1x256xf32>
    %4 = vector.broadcast %3 : vector<1x256xf32> to vector<64x256xf32>
    %5 = arith.mulf %2, %4 : vector<64x256xf32>
    %c0_5 = arith.constant 0 : index
    %c0_6 = arith.constant 0 : index
    %6 = vector.load %arg6[%c0_5, %c0_6] : memref<1x256xf32, #tpu.memory_space<vmem>>, vector<1x256xf32>
    %7 = vector.broadcast %6 : vector<1x256xf32> to vector<64x256xf32>
    %8 = arith.addf %5, %7 : vector<64x256xf32>
    %cst_7 = arith.constant 0.000000e+00 : f32
    %9 = vector.broadcast %cst_7 : f32 to vector<64x256xf32>
    %10 = arith.maximumf %8, %9 : vector<64x256xf32>
    %11 = arith.truncf %10 : vector<64x256xf32> to vector<64x256xbf16>
    %c0_8 = arith.constant 0 : index
    %c0_9 = arith.constant 0 : index
    %12 = vector.load %arg7[%c0_8, %c0_9] : memref<64x256xbf16, #tpu.memory_space<vmem>>, vector<64x256xbf16>
    tpu.vector_store %arg7[%c0_8, %c0_9], %11 {strides = array<i32>} : memref<64x256xbf16, #tpu.memory_space<vmem>>, vector<64x256xbf16>,
    return
  }
  func.func @transform_0(%arg0: i32, %arg1: i32, %arg2: i32) -> (i32, i32) {
    %c0_i32 = arith.constant 0 : i32
    return %arg0, %arg2 : i32, i32
  }
  func.func @transform_1(%arg0: i32, %arg1: i32, %arg2: i32) -> (i32, i32) {
    %c0_i32 = arith.constant 0 : i32
    return %arg2, %arg1 : i32, i32
  }
  func.func @transform_2(%arg0: i32, %arg1: i32, %arg2: i32) -> (i32, i32) {
    %c0_i32 = arith.constant 0 : i32
    %c0_i32_0 = arith.constant 0 : i32
    return %c0_i32, %arg1 : i32, i32
  }
  func.func @transform_3(%arg0: i32, %arg1: i32, %arg2: i32) -> (i32, i32) {
    %c0_i32 = arith.constant 0 : i32
    %c0_i32_0 = arith.constant 0 : i32
    return %c0_i32, %arg1 : i32, i32
  }
  func.func @transform_4(%arg0: i32, %arg1: i32, %arg2: i32) -> (i32, i32) {
    %c0_i32 = arith.constant 0 : i32
    return %arg0, %arg1 : i32, i32
  }
}

module attributes {stable_mosaic.version = 11 : i64} {
  func.func @_mm_bn_kernel_k1(%arg0: i32, %arg1: i32, %arg2: i32, %arg3: memref<16x256xbf16, #tpu.memory_space<vmem>>, %arg4: memref<256x256xbf16, #tpu.memory_space<vmem>>, %arg5: memref<1x256xf32, #tpu.memory_space<vmem>>, %arg6: memref<1x256xf32, #tpu.memory_space<vmem>>, %arg7: memref<16x256xbf16, #tpu.memory_space<vmem>>) attributes {dimension_semantics = [#tpu.dimension_semantics<parallel>, #tpu.dimension_semantics<parallel>, #tpu.dimension_semantics<arbitrary>], iteration_bounds = array<i64: 2, 2, 1>, scalar_prefetch = 0 : i64, scratch_operands = 0 : i64, tpu.core_type = #tpu.core_type<tc>, window_params = [{transform_indices = @transform_0, window_bounds = array<i64: 16, 256>}, {transform_indices = @transform_1, window_bounds = array<i64: 256, 256>}, {transform_indices = @transform_2, window_bounds = array<i64: 1, 256>}, {transform_indices = @transform_3, window_bounds = array<i64: 1, 256>}, {transform_indices = @transform_4, window_bounds = array<i64: 16, 256>}]} {
    %c0 = arith.constant 0 : index
    %c0_0 = arith.constant 0 : index
    %0 = vector.load %arg3[%c0, %c0_0] : memref<16x256xbf16, #tpu.memory_space<vmem>>, vector<16x256xbf16>
    %c0_1 = arith.constant 0 : index
    %c0_2 = arith.constant 0 : index
    %1 = vector.load %arg4[%c0_1, %c0_2] : memref<256x256xbf16, #tpu.memory_space<vmem>>, vector<256x256xbf16>
    %cst = arith.constant dense<0.000000e+00> : vector<16x256xf32>
    %2 = tpu.matmul %0, %1, %cst {dimension_numbers = #tpu.dot_dimension_numbers<[1], [0], [0], [1], [0, 0, 1, 1], [], []>} : vector<16x256xbf16>, vector<256x256xbf16>, vector<16x256xf32> -> vector<16x256xf32>
    %c0_3 = arith.constant 0 : index
    %c0_4 = arith.constant 0 : index
    %3 = vector.load %arg5[%c0_3, %c0_4] : memref<1x256xf32, #tpu.memory_space<vmem>>, vector<1x256xf32>
    %4 = vector.broadcast %3 : vector<1x256xf32> to vector<16x256xf32>
    %5 = arith.mulf %2, %4 : vector<16x256xf32>
    %c0_5 = arith.constant 0 : index
    %c0_6 = arith.constant 0 : index
    %6 = vector.load %arg6[%c0_5, %c0_6] : memref<1x256xf32, #tpu.memory_space<vmem>>, vector<1x256xf32>
    %7 = vector.broadcast %6 : vector<1x256xf32> to vector<16x256xf32>
    %8 = arith.addf %5, %7 : vector<16x256xf32>
    %9 = arith.truncf %8 : vector<16x256xf32> to vector<16x256xbf16>
    %c0_7 = arith.constant 0 : index
    %c0_8 = arith.constant 0 : index
    %10 = vector.load %arg7[%c0_7, %c0_8] : memref<16x256xbf16, #tpu.memory_space<vmem>>, vector<16x256xbf16>
    tpu.vector_store %arg7[%c0_7, %c0_8], %9 {strides = array<i32>} : memref<16x256xbf16, #tpu.memory_space<vmem>>, vector<16x256xbf16>,
    return
  }
  func.func @transform_0(%arg0: i32, %arg1: i32, %arg2: i32) -> (i32, i32) {
    %c0_i32 = arith.constant 0 : i32
    return %arg0, %arg2 : i32, i32
  }
  func.func @transform_1(%arg0: i32, %arg1: i32, %arg2: i32) -> (i32, i32) {
    %c0_i32 = arith.constant 0 : i32
    return %arg2, %arg1 : i32, i32
  }
  func.func @transform_2(%arg0: i32, %arg1: i32, %arg2: i32) -> (i32, i32) {
    %c0_i32 = arith.constant 0 : i32
    %c0_i32_0 = arith.constant 0 : i32
    return %c0_i32, %arg1 : i32, i32
  }
  func.func @transform_3(%arg0: i32, %arg1: i32, %arg2: i32) -> (i32, i32) {
    %c0_i32 = arith.constant 0 : i32
    %c0_i32_0 = arith.constant 0 : i32
    return %c0_i32, %arg1 : i32, i32
  }
  func.func @transform_4(%arg0: i32, %arg1: i32, %arg2: i32) -> (i32, i32) {
    %c0_i32 = arith.constant 0 : i32
    return %arg0, %arg1 : i32, i32
  }
}

module attributes {stable_mosaic.version = 11 : i64} {
  func.func @_grouped_conv3_kernel(%arg0: i32, %arg1: i32, %arg2: memref<16x2304xbf16, #tpu.memory_space<vmem>>, %arg3: memref<2x1152x128xbf16, #tpu.memory_space<vmem>>, %arg4: memref<1x256xf32, #tpu.memory_space<vmem>>, %arg5: memref<1x256xf32, #tpu.memory_space<vmem>>, %arg6: memref<256x256xbf16, #tpu.memory_space<vmem>>, %arg7: memref<1x256xf32, #tpu.memory_space<vmem>>, %arg8: memref<1x256xf32, #tpu.memory_space<vmem>>, %arg9: memref<16x256xbf16, #tpu.memory_space<vmem>>, %arg10: memref<16x256xbf16, #tpu.memory_space<vmem>>, %arg11: memref<16x256xbf16, #tpu.memory_space<vmem>>) attributes {dimension_semantics = [#tpu.dimension_semantics<parallel>, #tpu.dimension_semantics<arbitrary>], iteration_bounds = array<i64: 2, 2>, scalar_prefetch = 0 : i64, scratch_operands = 1 : i64, tpu.core_type = #tpu.core_type<tc>, window_params = [{transform_indices = @transform_0, window_bounds = array<i64: 16, 2304>}, {pipeline_mode = #tpu.pipeline_mode<synchronous>, transform_indices = @transform_1, window_bounds = array<i64: 2, 1152, 128>}, {pipeline_mode = #tpu.pipeline_mode<synchronous>, transform_indices = @transform_2, window_bounds = array<i64: 1, 256>}, {pipeline_mode = #tpu.pipeline_mode<synchronous>, transform_indices = @transform_3, window_bounds = array<i64: 1, 256>}, {transform_indices = @transform_4, window_bounds = array<i64: 256, 256>}, {transform_indices = @transform_5, window_bounds = array<i64: 1, 256>}, {transform_indices = @transform_6, window_bounds = array<i64: 1, 256>}, {transform_indices = @transform_7, window_bounds = array<i64: 16, 256>}, {transform_indices = @transform_8, window_bounds = array<i64: 16, 256>}]} {
    %c0_i32 = arith.constant 0 : i32
    %0 = arith.cmpi eq, %arg1, %c0_i32 : i32
    %1 = arith.extui %0 : i1 to i32
    %c0_i32_0 = arith.constant 0 : i32
    %2 = arith.cmpi ne, %1, %c0_i32_0 : i32
    scf.if %2 {
      %c0_13 = arith.constant 0 : index
      %c0_14 = arith.constant 0 : index
      %19 = vector.load %arg2[%c0_13, %c0_14] : memref<16x2304xbf16, #tpu.memory_space<vmem>>, vector<16x1152xbf16>
      %c0_15 = arith.constant 0 : index
      %c0_16 = arith.constant 0 : index
      %c0_17 = arith.constant 0 : index
      %20 = vector.load %arg3[%c0_15, %c0_16, %c0_17] : memref<2x1152x128xbf16, #tpu.memory_space<vmem>>, vector<1x1152x128xbf16>
      %21 = vector.shape_cast %20 : vector<1x1152x128xbf16> to vector<1152x128xbf16>
      %cst_18 = arith.constant dense<0.000000e+00> : vector<16x128xf32>
      %22 = tpu.matmul %19, %21, %cst_18 {dimension_numbers = #tpu.dot_dimension_numbers<[1], [0], [0], [1], [0, 0, 1, 1], [], []>} : vector<16x1152xbf16>, vector<1152x128xbf16>, vector<16x128xf32> -> vector<16x128xf32>
      %c0_19 = arith.constant 0 : index
      %c0_20 = arith.constant 0 : index
      %23 = vector.load %arg4[%c0_19, %c0_20] : memref<1x256xf32, #tpu.memory_space<vmem>>, vector<1x128xf32>
      %24 = vector.broadcast %23 : vector<1x128xf32> to vector<16x128xf32>
      %25 = arith.mulf %22, %24 : vector<16x128xf32>
      %c0_21 = arith.constant 0 : index
      %c0_22 = arith.constant 0 : index
      %26 = vector.load %arg5[%c0_21, %c0_22] : memref<1x256xf32, #tpu.memory_space<vmem>>, vector<1x128xf32>
      %27 = vector.broadcast %26 : vector<1x128xf32> to vector<16x128xf32>
      %28 = arith.addf %25, %27 : vector<16x128xf32>
      %cst_23 = arith.constant 0.000000e+00 : f32
      %29 = vector.broadcast %cst_23 : f32 to vector<16x128xf32>
      %30 = arith.maximumf %28, %29 : vector<16x128xf32>
      %31 = arith.truncf %30 : vector<16x128xf32> to vector<16x128xbf16>
      %c0_24 = arith.constant 0 : index
      %c0_25 = arith.constant 0 : index
      %32 = vector.load %arg11[%c0_24, %c0_25] : memref<16x256xbf16, #tpu.memory_space<vmem>>, vector<16x128xbf16>
      tpu.vector_store %arg11[%c0_24, %c0_25], %31 {strides = array<i32>} : memref<16x256xbf16, #tpu.memory_space<vmem>>, vector<16x128xbf16>,
      %c0_26 = arith.constant 0 : index
      %c1152 = arith.constant 1152 : index
      %33 = vector.load %arg2[%c0_26, %c1152] : memref<16x2304xbf16, #tpu.memory_space<vmem>>, vector<16x1152xbf16>
      %c1 = arith.constant 1 : index
      %c0_27 = arith.constant 0 : index
      %c0_28 = arith.constant 0 : index
      %34 = vector.load %arg3[%c1, %c0_27, %c0_28] : memref<2x1152x128xbf16, #tpu.memory_space<vmem>>, vector<1x1152x128xbf16>
      %35 = vector.shape_cast %34 : vector<1x1152x128xbf16> to vector<1152x128xbf16>
      %cst_29 = arith.constant dense<0.000000e+00> : vector<16x128xf32>
      %36 = tpu.matmul %33, %35, %cst_29 {dimension_numbers = #tpu.dot_dimension_numbers<[1], [0], [0], [1], [0, 0, 1, 1], [], []>} : vector<16x1152xbf16>, vector<1152x128xbf16>, vector<16x128xf32> -> vector<16x128xf32>
      %c0_30 = arith.constant 0 : index
      %c128 = arith.constant 128 : index
      %37 = vector.load %arg4[%c0_30, %c128] : memref<1x256xf32, #tpu.memory_space<vmem>>, vector<1x128xf32>
      %38 = vector.broadcast %37 : vector<1x128xf32> to vector<16x128xf32>
      %39 = arith.mulf %36, %38 : vector<16x128xf32>
      %c0_31 = arith.constant 0 : index
      %c128_32 = arith.constant 128 : index
      %40 = vector.load %arg5[%c0_31, %c128_32] : memref<1x256xf32, #tpu.memory_space<vmem>>, vector<1x128xf32>
      %41 = vector.broadcast %40 : vector<1x128xf32> to vector<16x128xf32>
      %42 = arith.addf %39, %41 : vector<16x128xf32>
      %cst_33 = arith.constant 0.000000e+00 : f32
      %43 = vector.broadcast %cst_33 : f32 to vector<16x128xf32>
      %44 = arith.maximumf %42, %43 : vector<16x128xf32>
      %45 = arith.truncf %44 : vector<16x128xf32> to vector<16x128xbf16>
      %c0_34 = arith.constant 0 : index
      %c128_35 = arith.constant 128 : index
      %46 = vector.load %arg11[%c0_34, %c128_35] : memref<16x256xbf16, #tpu.memory_space<vmem>>, vector<16x128xbf16>
      tpu.vector_store %arg11[%c0_34, %c128_35], %45 {strides = array<i32>} : memref<16x256xbf16, #tpu.memory_space<vmem>>, vector<16x128xbf16>,
    } else {
    }
    %c0 = arith.constant 0 : index
    %c0_1 = arith.constant 0 : index
    %3 = vector.load %arg11[%c0, %c0_1] : memref<16x256xbf16, #tpu.memory_space<vmem>>, vector<16x256xbf16>
    %c0_2 = arith.constant 0 : index
    %c0_3 = arith.constant 0 : index
    %4 = vector.load %arg6[%c0_2, %c0_3] : memref<256x256xbf16, #tpu.memory_space<vmem>>, vector<256x256xbf16>
    %cst = arith.constant dense<0.000000e+00> : vector<16x256xf32>
    %5 = tpu.matmul %3, %4, %cst {dimension_numbers = #tpu.dot_dimension_numbers<[1], [0], [0], [1], [0, 0, 1, 1], [], []>} : vector<16x256xbf16>, vector<256x256xbf16>, vector<16x256xf32> -> vector<16x256xf32>
    %c0_4 = arith.constant 0 : index
    %c0_5 = arith.constant 0 : index
    %6 = vector.load %arg7[%c0_4, %c0_5] : memref<1x256xf32, #tpu.memory_space<vmem>>, vector<1x256xf32>
    %7 = vector.broadcast %6 : vector<1x256xf32> to vector<16x256xf32>
    %8 = arith.mulf %5, %7 : vector<16x256xf32>
    %c0_6 = arith.constant 0 : index
    %c0_7 = arith.constant 0 : index
    %9 = vector.load %arg8[%c0_6, %c0_7] : memref<1x256xf32, #tpu.memory_space<vmem>>, vector<1x256xf32>
    %10 = vector.broadcast %9 : vector<1x256xf32> to vector<16x256xf32>
    %11 = arith.addf %8, %10 : vector<16x256xf32>
    %c0_8 = arith.constant 0 : index
    %c0_9 = arith.constant 0 : index
    %12 = vector.load %arg9[%c0_8, %c0_9] : memref<16x256xbf16, #tpu.memory_space<vmem>>, vector<16x256xbf16>
    %13 = arith.extf %12 : vector<16x256xbf16> to vector<16x256xf32>
    %14 = arith.addf %11, %13 : vector<16x256xf32>
    %cst_10 = arith.constant 0.000000e+00 : f32
    %15 = vector.broadcast %cst_10 : f32 to vector<16x256xf32>
    %16 = arith.maximumf %14, %15 : vector<16x256xf32>
    %17 = arith.truncf %16 : vector<16x256xf32> to vector<16x256xbf16>
    %c0_11 = arith.constant 0 : index
    %c0_12 = arith.constant 0 : index
    %18 = vector.load %arg10[%c0_11, %c0_12] : memref<16x256xbf16, #tpu.memory_space<vmem>>, vector<16x256xbf16>
    tpu.vector_store %arg10[%c0_11, %c0_12], %17 {strides = array<i32>} : memref<16x256xbf16, #tpu.memory_space<vmem>>, vector<16x256xbf16>,
    return
  }
  func.func @transform_0(%arg0: i32, %arg1: i32) -> (i32, i32) {
    %c0_i32 = arith.constant 0 : i32
    %c0_i32_0 = arith.constant 0 : i32
    return %arg0, %c0_i32 : i32, i32
  }
  func.func @transform_1(%arg0: i32, %arg1: i32) -> (i32, i32, i32) {
    %c0_i32 = arith.constant 0 : i32
    %c0_i32_0 = arith.constant 0 : i32
    %c0_i32_1 = arith.constant 0 : i32
    %c0_i32_2 = arith.constant 0 : i32
    return %c0_i32, %c0_i32_0, %c0_i32_1 : i32, i32, i32
  }
  func.func @transform_2(%arg0: i32, %arg1: i32) -> (i32, i32) {
    %c0_i32 = arith.constant 0 : i32
    %c0_i32_0 = arith.constant 0 : i32
    %c0_i32_1 = arith.constant 0 : i32
    return %c0_i32, %c0_i32_0 : i32, i32
  }
  func.func @transform_3(%arg0: i32, %arg1: i32) -> (i32, i32) {
    %c0_i32 = arith.constant 0 : i32
    %c0_i32_0 = arith.constant 0 : i32
    %c0_i32_1 = arith.constant 0 : i32
    return %c0_i32, %c0_i32_0 : i32, i32
  }
  func.func @transform_4(%arg0: i32, %arg1: i32) -> (i32, i32) {
    %c0_i32 = arith.constant 0 : i32
    %c0_i32_0 = arith.constant 0 : i32
    return %c0_i32, %arg1 : i32, i32
  }
  func.func @transform_5(%arg0: i32, %arg1: i32) -> (i32, i32) {
    %c0_i32 = arith.constant 0 : i32
    %c0_i32_0 = arith.constant 0 : i32
    return %c0_i32, %arg1 : i32, i32
  }
  func.func @transform_6(%arg0: i32, %arg1: i32) -> (i32, i32) {
    %c0_i32 = arith.constant 0 : i32
    %c0_i32_0 = arith.constant 0 : i32
    return %c0_i32, %arg1 : i32, i32
  }
  func.func @transform_7(%arg0: i32, %arg1: i32) -> (i32, i32) {
    %c0_i32 = arith.constant 0 : i32
    return %arg0, %arg1 : i32, i32
  }
  func.func @transform_8(%arg0: i32, %arg1: i32) -> (i32, i32) {
    %c0_i32 = arith.constant 0 : i32
    return %arg0, %arg1 : i32, i32
  }
}

module attributes {stable_mosaic.version = 11 : i64} {
  func.func @_mm_bn_kernel_k1(%arg0: i32, %arg1: i32, %arg2: i32, %arg3: memref<16x512xbf16, #tpu.memory_space<vmem>>, %arg4: memref<512x256xbf16, #tpu.memory_space<vmem>>, %arg5: memref<1x256xf32, #tpu.memory_space<vmem>>, %arg6: memref<1x256xf32, #tpu.memory_space<vmem>>, %arg7: memref<16x256xbf16, #tpu.memory_space<vmem>>) attributes {dimension_semantics = [#tpu.dimension_semantics<parallel>, #tpu.dimension_semantics<parallel>, #tpu.dimension_semantics<arbitrary>], iteration_bounds = array<i64: 2, 1, 1>, scalar_prefetch = 0 : i64, scratch_operands = 0 : i64, tpu.core_type = #tpu.core_type<tc>, window_params = [{transform_indices = @transform_0, window_bounds = array<i64: 16, 512>}, {transform_indices = @transform_1, window_bounds = array<i64: 512, 256>}, {transform_indices = @transform_2, window_bounds = array<i64: 1, 256>}, {transform_indices = @transform_3, window_bounds = array<i64: 1, 256>}, {transform_indices = @transform_4, window_bounds = array<i64: 16, 256>}]} {
    %c0 = arith.constant 0 : index
    %c0_0 = arith.constant 0 : index
    %0 = vector.load %arg3[%c0, %c0_0] : memref<16x512xbf16, #tpu.memory_space<vmem>>, vector<16x512xbf16>
    %c0_1 = arith.constant 0 : index
    %c0_2 = arith.constant 0 : index
    %1 = vector.load %arg4[%c0_1, %c0_2] : memref<512x256xbf16, #tpu.memory_space<vmem>>, vector<512x256xbf16>
    %cst = arith.constant dense<0.000000e+00> : vector<16x256xf32>
    %2 = tpu.matmul %0, %1, %cst {dimension_numbers = #tpu.dot_dimension_numbers<[1], [0], [0], [1], [0, 0, 1, 1], [], []>} : vector<16x512xbf16>, vector<512x256xbf16>, vector<16x256xf32> -> vector<16x256xf32>
    %c0_3 = arith.constant 0 : index
    %c0_4 = arith.constant 0 : index
    %3 = vector.load %arg5[%c0_3, %c0_4] : memref<1x256xf32, #tpu.memory_space<vmem>>, vector<1x256xf32>
    %4 = vector.broadcast %3 : vector<1x256xf32> to vector<16x256xf32>
    %5 = arith.mulf %2, %4 : vector<16x256xf32>
    %c0_5 = arith.constant 0 : index
    %c0_6 = arith.constant 0 : index
    %6 = vector.load %arg6[%c0_5, %c0_6] : memref<1x256xf32, #tpu.memory_space<vmem>>, vector<1x256xf32>
    %7 = vector.broadcast %6 : vector<1x256xf32> to vector<16x256xf32>
    %8 = arith.addf %5, %7 : vector<16x256xf32>
    %cst_7 = arith.constant 0.000000e+00 : f32
    %9 = vector.broadcast %cst_7 : f32 to vector<16x256xf32>
    %10 = arith.maximumf %8, %9 : vector<16x256xf32>
    %11 = arith.truncf %10 : vector<16x256xf32> to vector<16x256xbf16>
    %c0_8 = arith.constant 0 : index
    %c0_9 = arith.constant 0 : index
    %12 = vector.load %arg7[%c0_8, %c0_9] : memref<16x256xbf16, #tpu.memory_space<vmem>>, vector<16x256xbf16>
    tpu.vector_store %arg7[%c0_8, %c0_9], %11 {strides = array<i32>} : memref<16x256xbf16, #tpu.memory_space<vmem>>, vector<16x256xbf16>,
    return
  }
  func.func @transform_0(%arg0: i32, %arg1: i32, %arg2: i32) -> (i32, i32) {
    %c0_i32 = arith.constant 0 : i32
    return %arg0, %arg2 : i32, i32
  }
  func.func @transform_1(%arg0: i32, %arg1: i32, %arg2: i32) -> (i32, i32) {
    %c0_i32 = arith.constant 0 : i32
    return %arg2, %arg1 : i32, i32
  }
  func.func @transform_2(%arg0: i32, %arg1: i32, %arg2: i32) -> (i32, i32) {
    %c0_i32 = arith.constant 0 : i32
    %c0_i32_0 = arith.constant 0 : i32
    return %c0_i32, %arg1 : i32, i32
  }
  func.func @transform_3(%arg0: i32, %arg1: i32, %arg2: i32) -> (i32, i32) {
    %c0_i32 = arith.constant 0 : i32
    %c0_i32_0 = arith.constant 0 : i32
    return %c0_i32, %arg1 : i32, i32
  }
  func.func @transform_4(%arg0: i32, %arg1: i32, %arg2: i32) -> (i32, i32) {
    %c0_i32 = arith.constant 0 : i32
    return %arg0, %arg1 : i32, i32
  }
}

module attributes {stable_mosaic.version = 11 : i64} {
  func.func @_mm_bn_kernel_k1(%arg0: i32, %arg1: i32, %arg2: i32, %arg3: memref<16x512xbf16, #tpu.memory_space<vmem>>, %arg4: memref<512x256xbf16, #tpu.memory_space<vmem>>, %arg5: memref<1x256xf32, #tpu.memory_space<vmem>>, %arg6: memref<1x256xf32, #tpu.memory_space<vmem>>, %arg7: memref<16x256xbf16, #tpu.memory_space<vmem>>) attributes {dimension_semantics = [#tpu.dimension_semantics<parallel>, #tpu.dimension_semantics<parallel>, #tpu.dimension_semantics<arbitrary>], iteration_bounds = array<i64: 2, 2, 1>, scalar_prefetch = 0 : i64, scratch_operands = 0 : i64, tpu.core_type = #tpu.core_type<tc>, window_params = [{transform_indices = @transform_0, window_bounds = array<i64: 16, 512>}, {transform_indices = @transform_1, window_bounds = array<i64: 512, 256>}, {transform_indices = @transform_2, window_bounds = array<i64: 1, 256>}, {transform_indices = @transform_3, window_bounds = array<i64: 1, 256>}, {transform_indices = @transform_4, window_bounds = array<i64: 16, 256>}]} {
    %c0 = arith.constant 0 : index
    %c0_0 = arith.constant 0 : index
    %0 = vector.load %arg3[%c0, %c0_0] : memref<16x512xbf16, #tpu.memory_space<vmem>>, vector<16x512xbf16>
    %c0_1 = arith.constant 0 : index
    %c0_2 = arith.constant 0 : index
    %1 = vector.load %arg4[%c0_1, %c0_2] : memref<512x256xbf16, #tpu.memory_space<vmem>>, vector<512x256xbf16>
    %cst = arith.constant dense<0.000000e+00> : vector<16x256xf32>
    %2 = tpu.matmul %0, %1, %cst {dimension_numbers = #tpu.dot_dimension_numbers<[1], [0], [0], [1], [0, 0, 1, 1], [], []>} : vector<16x512xbf16>, vector<512x256xbf16>, vector<16x256xf32> -> vector<16x256xf32>
    %c0_3 = arith.constant 0 : index
    %c0_4 = arith.constant 0 : index
    %3 = vector.load %arg5[%c0_3, %c0_4] : memref<1x256xf32, #tpu.memory_space<vmem>>, vector<1x256xf32>
    %4 = vector.broadcast %3 : vector<1x256xf32> to vector<16x256xf32>
    %5 = arith.mulf %2, %4 : vector<16x256xf32>
    %c0_5 = arith.constant 0 : index
    %c0_6 = arith.constant 0 : index
    %6 = vector.load %arg6[%c0_5, %c0_6] : memref<1x256xf32, #tpu.memory_space<vmem>>, vector<1x256xf32>
    %7 = vector.broadcast %6 : vector<1x256xf32> to vector<16x256xf32>
    %8 = arith.addf %5, %7 : vector<16x256xf32>
    %cst_7 = arith.constant 0.000000e+00 : f32
    %9 = vector.broadcast %cst_7 : f32 to vector<16x256xf32>
    %10 = arith.maximumf %8, %9 : vector<16x256xf32>
    %11 = arith.truncf %10 : vector<16x256xf32> to vector<16x256xbf16>
    %c0_8 = arith.constant 0 : index
    %c0_9 = arith.constant 0 : index
    %12 = vector.load %arg7[%c0_8, %c0_9] : memref<16x256xbf16, #tpu.memory_space<vmem>>, vector<16x256xbf16>
    tpu.vector_store %arg7[%c0_8, %c0_9], %11 {strides = array<i32>} : memref<16x256xbf16, #tpu.memory_space<vmem>>, vector<16x256xbf16>,
    return
  }
  func.func @transform_0(%arg0: i32, %arg1: i32, %arg2: i32) -> (i32, i32) {
    %c0_i32 = arith.constant 0 : i32
    return %arg0, %arg2 : i32, i32
  }
  func.func @transform_1(%arg0: i32, %arg1: i32, %arg2: i32) -> (i32, i32) {
    %c0_i32 = arith.constant 0 : i32
    return %arg2, %arg1 : i32, i32
  }
  func.func @transform_2(%arg0: i32, %arg1: i32, %arg2: i32) -> (i32, i32) {
    %c0_i32 = arith.constant 0 : i32
    %c0_i32_0 = arith.constant 0 : i32
    return %c0_i32, %arg1 : i32, i32
  }
  func.func @transform_3(%arg0: i32, %arg1: i32, %arg2: i32) -> (i32, i32) {
    %c0_i32 = arith.constant 0 : i32
    %c0_i32_0 = arith.constant 0 : i32
    return %c0_i32, %arg1 : i32, i32
  }
  func.func @transform_4(%arg0: i32, %arg1: i32, %arg2: i32) -> (i32, i32) {
    %c0_i32 = arith.constant 0 : i32
    return %arg0, %arg1 : i32, i32
  }
}

module attributes {stable_mosaic.version = 11 : i64} {
  func.func @_mm_bn_kernel_k1(%arg0: i32, %arg1: i32, %arg2: i32, %arg3: memref<8x512xbf16, #tpu.memory_space<vmem>>, %arg4: memref<512x256xbf16, #tpu.memory_space<vmem>>, %arg5: memref<1x256xf32, #tpu.memory_space<vmem>>, %arg6: memref<1x256xf32, #tpu.memory_space<vmem>>, %arg7: memref<8x256xbf16, #tpu.memory_space<vmem>>) attributes {dimension_semantics = [#tpu.dimension_semantics<parallel>, #tpu.dimension_semantics<parallel>, #tpu.dimension_semantics<arbitrary>], iteration_bounds = array<i64: 1, 4, 1>, scalar_prefetch = 0 : i64, scratch_operands = 0 : i64, tpu.core_type = #tpu.core_type<tc>, window_params = [{transform_indices = @transform_0, window_bounds = array<i64: 8, 512>}, {transform_indices = @transform_1, window_bounds = array<i64: 512, 256>}, {transform_indices = @transform_2, window_bounds = array<i64: 1, 256>}, {transform_indices = @transform_3, window_bounds = array<i64: 1, 256>}, {transform_indices = @transform_4, window_bounds = array<i64: 8, 256>}]} {
    %c0 = arith.constant 0 : index
    %c0_0 = arith.constant 0 : index
    %0 = vector.load %arg3[%c0, %c0_0] : memref<8x512xbf16, #tpu.memory_space<vmem>>, vector<8x512xbf16>
    %c0_1 = arith.constant 0 : index
    %c0_2 = arith.constant 0 : index
    %1 = vector.load %arg4[%c0_1, %c0_2] : memref<512x256xbf16, #tpu.memory_space<vmem>>, vector<512x256xbf16>
    %cst = arith.constant dense<0.000000e+00> : vector<8x256xf32>
    %2 = tpu.matmul %0, %1, %cst {dimension_numbers = #tpu.dot_dimension_numbers<[1], [0], [0], [1], [0, 0, 1, 1], [], []>} : vector<8x512xbf16>, vector<512x256xbf16>, vector<8x256xf32> -> vector<8x256xf32>
    %c0_3 = arith.constant 0 : index
    %c0_4 = arith.constant 0 : index
    %3 = vector.load %arg5[%c0_3, %c0_4] : memref<1x256xf32, #tpu.memory_space<vmem>>, vector<1x256xf32>
    %4 = vector.broadcast %3 : vector<1x256xf32> to vector<8x256xf32>
    %5 = arith.mulf %2, %4 : vector<8x256xf32>
    %c0_5 = arith.constant 0 : index
    %c0_6 = arith.constant 0 : index
    %6 = vector.load %arg6[%c0_5, %c0_6] : memref<1x256xf32, #tpu.memory_space<vmem>>, vector<1x256xf32>
    %7 = vector.broadcast %6 : vector<1x256xf32> to vector<8x256xf32>
    %8 = arith.addf %5, %7 : vector<8x256xf32>
    %9 = arith.truncf %8 : vector<8x256xf32> to vector<8x256xbf16>
    %c0_7 = arith.constant 0 : index
    %c0_8 = arith.constant 0 : index
    %10 = vector.load %arg7[%c0_7, %c0_8] : memref<8x256xbf16, #tpu.memory_space<vmem>>, vector<8x256xbf16>
    tpu.vector_store %arg7[%c0_7, %c0_8], %9 {strides = array<i32>} : memref<8x256xbf16, #tpu.memory_space<vmem>>, vector<8x256xbf16>,
    return
  }
  func.func @transform_0(%arg0: i32, %arg1: i32, %arg2: i32) -> (i32, i32) {
    %c0_i32 = arith.constant 0 : i32
    return %arg0, %arg2 : i32, i32
  }
  func.func @transform_1(%arg0: i32, %arg1: i32, %arg2: i32) -> (i32, i32) {
    %c0_i32 = arith.constant 0 : i32
    return %arg2, %arg1 : i32, i32
  }
  func.func @transform_2(%arg0: i32, %arg1: i32, %arg2: i32) -> (i32, i32) {
    %c0_i32 = arith.constant 0 : i32
    %c0_i32_0 = arith.constant 0 : i32
    return %c0_i32, %arg1 : i32, i32
  }
  func.func @transform_3(%arg0: i32, %arg1: i32, %arg2: i32) -> (i32, i32) {
    %c0_i32 = arith.constant 0 : i32
    %c0_i32_0 = arith.constant 0 : i32
    return %c0_i32, %arg1 : i32, i32
  }
  func.func @transform_4(%arg0: i32, %arg1: i32, %arg2: i32) -> (i32, i32) {
    %c0_i32 = arith.constant 0 : i32
    return %arg0, %arg1 : i32, i32
  }
}

module attributes {stable_mosaic.version = 11 : i64} {
  func.func @_grouped_conv3_kernel(%arg0: i32, %arg1: i32, %arg2: memref<8x4608xbf16, #tpu.memory_space<vmem>>, %arg3: memref<4x1152x128xbf16, #tpu.memory_space<vmem>>, %arg4: memref<1x512xf32, #tpu.memory_space<vmem>>, %arg5: memref<1x512xf32, #tpu.memory_space<vmem>>, %arg6: memref<512x256xbf16, #tpu.memory_space<vmem>>, %arg7: memref<1x256xf32, #tpu.memory_space<vmem>>, %arg8: memref<1x256xf32, #tpu.memory_space<vmem>>, %arg9: memref<8x256xbf16, #tpu.memory_space<vmem>>, %arg10: memref<8x256xbf16, #tpu.memory_space<vmem>>, %arg11: memref<8x512xbf16, #tpu.memory_space<vmem>>) attributes {dimension_semantics = [#tpu.dimension_semantics<parallel>, #tpu.dimension_semantics<arbitrary>], iteration_bounds = array<i64: 1, 4>, scalar_prefetch = 0 : i64, scratch_operands = 1 : i64, tpu.core_type = #tpu.core_type<tc>, window_params = [{transform_indices = @transform_0, window_bounds = array<i64: 8, 4608>}, {pipeline_mode = #tpu.pipeline_mode<synchronous>, transform_indices = @transform_1, window_bounds = array<i64: 4, 1152, 128>}, {pipeline_mode = #tpu.pipeline_mode<synchronous>, transform_indices = @transform_2, window_bounds = array<i64: 1, 512>}, {pipeline_mode = #tpu.pipeline_mode<synchronous>, transform_indices = @transform_3, window_bounds = array<i64: 1, 512>}, {transform_indices = @transform_4, window_bounds = array<i64: 512, 256>}, {transform_indices = @transform_5, window_bounds = array<i64: 1, 256>}, {transform_indices = @transform_6, window_bounds = array<i64: 1, 256>}, {transform_indices = @transform_7, window_bounds = array<i64: 8, 256>}, {transform_indices = @transform_8, window_bounds = array<i64: 8, 256>}]} {
    %c0_i32 = arith.constant 0 : i32
    %0 = arith.cmpi eq, %arg1, %c0_i32 : i32
    %1 = arith.extui %0 : i1 to i32
    %c0_i32_0 = arith.constant 0 : i32
    %2 = arith.cmpi ne, %1, %c0_i32_0 : i32
    scf.if %2 {
      %c0_13 = arith.constant 0 : index
      %c0_14 = arith.constant 0 : index
      %19 = vector.load %arg2[%c0_13, %c0_14] : memref<8x4608xbf16, #tpu.memory_space<vmem>>, vector<8x1152xbf16>
      %c0_15 = arith.constant 0 : index
      %c0_16 = arith.constant 0 : index
      %c0_17 = arith.constant 0 : index
      %20 = vector.load %arg3[%c0_15, %c0_16, %c0_17] : memref<4x1152x128xbf16, #tpu.memory_space<vmem>>, vector<1x1152x128xbf16>
      %21 = vector.shape_cast %20 : vector<1x1152x128xbf16> to vector<1152x128xbf16>
      %cst_18 = arith.constant dense<0.000000e+00> : vector<8x128xf32>
      %22 = tpu.matmul %19, %21, %cst_18 {dimension_numbers = #tpu.dot_dimension_numbers<[1], [0], [0], [1], [0, 0, 1, 1], [], []>} : vector<8x1152xbf16>, vector<1152x128xbf16>, vector<8x128xf32> -> vector<8x128xf32>
      %c0_19 = arith.constant 0 : index
      %c0_20 = arith.constant 0 : index
      %23 = vector.load %arg4[%c0_19, %c0_20] : memref<1x512xf32, #tpu.memory_space<vmem>>, vector<1x128xf32>
      %24 = vector.broadcast %23 : vector<1x128xf32> to vector<8x128xf32>
      %25 = arith.mulf %22, %24 : vector<8x128xf32>
      %c0_21 = arith.constant 0 : index
      %c0_22 = arith.constant 0 : index
      %26 = vector.load %arg5[%c0_21, %c0_22] : memref<1x512xf32, #tpu.memory_space<vmem>>, vector<1x128xf32>
      %27 = vector.broadcast %26 : vector<1x128xf32> to vector<8x128xf32>
      %28 = arith.addf %25, %27 : vector<8x128xf32>
      %cst_23 = arith.constant 0.000000e+00 : f32
      %29 = vector.broadcast %cst_23 : f32 to vector<8x128xf32>
      %30 = arith.maximumf %28, %29 : vector<8x128xf32>
      %31 = arith.truncf %30 : vector<8x128xf32> to vector<8x128xbf16>
      %c0_24 = arith.constant 0 : index
      %c0_25 = arith.constant 0 : index
      %32 = vector.load %arg11[%c0_24, %c0_25] : memref<8x512xbf16, #tpu.memory_space<vmem>>, vector<8x128xbf16>
      tpu.vector_store %arg11[%c0_24, %c0_25], %31 {strides = array<i32>} : memref<8x512xbf16, #tpu.memory_space<vmem>>, vector<8x128xbf16>,
      %c0_26 = arith.constant 0 : index
      %c1152 = arith.constant 1152 : index
      %33 = vector.load %arg2[%c0_26, %c1152] : memref<8x4608xbf16, #tpu.memory_space<vmem>>, vector<8x1152xbf16>
      %c1 = arith.constant 1 : index
      %c0_27 = arith.constant 0 : index
      %c0_28 = arith.constant 0 : index
      %34 = vector.load %arg3[%c1, %c0_27, %c0_28] : memref<4x1152x128xbf16, #tpu.memory_space<vmem>>, vector<1x1152x128xbf16>
      %35 = vector.shape_cast %34 : vector<1x1152x128xbf16> to vector<1152x128xbf16>
      %cst_29 = arith.constant dense<0.000000e+00> : vector<8x128xf32>
      %36 = tpu.matmul %33, %35, %cst_29 {dimension_numbers = #tpu.dot_dimension_numbers<[1], [0], [0], [1], [0, 0, 1, 1], [], []>} : vector<8x1152xbf16>, vector<1152x128xbf16>, vector<8x128xf32> -> vector<8x128xf32>
      %c0_30 = arith.constant 0 : index
      %c128 = arith.constant 128 : index
      %37 = vector.load %arg4[%c0_30, %c128] : memref<1x512xf32, #tpu.memory_space<vmem>>, vector<1x128xf32>
      %38 = vector.broadcast %37 : vector<1x128xf32> to vector<8x128xf32>
      %39 = arith.mulf %36, %38 : vector<8x128xf32>
      %c0_31 = arith.constant 0 : index
      %c128_32 = arith.constant 128 : index
      %40 = vector.load %arg5[%c0_31, %c128_32] : memref<1x512xf32, #tpu.memory_space<vmem>>, vector<1x128xf32>
      %41 = vector.broadcast %40 : vector<1x128xf32> to vector<8x128xf32>
      %42 = arith.addf %39, %41 : vector<8x128xf32>
      %cst_33 = arith.constant 0.000000e+00 : f32
      %43 = vector.broadcast %cst_33 : f32 to vector<8x128xf32>
      %44 = arith.maximumf %42, %43 : vector<8x128xf32>
      %45 = arith.truncf %44 : vector<8x128xf32> to vector<8x128xbf16>
      %c0_34 = arith.constant 0 : index
      %c128_35 = arith.constant 128 : index
      %46 = vector.load %arg11[%c0_34, %c128_35] : memref<8x512xbf16, #tpu.memory_space<vmem>>, vector<8x128xbf16>
      tpu.vector_store %arg11[%c0_34, %c128_35], %45 {strides = array<i32>} : memref<8x512xbf16, #tpu.memory_space<vmem>>, vector<8x128xbf16>,
      %c0_36 = arith.constant 0 : index
      %c2304 = arith.constant 2304 : index
      %47 = vector.load %arg2[%c0_36, %c2304] : memref<8x4608xbf16, #tpu.memory_space<vmem>>, vector<8x1152xbf16>
      %c2 = arith.constant 2 : index
      %c0_37 = arith.constant 0 : index
      %c0_38 = arith.constant 0 : index
      %48 = vector.load %arg3[%c2, %c0_37, %c0_38] : memref<4x1152x128xbf16, #tpu.memory_space<vmem>>, vector<1x1152x128xbf16>
      %49 = vector.shape_cast %48 : vector<1x1152x128xbf16> to vector<1152x128xbf16>
      %cst_39 = arith.constant dense<0.000000e+00> : vector<8x128xf32>
      %50 = tpu.matmul %47, %49, %cst_39 {dimension_numbers = #tpu.dot_dimension_numbers<[1], [0], [0], [1], [0, 0, 1, 1], [], []>} : vector<8x1152xbf16>, vector<1152x128xbf16>, vector<8x128xf32> -> vector<8x128xf32>
      %c0_40 = arith.constant 0 : index
      %c256 = arith.constant 256 : index
      %51 = vector.load %arg4[%c0_40, %c256] : memref<1x512xf32, #tpu.memory_space<vmem>>, vector<1x128xf32>
      %52 = vector.broadcast %51 : vector<1x128xf32> to vector<8x128xf32>
      %53 = arith.mulf %50, %52 : vector<8x128xf32>
      %c0_41 = arith.constant 0 : index
      %c256_42 = arith.constant 256 : index
      %54 = vector.load %arg5[%c0_41, %c256_42] : memref<1x512xf32, #tpu.memory_space<vmem>>, vector<1x128xf32>
      %55 = vector.broadcast %54 : vector<1x128xf32> to vector<8x128xf32>
      %56 = arith.addf %53, %55 : vector<8x128xf32>
      %cst_43 = arith.constant 0.000000e+00 : f32
      %57 = vector.broadcast %cst_43 : f32 to vector<8x128xf32>
      %58 = arith.maximumf %56, %57 : vector<8x128xf32>
      %59 = arith.truncf %58 : vector<8x128xf32> to vector<8x128xbf16>
      %c0_44 = arith.constant 0 : index
      %c256_45 = arith.constant 256 : index
      %60 = vector.load %arg11[%c0_44, %c256_45] : memref<8x512xbf16, #tpu.memory_space<vmem>>, vector<8x128xbf16>
      tpu.vector_store %arg11[%c0_44, %c256_45], %59 {strides = array<i32>} : memref<8x512xbf16, #tpu.memory_space<vmem>>, vector<8x128xbf16>,
      %c0_46 = arith.constant 0 : index
      %c3456 = arith.constant 3456 : index
      %61 = vector.load %arg2[%c0_46, %c3456] : memref<8x4608xbf16, #tpu.memory_space<vmem>>, vector<8x1152xbf16>
      %c3 = arith.constant 3 : index
      %c0_47 = arith.constant 0 : index
      %c0_48 = arith.constant 0 : index
      %62 = vector.load %arg3[%c3, %c0_47, %c0_48] : memref<4x1152x128xbf16, #tpu.memory_space<vmem>>, vector<1x1152x128xbf16>
      %63 = vector.shape_cast %62 : vector<1x1152x128xbf16> to vector<1152x128xbf16>
      %cst_49 = arith.constant dense<0.000000e+00> : vector<8x128xf32>
      %64 = tpu.matmul %61, %63, %cst_49 {dimension_numbers = #tpu.dot_dimension_numbers<[1], [0], [0], [1], [0, 0, 1, 1], [], []>} : vector<8x1152xbf16>, vector<1152x128xbf16>, vector<8x128xf32> -> vector<8x128xf32>
      %c0_50 = arith.constant 0 : index
      %c384 = arith.constant 384 : index
      %65 = vector.load %arg4[%c0_50, %c384] : memref<1x512xf32, #tpu.memory_space<vmem>>, vector<1x128xf32>
      %66 = vector.broadcast %65 : vector<1x128xf32> to vector<8x128xf32>
      %67 = arith.mulf %64, %66 : vector<8x128xf32>
      %c0_51 = arith.constant 0 : index
      %c384_52 = arith.constant 384 : index
      %68 = vector.load %arg5[%c0_51, %c384_52] : memref<1x512xf32, #tpu.memory_space<vmem>>, vector<1x128xf32>
      %69 = vector.broadcast %68 : vector<1x128xf32> to vector<8x128xf32>
      %70 = arith.addf %67, %69 : vector<8x128xf32>
      %cst_53 = arith.constant 0.000000e+00 : f32
      %71 = vector.broadcast %cst_53 : f32 to vector<8x128xf32>
      %72 = arith.maximumf %70, %71 : vector<8x128xf32>
      %73 = arith.truncf %72 : vector<8x128xf32> to vector<8x128xbf16>
      %c0_54 = arith.constant 0 : index
      %c384_55 = arith.constant 384 : index
      %74 = vector.load %arg11[%c0_54, %c384_55] : memref<8x512xbf16, #tpu.memory_space<vmem>>, vector<8x128xbf16>
      tpu.vector_store %arg11[%c0_54, %c384_55], %73 {strides = array<i32>} : memref<8x512xbf16, #tpu.memory_space<vmem>>, vector<8x128xbf16>,
    } else {
    }
    %c0 = arith.constant 0 : index
    %c0_1 = arith.constant 0 : index
    %3 = vector.load %arg11[%c0, %c0_1] : memref<8x512xbf16, #tpu.memory_space<vmem>>, vector<8x512xbf16>
    %c0_2 = arith.constant 0 : index
    %c0_3 = arith.constant 0 : index
    %4 = vector.load %arg6[%c0_2, %c0_3] : memref<512x256xbf16, #tpu.memory_space<vmem>>, vector<512x256xbf16>
    %cst = arith.constant dense<0.000000e+00> : vector<8x256xf32>
    %5 = tpu.matmul %3, %4, %cst {dimension_numbers = #tpu.dot_dimension_numbers<[1], [0], [0], [1], [0, 0, 1, 1], [], []>} : vector<8x512xbf16>, vector<512x256xbf16>, vector<8x256xf32> -> vector<8x256xf32>
    %c0_4 = arith.constant 0 : index
    %c0_5 = arith.constant 0 : index
    %6 = vector.load %arg7[%c0_4, %c0_5] : memref<1x256xf32, #tpu.memory_space<vmem>>, vector<1x256xf32>
    %7 = vector.broadcast %6 : vector<1x256xf32> to vector<8x256xf32>
    %8 = arith.mulf %5, %7 : vector<8x256xf32>
    %c0_6 = arith.constant 0 : index
    %c0_7 = arith.constant 0 : index
    %9 = vector.load %arg8[%c0_6, %c0_7] : memref<1x256xf32, #tpu.memory_space<vmem>>, vector<1x256xf32>
    %10 = vector.broadcast %9 : vector<1x256xf32> to vector<8x256xf32>
    %11 = arith.addf %8, %10 : vector<8x256xf32>
    %c0_8 = arith.constant 0 : index
    %c0_9 = arith.constant 0 : index
    %12 = vector.load %arg9[%c0_8, %c0_9] : memref<8x256xbf16, #tpu.memory_space<vmem>>, vector<8x256xbf16>
    %13 = arith.extf %12 : vector<8x256xbf16> to vector<8x256xf32>
    %14 = arith.addf %11, %13 : vector<8x256xf32>
    %cst_10 = arith.constant 0.000000e+00 : f32
    %15 = vector.broadcast %cst_10 : f32 to vector<8x256xf32>
    %16 = arith.maximumf %14, %15 : vector<8x256xf32>
    %17 = arith.truncf %16 : vector<8x256xf32> to vector<8x256xbf16>
    %c0_11 = arith.constant 0 : index
    %c0_12 = arith.constant 0 : index
    %18 = vector.load %arg10[%c0_11, %c0_12] : memref<8x256xbf16, #tpu.memory_space<vmem>>, vector<8x256xbf16>
    tpu.vector_store %arg10[%c0_11, %c0_12], %17 {strides = array<i32>} : memref<8x256xbf16, #tpu.memory_space<vmem>>, vector<8x256xbf16>,
    return
  }
  func.func @transform_0(%arg0: i32, %arg1: i32) -> (i32, i32) {
    %c0_i32 = arith.constant 0 : i32
    %c0_i32_0 = arith.constant 0 : i32
    return %arg0, %c0_i32 : i32, i32
  }
  func.func @transform_1(%arg0: i32, %arg1: i32) -> (i32, i32, i32) {
    %c0_i32 = arith.constant 0 : i32
    %c0_i32_0 = arith.constant 0 : i32
    %c0_i32_1 = arith.constant 0 : i32
    %c0_i32_2 = arith.constant 0 : i32
    return %c0_i32, %c0_i32_0, %c0_i32_1 : i32, i32, i32
  }
  func.func @transform_2(%arg0: i32, %arg1: i32) -> (i32, i32) {
    %c0_i32 = arith.constant 0 : i32
    %c0_i32_0 = arith.constant 0 : i32
    %c0_i32_1 = arith.constant 0 : i32
    return %c0_i32, %c0_i32_0 : i32, i32
  }
  func.func @transform_3(%arg0: i32, %arg1: i32) -> (i32, i32) {
    %c0_i32 = arith.constant 0 : i32
    %c0_i32_0 = arith.constant 0 : i32
    %c0_i32_1 = arith.constant 0 : i32
    return %c0_i32, %c0_i32_0 : i32, i32
  }
  func.func @transform_4(%arg0: i32, %arg1: i32) -> (i32, i32) {
    %c0_i32 = arith.constant 0 : i32
    %c0_i32_0 = arith.constant 0 : i32
    return %c0_i32, %arg1 : i32, i32
  }
  func.func @transform_5(%arg0: i32, %arg1: i32) -> (i32, i32) {
    %c0_i32 = arith.constant 0 : i32
    %c0_i32_0 = arith.constant 0 : i32
    return %c0_i32, %arg1 : i32, i32
  }
  func.func @transform_6(%arg0: i32, %arg1: i32) -> (i32, i32) {
    %c0_i32 = arith.constant 0 : i32
    %c0_i32_0 = arith.constant 0 : i32
    return %c0_i32, %arg1 : i32, i32
  }
  func.func @transform_7(%arg0: i32, %arg1: i32) -> (i32, i32) {
    %c0_i32 = arith.constant 0 : i32
    return %arg0, %arg1 : i32, i32
  }
  func.func @transform_8(%arg0: i32, %arg1: i32) -> (i32, i32) {
    %c0_i32 = arith.constant 0 : i32
    return %arg0, %arg1 : i32, i32
  }
}

module attributes {stable_mosaic.version = 11 : i64} {
  func.func @_mm_bn_kernel(%arg0: i32, %arg1: i32, %arg2: i32, %arg3: memref<8x512xbf16, #tpu.memory_space<vmem>>, %arg4: memref<512x256xbf16, #tpu.memory_space<vmem>>, %arg5: memref<1x256xf32, #tpu.memory_space<vmem>>, %arg6: memref<1x256xf32, #tpu.memory_space<vmem>>, %arg7: memref<8x256xbf16, #tpu.memory_space<vmem>>, %arg8: memref<8x256xf32, #tpu.memory_space<vmem>>) attributes {dimension_semantics = [#tpu.dimension_semantics<parallel>, #tpu.dimension_semantics<parallel>, #tpu.dimension_semantics<arbitrary>], iteration_bounds = array<i64: 1, 2, 2>, scalar_prefetch = 0 : i64, scratch_operands = 1 : i64, tpu.core_type = #tpu.core_type<tc>, window_params = [{transform_indices = @transform_0, window_bounds = array<i64: 8, 512>}, {transform_indices = @transform_1, window_bounds = array<i64: 512, 256>}, {transform_indices = @transform_2, window_bounds = array<i64: 1, 256>}, {transform_indices = @transform_3, window_bounds = array<i64: 1, 256>}, {transform_indices = @transform_4, window_bounds = array<i64: 8, 256>}]} {
    %c0_i32 = arith.constant 0 : i32
    %0 = arith.cmpi eq, %arg2, %c0_i32 : i32
    %1 = arith.extui %0 : i1 to i32
    %c0_i32_0 = arith.constant 0 : i32
    %2 = arith.cmpi ne, %1, %c0_i32_0 : i32
    scf.if %2 {
      %cst_9 = arith.constant 0.000000e+00 : f32
      %12 = vector.broadcast %cst_9 : f32 to vector<8x256xf32>
      %c0_10 = arith.constant 0 : index
      %c0_11 = arith.constant 0 : index
      %13 = vector.load %arg8[%c0_10, %c0_11] : memref<8x256xf32, #tpu.memory_space<vmem>>, vector<8x256xf32>
      tpu.vector_store %arg8[%c0_10, %c0_11], %12 {strides = array<i32>} : memref<8x256xf32, #tpu.memory_space<vmem>>, vector<8x256xf32>,
    } else {
    }
    %c0 = arith.constant 0 : index
    %c0_1 = arith.constant 0 : index
    %3 = vector.load %arg8[%c0, %c0_1] : memref<8x256xf32, #tpu.memory_space<vmem>>, vector<8x256xf32>
    %c0_2 = arith.constant 0 : index
    %c0_3 = arith.constant 0 : index
    %4 = vector.load %arg3[%c0_2, %c0_3] : memref<8x512xbf16, #tpu.memory_space<vmem>>, vector<8x512xbf16>
    %c0_4 = arith.constant 0 : index
    %c0_5 = arith.constant 0 : index
    %5 = vector.load %arg4[%c0_4, %c0_5] : memref<512x256xbf16, #tpu.memory_space<vmem>>, vector<512x256xbf16>
    %cst = arith.constant dense<0.000000e+00> : vector<8x256xf32>
    %6 = tpu.matmul %4, %5, %cst {dimension_numbers = #tpu.dot_dimension_numbers<[1], [0], [0], [1], [0, 0, 1, 1], [], []>} : vector<8x512xbf16>, vector<512x256xbf16>, vector<8x256xf32> -> vector<8x256xf32>
    %7 = arith.addf %3, %6 : vector<8x256xf32>
    %c0_6 = arith.constant 0 : index
    %c0_7 = arith.constant 0 : index
    %8 = vector.load %arg8[%c0_6, %c0_7] : memref<8x256xf32, #tpu.memory_space<vmem>>, vector<8x256xf32>
    tpu.vector_store %arg8[%c0_6, %c0_7], %7 {strides = array<i32>} : memref<8x256xf32, #tpu.memory_space<vmem>>, vector<8x256xf32>,
    %c1_i32 = arith.constant 1 : i32
    %9 = arith.cmpi eq, %arg2, %c1_i32 : i32
    %10 = arith.extui %9 : i1 to i32
    %c0_i32_8 = arith.constant 0 : i32
    %11 = arith.cmpi ne, %10, %c0_i32_8 : i32
    scf.if %11 {
      %c0_9 = arith.constant 0 : index
      %c0_10 = arith.constant 0 : index
      %12 = vector.load %arg8[%c0_9, %c0_10] : memref<8x256xf32, #tpu.memory_space<vmem>>, vector<8x256xf32>
      %c0_11 = arith.constant 0 : index
      %c0_12 = arith.constant 0 : index
      %13 = vector.load %arg5[%c0_11, %c0_12] : memref<1x256xf32, #tpu.memory_space<vmem>>, vector<1x256xf32>
      %14 = vector.broadcast %13 : vector<1x256xf32> to vector<8x256xf32>
      %15 = arith.mulf %12, %14 : vector<8x256xf32>
      %c0_13 = arith.constant 0 : index
      %c0_14 = arith.constant 0 : index
      %16 = vector.load %arg6[%c0_13, %c0_14] : memref<1x256xf32, #tpu.memory_space<vmem>>, vector<1x256xf32>
      %17 = vector.broadcast %16 : vector<1x256xf32> to vector<8x256xf32>
      %18 = arith.addf %15, %17 : vector<8x256xf32>
      %cst_15 = arith.constant 0.000000e+00 : f32
      %19 = vector.broadcast %cst_15 : f32 to vector<8x256xf32>
      %20 = arith.maximumf %18, %19 : vector<8x256xf32>
      %21 = arith.truncf %20 : vector<8x256xf32> to vector<8x256xbf16>
      %c0_16 = arith.constant 0 : index
      %c0_17 = arith.constant 0 : index
      %22 = vector.load %arg7[%c0_16, %c0_17] : memref<8x256xbf16, #tpu.memory_space<vmem>>, vector<8x256xbf16>
      tpu.vector_store %arg7[%c0_16, %c0_17], %21 {strides = array<i32>} : memref<8x256xbf16, #tpu.memory_space<vmem>>, vector<8x256xbf16>,
    } else {
    }
    return
  }
  func.func @transform_0(%arg0: i32, %arg1: i32, %arg2: i32) -> (i32, i32) {
    %c0_i32 = arith.constant 0 : i32
    return %arg0, %arg2 : i32, i32
  }
  func.func @transform_1(%arg0: i32, %arg1: i32, %arg2: i32) -> (i32, i32) {
    %c0_i32 = arith.constant 0 : i32
    return %arg2, %arg1 : i32, i32
  }
  func.func @transform_2(%arg0: i32, %arg1: i32, %arg2: i32) -> (i32, i32) {
    %c0_i32 = arith.constant 0 : i32
    %c0_i32_0 = arith.constant 0 : i32
    return %c0_i32, %arg1 : i32, i32
  }
  func.func @transform_3(%arg0: i32, %arg1: i32, %arg2: i32) -> (i32, i32) {
    %c0_i32 = arith.constant 0 : i32
    %c0_i32_0 = arith.constant 0 : i32
    return %c0_i32, %arg1 : i32, i32
  }
  func.func @transform_4(%arg0: i32, %arg1: i32, %arg2: i32) -> (i32, i32) {
    %c0_i32 = arith.constant 0 : i32
    return %arg0, %arg1 : i32, i32
  }
}

</mosaic_0001>

<bundles_post_ra>
// kernel: resnext50_encoder.31
= control target key start
LH: loop header
LB: loop body
LE: loop exit
PB: predicated region body
PF: predicated region fallthrough
CT: control target
= control target key end

     0   :  { %s1582_s15 = smov 0   ;;  %s1584_s16 = smov 0   ;;  %s1841_s0 = inlined_call_operand.vmem [shape: bf16[512,256], index: 0, kind: input, shape index: {}]   ;;  %s1842_s1 = inlined_call_operand.vmem [shape: bf16[256,64], index: 1, kind: input, shape index: {}]   ;;  %s1843_s2 = inlined_call_operand.vmem [shape: f32[1,64], index: 2, kind: input, shape index: {}]   ;;  %s1844_s3 = inlined_call_operand.vmem [shape: f32[1,64], index: 3, kind: input, shape index: {}]   ;;  %s1845_s4 = inlined_call_operand.vmem [shape: bf16[512,64], index: 4, kind: output, shape index: {}]  }
   0x1   :  { %s1586_s17 = smov 0  }
   0x2 LB: > { %s33_s18 = sadd.s32 1, %s1551_s16  ;;  %p1194_p0 = scmp.ge.s32.totalorder %s1555_s17, 1  ;;  %s1555_s17 = sphi %s1586_s17, %s14_s17   ;;  %s1551_s16 = sphi %s1584_s16, %s1847_s16   ;;  %s1547_s15 = sphi %s1582_s15, %s1846_s15  }
   0x3   : > { %p35_p1 = scmp.ge.s32.totalorder %s33_s18, 2  ;;  %p224_p2 = scmp.lt.s32.totalorder %s1555_s17, 3 }
   0x5   : > { %s1849_s18 = smov (%p35_p1, %s33_s18), 0  ;;  %p225_p3 = pnand %p1194_p0, %p224_p2 }
   0x6   : > { %v1469_v0 = vld [vmem:[%s1842_s1 + $0x40] sm:$0xff] (!%p225_p3)   ;;  %s1195_s21 = sshll.u32 (!%p225_p3), %s1547_s15, 5  ;;  %v1471_v2 = vld [vmem:[%s1842_s1 + $0x48] sm:$0xff] (!%p225_p3)   ;;  %v1473_v4 = vld [vmem:[%s1842_s1 + $0x50] sm:$0xff] (!%p225_p3)   ;;  %vm1028_vm0 = vcmask (!%p225_p3), 519168  }
   0x7   : > { %228 = sbr.rel (%p225_p3) target bundleno = 321 (0x141), region = 36  ;;  %v1470_v1 = vld [vmem:[%s1842_s1] sm:$0xff] (!%p225_p3)   ;;  %1317 = vmatprep.subr.bf16.mxu0 (!%p225_p3), %v1469_v0  ;;  %1429 = vmatprep.subr.bf16.mxu1 (!%p225_p3), %v1469_v0  ;;  %v1472_v3 = vld [vmem:[%s1842_s1 + $0x8] sm:$0xff] (!%p225_p3)   ;;  %p274_p4 = scmp.lt.s32.totalorder (!%p225_p3), %s1195_s21, 63  ;;  %v1474_v5 = vld [vmem:[%s1842_s1 + $0x10] sm:$0xff] (!%p225_p3)  }
   0x8   : > { %1318 = vmatpush3.bf16.msra.mxu0 (!%p225_p3), %v1470_v1  ;;  %1437 = vmatpush3.bf16.msra.mxu1 (!%p225_p3), %v1470_v1  ;;  %v1475_v6 = vld [vmem:[%s1842_s1 + $0x58] sm:$0xff] (!%p225_p3)   ;;  %v1477_v8 = vld [vmem:[%s1842_s1 + $0x60] sm:$0xff] (!%p225_p3)   ;;  %v1479_v10 = vld [vmem:[%s1842_s1 + $0x68] sm:$0xff] (!%p225_p3)  }
   0x9   : > { %1319 = vmatprep.subr.bf16.mxu0 (!%p225_p3), %v1471_v2  ;;  %1430 = vmatprep.subr.bf16.mxu1 (!%p225_p3), %v1471_v2  ;;  %v1476_v7 = vld [vmem:[%s1842_s1 + $0x18] sm:$0xff] (!%p225_p3)   ;;  %v1478_v9 = vld [vmem:[%s1842_s1 + $0x20] sm:$0xff] (!%p225_p3)   ;;  %v1480_v13 = vld [vmem:[%s1842_s1 + $0x28] sm:$0xff] (!%p225_p3)  }
   0xa   : > { %v1481_v14 = vld [vmem:[%s1842_s1 + $0x70] sm:$0xff] (!%p225_p3)   ;;  %v1483_v16 = vld [vmem:[%s1842_s1 + $0x78] sm:$0xff] (!%p225_p3)   ;;  %v1691_v51 = vld [vmem:[%s1843_s2] ss:$0 sm:$0xff] (!%p225_p3) }
   0xb   : > { %v1482_v15 = vld [vmem:[%s1842_s1 + $0x30] sm:$0xff] (!%p225_p3)   ;;  %v1484_v17 = vld [vmem:[%s1842_s1 + $0x38] sm:$0xff] (!%p225_p3)   ;;  %v1696_v57 = vld [vmem:[%s1844_s3] ss:$0 sm:$0xff] (!%p225_p3) }
   0xc   : > { %1320 = vmatpush3.bf16.msra.mxu0 (!%p225_p3), %v1472_v3  ;;  %1438 = vmatpush3.bf16.msra.mxu1 (!%p225_p3), %v1472_v3 }
   0xd   : > { %1321 = vmatprep.subr.bf16.mxu0 (!%p225_p3), %v1473_v4  ;;  %1431 = vmatprep.subr.bf16.mxu1 (!%p225_p3), %v1473_v4 }
   0xe   : > { %s1851_s21 = smov (!%p274_p4, %s1195_s21), 63 }
   0xf   : > { %s1284_s10 = sshll.u32 %s1851_s21, 3  ;;  %s1199_s12 = sshll.u32 %s1851_s21, 2 }
  0x10   : > { %1322 = vmatpush3.bf16.msra.mxu0 %v1474_v5  ;;  %1439 = vmatpush3.bf16.msra.mxu1 %v1474_v5  ;;  %s1633_s15 = scalar_lea.vmem %s1841_s0, %s1284_s10  ;;  %s1710_s21 = scalar_lea.vmem %s1845_s4, %s1199_s12 }
  0x11   : > { %1323 = vmatprep.subr.bf16.mxu0 %v1475_v6  ;;  %1432 = vmatprep.subr.bf16.mxu1 %v1475_v6  ;;  %v1487_v11 = vld [vmem:[%s1633_s15 + $0x4] ss:$8 sps:$4 sm:$0xff]   ;;  %v1485_v18 = vld [vmem:[%s1633_s15] ss:$8 sps:$4 sm:$0xff]   ;;  %v1491_v20 = vld [vmem:[%s1633_s15 + $0x14] ss:$8 sps:$4 sm:$0xff]  }
  0x12   : > { %v1490_v12 = vld [vmem:[%s1633_s15 + $0x84] ss:$8 sps:$4 sm:$0xff]   ;;  %661 = vmatprep.mubr.bf16.mxu0 %v1487_v11  ;;  %v1488_v19 = vld [vmem:[%s1633_s15 + $0x80] ss:$8 sps:$4 sm:$0xff]   ;;  %v1493_v21 = vld [vmem:[%s1633_s15 + $0x94] ss:$8 sps:$4 sm:$0xff]  }
  0x13   : > { %725 = vmatprep.mubr.bf16.mxu1 %v1490_v12  ;;  %v1495_v22 = vld [vmem:[%s1633_s15 + $0x10] ss:$8 sps:$4 sm:$0xff]   ;;  %v1497_v24 = vld [vmem:[%s1633_s15 + $0x24] ss:$8 sps:$4 sm:$0xff]   ;;  %v1501_v26 = vld [vmem:[%s1633_s15 + $0x20] ss:$8 sps:$4 sm:$0xff]  }
  0x14   : > { %1324 = vmatpush3.bf16.msra.mxu0 %v1476_v7  ;;  %1440 = vmatpush3.bf16.msra.mxu1 %v1476_v7  ;;  %v1496_v23 = vld [vmem:[%s1633_s15 + $0x90] ss:$8 sps:$4 sm:$0xff]   ;;  %v1499_v25 = vld [vmem:[%s1633_s15 + $0xa4] ss:$8 sps:$4 sm:$0xff]   ;;  %v1502_v27 = vld [vmem:[%s1633_s15 + $0xa0] ss:$8 sps:$4 sm:$0xff]  }
  0x15   : > { %1325 = vmatprep.subr.bf16.mxu0 %v1477_v8  ;;  %1433 = vmatprep.subr.bf16.mxu1 %v1477_v8  ;;  %v1503_v28 = vld [vmem:[%s1633_s15 + $0x34] ss:$8 sps:$4 sm:$0xff]   ;;  %v1507_v30 = vld [vmem:[%s1633_s15 + $0x30] ss:$8 sps:$4 sm:$0xff]   ;;  %v1509_v32 = vld [vmem:[%s1633_s15 + $0x44] ss:$8 sps:$4 sm:$0xff]  }
  0x16   : > { %v1505_v29 = vld [vmem:[%s1633_s15 + $0xb4] ss:$8 sps:$4 sm:$0xff]   ;;  %v1508_v31 = vld [vmem:[%s1633_s15 + $0xb0] ss:$8 sps:$4 sm:$0xff]   ;;  %v1511_v33 = vld [vmem:[%s1633_s15 + $0xc4] ss:$8 sps:$4 sm:$0xff]  }
  0x17   : > { %v1513_v34 = vld [vmem:[%s1633_s15 + $0x40] ss:$8 sps:$4 sm:$0xff]   ;;  %v1515_v36 = vld [vmem:[%s1633_s15 + $0x54] ss:$8 sps:$4 sm:$0xff]   ;;  %v1519_v38 = vld [vmem:[%s1633_s15 + $0x50] ss:$8 sps:$4 sm:$0xff]  }
  0x18   : > { %1326 = vmatpush3.bf16.msra.mxu0 %v1478_v9  ;;  %1441 = vmatpush3.bf16.msra.mxu1 %v1478_v9  ;;  %v1514_v35 = vld [vmem:[%s1633_s15 + $0xc0] ss:$8 sps:$4 sm:$0xff]   ;;  %v1517_v37 = vld [vmem:[%s1633_s15 + $0xd4] ss:$8 sps:$4 sm:$0xff]   ;;  %v1520_v39 = vld [vmem:[%s1633_s15 + $0xd0] ss:$8 sps:$4 sm:$0xff]  }
  0x19   : > { %1327 = vmatprep.subr.bf16.mxu0 %v1479_v10  ;;  %1434 = vmatprep.subr.bf16.mxu1 %v1479_v10  ;;  %v1521_v40 = vld [vmem:[%s1633_s15 + $0x64] ss:$8 sps:$4 sm:$0xff]   ;;  %v1525_v42 = vld [vmem:[%s1633_s15 + $0x60] ss:$8 sps:$4 sm:$0xff]   ;;  %v1527_v44 = vld [vmem:[%s1633_s15 + $0x74] ss:$8 sps:$4 sm:$0xff]  }
  0x1a   : > { %v1523_v41 = vld [vmem:[%s1633_s15 + $0xe4] ss:$8 sps:$4 sm:$0xff]   ;;  %v1526_v43 = vld [vmem:[%s1633_s15 + $0xe0] ss:$8 sps:$4 sm:$0xff]   ;;  %v1529_v45 = vld [vmem:[%s1633_s15 + $0xf4] ss:$8 sps:$4 sm:$0xff]  }
  0x1b   : > { %v1531_v46 = vld [vmem:[%s1633_s15 + $0x70] ss:$8 sps:$4 sm:$0xff]  }
  0x1c   : > { %1328 = vmatpush3.bf16.msra.mxu0 %v1480_v13  ;;  %1442 = vmatpush3.bf16.msra.mxu1 %v1480_v13  ;;  %v1532_v47 = vld [vmem:[%s1633_s15 + $0xf0] ss:$8 sps:$4 sm:$0xff]  }
  0x1d   : > { %1329 = vmatprep.subr.bf16.mxu0 %v1481_v14  ;;  %1435 = vmatprep.subr.bf16.mxu1 %v1481_v14 }
  0x20   : > { %1330 = vmatpush3.bf16.msra.mxu0 %v1482_v15  ;;  %1443 = vmatpush3.bf16.msra.mxu1 %v1482_v15 }
  0x21   : > { %1331 = vmatprep.subr.bf16.mxu0 %v1483_v16  ;;  %1436 = vmatprep.subr.bf16.mxu1 %v1483_v16 }
  0x24   : > { %1332 = vmatpush3.bf16.msra.mxu0 %v1484_v17  ;;  %1444 = vmatpush3.bf16.msra.mxu1 %v1484_v17 }
  0x27   : > { %662 = vmatmul.mubr.bf16.vlgmr.msra.gmra.mrb[0].mxu0 %v1485_v18  ;;  %726 = vmatmul.mubr.bf16.vlgmr.msra.gmra.mrb[0].mxu1 %v1488_v19 }
  0x28   : > { %669 = vmatprep.mubr.bf16.mxu0 %v1491_v20  ;;  %733 = vmatprep.mubr.bf16.mxu1 %v1493_v21 }
  0x2f   : > { %670 = vmatmul.mubr.bf16.gmra.mrb[4].mxu0 %v1495_v22  ;;  %734 = vmatmul.mubr.bf16.gmra.mrb[4].mxu1 %v1496_v23 }
  0x30   : > { %677 = vmatprep.mubr.bf16.mxu0 %v1497_v24  ;;  %741 = vmatprep.mubr.bf16.mxu1 %v1499_v25 }
  0x37   : > { %678 = vmatmul.mubr.bf16.gmra.mrb[8].mxu0 %v1501_v26  ;;  %742 = vmatmul.mubr.bf16.gmra.mrb[8].mxu1 %v1502_v27 }
  0x38   : > { %685 = vmatprep.mubr.bf16.mxu0 %v1503_v28  ;;  %749 = vmatprep.mubr.bf16.mxu1 %v1505_v29 }
  0x3f   : > { %686 = vmatmul.mubr.bf16.gmra.mrb[12].mxu0 %v1507_v30  ;;  %750 = vmatmul.mubr.bf16.gmra.mrb[12].mxu1 %v1508_v31 }
  0x40   : > { %693 = vmatprep.mubr.bf16.mxu0 %v1509_v32  ;;  %757 = vmatprep.mubr.bf16.mxu1 %v1511_v33 }
  0x47   : > { %694 = vmatmul.mubr.bf16.gmra.mrb[16].mxu0 %v1513_v34  ;;  %758 = vmatmul.mubr.bf16.gmra.mrb[16].mxu1 %v1514_v35 }
  0x48   : > { %701 = vmatprep.mubr.bf16.mxu0 %v1515_v36  ;;  %765 = vmatprep.mubr.bf16.mxu1 %v1517_v37 }
  0x4f   : > { %702 = vmatmul.mubr.bf16.gmra.mrb[20].mxu0 %v1519_v38  ;;  %766 = vmatmul.mubr.bf16.gmra.mrb[20].mxu1 %v1520_v39 }
  0x50   : > { %709 = vmatprep.mubr.bf16.mxu0 %v1521_v40  ;;  %773 = vmatprep.mubr.bf16.mxu1 %v1523_v41 }
  0x57   : > { %710 = vmatmul.mubr.bf16.gmra.mrb[24].mxu0 %v1525_v42  ;;  %774 = vmatmul.mubr.bf16.gmra.mrb[24].mxu1 %v1526_v43 }
  0x58   : > { %717 = vmatprep.mubr.bf16.mxu0 %v1527_v44  ;;  %781 = vmatprep.mubr.bf16.mxu1 %v1529_v45 }
  0x5f   : > { %718 = vmatmul.mubr.bf16.gmra.mrb[28].mxu0 %v1531_v46  ;;  %782 = vmatmul.mubr.bf16.gmra.mrb[28].mxu1 %v1532_v47 }
  0xfa   : > { %v1333_v48 = vpop.f32.mrb[0].mxu0  ;;  %v1381_v49 = vpop.f32.mrb[0].mxu1 }
  0xfb   : > { %v1334_v50 = vpop.f32.mrb[1].mxu0  ;;  %v1382_v52 = vpop.f32.mrb[1].mxu1 }
  0xfc   : > { %v1335_v53 = vadd.f32 %v1334_v50, %v1333_v48  ;;  %v1383_v54 = vadd.f32 %v1382_v52, %v1381_v49  ;;  %v1336_v55 = vpop.f32.mrb[2].mxu0  ;;  %v1384_v56 = vpop.f32.mrb[2].mxu1 }
  0xfd   : > { %v1337_v58 = vpop.f32.mrb[3].mxu0  ;;  %v1385_v59 = vpop.f32.mrb[3].mxu1 }
  0xfe   : > { %v797_v60 = vmul.f32 %v1335_v53, %v1691_v51  ;;  %v813_v61 = vmul.f32 %v1383_v54, %v1691_v51  ;;  %v1338_v62 = vadd.f32 %v1337_v58, %v1336_v55  ;;  %v1386_v63 = vadd.f32 %v1385_v59, %v1384_v56 }
 0x100   : > { %v836_v0 = vadd.f32 %v1696_v57, %v797_v60  ;;  %v852_v1 = vadd.f32 %v1696_v57, %v813_v61  ;;  %v798_v2 = vmul.f32 %v1338_v62, %v1691_v51  ;;  %v814_v3 = vmul.f32 %v1386_v63, %v1691_v51 }
 0x102   : > { %v868_v4 = vmax.f32 %v836_v0, 0.0  ;;  %v884_v5 = vmax.f32 %v852_v1, 0.0  ;;  %v837_v6 = vadd.f32 %v1696_v57, %v798_v2  ;;  %v853_v7 = vadd.f32 %v1696_v57, %v814_v3  ;;  %v1339_v8 = vpop.f32.mrb[4].mxu0  ;;  %v1387_v9 = vpop.f32.mrb[4].mxu1 }
 0x103   : > { %v1340_v10 = vpop.f32.mrb[5].mxu0  ;;  %v1388_v11 = vpop.f32.mrb[5].mxu1 }
 0x104   : > { %v1285_v12 = vpack.c.bf16 %v868_v4, %v868_v4  ;;  %v1301_v13 = vpack.c.bf16 %v884_v5, %v884_v5  ;;  %v869_v14 = vmax.f32 %v837_v6, 0.0  ;;  %v885_v15 = vmax.f32 %v853_v7, 0.0  ;;  %v1342_v16 = vpop.f32.mrb[6].mxu0  ;;  %v1390_v17 = vpop.f32.mrb[6].mxu1 }
 0x105   : > { %v1341_v18 = vadd.f32 %v1340_v10, %v1339_v8  ;;  %v1389_v19 = vadd.f32 %v1388_v11, %v1387_v9  ;;  %v1343_v20 = vpop.f32.mrb[7].mxu0  ;;  %v1391_v21 = vpop.f32.mrb[7].mxu1 }
 0x106   : > { %1029 = vst.msk [vmem:[%s1710_s21] sm:$0xf] %vm1028_vm0, %v1285_v12  ;;  %1045 = vst.msk [vmem:[%s1710_s21 + $0x40] sm:$0xf] %vm1028_vm0, %v1301_v13  ;;  %v1286_v22 = vpack.c.bf16 %v869_v14, %v869_v14  ;;  %v1302_v23 = vpack.c.bf16 %v885_v15, %v885_v15  ;;  %v1344_v24 = vadd.f32 %v1343_v20, %v1342_v16 }
 0x107   : > { %v1392_v25 = vadd.f32 %v1391_v21, %v1390_v17  ;;  %v799_v26 = vmul.f32 %v1341_v18, %v1691_v51  ;;  %v815_v27 = vmul.f32 %v1389_v19, %v1691_v51 }
 0x108   : > { %1030 = vst.msk [vmem:[%s1710_s21 + $0x4] sm:$0xf] %vm1028_vm0, %v1286_v22  ;;  %1046 = vst.msk [vmem:[%s1710_s21 + $0x44] sm:$0xf] %vm1028_vm0, %v1302_v23  ;;  %v800_v28 = vmul.f32 %v1344_v24, %v1691_v51 }
 0x109   : > { %v816_v29 = vmul.f32 %v1392_v25, %v1691_v51  ;;  %v838_v30 = vadd.f32 %v1696_v57, %v799_v26  ;;  %v854_v31 = vadd.f32 %v1696_v57, %v815_v27 }
 0x10a   : > { %v839_v32 = vadd.f32 %v1696_v57, %v800_v28  ;;  %v1345_v34 = vpop.f32.mrb[8].mxu0  ;;  %v1393_v35 = vpop.f32.mrb[8].mxu1 }
 0x10b   : > { %v855_v33 = vadd.f32 %v1696_v57, %v816_v29  ;;  %v870_v36 = vmax.f32 %v838_v30, 0.0  ;;  %v886_v37 = vmax.f32 %v854_v31, 0.0  ;;  %v1346_v38 = vpop.f32.mrb[9].mxu0  ;;  %v1394_v39 = vpop.f32.mrb[9].mxu1 }
 0x10c   : > { %v871_v40 = vmax.f32 %v839_v32, 0.0  ;;  %v1347_v42 = vadd.f32 %v1346_v38, %v1345_v34  ;;  %v1395_v43 = vadd.f32 %v1394_v39, %v1393_v35  ;;  %v1348_v44 = vpop.f32.mrb[10].mxu0  ;;  %v1396_v45 = vpop.f32.mrb[10].mxu1 }
 0x10d   : > { %v887_v41 = vmax.f32 %v855_v33, 0.0  ;;  %v1287_v46 = vpack.c.bf16 %v870_v36, %v870_v36  ;;  %v1303_v47 = vpack.c.bf16 %v886_v37, %v886_v37  ;;  %v1349_v48 = vpop.f32.mrb[11].mxu0  ;;  %v1397_v49 = vpop.f32.mrb[11].mxu1 }
 0x10e   : > { %v1288_v50 = vpack.c.bf16 %v871_v40, %v871_v40  ;;  %v801_v53 = vmul.f32 %v1347_v42, %v1691_v51  ;;  %v817_v54 = vmul.f32 %v1395_v43, %v1691_v51  ;;  %v1350_v55 = vadd.f32 %v1349_v48, %v1348_v44 }
 0x10f   : > { %v1304_v52 = vpack.c.bf16 %v887_v41, %v887_v41  ;;  %1031 = vst.msk [vmem:[%s1710_s21 + $0x8] sm:$0xf] %vm1028_vm0, %v1287_v46  ;;  %1047 = vst.msk [vmem:[%s1710_s21 + $0x48] sm:$0xf] %vm1028_vm0, %v1303_v47  ;;  %v1398_v56 = vadd.f32 %v1397_v49, %v1396_v45 }
 0x110   : > { %1032 = vst.msk [vmem:[%s1710_s21 + $0xc] sm:$0xf] %vm1028_vm0, %v1288_v50  ;;  %v840_v58 = vadd.f32 %v1696_v57, %v801_v53  ;;  %v856_v59 = vadd.f32 %v1696_v57, %v817_v54  ;;  %v802_v60 = vmul.f32 %v1350_v55, %v1691_v51 }
 0x111   : > { %1048 = vst.msk [vmem:[%s1710_s21 + $0x4c] sm:$0xf] %vm1028_vm0, %v1304_v52  ;;  %v818_v61 = vmul.f32 %v1398_v56, %v1691_v51 }
 0x112   : > { %v872_v62 = vmax.f32 %v840_v58, 0.0  ;;  %v888_v63 = vmax.f32 %v856_v59, 0.0  ;;  %v1351_v0 = vpop.f32.mrb[12].mxu0  ;;  %v1399_v1 = vpop.f32.mrb[12].mxu1  ;;  %v841_v2 = vadd.f32 %v1696_v57, %v802_v60 }
 0x113   : > { %v857_v3 = vadd.f32 %v1696_v57, %v818_v61  ;;  %v1352_v4 = vpop.f32.mrb[13].mxu0  ;;  %v1400_v5 = vpop.f32.mrb[13].mxu1 }
 0x114   : > { %v1289_v6 = vpack.c.bf16 %v872_v62, %v872_v62  ;;  %v1305_v7 = vpack.c.bf16 %v888_v63, %v888_v63  ;;  %v1353_v8 = vadd.f32 %v1352_v4, %v1351_v0  ;;  %v1401_v9 = vadd.f32 %v1400_v5, %v1399_v1  ;;  %v1354_v10 = vpop.f32.mrb[14].mxu0  ;;  %v1402_v11 = vpop.f32.mrb[14].mxu1 }
 0x115   : > { %v873_v12 = vmax.f32 %v841_v2, 0.0  ;;  %v889_v13 = vmax.f32 %v857_v3, 0.0  ;;  %v1355_v14 = vpop.f32.mrb[15].mxu0  ;;  %v1403_v15 = vpop.f32.mrb[15].mxu1 }
 0x116   : > { %1033 = vst.msk [vmem:[%s1710_s21 + $0x10] sm:$0xf] %vm1028_vm0, %v1289_v6  ;;  %1049 = vst.msk [vmem:[%s1710_s21 + $0x50] sm:$0xf] %vm1028_vm0, %v1305_v7  ;;  %v803_v16 = vmul.f32 %v1353_v8, %v1691_v51  ;;  %v819_v17 = vmul.f32 %v1401_v9, %v1691_v51  ;;  %v1356_v18 = vadd.f32 %v1355_v14, %v1354_v10 }
 0x117   : > { %v1404_v19 = vadd.f32 %v1403_v15, %v1402_v11  ;;  %v1290_v20 = vpack.c.bf16 %v873_v12, %v873_v12  ;;  %v1306_v21 = vpack.c.bf16 %v889_v13, %v889_v13 }
 0x118   : > { %v842_v22 = vadd.f32 %v1696_v57, %v803_v16  ;;  %v858_v23 = vadd.f32 %v1696_v57, %v819_v17  ;;  %v804_v24 = vmul.f32 %v1356_v18, %v1691_v51 }
 0x119   : > { %v820_v25 = vmul.f32 %v1404_v19, %v1691_v51  ;;  %1034 = vst.msk [vmem:[%s1710_s21 + $0x14] sm:$0xf] %vm1028_vm0, %v1290_v20  ;;  %1050 = vst.msk [vmem:[%s1710_s21 + $0x54] sm:$0xf] %vm1028_vm0, %v1306_v21 }
 0x11a   : > { %v874_v26 = vmax.f32 %v842_v22, 0.0  ;;  %v890_v27 = vmax.f32 %v858_v23, 0.0  ;;  %v843_v28 = vadd.f32 %v1696_v57, %v804_v24  ;;  %v1357_v30 = vpop.f32.mrb[16].mxu0  ;;  %v1405_v31 = vpop.f32.mrb[16].mxu1 }
 0x11b   : > { %v859_v29 = vadd.f32 %v1696_v57, %v820_v25  ;;  %v1358_v32 = vpop.f32.mrb[17].mxu0  ;;  %v1406_v33 = vpop.f32.mrb[17].mxu1 }
 0x11c   : > { %v1291_v34 = vpack.c.bf16 %v874_v26, %v874_v26  ;;  %v1307_v35 = vpack.c.bf16 %v890_v27, %v890_v27  ;;  %v875_v36 = vmax.f32 %v843_v28, 0.0  ;;  %v1360_v38 = vpop.f32.mrb[18].mxu0  ;;  %v1408_v39 = vpop.f32.mrb[18].mxu1  ;;  %v1359_v40 = vadd.f32 %v1358_v32, %v1357_v30 }
 0x11d   : > { %v891_v37 = vmax.f32 %v859_v29, 0.0  ;;  %v1407_v41 = vadd.f32 %v1406_v33, %v1405_v31  ;;  %v1361_v42 = vpop.f32.mrb[19].mxu0  ;;  %v1409_v43 = vpop.f32.mrb[19].mxu1 }
 0x11e   : > { %1035 = vst.msk [vmem:[%s1710_s21 + $0x18] sm:$0xf] %vm1028_vm0, %v1291_v34  ;;  %1051 = vst.msk [vmem:[%s1710_s21 + $0x58] sm:$0xf] %vm1028_vm0, %v1307_v35  ;;  %v1292_v44 = vpack.c.bf16 %v875_v36, %v875_v36  ;;  %v1362_v46 = vadd.f32 %v1361_v42, %v1360_v38  ;;  %v1410_v47 = vadd.f32 %v1409_v43, %v1408_v39 }
 0x11f   : > { %v1308_v45 = vpack.c.bf16 %v891_v37, %v891_v37  ;;  %v805_v48 = vmul.f32 %v1359_v40, %v1691_v51  ;;  %v821_v49 = vmul.f32 %v1407_v41, %v1691_v51 }
 0x120   : > { %1036 = vst.msk [vmem:[%s1710_s21 + $0x1c] sm:$0xf] %vm1028_vm0, %v1292_v44  ;;  %v806_v50 = vmul.f32 %v1362_v46, %v1691_v51  ;;  %v822_v52 = vmul.f32 %v1410_v47, %v1691_v51 }
 0x121   : > { %1052 = vst.msk [vmem:[%s1710_s21 + $0x5c] sm:$0xf] %vm1028_vm0, %v1308_v45  ;;  %v844_v53 = vadd.f32 %v1696_v57, %v805_v48  ;;  %v860_v54 = vadd.f32 %v1696_v57, %v821_v49 }
 0x122   : > { %v845_v55 = vadd.f32 %v1696_v57, %v806_v50  ;;  %v861_v56 = vadd.f32 %v1696_v57, %v822_v52  ;;  %v1363_v58 = vpop.f32.mrb[20].mxu0  ;;  %v1411_v59 = vpop.f32.mrb[20].mxu1 }
 0x123   : > { %v876_v60 = vmax.f32 %v844_v53, 0.0  ;;  %v892_v61 = vmax.f32 %v860_v54, 0.0  ;;  %v1364_v62 = vpop.f32.mrb[21].mxu0  ;;  %v1412_v63 = vpop.f32.mrb[21].mxu1 }
 0x124   : > { %v877_v0 = vmax.f32 %v845_v55, 0.0  ;;  %v893_v1 = vmax.f32 %v861_v56, 0.0  ;;  %v1365_v2 = vadd.f32 %v1364_v62, %v1363_v58  ;;  %v1413_v3 = vadd.f32 %v1412_v63, %v1411_v59  ;;  %v1366_v4 = vpop.f32.mrb[22].mxu0  ;;  %v1414_v5 = vpop.f32.mrb[22].mxu1 }
 0x125   : > { %v1293_v6 = vpack.c.bf16 %v876_v60, %v876_v60  ;;  %v1309_v7 = vpack.c.bf16 %v892_v61, %v892_v61  ;;  %v1367_v8 = vpop.f32.mrb[23].mxu0  ;;  %v1415_v9 = vpop.f32.mrb[23].mxu1 }
 0x126   : > { %v1294_v10 = vpack.c.bf16 %v877_v0, %v877_v0  ;;  %v1310_v11 = vpack.c.bf16 %v893_v1, %v893_v1  ;;  %v807_v12 = vmul.f32 %v1365_v2, %v1691_v51  ;;  %v823_v13 = vmul.f32 %v1413_v3, %v1691_v51 }
 0x127   : > { %1037 = vst.msk [vmem:[%s1710_s21 + $0x20] sm:$0xf] %vm1028_vm0, %v1293_v6  ;;  %1053 = vst.msk [vmem:[%s1710_s21 + $0x60] sm:$0xf] %vm1028_vm0, %v1309_v7  ;;  %v1368_v14 = vadd.f32 %v1367_v8, %v1366_v4  ;;  %v1416_v15 = vadd.f32 %v1415_v9, %v1414_v5 }
 0x128   : > { %1038 = vst.msk [vmem:[%s1710_s21 + $0x24] sm:$0xf] %vm1028_vm0, %v1294_v10  ;;  %1054 = vst.msk [vmem:[%s1710_s21 + $0x64] sm:$0xf] %vm1028_vm0, %v1310_v11  ;;  %v846_v16 = vadd.f32 %v1696_v57, %v807_v12  ;;  %v862_v17 = vadd.f32 %v1696_v57, %v823_v13 }
 0x129   : > { %v808_v18 = vmul.f32 %v1368_v14, %v1691_v51  ;;  %v824_v19 = vmul.f32 %v1416_v15, %v1691_v51 }
 0x12a   : > { %v878_v20 = vmax.f32 %v846_v16, 0.0  ;;  %v894_v21 = vmax.f32 %v862_v17, 0.0  ;;  %v1369_v22 = vpop.f32.mrb[24].mxu0  ;;  %v1417_v23 = vpop.f32.mrb[24].mxu1 }
 0x12b   : > { %v847_v24 = vadd.f32 %v1696_v57, %v808_v18  ;;  %v863_v25 = vadd.f32 %v1696_v57, %v824_v19  ;;  %v1370_v26 = vpop.f32.mrb[25].mxu0  ;;  %v1418_v27 = vpop.f32.mrb[25].mxu1 }
 0x12c   : > { %v1295_v28 = vpack.c.bf16 %v878_v20, %v878_v20  ;;  %v1311_v29 = vpack.c.bf16 %v894_v21, %v894_v21  ;;  %v1371_v30 = vadd.f32 %v1370_v26, %v1369_v22  ;;  %v1419_v31 = vadd.f32 %v1418_v27, %v1417_v23  ;;  %v1372_v32 = vpop.f32.mrb[26].mxu0  ;;  %v1420_v33 = vpop.f32.mrb[26].mxu1 }
 0x12d   : > { %v879_v34 = vmax.f32 %v847_v24, 0.0  ;;  %v895_v35 = vmax.f32 %v863_v25, 0.0  ;;  %v1373_v36 = vpop.f32.mrb[27].mxu0  ;;  %v1421_v37 = vpop.f32.mrb[27].mxu1 }
 0x12e   : > { %1039 = vst.msk [vmem:[%s1710_s21 + $0x28] sm:$0xf] %vm1028_vm0, %v1295_v28  ;;  %1055 = vst.msk [vmem:[%s1710_s21 + $0x68] sm:$0xf] %vm1028_vm0, %v1311_v29  ;;  %v809_v38 = vmul.f32 %v1371_v30, %v1691_v51  ;;  %v825_v39 = vmul.f32 %v1419_v31, %v1691_v51  ;;  %v1374_v40 = vadd.f32 %v1373_v36, %v1372_v32 }
 0x12f   : > { %v1422_v41 = vadd.f32 %v1421_v37, %v1420_v33  ;;  %v1296_v42 = vpack.c.bf16 %v879_v34, %v879_v34  ;;  %v1312_v43 = vpack.c.bf16 %v895_v35, %v895_v35 }
 0x130   : > { %v848_v44 = vadd.f32 %v1696_v57, %v809_v38  ;;  %v864_v45 = vadd.f32 %v1696_v57, %v825_v39  ;;  %v810_v46 = vmul.f32 %v1374_v40, %v1691_v51 }
 0x131   : > { %v826_v47 = vmul.f32 %v1422_v41, %v1691_v51  ;;  %1040 = vst.msk [vmem:[%s1710_s21 + $0x2c] sm:$0xf] %vm1028_vm0, %v1296_v42  ;;  %1056 = vst.msk [vmem:[%s1710_s21 + $0x6c] sm:$0xf] %vm1028_vm0, %v1312_v43 }
 0x132   : > { %v880_v48 = vmax.f32 %v848_v44, 0.0  ;;  %v896_v49 = vmax.f32 %v864_v45, 0.0  ;;  %v849_v50 = vadd.f32 %v1696_v57, %v810_v46  ;;  %v1375_v53 = vpop.f32.mrb[28].mxu0  ;;  %v1423_v54 = vpop.f32.mrb[28].mxu1 }
 0x133   : > { %v865_v52 = vadd.f32 %v1696_v57, %v826_v47  ;;  %v1376_v55 = vpop.f32.mrb[29].mxu0  ;;  %v1424_v56 = vpop.f32.mrb[29].mxu1 }
 0x134   : > { %v1297_v58 = vpack.c.bf16 %v880_v48, %v880_v48  ;;  %v1313_v59 = vpack.c.bf16 %v896_v49, %v896_v49  ;;  %v881_v60 = vmax.f32 %v849_v50, 0.0  ;;  %v1378_v62 = vpop.f32.mrb[30].mxu0  ;;  %v1426_v63 = vpop.f32.mrb[30].mxu1  ;;  %v1377_v0 = vadd.f32 %v1376_v55, %v1375_v53 }
 0x135   : > { %v897_v61 = vmax.f32 %v865_v52, 0.0  ;;  %v1425_v1 = vadd.f32 %v1424_v56, %v1423_v54  ;;  %v1379_v2 = vpop.f32.mrb[31].mxu0  ;;  %v1427_v3 = vpop.f32.mrb[31].mxu1 }
 0x136   : > { %1041 = vst.msk [vmem:[%s1710_s21 + $0x30] sm:$0xf] %vm1028_vm0, %v1297_v58  ;;  %1057 = vst.msk [vmem:[%s1710_s21 + $0x70] sm:$0xf] %vm1028_vm0, %v1313_v59  ;;  %v1298_v4 = vpack.c.bf16 %v881_v60, %v881_v60  ;;  %v1380_v6 = vadd.f32 %v1379_v2, %v1378_v62  ;;  %v1428_v7 = vadd.f32 %v1427_v3, %v1426_v63 }
 0x137   : > { %v1314_v5 = vpack.c.bf16 %v897_v61, %v897_v61  ;;  %v811_v8 = vmul.f32 %v1377_v0, %v1691_v51  ;;  %v827_v9 = vmul.f32 %v1425_v1, %v1691_v51 }
 0x138   : > { %1042 = vst.msk [vmem:[%s1710_s21 + $0x34] sm:$0xf] %vm1028_vm0, %v1298_v4  ;;  %v812_v10 = vmul.f32 %v1380_v6, %v1691_v51  ;;  %v828_v11 = vmul.f32 %v1428_v7, %v1691_v51 }
 0x139   : > { %1058 = vst.msk [vmem:[%s1710_s21 + $0x74] sm:$0xf] %vm1028_vm0, %v1314_v5  ;;  %v850_v12 = vadd.f32 %v1696_v57, %v811_v8  ;;  %v866_v13 = vadd.f32 %v1696_v57, %v827_v9 }
 0x13a   : > { %v851_v14 = vadd.f32 %v1696_v57, %v812_v10  ;;  %v867_v15 = vadd.f32 %v1696_v57, %v828_v11 }
 0x13b   : > { %v882_v16 = vmax.f32 %v850_v12, 0.0  ;;  %v898_v17 = vmax.f32 %v866_v13, 0.0 }
 0x13c   : > { %v883_v18 = vmax.f32 %v851_v14, 0.0  ;;  %v899_v19 = vmax.f32 %v867_v15, 0.0 }
 0x13d   : > { %v1299_v20 = vpack.c.bf16 %v882_v16, %v882_v16  ;;  %v1315_v21 = vpack.c.bf16 %v898_v17, %v898_v17 }
 0x13e   : > { %v1300_v22 = vpack.c.bf16 %v883_v18, %v883_v18  ;;  %v1316_v23 = vpack.c.bf16 %v899_v19, %v899_v19 }
 0x13f   : > { %1043 = vst.msk [vmem:[%s1710_s21 + $0x38] sm:$0xf] %vm1028_vm0, %v1299_v20  ;;  %1059 = vst.msk [vmem:[%s1710_s21 + $0x78] sm:$0xf] %vm1028_vm0, %v1315_v21 }
 0x140   : > { %1044 = vst.msk [vmem:[%s1710_s21 + $0x3c] sm:$0xf] %vm1028_vm0, %v1300_v22  ;;  %1060 = vst.msk [vmem:[%s1710_s21 + $0x7c] sm:$0xf] %vm1028_vm0, %v1316_v23 }
 0x141 PF: > { %s14_s17 = sadd.s32 1, %s1555_s17   ;;  %s1846_s15 = smov %s1551_s16 }
 0x142   : > { %p11_p5 = scmp.ge.s32.totalorder %s14_s17, 4   ;;  %s1847_s16 = smov %s1849_s18 }
 0x144   :  { %13 = sbr.rel (!%p11_p5) target bundleno = 2 (0x2), region = 75 }

// kernel: resnext50_encoder.33
= control target key start
LH: loop header
LB: loop body
LE: loop exit
PB: predicated region body
PF: predicated region fallthrough
CT: control target
= control target key end

     0   :  { %s820_s15 = smov 0   ;;  %s822_s16 = smov 0   ;;  %s882_s0 = inlined_call_operand.vmem [shape: bf16[128,64], index: 0, kind: input, shape index: {}]   ;;  %s883_s1 = inlined_call_operand.vmem [shape: bf16[64,128], index: 1, kind: input, shape index: {}]   ;;  %s884_s2 = inlined_call_operand.vmem [shape: f32[1,128], index: 2, kind: input, shape index: {}]   ;;  %s885_s3 = inlined_call_operand.vmem [shape: f32[1,128], index: 3, kind: input, shape index: {}]   ;;  %s886_s4 = inlined_call_operand.vmem [shape: bf16[128,128], index: 4, kind: output, shape index: {}]  }
   0x1   :  { %s824_s17 = smov 0  }
   0x2 LB: > { %s33_s18 = sadd.s32 1, %s789_s16  ;;  %p647_p0 = scmp.ge.s32.totalorder %s793_s17, 1  ;;  %s793_s17 = sphi %s824_s17, %s14_s17   ;;  %s789_s16 = sphi %s822_s16, %s888_s16   ;;  %s785_s15 = sphi %s820_s15, %s887_s15  }
   0x3   : > { %p35_p1 = scmp.ge.s32.totalorder %s33_s18, 2  ;;  %p221_p2 = scmp.lt.s32.totalorder %s793_s17, 3 }
   0x5   : > { %s890_s18 = smov (%p35_p1, %s33_s18), 0  ;;  %p222_p3 = pnand %p647_p0, %p221_p2 }
   0x6   : > { %v763_v0 = vld [vmem:[%s883_s1] sm:$0xff] (!%p222_p3)   ;;  %s648_s21 = sshll.u32 (!%p222_p3), %s785_s15, 3  ;;  %v764_v1 = vld [vmem:[%s883_s1 + $0x8] sm:$0xff] (!%p222_p3)   ;;  %v765_v2 = vld [vmem:[%s883_s1 + $0x10] sm:$0xff] (!%p222_p3)   ;;  %vm361_vm0 = vcmask (!%p222_p3), 523264  }
   0x7   : > { %225 = sbr.rel (%p222_p3) target bundleno = 247 (0xf7), region = 36  ;;  %p268_p4 = scmp.lt.s32.totalorder (!%p222_p3), %s648_s21, 15  ;;  %715 = vmatprep.subr.bf16.mxu0 (!%p222_p3), %v763_v0  ;;  %731 = vmatprep.subr.bf16.mxu1 (!%p222_p3), %v763_v0  ;;  %v766_v3 = vld [vmem:[%s883_s1 + $0x18] sm:$0xff] (!%p222_p3)   ;;  %v664_v8 = vld [vmem:[%s884_s2] ss:$0 sm:$0xff] (!%p222_p3) }
   0x8   : > { %716 = vmatpush3.bf16.msra.mxu0 (!%p222_p3), %v763_v0  ;;  %735 = vmatpush3.bf16.msra.mxu1 (!%p222_p3), %v763_v0  ;;  %v665_v10 = vld [vmem:[%s885_s3] ss:$0 sm:$0xff] (!%p222_p3) }
   0x9   : > { %717 = vmatprep.subr.bf16.mxu0 (!%p222_p3), %v764_v1  ;;  %732 = vmatprep.subr.bf16.mxu1 (!%p222_p3), %v764_v1 }
   0xc   : > { %718 = vmatpush3.bf16.msra.mxu0 (!%p222_p3), %v764_v1  ;;  %736 = vmatpush3.bf16.msra.mxu1 (!%p222_p3), %v764_v1 }
   0xd   : > { %719 = vmatprep.subr.bf16.mxu0 (!%p222_p3), %v765_v2  ;;  %733 = vmatprep.subr.bf16.mxu1 (!%p222_p3), %v765_v2 }
   0xe   : > { %s892_s21 = smov (!%p268_p4, %s648_s21), 15 }
   0xf   : > { %s649_s26 = sshll.u32 %s892_s21, 2 }
  0x10   : > { %s274_s5 = scalar_lea.vmem %s882_s0, %s649_s26  ;;  %720 = vmatpush3.bf16.msra.mxu0 %v765_v2  ;;  %737 = vmatpush3.bf16.msra.mxu1 %v765_v2  ;;  %s298_s12 = scalar_lea.vmem %s886_s4, %s649_s26 }
  0x11   : > { %v767_v4 = vld [vmem:[%s274_s5] sm:$0xff]   ;;  %v768_v5 = vld [vmem:[%s274_s5 + $0x10] sm:$0xff]   ;;  %721 = vmatprep.subr.bf16.mxu0 %v766_v3  ;;  %734 = vmatprep.subr.bf16.mxu1 %v766_v3  ;;  %v769_v6 = vld [vmem:[%s274_s5 + $0x8] sm:$0xff]  }
  0x12   : > { %723 = vmatprep.mubr.msk.bf16.mxu0 %vm361_vm0, %v767_v4  ;;  %727 = vmatprep.mubr.msk.bf16.mxu1 %vm361_vm0, %v768_v5  ;;  %v770_v7 = vld [vmem:[%s274_s5 + $0x18] sm:$0xff]  }
  0x14   : > { %722 = vmatpush3.bf16.msra.mxu0 %v766_v3  ;;  %738 = vmatpush3.bf16.msra.mxu1 %v766_v3 }
  0x17   : > { %724 = vmatmul.mubr.msk.bf16.vlgmr.msra.gmra.mrb[0].mxu0 %vm361_vm0, %v769_v6  ;;  %728 = vmatmul.mubr.msk.bf16.vlgmr.msra.gmra.mrb[0].mxu1 %vm361_vm0, %v770_v7 }
  0xea   : > { %v725_v9 = vpop.f32.mrb[0].mxu0  ;;  %v729_v11 = vpop.f32.mrb[0].mxu1 }
  0xeb   : > { %v448_v12 = vmul.f32 %v725_v9, %v664_v8  ;;  %v452_v13 = vmul.f32 %v729_v11, %v664_v8  ;;  %v408_v14 = vpop.f32.mrb[1].mxu0  ;;  %v424_v15 = vpop.f32.mrb[1].mxu1 }
  0xec   : > { %v446_v16 = vmul.f32 %v664_v8, %v408_v14  ;;  %v450_v17 = vmul.f32 %v664_v8, %v424_v15  ;;  %v726_v18 = vpop.f32.mrb[2].mxu0  ;;  %v730_v19 = vpop.f32.mrb[2].mxu1 }
  0xed   : > { %v463_v20 = vadd.f32 %v665_v10, %v448_v12  ;;  %v467_v21 = vadd.f32 %v665_v10, %v452_v13  ;;  %v449_v22 = vmul.f32 %v726_v18, %v664_v8  ;;  %v453_v23 = vmul.f32 %v730_v19, %v664_v8  ;;  %v411_v24 = vpop.f32.mrb[3].mxu0  ;;  %v427_v25 = vpop.f32.mrb[3].mxu1 }
  0xee   : > { %v461_v26 = vadd.f32 %v665_v10, %v446_v16  ;;  %v465_v27 = vadd.f32 %v665_v10, %v450_v17  ;;  %v447_v28 = vmul.f32 %v664_v8, %v411_v24  ;;  %v451_v29 = vmul.f32 %v664_v8, %v427_v25 }
  0xef   : > { %v464_v30 = vadd.f32 %v665_v10, %v449_v22  ;;  %v468_v31 = vadd.f32 %v665_v10, %v453_v23  ;;  %v471_v34 = vmax.f32 %v463_v20, 0.0  ;;  %v475_v35 = vmax.f32 %v467_v21, 0.0 }
  0xf0   : > { %v462_v32 = vadd.f32 %v665_v10, %v447_v28  ;;  %v466_v33 = vadd.f32 %v665_v10, %v451_v29  ;;  %v469_v38 = vmax.f32 %v461_v26, 0.0  ;;  %v473_v39 = vmax.f32 %v465_v27, 0.0 }
  0xf1   : > { %v472_v36 = vmax.f32 %v464_v30, 0.0  ;;  %v476_v37 = vmax.f32 %v468_v31, 0.0 }
  0xf2   : > { %v470_v40 = vmax.f32 %v462_v32, 0.0  ;;  %v474_v41 = vmax.f32 %v466_v33, 0.0 }
  0xf3   : > { %v692_v42 = vpack.c.bf16 %v472_v36, %v471_v34  ;;  %v702_v43 = vpack.c.bf16 %v476_v37, %v475_v35 }
  0xf4   : > { %v687_v44 = vpack.c.bf16 %v470_v40, %v469_v38  ;;  %v697_v45 = vpack.c.bf16 %v474_v41, %v473_v39 }
  0xf5   : > { %704 = vst [vmem:[%s298_s12 + $0x8] sm:$0xff] %v692_v42   ;;  %706 = vst [vmem:[%s298_s12 + $0x18] sm:$0xff] %v702_v43  }
  0xf6   : > { %688 = vst [vmem:[%s298_s12] sm:$0xff] %v687_v44   ;;  %705 = vst [vmem:[%s298_s12 + $0x10] sm:$0xff] %v697_v45  }
  0xf7 PF: > { %s14_s17 = sadd.s32 1, %s793_s17   ;;  %s887_s15 = smov %s789_s16 }
  0xf8   : > { %p11_p5 = scmp.ge.s32.totalorder %s14_s17, 4   ;;  %s888_s16 = smov %s890_s18 }
  0xfa   :  { %13 = sbr.rel (!%p11_p5) target bundleno = 2 (0x2), region = 75 }

// kernel: resnext50_encoder.32
= control target key start
LH: loop header
LB: loop body
LE: loop exit
PB: predicated region body
PF: predicated region fallthrough
CT: control target
= control target key end

     0   :  { %s942_s6 = smov 0   ;;  %s944_s7 = smov 0   ;;  %s1239_s0 = inlined_call_operand.vmem [shape: bf16[9,128,64], index: 0, kind: input, shape index: {}]   ;;  %s1240_s1 = inlined_call_operand.vmem [shape: bf16[128,64], index: 1, kind: output, shape index: {}]  }
   0x1   :  { %s946_s8 = smov 0  }
   0x2 LB: > { %s870_s9 = sadd.s32 4294967295, %s930_s8   ;;  %s959_s10 = sadd.s32 1, %s930_s8   ;;  %s930_s8 = sphi %s946_s8, %s1243_s8   ;;  %s926_s7 = sphi %s944_s7, %s1242_s7   ;;  %s922_s6 = sphi %s942_s6, %s1241_s6  }
   0x3   : > { %s15_s11 = ssub.s32 %s930_s8, %s959_s10  ;;  %s18_s12 = sadd.s32 1, %s926_s7 }
   0x4   : > { %p16_p0 = scmp.eq.s32.totalorder %s15_s11, 0  ;;  %p25_p1 = scmp.ne.s32.totalorder %s926_s7, %s922_s6 }
   0x5   : > { %p26_p2 = scmp.eq.s32.totalorder %s930_s8, 0  ;;  %p873_p4 = scmp.ge.s32.totalorder %s930_s8, 2 }
   0x6   : > { %s968_s13 = scalar_select %p16_p0, %s926_s7, %s18_s12  }
   0x7   : > { %p27_p3 = por %p26_p2, %p25_p1  ;;  %77 = sbr.rel (%p873_p4) target bundleno = 37 (0x25), region = 16 }
   0xe   : > { %80 = sbr.rel (!%p27_p3) target bundleno = 37 (0x25), region = 20  ;;  %s82_s14 = sand.u32 (%p27_p3), 1, %s926_s7  }
   0xf   : > { %s881_s15 = sshll.u32 (%p27_p3), %s930_s8, 5  ;;  %s882_s16 = smul.u32 (%p27_p3), 288, %s82_s14 }
  0x10   : > { %s976_s19 = scalar_lea.vmem (%p27_p3), %s1239_s0, %s881_s15 }
  0x11   : > { %v103_v0 = vld [vmem:[%s976_s19] sm:$0xff] (%p27_p3)   ;;  %v107_v1 = vld [vmem:[%s976_s19 + $0x8] sm:$0xff] (%p27_p3)   ;;  %v111_v2 = vld [vmem:[%s976_s19 + $0x10] sm:$0xff] (%p27_p3)   ;;  %s984_s20 = scalar_lea.vmem (%p27_p3), [#allocation2], %s882_s16 }
  0x12   : > { %v115_v3 = vld [vmem:[%s976_s19 + $0x18] sm:$0xff] (%p27_p3)   ;;  %v119_v4 = vld [vmem:[%s976_s19 + $0x40] sm:$0xff] (%p27_p3)   ;;  %v123_v5 = vld [vmem:[%s976_s19 + $0x48] sm:$0xff] (%p27_p3)   ;;  %104 = vst [vmem:[%s984_s20] sm:$0xff] (%p27_p3), %v103_v0  }
  0x13   : > { %108 = vst [vmem:[%s984_s20 + $0x8] sm:$0xff] (%p27_p3), %v107_v1   ;;  %112 = vst [vmem:[%s984_s20 + $0x10] sm:$0xff] (%p27_p3), %v111_v2   ;;  %v127_v6 = vld [vmem:[%s976_s19 + $0x50] sm:$0xff] (%p27_p3)   ;;  %v131_v7 = vld [vmem:[%s976_s19 + $0x58] sm:$0xff] (%p27_p3)  }
  0x14   : > { %116 = vst [vmem:[%s984_s20 + $0x18] sm:$0xff] (%p27_p3), %v115_v3   ;;  %120 = vst [vmem:[%s984_s20 + $0x20] sm:$0xff] (%p27_p3), %v119_v4   ;;  %v135_v8 = vld [vmem:[%s976_s19 + $0x80] sm:$0xff] (%p27_p3)   ;;  %v139_v9 = vld [vmem:[%s976_s19 + $0x88] sm:$0xff] (%p27_p3)  }
  0x15   : > { %124 = vst [vmem:[%s984_s20 + $0x28] sm:$0xff] %v123_v5   ;;  %128 = vst [vmem:[%s984_s20 + $0x30] sm:$0xff] %v127_v6   ;;  %v143_v10 = vld [vmem:[%s976_s19 + $0x90] sm:$0xff]   ;;  %v147_v11 = vld [vmem:[%s976_s19 + $0x98] sm:$0xff]  }
  0x16   : > { %132 = vst [vmem:[%s984_s20 + $0x38] sm:$0xff] %v131_v7   ;;  %136 = vst [vmem:[%s984_s20 + $0x40] sm:$0xff] %v135_v8   ;;  %v151_v12 = vld [vmem:[%s976_s19 + $0xc0] sm:$0xff]   ;;  %v155_v13 = vld [vmem:[%s976_s19 + $0xc8] sm:$0xff]  }
  0x17   : > { %140 = vst [vmem:[%s984_s20 + $0x48] sm:$0xff] %v139_v9   ;;  %144 = vst [vmem:[%s984_s20 + $0x50] sm:$0xff] %v143_v10   ;;  %v159_v14 = vld [vmem:[%s976_s19 + $0xd0] sm:$0xff]   ;;  %v163_v15 = vld [vmem:[%s976_s19 + $0xd8] sm:$0xff]  }
  0x18   : > { %148 = vst [vmem:[%s984_s20 + $0x58] sm:$0xff] %v147_v11   ;;  %152 = vst [vmem:[%s984_s20 + $0x60] sm:$0xff] %v151_v12   ;;  %v167_v16 = vld [vmem:[%s976_s19 + $0x100] sm:$0xff]   ;;  %v171_v17 = vld [vmem:[%s976_s19 + $0x108] sm:$0xff]  }
  0x19   : > { %156 = vst [vmem:[%s984_s20 + $0x68] sm:$0xff] %v155_v13   ;;  %160 = vst [vmem:[%s984_s20 + $0x70] sm:$0xff] %v159_v14   ;;  %v175_v18 = vld [vmem:[%s976_s19 + $0x110] sm:$0xff]   ;;  %v179_v19 = vld [vmem:[%s976_s19 + $0x118] sm:$0xff]  }
  0x1a   : > { %164 = vst [vmem:[%s984_s20 + $0x78] sm:$0xff] %v163_v15   ;;  %168 = vst [vmem:[%s984_s20 + $0x80] sm:$0xff] %v167_v16   ;;  %v183_v20 = vld [vmem:[%s976_s19 + $0x140] sm:$0xff]   ;;  %v187_v21 = vld [vmem:[%s976_s19 + $0x148] sm:$0xff]  }
  0x1b   : > { %172 = vst [vmem:[%s984_s20 + $0x88] sm:$0xff] %v171_v17   ;;  %176 = vst [vmem:[%s984_s20 + $0x90] sm:$0xff] %v175_v18   ;;  %v191_v22 = vld [vmem:[%s976_s19 + $0x150] sm:$0xff]   ;;  %v195_v23 = vld [vmem:[%s976_s19 + $0x158] sm:$0xff]  }
  0x1c   : > { %180 = vst [vmem:[%s984_s20 + $0x98] sm:$0xff] %v179_v19   ;;  %184 = vst [vmem:[%s984_s20 + $0xa0] sm:$0xff] %v183_v20   ;;  %v199_v24 = vld [vmem:[%s976_s19 + $0x180] sm:$0xff]   ;;  %v203_v25 = vld [vmem:[%s976_s19 + $0x188] sm:$0xff]  }
  0x1d   : > { %188 = vst [vmem:[%s984_s20 + $0xa8] sm:$0xff] %v187_v21   ;;  %192 = vst [vmem:[%s984_s20 + $0xb0] sm:$0xff] %v191_v22   ;;  %v207_v26 = vld [vmem:[%s976_s19 + $0x190] sm:$0xff]   ;;  %v211_v27 = vld [vmem:[%s976_s19 + $0x198] sm:$0xff]  }
  0x1e   : > { %196 = vst [vmem:[%s984_s20 + $0xb8] sm:$0xff] %v195_v23   ;;  %200 = vst [vmem:[%s984_s20 + $0xc0] sm:$0xff] %v199_v24   ;;  %v215_v28 = vld [vmem:[%s976_s19 + $0x1c0] sm:$0xff]   ;;  %v219_v29 = vld [vmem:[%s976_s19 + $0x1c8] sm:$0xff]  }
  0x1f   : > { %204 = vst [vmem:[%s984_s20 + $0xc8] sm:$0xff] %v203_v25   ;;  %208 = vst [vmem:[%s984_s20 + $0xd0] sm:$0xff] %v207_v26   ;;  %v223_v30 = vld [vmem:[%s976_s19 + $0x1d0] sm:$0xff]   ;;  %v227_v31 = vld [vmem:[%s976_s19 + $0x1d8] sm:$0xff]  }
  0x20   : > { %212 = vst [vmem:[%s984_s20 + $0xd8] sm:$0xff] %v211_v27   ;;  %216 = vst [vmem:[%s984_s20 + $0xe0] sm:$0xff] %v215_v28   ;;  %v231_v32 = vld [vmem:[%s976_s19 + $0x200] sm:$0xff]   ;;  %v235_v33 = vld [vmem:[%s976_s19 + $0x208] sm:$0xff]  }
  0x21   : > { %220 = vst [vmem:[%s984_s20 + $0xe8] sm:$0xff] %v219_v29   ;;  %224 = vst [vmem:[%s984_s20 + $0xf0] sm:$0xff] %v223_v30   ;;  %v239_v34 = vld [vmem:[%s976_s19 + $0x210] sm:$0xff]   ;;  %v243_v35 = vld [vmem:[%s976_s19 + $0x218] sm:$0xff]  }
  0x22   : > { %228 = vst [vmem:[%s984_s20 + $0xf8] sm:$0xff] %v227_v31   ;;  %232 = vst [vmem:[%s984_s20 + $0x100] sm:$0xff] %v231_v32  }
  0x23   : > { %236 = vst [vmem:[%s984_s20 + $0x108] sm:$0xff] %v235_v33   ;;  %240 = vst [vmem:[%s984_s20 + $0x110] sm:$0xff] %v239_v34  }
  0x24   : > { %244 = vst [vmem:[%s984_s20 + $0x118] sm:$0xff] %v243_v35  }
  0x25 PF: > { %p876_p5 = scmp.ge.s32.totalorder %s930_s8, 1  ;;  %p412_p6 = scmp.lt.s32.totalorder %s930_s8, 3 }
  0x27   : > { %p413_p7 = pnand %p876_p5, %p412_p6 }
  0x28   : > { %s419_s21 = sand.u32 (!%p413_p7), 1, %s922_s6   ;;  %s877_s23 = sshll.u32 (!%p413_p7), %s870_s9, 3  ;;  %vm518_vm0 = vcmask (!%p413_p7), 519168  }
  0x29   : > { %416 = sbr.rel (%p413_p7) target bundleno = 107 (0x6b), region = 61  ;;  %p440_p8 = scmp.lt.s32.totalorder (!%p413_p7), %s877_s23, 15 }
  0x2a   : > { %s883_s22 = smul.u32 (!%p413_p7), 288, %s419_s21 }
  0x2c   : > { %s1057_s24 = scalar_lea.vmem (!%p413_p7), [#allocation2], %s883_s22 }
  0x2d   : > { %v446_v36 = vld [vmem:[%s1057_s24] sm:$0xf] (!%p413_p7)  ;;  %v447_v46 = vld [vmem:[%s1057_s24 + $0x4] sm:$0xf] (!%p413_p7)  ;;  %v448_v2 = vld [vmem:[%s1057_s24 + $0x8] sm:$0xf] (!%p413_p7) }
  0x2e   : > { %v454_v37 = vld [vmem:[%s1057_s24 + $0x20] sm:$0xf] (!%p413_p7)  ;;  %v521_v40 = vsel (!%p413_p7), %vm518_vm0, %v446_v36, 4286644096  ;;  %v455_v49 = vld [vmem:[%s1057_s24 + $0x24] sm:$0xf] (!%p413_p7) }
  0x2f   : > { %v462_v38 = vld [vmem:[%s1057_s24 + $0x40] sm:$0xf] (!%p413_p7)  ;;  %v524_v41 = vsel (!%p413_p7), %vm518_vm0, %v454_v37, 4286644096  ;;  %v463_v50 = vld [vmem:[%s1057_s24 + $0x44] sm:$0xf] (!%p413_p7) }
  0x30   : > { %v470_v39 = vld [vmem:[%s1057_s24 + $0x60] sm:$0xf]  ;;  %s1245_s23 = smov (!%p440_p8, %s877_s23), 15  ;;  %v528_v42 = vsel %vm518_vm0, %v462_v38, 4286644096  ;;  %v526_v44 = vmax.bf16 %v524_v41, %v521_v40 }
  0x31   : > { %v478_v43 = vld [vmem:[%s1057_s24 + $0x80] sm:$0xf]  ;;  %v532_v45 = vsel %vm518_vm0, %v470_v39, 4286644096  ;;  %s878_s25 = sshll.u32 %s1245_s23, 2 }
  0x32   : > { %v486_v47 = vld [vmem:[%s1057_s24 + $0xa0] sm:$0xf]  ;;  %v530_v48 = vmax.bf16 %v528_v42, %v526_v44  ;;  %v536_v51 = vsel %vm518_vm0, %v478_v43, 4286644096  ;;  %v471_v54 = vld [vmem:[%s1057_s24 + $0x64] sm:$0xf]  ;;  %s1108_s28 = scalar_lea.vmem %s1240_s1, %s878_s25 }
  0x33   : > { %v494_v52 = vld [vmem:[%s1057_s24 + $0xc0] sm:$0xf]  ;;  %v556_v55 = vsel %vm518_vm0, %v447_v46, 4286644096  ;;  %v540_v56 = vsel %vm518_vm0, %v486_v47, 4286644096 }
  0x34   : > { %v534_v53 = vmax.bf16 %v532_v45, %v530_v48  ;;  %v559_v57 = vsel %vm518_vm0, %v455_v49, 4286644096  ;;  %v563_v58 = vsel %vm518_vm0, %v463_v50, 4286644096  ;;  %v502_v59 = vld [vmem:[%s1057_s24 + $0xe0] sm:$0xf] }
  0x35   : > { %v510_v60 = vld [vmem:[%s1057_s24 + $0x100] sm:$0xf]  ;;  %v479_v62 = vld [vmem:[%s1057_s24 + $0x84] sm:$0xf]  ;;  %v561_v63 = vmax.bf16 %v559_v57, %v556_v55  ;;  %v544_v0 = vsel %vm518_vm0, %v494_v52, 4286644096 }
  0x36   : > { %v538_v61 = vmax.bf16 %v536_v51, %v534_v53  ;;  %v567_v1 = vsel %vm518_vm0, %v471_v54, 4286644096  ;;  %v487_v4 = vld [vmem:[%s1057_s24 + $0xa4] sm:$0xf]  ;;  %v456_v6 = vld [vmem:[%s1057_s24 + $0x28] sm:$0xf] }
  0x37   : > { %v565_v5 = vmax.bf16 %v563_v58, %v561_v63  ;;  %v464_v7 = vld [vmem:[%s1057_s24 + $0x48] sm:$0xf]  ;;  %v548_v8 = vsel %vm518_vm0, %v502_v59, 4286644096  ;;  %v552_v9 = vsel %vm518_vm0, %v510_v60, 4286644096 }
  0x38   : > { %v542_v3 = vmax.bf16 %v540_v56, %v538_v61  ;;  %v571_v10 = vsel %vm518_vm0, %v479_v62, 4286644096  ;;  %v495_v12 = vld [vmem:[%s1057_s24 + $0xc4] sm:$0xf]  ;;  %v472_v14 = vld [vmem:[%s1057_s24 + $0x68] sm:$0xf] }
  0x39   : > { %v569_v13 = vmax.bf16 %v567_v1, %v565_v5  ;;  %v591_v15 = vsel %vm518_vm0, %v448_v2, 4286644096  ;;  %v575_v16 = vsel %vm518_vm0, %v487_v4, 4286644096  ;;  %v594_v17 = vsel %vm518_vm0, %v456_v6, 4286644096 }
  0x3a   : > { %v546_v11 = vmax.bf16 %v544_v0, %v542_v3  ;;  %v598_v18 = vsel %vm518_vm0, %v464_v7, 4286644096  ;;  %v503_v20 = vld [vmem:[%s1057_s24 + $0xe4] sm:$0xf]  ;;  %v480_v23 = vld [vmem:[%s1057_s24 + $0x88] sm:$0xf]  ;;  %v596_v24 = vmax.bf16 %v594_v17, %v591_v15 }
  0x3b   : > { %v511_v21 = vld [vmem:[%s1057_s24 + $0x104] sm:$0xf]  ;;  %v573_v22 = vmax.bf16 %v571_v10, %v569_v13  ;;  %v579_v25 = vsel %vm518_vm0, %v495_v12, 4286644096  ;;  %v602_v26 = vsel %vm518_vm0, %v472_v14, 4286644096 }
  0x3c   : > { %v550_v19 = vmax.bf16 %v548_v8, %v546_v11  ;;  %v449_v27 = vld [vmem:[%s1057_s24 + $0xc] sm:$0xf]  ;;  %v488_v30 = vld [vmem:[%s1057_s24 + $0xa8] sm:$0xf]  ;;  %v600_v31 = vmax.bf16 %v598_v18, %v596_v24  ;;  %v583_v34 = vsel %vm518_vm0, %v503_v20, 4286644096 }
  0x3d   : > { %v577_v29 = vmax.bf16 %v575_v16, %v573_v22  ;;  %v457_v32 = vld [vmem:[%s1057_s24 + $0x2c] sm:$0xf]  ;;  %v587_v35 = vsel %vm518_vm0, %v511_v21, 4286644096  ;;  %v606_v36 = vsel %vm518_vm0, %v480_v23, 4286644096 }
  0x3e   : > { %v554_v28 = vmax.bf16 %v552_v9, %v550_v19  ;;  %v465_v33 = vld [vmem:[%s1057_s24 + $0x4c] sm:$0xf]  ;;  %v496_v38 = vld [vmem:[%s1057_s24 + $0xc8] sm:$0xf]  ;;  %v604_v39 = vmax.bf16 %v602_v26, %v600_v31  ;;  %v626_v41 = vsel %vm518_vm0, %v449_v27, 4286644096 }
  0x3f   : > { %v581_v37 = vmax.bf16 %v579_v25, %v577_v29  ;;  %v473_v40 = vld [vmem:[%s1057_s24 + $0x6c] sm:$0xf]  ;;  %v610_v42 = vsel %vm518_vm0, %v488_v30, 4286644096  ;;  %v629_v43 = vsel %vm518_vm0, %v457_v32, 4286644096 }
  0x40   : > { %800 = vst.msk [vmem:[%s1108_s28] sm:$0xf] %vm518_vm0, %v554_v28  ;;  %v633_v44 = vsel %vm518_vm0, %v465_v33, 4286644096  ;;  %v504_v46 = vld [vmem:[%s1057_s24 + $0xe8] sm:$0xf]  ;;  %v608_v48 = vmax.bf16 %v606_v36, %v604_v39  ;;  %v631_v50 = vmax.bf16 %v629_v43, %v626_v41 }
  0x41   : > { %v585_v45 = vmax.bf16 %v583_v34, %v581_v37  ;;  %v512_v47 = vld [vmem:[%s1057_s24 + $0x108] sm:$0xf]  ;;  %v481_v49 = vld [vmem:[%s1057_s24 + $0x8c] sm:$0xf]  ;;  %v614_v51 = vsel %vm518_vm0, %v496_v38, 4286644096 }
  0x42   : > { %v637_v52 = vsel %vm518_vm0, %v473_v40, 4286644096  ;;  %v450_v53 = vld [vmem:[%s1057_s24 + $0x10] sm:$0xf]  ;;  %v612_v55 = vmax.bf16 %v610_v42, %v608_v48  ;;  %v489_v56 = vld [vmem:[%s1057_s24 + $0xac] sm:$0xf]  ;;  %v635_v57 = vmax.bf16 %v633_v44, %v631_v50 }
  0x43   : > { %v589_v54 = vmax.bf16 %v587_v35, %v585_v45  ;;  %v458_v58 = vld [vmem:[%s1057_s24 + $0x30] sm:$0xf]  ;;  %v618_v60 = vsel %vm518_vm0, %v504_v46, 4286644096  ;;  %v622_v61 = vsel %vm518_vm0, %v512_v47, 4286644096 }
  0x44   : > { %v466_v59 = vld [vmem:[%s1057_s24 + $0x50] sm:$0xf]  ;;  %v641_v62 = vsel %vm518_vm0, %v481_v49, 4286644096  ;;  %v616_v63 = vmax.bf16 %v614_v51, %v612_v55  ;;  %v497_v0 = vld [vmem:[%s1057_s24 + $0xcc] sm:$0xf]  ;;  %v639_v1 = vmax.bf16 %v637_v52, %v635_v57 }
  0x45   : > { %801 = vst.msk [vmem:[%s1108_s28 + $0x4] sm:$0xf] %vm518_vm0, %v589_v54  ;;  %v474_v2 = vld [vmem:[%s1057_s24 + $0x70] sm:$0xf]  ;;  %v661_v3 = vsel %vm518_vm0, %v450_v53, 4286644096 }
  0x46   : > { %v645_v4 = vsel %vm518_vm0, %v489_v56, 4286644096  ;;  %v664_v5 = vsel %vm518_vm0, %v458_v58, 4286644096  ;;  %v668_v6 = vsel %vm518_vm0, %v466_v59, 4286644096  ;;  %v620_v7 = vmax.bf16 %v618_v60, %v616_v63 }
  0x47   : > { %v505_v8 = vld [vmem:[%s1057_s24 + $0xec] sm:$0xf]  ;;  %v643_v10 = vmax.bf16 %v641_v62, %v639_v1  ;;  %v482_v11 = vld [vmem:[%s1057_s24 + $0x90] sm:$0xf]  ;;  %v666_v12 = vmax.bf16 %v664_v5, %v661_v3  ;;  %v649_v13 = vsel %vm518_vm0, %v497_v0, 4286644096 }
  0x48   : > { %v513_v9 = vld [vmem:[%s1057_s24 + $0x10c] sm:$0xf]  ;;  %v672_v14 = vsel %vm518_vm0, %v474_v2, 4286644096  ;;  %v451_v15 = vld [vmem:[%s1057_s24 + $0x14] sm:$0xf]  ;;  %v624_v16 = vmax.bf16 %v622_v61, %v620_v7 }
  0x49   : > { %v647_v17 = vmax.bf16 %v645_v4, %v643_v10  ;;  %v490_v18 = vld [vmem:[%s1057_s24 + $0xb0] sm:$0xf]  ;;  %v670_v19 = vmax.bf16 %v668_v6, %v666_v12  ;;  %v459_v20 = vld [vmem:[%s1057_s24 + $0x34] sm:$0xf]  ;;  %v653_v22 = vsel %vm518_vm0, %v505_v8, 4286644096 }
  0x4a   : > { %v467_v21 = vld [vmem:[%s1057_s24 + $0x54] sm:$0xf]  ;;  %v657_v23 = vsel %vm518_vm0, %v513_v9, 4286644096  ;;  %v676_v24 = vsel %vm518_vm0, %v482_v11, 4286644096 }
  0x4b   : > { %802 = vst.msk [vmem:[%s1108_s28 + $0x8] sm:$0xf] %vm518_vm0, %v624_v16  ;;  %v651_v25 = vmax.bf16 %v649_v13, %v647_v17  ;;  %v498_v26 = vld [vmem:[%s1057_s24 + $0xd0] sm:$0xf]  ;;  %v674_v27 = vmax.bf16 %v672_v14, %v670_v19  ;;  %v475_v28 = vld [vmem:[%s1057_s24 + $0x74] sm:$0xf] }
  0x4c   : > { %v696_v29 = vsel %vm518_vm0, %v451_v15, 4286644096  ;;  %v680_v30 = vsel %vm518_vm0, %v490_v18, 4286644096  ;;  %v699_v31 = vsel %vm518_vm0, %v459_v20, 4286644096 }
  0x4d   : > { %v703_v32 = vsel %vm518_vm0, %v467_v21, 4286644096  ;;  %v655_v33 = vmax.bf16 %v653_v22, %v651_v25  ;;  %v506_v34 = vld [vmem:[%s1057_s24 + $0xf0] sm:$0xf]  ;;  %v678_v36 = vmax.bf16 %v676_v24, %v674_v27  ;;  %v483_v37 = vld [vmem:[%s1057_s24 + $0x94] sm:$0xf]  ;;  %v701_v38 = vmax.bf16 %v699_v31, %v696_v29 }
  0x4e   : > { %v514_v35 = vld [vmem:[%s1057_s24 + $0x110] sm:$0xf]  ;;  %v684_v39 = vsel %vm518_vm0, %v498_v26, 4286644096  ;;  %v707_v40 = vsel %vm518_vm0, %v475_v28, 4286644096 }
  0x4f   : > { %v452_v41 = vld [vmem:[%s1057_s24 + $0x18] sm:$0xf]  ;;  %v659_v42 = vmax.bf16 %v657_v23, %v655_v33  ;;  %v682_v43 = vmax.bf16 %v680_v30, %v678_v36  ;;  %v491_v44 = vld [vmem:[%s1057_s24 + $0xb4] sm:$0xf]  ;;  %v705_v45 = vmax.bf16 %v703_v32, %v701_v38  ;;  %v688_v48 = vsel %vm518_vm0, %v506_v34, 4286644096 }
  0x50   : > { %v460_v46 = vld [vmem:[%s1057_s24 + $0x38] sm:$0xf]  ;;  %v692_v49 = vsel %vm518_vm0, %v514_v35, 4286644096  ;;  %v711_v50 = vsel %vm518_vm0, %v483_v37, 4286644096 }
  0x51   : > { %v468_v47 = vld [vmem:[%s1057_s24 + $0x58] sm:$0xf]  ;;  %803 = vst.msk [vmem:[%s1108_s28 + $0xc] sm:$0xf] %vm518_vm0, %v659_v42  ;;  %v686_v51 = vmax.bf16 %v684_v39, %v682_v43  ;;  %v499_v52 = vld [vmem:[%s1057_s24 + $0xd4] sm:$0xf]  ;;  %v709_v53 = vmax.bf16 %v707_v40, %v705_v45 }
  0x52   : > { %v476_v54 = vld [vmem:[%s1057_s24 + $0x78] sm:$0xf]  ;;  %v731_v55 = vsel %vm518_vm0, %v452_v41, 4286644096  ;;  %v715_v56 = vsel %vm518_vm0, %v491_v44, 4286644096 }
  0x53   : > { %v734_v57 = vsel %vm518_vm0, %v460_v46, 4286644096  ;;  %v738_v58 = vsel %vm518_vm0, %v468_v47, 4286644096  ;;  %v690_v59 = vmax.bf16 %v688_v48, %v686_v51  ;;  %v507_v60 = vld [vmem:[%s1057_s24 + $0xf4] sm:$0xf]  ;;  %v713_v62 = vmax.bf16 %v711_v50, %v709_v53 }
  0x54   : > { %v515_v61 = vld [vmem:[%s1057_s24 + $0x114] sm:$0xf]  ;;  %v484_v63 = vld [vmem:[%s1057_s24 + $0x98] sm:$0xf]  ;;  %v736_v0 = vmax.bf16 %v734_v57, %v731_v55  ;;  %v719_v1 = vsel %vm518_vm0, %v499_v52, 4286644096 }
  0x55   : > { %v742_v2 = vsel %vm518_vm0, %v476_v54, 4286644096  ;;  %v453_v3 = vld [vmem:[%s1057_s24 + $0x1c] sm:$0xf]  ;;  %v694_v4 = vmax.bf16 %v692_v49, %v690_v59  ;;  %v717_v5 = vmax.bf16 %v715_v56, %v713_v62  ;;  %v492_v6 = vld [vmem:[%s1057_s24 + $0xb8] sm:$0xf] }
  0x56   : > { %v740_v7 = vmax.bf16 %v738_v58, %v736_v0  ;;  %v461_v8 = vld [vmem:[%s1057_s24 + $0x3c] sm:$0xf]  ;;  %v723_v10 = vsel %vm518_vm0, %v507_v60, 4286644096  ;;  %v727_v11 = vsel %vm518_vm0, %v515_v61, 4286644096 }
  0x57   : > { %v469_v9 = vld [vmem:[%s1057_s24 + $0x5c] sm:$0xf]  ;;  %v746_v12 = vsel %vm518_vm0, %v484_v63, 4286644096  ;;  %804 = vst.msk [vmem:[%s1108_s28 + $0x10] sm:$0xf] %vm518_vm0, %v694_v4  ;;  %v721_v13 = vmax.bf16 %v719_v1, %v717_v5 }
  0x58   : > { %v500_v14 = vld [vmem:[%s1057_s24 + $0xd8] sm:$0xf]  ;;  %v744_v15 = vmax.bf16 %v742_v2, %v740_v7  ;;  %v477_v16 = vld [vmem:[%s1057_s24 + $0x7c] sm:$0xf]  ;;  %v766_v17 = vsel %vm518_vm0, %v453_v3, 4286644096 }
  0x59   : > { %v750_v18 = vsel %vm518_vm0, %v492_v6, 4286644096  ;;  %v769_v19 = vsel %vm518_vm0, %v461_v8, 4286644096  ;;  %v773_v20 = vsel %vm518_vm0, %v469_v9, 4286644096  ;;  %v725_v21 = vmax.bf16 %v723_v10, %v721_v13 }
  0x5a   : > { %v508_v22 = vld [vmem:[%s1057_s24 + $0xf8] sm:$0xf]  ;;  %v748_v23 = vmax.bf16 %v746_v12, %v744_v15  ;;  %v485_v24 = vld [vmem:[%s1057_s24 + $0x9c] sm:$0xf]  ;;  %v771_v25 = vmax.bf16 %v769_v19, %v766_v17  ;;  %v754_v26 = vsel %vm518_vm0, %v500_v14, 4286644096 }
  0x5b   : > { %v777_v27 = vsel %vm518_vm0, %v477_v16, 4286644096  ;;  %v729_v28 = vmax.bf16 %v727_v11, %v725_v21  ;;  %v516_v29 = vld [vmem:[%s1057_s24 + $0x118] sm:$0xf]  ;;  %v493_v31 = vld [vmem:[%s1057_s24 + $0xbc] sm:$0xf] }
  0x5c   : > { %v752_v30 = vmax.bf16 %v750_v18, %v748_v23  ;;  %v775_v32 = vmax.bf16 %v773_v20, %v771_v25  ;;  %v758_v33 = vsel %vm518_vm0, %v508_v22, 4286644096  ;;  %v781_v34 = vsel %vm518_vm0, %v485_v24, 4286644096  ;;  %v501_v36 = vld [vmem:[%s1057_s24 + $0xdc] sm:$0xf] }
  0x5d   : > { %805 = vst.msk [vmem:[%s1108_s28 + $0x14] sm:$0xf] %vm518_vm0, %v729_v28  ;;  %v762_v38 = vsel %vm518_vm0, %v516_v29, 4286644096  ;;  %v785_v39 = vsel %vm518_vm0, %v493_v31, 4286644096 }
  0x5e   : > { %v756_v35 = vmax.bf16 %v754_v26, %v752_v30  ;;  %v779_v37 = vmax.bf16 %v777_v27, %v775_v32  ;;  %v509_v41 = vld [vmem:[%s1057_s24 + $0xfc] sm:$0xf]  ;;  %v789_v43 = vsel %vm518_vm0, %v501_v36, 4286644096 }
  0x5f   : > { %v517_v45 = vld [vmem:[%s1057_s24 + $0x11c] sm:$0xf]  ;;  %v793_v47 = vsel %vm518_vm0, %v509_v41, 4286644096 }
  0x60   : > { %v760_v40 = vmax.bf16 %v758_v33, %v756_v35  ;;  %v783_v42 = vmax.bf16 %v781_v34, %v779_v37  ;;  %v797_v49 = vsel %vm518_vm0, %v517_v45, 4286644096 }
  0x62   : > { %v764_v44 = vmax.bf16 %v762_v38, %v760_v40  ;;  %v787_v46 = vmax.bf16 %v785_v39, %v783_v42 }
  0x64   : > { %806 = vst.msk [vmem:[%s1108_s28 + $0x18] sm:$0xf] %vm518_vm0, %v764_v44  ;;  %v791_v48 = vmax.bf16 %v789_v43, %v787_v46 }
  0x66   : > { %v795_v50 = vmax.bf16 %v793_v47, %v791_v48 }
  0x68   : > { %v799_v51 = vmax.bf16 %v797_v49, %v795_v50 }
  0x6a   : > { %807 = vst.msk [vmem:[%s1108_s28 + $0x1c] sm:$0xf] %vm518_vm0, %v799_v51 }
  0x6b PF: > { %p8_p9 = scmp.ge.s32.totalorder %s959_s10, 4   ;;  %s1241_s6 = smov %s926_s7 }
  0x6c   : > { %s1242_s7 = smov %s968_s13  ;;  %s1243_s8 = smov %s959_s10 }
  0x6d   :  { %10 = sbr.rel (!%p8_p9) target bundleno = 2 (0x2), region = 100 }

// kernel: resnext50_encoder.34
= control target key start
LH: loop header
LB: loop body
LE: loop exit
PB: predicated region body
PF: predicated region fallthrough
CT: control target
= control target key end

     0   :  { %s880_s15 = smov 0   ;;  %s882_s16 = smov 0   ;;  %s957_s0 = inlined_call_operand.vmem [shape: bf16[128,64], index: 0, kind: input, shape index: {}]   ;;  %s958_s1 = inlined_call_operand.vmem [shape: bf16[64,256], index: 1, kind: input, shape index: {}]   ;;  %s959_s2 = inlined_call_operand.vmem [shape: f32[1,256], index: 2, kind: input, shape index: {}]   ;;  %s960_s3 = inlined_call_operand.vmem [shape: f32[1,256], index: 3, kind: input, shape index: {}]   ;;  %s961_s4 = inlined_call_operand.vmem [shape: bf16[128,256], index: 4, kind: output, shape index: {}]  }
   0x1   :  { %s884_s17 = smov 0  }
   0x2 LB: > { %s33_s18 = sadd.s32 1, %s848_s16  ;;  %p740_p0 = scmp.ge.s32.totalorder %s852_s17, 1  ;;  %s852_s17 = sphi %s884_s17, %s14_s17   ;;  %s848_s16 = sphi %s882_s16, %s963_s16   ;;  %s844_s15 = sphi %s880_s15, %s962_s15  }
   0x3   : > { %p35_p1 = scmp.ge.s32.totalorder %s33_s18, 2  ;;  %p228_p2 = scmp.lt.s32.totalorder %s852_s17, 3 }
   0x5   : > { %s965_s18 = smov (%p35_p1, %s33_s18), 0  ;;  %p229_p3 = pnand %p740_p0, %p228_p2 }
   0x6   : > { %v814_v0 = vld [vmem:[%s958_s1 + $0x4] ss:$8 sps:$4 sm:$0xff] (!%p229_p3)   ;;  %s741_s21 = sshll.u32 (!%p229_p3), %s844_s15, 3  ;;  %v816_v1 = vld [vmem:[%s958_s1] ss:$8 sps:$4 sm:$0xff] (!%p229_p3)   ;;  %v854_v2 = vmov (!%p229_p3), 0   ;;  %v488_v13 = vlaneseq (!%p229_p3) }
   0x7   : > { %232 = sbr.rel (%p229_p3) target bundleno = 254 (0xfe), region = 36  ;;  %445 = vmatprep.mubr.bf16.mxu0 (!%p229_p3), %v854_v2  ;;  %465 = vmatprep.mubr.bf16.mxu1 (!%p229_p3), %v854_v2  ;;  %p281_p4 = scmp.lt.s32.totalorder (!%p229_p3), %s741_s21, 15  ;;  %v817_v3 = vld [vmem:[%s958_s1 + $0x14] ss:$8 sps:$4 sm:$0xff] (!%p229_p3)   ;;  %v819_v4 = vld [vmem:[%s958_s1 + $0x10] ss:$8 sps:$4 sm:$0xff] (!%p229_p3)  }
   0x8   : > { %413 = vmatprep.subr.bf16.mxu0 (!%p229_p3), %v814_v0  ;;  %781 = vmatprep.subr.bf16.mxu1 (!%p229_p3), %v814_v0  ;;  %v820_v5 = vld [vmem:[%s958_s1 + $0x24] ss:$8 sps:$4 sm:$0xff] (!%p229_p3)   ;;  %v822_v6 = vld [vmem:[%s958_s1 + $0x20] ss:$8 sps:$4 sm:$0xff] (!%p229_p3)   ;;  %v823_v7 = vld [vmem:[%s958_s1 + $0x34] ss:$8 sps:$4 sm:$0xff] (!%p229_p3)  }
   0x9   : > { %414 = vmatpush1.bf16.msra.mxu0 (!%p229_p3), %v816_v1  ;;  %785 = vmatpush1.bf16.msra.mxu1 (!%p229_p3), %v816_v1  ;;  %v825_v8 = vld [vmem:[%s958_s1 + $0x30] ss:$8 sps:$4 sm:$0xff] (!%p229_p3)   ;;  %vm400_vm0 = vcmask (!%p229_p3), 523264   ;;  %v489_v14 = vshrl.u32 (!%p229_p3), %v488_v13, 7  ;;  %v486_v16 = vld [vmem:[%s959_s2] sm:$0x3] (!%p229_p3) }
   0xa   : > { %415 = vmatprep.subr.bf16.mxu0 (!%p229_p3), %v817_v3  ;;  %782 = vmatprep.subr.bf16.mxu1 (!%p229_p3), %v817_v3  ;;  %v514_v18 = vld [vmem:[%s960_s3] sm:$0x3] (!%p229_p3) }
   0xb   : > { %v490_v15 = vsub.s32 (!%p229_p3), 0, %v489_v14  ;;  %v494_v17 = vsub.s32 (!%p229_p3), 1, %v489_v14 }
   0xd   : > { %416 = vmatpush1.bf16.msra.mxu0 (!%p229_p3), %v819_v4  ;;  %786 = vmatpush1.bf16.msra.mxu1 (!%p229_p3), %v819_v4  ;;  %v491_v19 = vrot.slane (!%p229_p3), %v486_v16, %v490_v15  ;;  %v495_v20 = vrot.slane (!%p229_p3), %v486_v16, %v494_v17  ;;  %v519_v21 = vrot.slane (!%p229_p3), %v514_v18, %v490_v15 }
   0xe   : > { %s967_s21 = smov (!%p281_p4, %s741_s21), 15  ;;  %417 = vmatprep.subr.bf16.mxu0 %v820_v5  ;;  %783 = vmatprep.subr.bf16.mxu1 %v820_v5  ;;  %v523_v24 = vrot.slane %v514_v18, %v494_v17 }
   0xf   : > { %s742_s30 = sshll.u32 %s967_s21, 2  ;;  %s772_s22 = sshll.u32 %s967_s21, 3 }
  0x10   : > { %s287_s7 = scalar_lea.vmem %s957_s0, %s742_s30  ;;  %s938_s25 = scalar_lea.vmem %s961_s4, %s772_s22 }
  0x11   : > { %418 = vmatpush1.bf16.msra.mxu0 %v822_v6  ;;  %787 = vmatpush1.bf16.msra.mxu1 %v822_v6  ;;  %v826_v9 = vld [vmem:[%s287_s7] sm:$0xff]   ;;  %v827_v10 = vld [vmem:[%s287_s7 + $0x10] sm:$0xff]   ;;  %v828_v11 = vld [vmem:[%s287_s7 + $0x8] sm:$0xff]  }
  0x12   : > { %419 = vmatprep.subr.bf16.mxu0 %v823_v7  ;;  %784 = vmatprep.subr.bf16.mxu1 %v823_v7  ;;  %v829_v12 = vld [vmem:[%s287_s7 + $0x18] sm:$0xff]  }
  0x15   : > { %420 = vmatpush1.bf16.msra.mxu0 %v825_v8  ;;  %788 = vmatpush1.bf16.msra.mxu1 %v825_v8 }
  0x18   : > { %758 = vmatmul.mubr.msk.bf16.vlgmr.msra.gmra.mrb[0].mxu0 %vm400_vm0, %v826_v9  ;;  %760 = vmatmul.mubr.msk.bf16.vlgmr.msra.gmra.mrb[0].mxu1 %vm400_vm0, %v827_v10 }
  0x19   : > { %455 = vmatprep.mubr.bf16.mxu0 %v854_v2  ;;  %475 = vmatprep.mubr.bf16.mxu1 %v854_v2 }
  0x20   : > { %759 = vmatmul.mubr.msk.bf16.gmra.mrb[4].mxu0 %vm400_vm0, %v828_v11  ;;  %761 = vmatmul.mubr.msk.bf16.gmra.mrb[4].mxu1 %vm400_vm0, %v829_v12 }
  0xeb   : > { %v447_v22 = vpop.f32.mrb[0].mxu0  ;;  %v467_v23 = vpop.f32.mrb[0].mxu1 }
  0xec   : > { %v498_v25 = vmul.f32 %v491_v19, %v447_v22  ;;  %v506_v26 = vmul.f32 %v491_v19, %v467_v23  ;;  %v449_v27 = vpop.f32.mrb[1].mxu0  ;;  %v469_v28 = vpop.f32.mrb[1].mxu1 }
  0xed   : > { %v499_v29 = vmul.f32 %v495_v20, %v449_v27  ;;  %v507_v30 = vmul.f32 %v495_v20, %v469_v28  ;;  %v451_v31 = vpop.f32.mrb[2].mxu0  ;;  %v471_v32 = vpop.f32.mrb[2].mxu1 }
  0xee   : > { %v526_v33 = vadd.f32 %v519_v21, %v498_v25  ;;  %v534_v34 = vadd.f32 %v519_v21, %v506_v26  ;;  %v500_v35 = vmul.f32 %v491_v19, %v451_v31  ;;  %v508_v36 = vmul.f32 %v491_v19, %v471_v32  ;;  %v453_v37 = vpop.f32.mrb[3].mxu0  ;;  %v473_v38 = vpop.f32.mrb[3].mxu1 }
  0xef   : > { %v527_v39 = vadd.f32 %v523_v24, %v499_v29  ;;  %v535_v40 = vadd.f32 %v523_v24, %v507_v30  ;;  %v501_v41 = vmul.f32 %v495_v20, %v453_v37  ;;  %v509_v42 = vmul.f32 %v495_v20, %v473_v38 }
  0xf0   : > { %v528_v43 = vadd.f32 %v519_v21, %v500_v35  ;;  %v536_v44 = vadd.f32 %v519_v21, %v508_v36 }
  0xf1   : > { %v773_v45 = vpack.c.bf16 %v527_v39, %v526_v33  ;;  %v777_v46 = vpack.c.bf16 %v535_v40, %v534_v34  ;;  %v529_v47 = vadd.f32 %v523_v24, %v501_v41  ;;  %v537_v48 = vadd.f32 %v523_v24, %v509_v42 }
  0xf3   : > { %590 = vst [vmem:[%s938_s25] sm:$0xff] %v773_v45  ;;  %594 = vst [vmem:[%s938_s25 + $0x20] sm:$0xff] %v777_v46  ;;  %v774_v49 = vpack.c.bf16 %v529_v47, %v528_v43  ;;  %v778_v50 = vpack.c.bf16 %v537_v48, %v536_v44  ;;  %v457_v51 = vpop.f32.mrb[4].mxu0  ;;  %v477_v52 = vpop.f32.mrb[4].mxu1 }
  0xf4   : > { %v502_v53 = vmul.f32 %v491_v19, %v457_v51  ;;  %v510_v54 = vmul.f32 %v491_v19, %v477_v52  ;;  %v459_v55 = vpop.f32.mrb[5].mxu0  ;;  %v479_v56 = vpop.f32.mrb[5].mxu1 }
  0xf5   : > { %591 = vst [vmem:[%s938_s25 + $0x8] sm:$0xff] %v774_v49  ;;  %595 = vst [vmem:[%s938_s25 + $0x28] sm:$0xff] %v778_v50  ;;  %v503_v57 = vmul.f32 %v495_v20, %v459_v55  ;;  %v511_v58 = vmul.f32 %v495_v20, %v479_v56  ;;  %v461_v59 = vpop.f32.mrb[6].mxu0  ;;  %v481_v60 = vpop.f32.mrb[6].mxu1 }
  0xf6   : > { %v530_v61 = vadd.f32 %v519_v21, %v502_v53  ;;  %v538_v62 = vadd.f32 %v519_v21, %v510_v54  ;;  %v504_v63 = vmul.f32 %v491_v19, %v461_v59  ;;  %v512_v0 = vmul.f32 %v491_v19, %v481_v60  ;;  %v463_v1 = vpop.f32.mrb[7].mxu0  ;;  %v483_v2 = vpop.f32.mrb[7].mxu1 }
  0xf7   : > { %v531_v3 = vadd.f32 %v523_v24, %v503_v57  ;;  %v539_v4 = vadd.f32 %v523_v24, %v511_v58  ;;  %v505_v5 = vmul.f32 %v495_v20, %v463_v1  ;;  %v513_v6 = vmul.f32 %v495_v20, %v483_v2 }
  0xf8   : > { %v532_v7 = vadd.f32 %v519_v21, %v504_v63  ;;  %v540_v8 = vadd.f32 %v519_v21, %v512_v0 }
  0xf9   : > { %v775_v9 = vpack.c.bf16 %v531_v3, %v530_v61  ;;  %v779_v10 = vpack.c.bf16 %v539_v4, %v538_v62  ;;  %v533_v11 = vadd.f32 %v523_v24, %v505_v5  ;;  %v541_v12 = vadd.f32 %v523_v24, %v513_v6 }
  0xfb   : > { %592 = vst [vmem:[%s938_s25 + $0x10] sm:$0xff] %v775_v9  ;;  %596 = vst [vmem:[%s938_s25 + $0x30] sm:$0xff] %v779_v10  ;;  %v776_v13 = vpack.c.bf16 %v533_v11, %v532_v7  ;;  %v780_v14 = vpack.c.bf16 %v541_v12, %v540_v8 }
  0xfd   : > { %593 = vst [vmem:[%s938_s25 + $0x18] sm:$0xff] %v776_v13  ;;  %597 = vst [vmem:[%s938_s25 + $0x38] sm:$0xff] %v780_v14 }
  0xfe PF: > { %s14_s17 = sadd.s32 1, %s852_s17   ;;  %s962_s15 = smov %s848_s16 }
  0xff   : > { %p11_p5 = scmp.ge.s32.totalorder %s14_s17, 4   ;;  %s963_s16 = smov %s965_s18 }
 0x101   :  { %13 = sbr.rel (!%p11_p5) target bundleno = 2 (0x2), region = 75 }

// kernel: resnext50_encoder.35
= control target key start
LH: loop header
LB: loop body
LE: loop exit
PB: predicated region body
PF: predicated region fallthrough
CT: control target
= control target key end

     0   :  { %s2698_s27 = smov 0   ;;  %s2700_s28 = smov 0   ;;  %s3123_s0 = inlined_call_operand.vmem [shape: bf16[128,1152], index: 0, kind: input, shape index: {}]   ;;  %s3124_s1 = inlined_call_operand.vmem [shape: bf16[1,1152,128], index: 1, kind: input, shape index: {}]   ;;  %s3125_s2 = inlined_call_operand.vmem [shape: f32[1,128], index: 2, kind: input, shape index: {}]   ;;  %s3126_s3 = inlined_call_operand.vmem [shape: f32[1,128], index: 3, kind: input, shape index: {}]   ;;  %s3127_s4 = inlined_call_operand.vmem [shape: bf16[128,256], index: 4, kind: input, shape index: {}]   ;;  %s3128_s5 = inlined_call_operand.vmem [shape: f32[1,256], index: 5, kind: input, shape index: {}]   ;;  %s3129_s6 = inlined_call_operand.vmem [shape: f32[1,256], index: 6, kind: input, shape index: {}]   ;;  %s3130_s7 = inlined_call_operand.vmem [shape: bf16[128,256], index: 7, kind: input, shape index: {}]   ;;  %s3131_s8 = inlined_call_operand.vmem [shape: bf16[128,256], index: 8, kind: output, shape index: {}]  }
   0x1   :  { %s2702_s29 = smov 0  }
   0x2 LB: > { %s30_s30 = sadd.s32 1, %s2646_s28  ;;  %p2103_p0 = scmp.ge.s32.totalorder %s2650_s29, 1  ;;  %s2650_s29 = sphi %s2702_s29, %s18_s29   ;;  %s2646_s28 = sphi %s2700_s28, %s3133_s28   ;;  %s2642_s27 = sphi %s2698_s27, %s3132_s27  }
   0x3   : > { %p32_p1 = scmp.ge.s32.totalorder %s30_s30, 2  ;;  %p328_p2 = scmp.lt.s32.totalorder %s2650_s29, 3 }
   0x5   : > { %s3135_s30 = smov (%p32_p1, %s30_s30), 0  ;;  %p329_p3 = pnand %p2103_p0, %p328_p2 }
   0x6   : > { %v2480_v0 = vld [vmem:[%s3124_s1 + $0x40] sm:$0xff] (!%p329_p3)   ;;  %v2484_v4 = vld [vmem:[%s3124_s1 + $0x48] sm:$0xff] (!%p329_p3)   ;;  %v2488_v8 = vld [vmem:[%s3124_s1 + $0x50] sm:$0xff] (!%p329_p3)   ;;  %s2104_s21 = sshll.u32 (!%p329_p3), %s2642_s27, 3 }
   0x7   : > { %332 = sbr.rel (%p329_p3) target bundleno = 579 (0x243), region = 52  ;;  %v2481_v1 = vld [vmem:[%s3124_s1 + $0xc0] sm:$0xff] (!%p329_p3)   ;;  %2258 = vmatprep.subr.bf16.mxu0 (!%p329_p3), %v2480_v0  ;;  %v2485_v5 = vld [vmem:[%s3124_s1 + $0xc8] sm:$0xff] (!%p329_p3)   ;;  %v2489_v9 = vld [vmem:[%s3124_s1 + $0xd0] sm:$0xff] (!%p329_p3)   ;;  %p392_p4 = scmp.lt.s32.totalorder (!%p329_p3), %s2104_s21, 15 }
   0x8   : > { %v2482_v2 = vld [vmem:[%s3124_s1] sm:$0xff] (!%p329_p3)   ;;  %2298 = vmatprep.subr.bf16.mxu1 (!%p329_p3), %v2481_v1  ;;  %v2486_v6 = vld [vmem:[%s3124_s1 + $0x8] sm:$0xff] (!%p329_p3)   ;;  %v2490_v10 = vld [vmem:[%s3124_s1 + $0x10] sm:$0xff] (!%p329_p3)  }
   0x9   : > { %v2483_v3 = vld [vmem:[%s3124_s1 + $0x80] sm:$0xff] (!%p329_p3)   ;;  %2259 = vmatpush3.bf16.msra.mxu0 (!%p329_p3), %v2482_v2  ;;  %v2487_v7 = vld [vmem:[%s3124_s1 + $0x88] sm:$0xff] (!%p329_p3)   ;;  %v2491_v11 = vld [vmem:[%s3124_s1 + $0x90] sm:$0xff] (!%p329_p3)  }
   0xa   : > { %2299 = vmatpush3.bf16.msra.mxu1 (!%p329_p3), %v2483_v3  ;;  %2260 = vmatprep.subr.bf16.mxu0 (!%p329_p3), %v2484_v4  ;;  %v2492_v12 = vld [vmem:[%s3124_s1 + $0x58] sm:$0xff] (!%p329_p3)   ;;  %v2496_v16 = vld [vmem:[%s3124_s1 + $0x60] sm:$0xff] (!%p329_p3)   ;;  %v2500_v20 = vld [vmem:[%s3124_s1 + $0x68] sm:$0xff] (!%p329_p3)  }
   0xb   : > { %2300 = vmatprep.subr.bf16.mxu1 (!%p329_p3), %v2485_v5  ;;  %v2493_v13 = vld [vmem:[%s3124_s1 + $0xd8] sm:$0xff] (!%p329_p3)   ;;  %v2497_v17 = vld [vmem:[%s3124_s1 + $0xe0] sm:$0xff] (!%p329_p3)   ;;  %v2501_v21 = vld [vmem:[%s3124_s1 + $0xe8] sm:$0xff] (!%p329_p3)  }
   0xc   : > { %v2494_v14 = vld [vmem:[%s3124_s1 + $0x18] sm:$0xff] (!%p329_p3)   ;;  %v2498_v18 = vld [vmem:[%s3124_s1 + $0x20] sm:$0xff] (!%p329_p3)   ;;  %v2502_v22 = vld [vmem:[%s3124_s1 + $0x28] sm:$0xff] (!%p329_p3)  }
   0xd   : > { %2261 = vmatpush3.bf16.msra.mxu0 (!%p329_p3), %v2486_v6  ;;  %v2495_v15 = vld [vmem:[%s3124_s1 + $0x98] sm:$0xff] (!%p329_p3)   ;;  %v2499_v19 = vld [vmem:[%s3124_s1 + $0xa0] sm:$0xff] (!%p329_p3)   ;;  %v2503_v23 = vld [vmem:[%s3124_s1 + $0xa8] sm:$0xff] (!%p329_p3)  }
   0xe   : > { %2301 = vmatpush3.bf16.msra.mxu1 %v2487_v7  ;;  %2262 = vmatprep.subr.bf16.mxu0 %v2488_v8  ;;  %s3137_s21 = smov (!%p392_p4, %s2104_s21), 15  ;;  %v2504_v24 = vld [vmem:[%s3124_s1 + $0x70] sm:$0xff]   ;;  %v2508_v28 = vld [vmem:[%s3124_s1 + $0x78] sm:$0xff]   ;;  %v2518_v36 = vld [vmem:[%s3124_s1 + $0x140] sm:$0xff]  }
   0xf   : > { %2302 = vmatprep.subr.bf16.mxu1 %v2489_v9  ;;  %v2505_v25 = vld [vmem:[%s3124_s1 + $0xf0] sm:$0xff]   ;;  %s2454_s26 = smul.u32 36, %s3137_s21  ;;  %v2509_v29 = vld [vmem:[%s3124_s1 + $0xf8] sm:$0xff]   ;;  %v2519_v37 = vld [vmem:[%s3124_s1 + $0x100] sm:$0xff]   ;;  %s2248_s17 = sshll.u32 %s3137_s21, 3 }
  0x10   : > { %v2506_v26 = vld [vmem:[%s3124_s1 + $0x30] sm:$0xff]   ;;  %v2510_v30 = vld [vmem:[%s3124_s1 + $0x38] sm:$0xff]   ;;  %v2520_v38 = vld [vmem:[%s3124_s1 + $0x1c0] sm:$0xff]   ;;  %s3046_s24 = scalar_lea.vmem %s3130_s7, %s2248_s17  ;;  %s3076_s10 = scalar_lea.vmem %s3131_s8, %s2248_s17 }
  0x11   : > { %2263 = vmatpush3.bf16.msra.mxu0 %v2490_v10  ;;  %v2507_v27 = vld [vmem:[%s3124_s1 + $0xb0] sm:$0xff]   ;;  %s2815_s18 = scalar_lea.vmem %s3123_s0, %s2454_s26  ;;  %v2511_v31 = vld [vmem:[%s3124_s1 + $0xb8] sm:$0xff]   ;;  %v2521_v39 = vld [vmem:[%s3124_s1 + $0x180] sm:$0xff]  }
  0x12   : > { %2303 = vmatpush3.bf16.msra.mxu1 %v2491_v11  ;;  %2264 = vmatprep.subr.bf16.mxu0 %v2492_v12  ;;  %v2512_v32 = vld [vmem:[%s2815_s18] ss:$36 sps:$4 sm:$0xff]   ;;  %v2515_v34 = vld [vmem:[%s2815_s18 + $0x8] ss:$36 sps:$4 sm:$0xff]   ;;  %v2527_v44 = vld [vmem:[%s2815_s18 + $0x54] ss:$36 sps:$4 sm:$0xff]  }
  0x13   : > { %2304 = vmatprep.subr.bf16.mxu1 %v2493_v13  ;;  %v2514_v33 = vld [vmem:[%s2815_s18 + $0x4] ss:$36 sps:$4 sm:$0xff]   ;;  %v2517_v35 = vld [vmem:[%s2815_s18 + $0xc] ss:$36 sps:$4 sm:$0xff]   ;;  %v2536_v52 = vld [vmem:[%s3124_s1 + $0x158] sm:$0xff]  }
  0x14   : > { %1275 = vmatprep.mubr.bf16.mxu0 %v2514_v33  ;;  %1340 = vmatprep.mubr.bf16.mxu1 %v2517_v35  ;;  %v2522_v40 = vld [vmem:[%s3124_s1 + $0x148] sm:$0xff]   ;;  %v2531_v47 = vld [vmem:[%s2815_s18 + $0x50] ss:$36 sps:$4 sm:$0xff]   ;;  %v2537_v53 = vld [vmem:[%s3124_s1 + $0x118] sm:$0xff]  }
  0x15   : > { %2265 = vmatpush3.bf16.msra.mxu0 %v2494_v14  ;;  %v2523_v41 = vld [vmem:[%s3124_s1 + $0x108] sm:$0xff]   ;;  %v2532_v48 = vld [vmem:[%s3124_s1 + $0x150] sm:$0xff]   ;;  %v2538_v54 = vld [vmem:[%s3124_s1 + $0x1d8] sm:$0xff]  }
  0x16   : > { %2305 = vmatpush3.bf16.msra.mxu1 %v2495_v15  ;;  %2266 = vmatprep.subr.bf16.mxu0 %v2496_v16  ;;  %v2524_v42 = vld [vmem:[%s3124_s1 + $0x1c8] sm:$0xff]   ;;  %v2533_v49 = vld [vmem:[%s3124_s1 + $0x110] sm:$0xff]   ;;  %v2541_v56 = vld [vmem:[%s2815_s18 + $0x9c] ss:$36 sps:$4 sm:$0xff]  }
  0x17   : > { %2306 = vmatprep.subr.bf16.mxu1 %v2497_v17  ;;  %v2525_v43 = vld [vmem:[%s2815_s18 + $0x4c] ss:$36 sps:$4 sm:$0xff]   ;;  %v2539_v55 = vld [vmem:[%s2815_s18 + $0x94] ss:$36 sps:$4 sm:$0xff]   ;;  %v2546_v60 = vld [vmem:[%s3124_s1 + $0x160] sm:$0xff]  }
  0x18   : > { %v2529_v45 = vld [vmem:[%s3124_s1 + $0x188] sm:$0xff]   ;;  %v2534_v50 = vld [vmem:[%s3124_s1 + $0x1d0] sm:$0xff]   ;;  %v2543_v57 = vld [vmem:[%s3124_s1 + $0x198] sm:$0xff]  }
  0x19   : > { %2267 = vmatpush3.bf16.msra.mxu0 %v2498_v18  ;;  %v2530_v46 = vld [vmem:[%s2815_s18 + $0x48] ss:$36 sps:$4 sm:$0xff]   ;;  %v2535_v51 = vld [vmem:[%s3124_s1 + $0x190] sm:$0xff]   ;;  %v2545_v59 = vld [vmem:[%s2815_s18 + $0x98] ss:$36 sps:$4 sm:$0xff]  }
  0x1a   : > { %2307 = vmatpush3.bf16.msra.mxu1 %v2499_v19  ;;  %2268 = vmatprep.subr.bf16.mxu0 %v2500_v20  ;;  %v2544_v58 = vld [vmem:[%s2815_s18 + $0x90] ss:$36 sps:$4 sm:$0xff]   ;;  %v2547_v61 = vld [vmem:[%s3124_s1 + $0x120] sm:$0xff]   ;;  %v2550_v0 = vld [vmem:[%s3124_s1 + $0x168] sm:$0xff]  }
  0x1b   : > { %2308 = vmatprep.subr.bf16.mxu1 %v2501_v21  ;;  %v2548_v62 = vld [vmem:[%s3124_s1 + $0x1e0] sm:$0xff]   ;;  %v2551_v1 = vld [vmem:[%s3124_s1 + $0x128] sm:$0xff]   ;;  %v2558_v6 = vld [vmem:[%s2815_s18 + $0xd8] ss:$36 sps:$4 sm:$0xff]  }
  0x1c   : > { %v2549_v63 = vld [vmem:[%s3124_s1 + $0x1a0] sm:$0xff]   ;;  %v2552_v2 = vld [vmem:[%s3124_s1 + $0x1e8] sm:$0xff]   ;;  %v2560_v8 = vld [vmem:[%s3124_s1 + $0x170] sm:$0xff]  }
  0x1d   : > { %2269 = vmatpush3.bf16.msra.mxu0 %v2502_v22  ;;  %v2553_v3 = vld [vmem:[%s2815_s18 + $0xdc] ss:$36 sps:$4 sm:$0xff]   ;;  %v2555_v4 = vld [vmem:[%s2815_s18 + $0xe4] ss:$36 sps:$4 sm:$0xff]   ;;  %v2561_v9 = vld [vmem:[%s3124_s1 + $0x130] sm:$0xff]  }
  0x1e   : > { %2309 = vmatpush3.bf16.msra.mxu1 %v2503_v23  ;;  %2270 = vmatprep.subr.bf16.mxu0 %v2504_v24  ;;  %v2557_v5 = vld [vmem:[%s3124_s1 + $0x1a8] sm:$0xff]   ;;  %v2559_v7 = vld [vmem:[%s2815_s18 + $0xe0] ss:$36 sps:$4 sm:$0xff]   ;;  %v2562_v10 = vld [vmem:[%s3124_s1 + $0x1f0] sm:$0xff]  }
  0x1f   : > { %2310 = vmatprep.subr.bf16.mxu1 %v2505_v25  ;;  %v2563_v11 = vld [vmem:[%s3124_s1 + $0x1b0] sm:$0xff]   ;;  %v2564_v12 = vld [vmem:[%s3124_s1 + $0x178] sm:$0xff]   ;;  %v2571_v18 = vld [vmem:[%s3124_s1 + $0x200] sm:$0xff]  }
  0x20   : > { %v2565_v13 = vld [vmem:[%s3124_s1 + $0x138] sm:$0xff]   ;;  %v2567_v15 = vld [vmem:[%s2815_s18 + $0x10] ss:$36 sps:$4 sm:$0xff]   ;;  %v2575_v21 = vld [vmem:[%s3124_s1 + $0x208] sm:$0xff]  }
  0x21   : > { %2271 = vmatpush3.bf16.msra.mxu0 %v2506_v26  ;;  %v2566_v14 = vld [vmem:[%s3124_s1 + $0x1f8] sm:$0xff]   ;;  %v2579_v24 = vld [vmem:[%s3124_s1 + $0x210] sm:$0xff]   ;;  %v2580_v25 = vld [vmem:[%s2815_s18 + $0x64] ss:$36 sps:$4 sm:$0xff]  }
  0x22   : > { %2311 = vmatpush3.bf16.msra.mxu1 %v2507_v27  ;;  %2272 = vmatprep.subr.bf16.mxu0 %v2508_v28  ;;  %v2569_v16 = vld [vmem:[%s2815_s18 + $0x14] ss:$36 sps:$4 sm:$0xff]   ;;  %v2574_v20 = vld [vmem:[%s2815_s18 + $0x1c] ss:$36 sps:$4 sm:$0xff]   ;;  %v2584_v27 = vld [vmem:[%s2815_s18 + $0xa4] ss:$36 sps:$4 sm:$0xff]  }
  0x23   : > { %2312 = vmatprep.subr.bf16.mxu1 %v2509_v29  ;;  %v2570_v17 = vld [vmem:[%s3124_s1 + $0x1b8] sm:$0xff]   ;;  %v2582_v28 = vld [vmem:[%s2815_s18 + $0x60] ss:$36 sps:$4 sm:$0xff]   ;;  %v2588_v29 = vld [vmem:[%s2815_s18 + $0xac] ss:$36 sps:$4 sm:$0xff]  }
  0x24   : > { %v2572_v19 = vld [vmem:[%s2815_s18 + $0x18] ss:$36 sps:$4 sm:$0xff]   ;;  %v2591_v33 = vld [vmem:[%s3124_s1 + $0x228] sm:$0xff]  }
  0x25   : > { %2273 = vmatpush3.bf16.msra.mxu0 %v2510_v30  ;;  %v2576_v22 = vld [vmem:[%s2815_s18 + $0x5c] ss:$36 sps:$4 sm:$0xff]   ;;  %v2596_v35 = vld [vmem:[%s2815_s18 + $0xf4] ss:$36 sps:$4 sm:$0xff]  }
  0x26   : > { %2313 = vmatpush3.bf16.msra.mxu1 %v2511_v31  ;;  %2338 = vmatprep.subr.bf16.mxu0 %v2518_v36  ;;  %v2578_v23 = vld [vmem:[%s2815_s18 + $0x58] ss:$36 sps:$4 sm:$0xff]   ;;  %v2587_v30 = vld [vmem:[%s3124_s1 + $0x220] sm:$0xff]   ;;  %v2594_v36 = vld [vmem:[%s2815_s18 + $0xe8] ss:$36 sps:$4 sm:$0xff]  }
  0x27   : > { %2378 = vmatprep.subr.bf16.mxu1 %v2520_v38  ;;  %v2583_v26 = vld [vmem:[%s3124_s1 + $0x218] sm:$0xff]   ;;  %v2586_v31 = vld [vmem:[%s2815_s18 + $0xa0] ss:$36 sps:$4 sm:$0xff]  }
  0x28   : > { %1276 = vmatmul.mubr.bf16.vlgmr.msra.gmra.mrb[0].mxu0 %v2512_v32  ;;  %v2592_v32 = vld [vmem:[%s2815_s18 + $0xec] ss:$36 sps:$4 sm:$0xff]   ;;  %v2600_v38 = vld [vmem:[%s2815_s18 + $0x20] ss:$36 sps:$4 sm:$0xff]  }
  0x29   : > { %1341 = vmatmul.mubr.bf16.vlgmr.msra.gmra.mrb[0].mxu1 %v2515_v34  ;;  %2339 = vmatpush3.bf16.msra.mxu0 %v2519_v37  ;;  %v2590_v34 = vld [vmem:[%s2815_s18 + $0xa8] ss:$36 sps:$4 sm:$0xff]   ;;  %v2595_v37 = vld [vmem:[%s3124_s1 + $0x230] sm:$0xff]  }
  0x2a   : > { %2379 = vmatpush3.bf16.msra.mxu1 %v2521_v39  ;;  %2340 = vmatprep.subr.bf16.mxu0 %v2522_v40  ;;  %v2599_v39 = vld [vmem:[%s3124_s1 + $0x238] sm:$0xff]   ;;  %v2598_v40 = vld [vmem:[%s2815_s18 + $0xf0] ss:$36 sps:$4 sm:$0xff]  }
  0x2b   : > { %2380 = vmatprep.subr.bf16.mxu1 %v2524_v42  ;;  %1283 = vmatprep.mubr.bf16.mxu0 %v2525_v43  ;;  %v2602_v42 = vld [vmem:[%s2815_s18 + $0xb0] ss:$36 sps:$4 sm:$0xff]   ;;  %v2603_v43 = vld [vmem:[%s2815_s18 + $0xf8] ss:$36 sps:$4 sm:$0xff]  }
  0x2c   : > { %1348 = vmatprep.mubr.bf16.mxu1 %v2527_v44  ;;  %v2606_v44 = vld [vmem:[%s3127_s4 + $0x4] ss:$8 sps:$4 sm:$0xff]  }
  0x2d   : > { %2341 = vmatpush3.bf16.msra.mxu0 %v2523_v41  ;;  %v2601_v41 = vld [vmem:[%s2815_s18 + $0x68] ss:$36 sps:$4 sm:$0xff]  }
  0x2e   : > { %2381 = vmatpush3.bf16.msra.mxu1 %v2529_v45  ;;  %2342 = vmatprep.subr.bf16.mxu0 %v2532_v48  ;;  %v2604_v45 = vld [vmem:[%s3127_s4] ss:$8 sps:$4 sm:$0xff]   ;;  %v2612_v48 = vld [vmem:[%s3127_s4 + $0x24] ss:$8 sps:$4 sm:$0xff]  }
  0x2f   : > { %2382 = vmatprep.subr.bf16.mxu1 %v2534_v50  ;;  %v2615_v50 = vld [vmem:[%s3127_s4 + $0x34] ss:$8 sps:$4 sm:$0xff]  }
  0x30   : > { %1284 = vmatmul.mubr.bf16.gmra.mrb[4].mxu0 %v2530_v46  ;;  %v2609_v46 = vld [vmem:[%s3127_s4 + $0x14] ss:$8 sps:$4 sm:$0xff]  }
  0x31   : > { %1349 = vmatmul.mubr.bf16.gmra.mrb[4].mxu1 %v2531_v47  ;;  %2343 = vmatpush3.bf16.msra.mxu0 %v2533_v49  ;;  %v2607_v47 = vld [vmem:[%s3127_s4 + $0x10] ss:$8 sps:$4 sm:$0xff]   ;;  %v2610_v49 = vld [vmem:[%s3127_s4 + $0x20] ss:$8 sps:$4 sm:$0xff]  }
  0x32   : > { %2383 = vmatpush3.bf16.msra.mxu1 %v2535_v51  ;;  %2344 = vmatprep.subr.bf16.mxu0 %v2536_v52  ;;  %v2613_v51 = vld [vmem:[%s3127_s4 + $0x30] ss:$8 sps:$4 sm:$0xff]   ;;  %v2618_v52 = vld [vmem:[%s3127_s4 + $0x44] ss:$8 sps:$4 sm:$0xff]  }
  0x33   : > { %2384 = vmatprep.subr.bf16.mxu1 %v2538_v54  ;;  %1291 = vmatprep.mubr.bf16.mxu0 %v2539_v55  ;;  %v2621_v54 = vld [vmem:[%s3127_s4 + $0x54] ss:$8 sps:$4 sm:$0xff]   ;;  %v2619_v55 = vld [vmem:[%s3127_s4 + $0x50] ss:$8 sps:$4 sm:$0xff]  }
  0x34   : > { %1356 = vmatprep.mubr.bf16.mxu1 %v2541_v56  ;;  %v2624_v56 = vld [vmem:[%s3127_s4 + $0x64] ss:$8 sps:$4 sm:$0xff]  }
  0x35   : > { %2345 = vmatpush3.bf16.msra.mxu0 %v2537_v53  ;;  %v2616_v53 = vld [vmem:[%s3127_s4 + $0x40] ss:$8 sps:$4 sm:$0xff]  }
  0x36   : > { %2385 = vmatpush3.bf16.msra.mxu1 %v2543_v57  ;;  %2346 = vmatprep.subr.bf16.mxu0 %v2546_v60  ;;  %v2622_v57 = vld [vmem:[%s3127_s4 + $0x60] ss:$8 sps:$4 sm:$0xff]   ;;  %v2652_v60 = vmov 0  }
  0x37   : > { %2386 = vmatprep.subr.bf16.mxu1 %v2548_v62 }
  0x38   : > { %1292 = vmatmul.mubr.bf16.gmra.mrb[8].mxu0 %v2544_v58  ;;  %v2627_v58 = vld [vmem:[%s3127_s4 + $0x74] ss:$8 sps:$4 sm:$0xff]  }
  0x39   : > { %1357 = vmatmul.mubr.bf16.gmra.mrb[8].mxu1 %v2545_v59  ;;  %2347 = vmatpush3.bf16.msra.mxu0 %v2547_v61  ;;  %v2625_v59 = vld [vmem:[%s3127_s4 + $0x70] ss:$8 sps:$4 sm:$0xff]  }
  0x3a   : > { %2387 = vmatpush3.bf16.msra.mxu1 %v2549_v63  ;;  %2348 = vmatprep.subr.bf16.mxu0 %v2550_v0 }
  0x3b   : > { %2388 = vmatprep.subr.bf16.mxu1 %v2552_v2  ;;  %1299 = vmatprep.mubr.bf16.mxu0 %v2553_v3 }
  0x3c   : > { %1364 = vmatprep.mubr.bf16.mxu1 %v2555_v4 }
  0x3d   : > { %2349 = vmatpush3.bf16.msra.mxu0 %v2551_v1 }
  0x3e   : > { %2389 = vmatpush3.bf16.msra.mxu1 %v2557_v5  ;;  %2350 = vmatprep.subr.bf16.mxu0 %v2560_v8 }
  0x3f   : > { %2390 = vmatprep.subr.bf16.mxu1 %v2562_v10 }
  0x40   : > { %1300 = vmatmul.mubr.bf16.gmra.mrb[12].mxu0 %v2558_v6 }
  0x41   : > { %1365 = vmatmul.mubr.bf16.gmra.mrb[12].mxu1 %v2559_v7  ;;  %2351 = vmatpush3.bf16.msra.mxu0 %v2561_v9 }
  0x42   : > { %2391 = vmatpush3.bf16.msra.mxu1 %v2563_v11  ;;  %2352 = vmatprep.subr.bf16.mxu0 %v2564_v12 }
  0x43   : > { %2392 = vmatprep.subr.bf16.mxu1 %v2566_v14  ;;  %1405 = vmatprep.mubr.bf16.mxu0 %v2569_v16 }
  0x44   : > { %1470 = vmatprep.mubr.bf16.mxu1 %v2574_v20 }
  0x45   : > { %2353 = vmatpush3.bf16.msra.mxu0 %v2565_v13 }
  0x46   : > { %2393 = vmatpush3.bf16.msra.mxu1 %v2570_v17  ;;  %2430 = vmatprep.subr.bf16.mxu0 %v2571_v18 }
  0x47   : > { %1714 = vmatprep.subr.bf16.mxu1 %v2606_v44 }
  0x48   : > { %1406 = vmatmul.mubr.bf16.vlgmr.msra.gmra.mrb[16].mxu0 %v2567_v15 }
  0x49   : > { %2431 = vmatpush3.bf16.msra.mxu0 %v2571_v18  ;;  %1471 = vmatmul.mubr.bf16.vlgmr.msra.gmra.mrb[16].mxu1 %v2572_v19 }
  0x4a   : > { %2432 = vmatprep.subr.bf16.mxu0 %v2575_v21  ;;  %1413 = vmatprep.mubr.bf16.mxu0 %v2576_v22 }
  0x4b   : > { %1478 = vmatprep.mubr.bf16.mxu1 %v2580_v25  ;;  %1715 = vmatpush1.bf16.msra.mxu1 %v2604_v45 }
  0x4c   : > { %1716 = vmatprep.subr.bf16.mxu1 %v2609_v46 }
  0x4d   : > { %2433 = vmatpush3.bf16.msra.mxu0 %v2575_v21 }
  0x4e   : > { %2434 = vmatprep.subr.bf16.mxu0 %v2579_v24 }
  0x4f   : > { %1717 = vmatpush1.bf16.msra.mxu1 %v2607_v47 }
  0x50   : > { %1414 = vmatmul.mubr.bf16.gmra.mrb[20].mxu0 %v2578_v23  ;;  %1718 = vmatprep.subr.bf16.mxu1 %v2612_v48 }
  0x51   : > { %1421 = vmatprep.mubr.bf16.mxu0 %v2584_v27  ;;  %2435 = vmatpush3.bf16.msra.mxu0 %v2579_v24 }
  0x52   : > { %2436 = vmatprep.subr.bf16.mxu0 %v2583_v26  ;;  %1479 = vmatmul.mubr.bf16.gmra.mrb[20].mxu1 %v2582_v28 }
  0x53   : > { %1486 = vmatprep.mubr.bf16.mxu1 %v2588_v29  ;;  %1719 = vmatpush1.bf16.msra.mxu1 %v2610_v49 }
  0x54   : > { %1720 = vmatprep.subr.bf16.mxu1 %v2615_v50 }
  0x55   : > { %2437 = vmatpush3.bf16.msra.mxu0 %v2583_v26 }
  0x56   : > { %2438 = vmatprep.subr.bf16.mxu0 %v2587_v30 }
  0x57   : > { %1721 = vmatpush1.bf16.msra.mxu1 %v2613_v51 }
  0x58   : > { %1422 = vmatmul.mubr.bf16.gmra.mrb[24].mxu0 %v2586_v31  ;;  %1722 = vmatprep.subr.bf16.mxu1 %v2618_v52 }
  0x59   : > { %1429 = vmatprep.mubr.bf16.mxu0 %v2592_v32  ;;  %2439 = vmatpush3.bf16.msra.mxu0 %v2587_v30 }
  0x5a   : > { %2440 = vmatprep.subr.bf16.mxu0 %v2591_v33  ;;  %1487 = vmatmul.mubr.bf16.gmra.mrb[24].mxu1 %v2590_v34 }
  0x5b   : > { %1494 = vmatprep.mubr.bf16.mxu1 %v2596_v35  ;;  %1723 = vmatpush1.bf16.msra.mxu1 %v2616_v53 }
  0x5c   : > { %1724 = vmatprep.subr.bf16.mxu1 %v2621_v54 }
  0x5d   : > { %2441 = vmatpush3.bf16.msra.mxu0 %v2591_v33 }
  0x5e   : > { %2442 = vmatprep.subr.bf16.mxu0 %v2595_v37 }
  0x5f   : > { %1725 = vmatpush1.bf16.msra.mxu1 %v2619_v55 }
  0x60   : > { %1430 = vmatmul.mubr.bf16.gmra.mrb[28].mxu0 %v2594_v36  ;;  %1726 = vmatprep.subr.bf16.mxu1 %v2624_v56 }
  0x61   : > { %2446 = vmatprep.mubr.bf16.mxu0 %v2600_v38  ;;  %2443 = vmatpush3.bf16.msra.mxu0 %v2595_v37 }
  0x62   : > { %2444 = vmatprep.subr.bf16.mxu0 %v2599_v39  ;;  %1495 = vmatmul.mubr.bf16.gmra.mrb[28].mxu1 %v2598_v40 }
  0x63   : > { %1727 = vmatpush1.bf16.msra.mxu1 %v2622_v57  ;;  %1746 = vmatprep.mubr.bf16.mxu1 %v2652_v60 }
  0x64   : > { %1728 = vmatprep.subr.bf16.mxu1 %v2627_v58 }
  0x65   : > { %2445 = vmatpush3.bf16.msra.mxu0 %v2599_v39 }
  0x67   : > { %1729 = vmatpush1.bf16.msra.mxu1 %v2625_v59 }
  0x68   : > { %2447 = vmatmul.mubr.bf16.vlgmr.msra.gmra.mrb[32].mxu0 %v2601_v41 }
  0x69   : > { %2450 = vmatprep.mubr.bf16.mxu0 %v2602_v42 }
  0x70   : > { %2451 = vmatmul.mubr.bf16.gmra.mrb[36].mxu0 %v2603_v43 }
  0xfb   : > { %v2274_v61 = vpop.f32.mrb[0].mxu0 }
  0xfc   : > { %v2314_v62 = vpop.f32.mrb[0].mxu1  ;;  %v2275_v63 = vpop.f32.mrb[1].mxu0 }
  0xfd   : > { %v2276_v0 = vadd.f32 %v2275_v63, %v2274_v61  ;;  %v2315_v1 = vpop.f32.mrb[1].mxu1  ;;  %v2277_v2 = vpop.f32.mrb[2].mxu0 }
  0xfe   : > { %v2316_v3 = vadd.f32 %v2315_v1, %v2314_v62  ;;  %v2317_v4 = vpop.f32.mrb[2].mxu1  ;;  %v2278_v5 = vpop.f32.mrb[3].mxu0 }
  0xff   : > { %v2279_v6 = vadd.f32 %v2278_v5, %v2277_v2  ;;  %v2318_v7 = vpop.f32.mrb[3].mxu1 }
 0x100   : > { %v1343_v8 = vadd.f32 %v2316_v3, %v2276_v0  ;;  %v2319_v9 = vadd.f32 %v2318_v7, %v2317_v4 }
 0x102   : > { %v1346_v10 = vadd.f32 %v2319_v9, %v2279_v6 }
 0x103   : > { %v2280_v11 = vpop.f32.mrb[4].mxu0 }
 0x104   : > { %v2320_v12 = vpop.f32.mrb[4].mxu1  ;;  %v2281_v13 = vpop.f32.mrb[5].mxu0 }
 0x105   : > { %v2282_v14 = vadd.f32 %v2281_v13, %v2280_v11  ;;  %v2321_v15 = vpop.f32.mrb[5].mxu1  ;;  %v2283_v16 = vpop.f32.mrb[6].mxu0 }
 0x106   : > { %v2322_v17 = vadd.f32 %v2321_v15, %v2320_v12  ;;  %v2323_v18 = vpop.f32.mrb[6].mxu1  ;;  %v2284_v19 = vpop.f32.mrb[7].mxu0 }
 0x107   : > { %v2285_v20 = vadd.f32 %v2284_v19, %v2283_v16  ;;  %v2324_v21 = vpop.f32.mrb[7].mxu1 }
 0x108   : > { %v1351_v22 = vadd.f32 %v2322_v17, %v2282_v14  ;;  %v2325_v23 = vadd.f32 %v2324_v21, %v2323_v18 }
 0x10a   : > { %v1354_v24 = vadd.f32 %v2325_v23, %v2285_v20 }
 0x10b   : > { %v2286_v25 = vpop.f32.mrb[8].mxu0 }
 0x10c   : > { %v2326_v26 = vpop.f32.mrb[8].mxu1  ;;  %v2287_v27 = vpop.f32.mrb[9].mxu0 }
 0x10d   : > { %v2288_v28 = vadd.f32 %v2287_v27, %v2286_v25  ;;  %v2327_v29 = vpop.f32.mrb[9].mxu1  ;;  %v2289_v30 = vpop.f32.mrb[10].mxu0 }
 0x10e   : > { %v2328_v31 = vadd.f32 %v2327_v29, %v2326_v26  ;;  %v2329_v32 = vpop.f32.mrb[10].mxu1  ;;  %v2290_v33 = vpop.f32.mrb[11].mxu0 }
 0x10f   : > { %v2291_v34 = vadd.f32 %v2290_v33, %v2289_v30  ;;  %v2330_v35 = vpop.f32.mrb[11].mxu1 }
 0x110   : > { %v1359_v36 = vadd.f32 %v2328_v31, %v2288_v28  ;;  %v2331_v37 = vadd.f32 %v2330_v35, %v2329_v32 }
 0x112   : > { %v1362_v38 = vadd.f32 %v2331_v37, %v2291_v34 }
 0x113   : > { %v2292_v39 = vpop.f32.mrb[12].mxu0 }
 0x114   : > { %v2332_v40 = vpop.f32.mrb[12].mxu1  ;;  %v2293_v41 = vpop.f32.mrb[13].mxu0 }
 0x115   : > { %v2333_v42 = vpop.f32.mrb[13].mxu1  ;;  %v2294_v43 = vadd.f32 %v2293_v41, %v2292_v39  ;;  %v2295_v45 = vpop.f32.mrb[14].mxu0 }
 0x116   : > { %v2334_v44 = vadd.f32 %v2333_v42, %v2332_v40  ;;  %v2335_v46 = vpop.f32.mrb[14].mxu1  ;;  %v2296_v47 = vpop.f32.mrb[15].mxu0 }
 0x117   : > { %v2336_v48 = vpop.f32.mrb[15].mxu1  ;;  %v2297_v50 = vadd.f32 %v2296_v47, %v2295_v45 }
 0x118   : > { %v1367_v49 = vadd.f32 %v2334_v44, %v2294_v43  ;;  %v2337_v51 = vadd.f32 %v2336_v48, %v2335_v46 }
 0x11a   : > { %v1370_v52 = vadd.f32 %v2337_v51, %v2297_v50 }
 0x11b   : > { %v2354_v53 = vpop.f32.mrb[16].mxu0 }
 0x11c   : > { %v2355_v54 = vpop.f32.mrb[17].mxu0  ;;  %v2394_v59 = vpop.f32.mrb[16].mxu1 }
 0x11d   : > { %v2356_v55 = vadd.f32 %v2355_v54, %v2354_v53  ;;  %v2357_v56 = vpop.f32.mrb[18].mxu0  ;;  %v2395_v62 = vpop.f32.mrb[17].mxu1 }
 0x11e   : > { %v2358_v57 = vpop.f32.mrb[19].mxu0  ;;  %v2396_v0 = vadd.f32 %v2395_v62, %v2394_v59  ;;  %v2397_v1 = vpop.f32.mrb[18].mxu1 }
 0x11f   : > { %v1408_v58 = vadd.f32 %v2356_v55, %v1343_v8  ;;  %v2359_v61 = vadd.f32 %v2358_v57, %v2357_v56  ;;  %v2398_v2 = vpop.f32.mrb[19].mxu1  ;;  %v2220_v56 = vld [vmem:[%s3125_s2] ss:$0 sm:$0xff] }
 0x120   : > { %v2399_v3 = vadd.f32 %v2398_v2, %v2397_v1 }
 0x121   : > { %v1411_v63 = vadd.f32 %v2359_v61, %v1346_v10  ;;  %v1473_v5 = vadd.f32 %v2396_v0, %v1408_v58 }
 0x123   : > { %v2360_v4 = vpop.f32.mrb[20].mxu0  ;;  %v1476_v11 = vadd.f32 %v2399_v3, %v1411_v63 }
 0x124   : > { %v2361_v6 = vpop.f32.mrb[21].mxu0 }
 0x125   : > { %v2362_v7 = vadd.f32 %v2361_v6, %v2360_v4  ;;  %v2363_v9 = vpop.f32.mrb[22].mxu0  ;;  %v2400_v14 = vpop.f32.mrb[20].mxu1 }
 0x126   : > { %v2364_v12 = vpop.f32.mrb[23].mxu0  ;;  %v2401_v16 = vpop.f32.mrb[21].mxu1 }
 0x127   : > { %v1416_v13 = vadd.f32 %v2362_v7, %v1351_v22  ;;  %v2365_v15 = vadd.f32 %v2364_v12, %v2363_v9  ;;  %v2402_v17 = vadd.f32 %v2401_v16, %v2400_v14  ;;  %v2403_v18 = vpop.f32.mrb[22].mxu1 }
 0x128   : > { %v2404_v19 = vpop.f32.mrb[23].mxu1 }
 0x129   : > { %v1419_v8 = vadd.f32 %v2365_v15, %v1354_v24  ;;  %v2405_v10 = vadd.f32 %v2404_v19, %v2403_v18  ;;  %v1481_v21 = vadd.f32 %v2402_v17, %v1416_v13 }
 0x12b   : > { %v2366_v20 = vpop.f32.mrb[24].mxu0  ;;  %v1484_v27 = vadd.f32 %v2405_v10, %v1419_v8 }
 0x12c   : > { %v2367_v23 = vpop.f32.mrb[25].mxu0 }
 0x12d   : > { %v2368_v25 = vadd.f32 %v2367_v23, %v2366_v20  ;;  %v2369_v26 = vpop.f32.mrb[26].mxu0  ;;  %v2406_v30 = vpop.f32.mrb[24].mxu1 }
 0x12e   : > { %v2370_v28 = vpop.f32.mrb[27].mxu0  ;;  %v2407_v32 = vpop.f32.mrb[25].mxu1 }
 0x12f   : > { %v1424_v29 = vadd.f32 %v2368_v25, %v1359_v36  ;;  %v2371_v31 = vadd.f32 %v2370_v28, %v2369_v26  ;;  %v2408_v33 = vadd.f32 %v2407_v32, %v2406_v30  ;;  %v2409_v34 = vpop.f32.mrb[26].mxu1 }
 0x130   : > { %v2410_v35 = vpop.f32.mrb[27].mxu1 }
 0x131   : > { %v1427_v22 = vadd.f32 %v2371_v31, %v1362_v38  ;;  %v2411_v24 = vadd.f32 %v2410_v35, %v2409_v34  ;;  %v1489_v39 = vadd.f32 %v2408_v33, %v1424_v29 }
 0x133   : > { %v2372_v37 = vpop.f32.mrb[28].mxu0  ;;  %v1492_v43 = vadd.f32 %v2411_v24, %v1427_v22 }
 0x134   : > { %v2373_v40 = vpop.f32.mrb[29].mxu0 }
 0x135   : > { %v2374_v41 = vadd.f32 %v2373_v40, %v2372_v37  ;;  %v2375_v42 = vpop.f32.mrb[30].mxu0  ;;  %v2412_v46 = vpop.f32.mrb[28].mxu1 }
 0x136   : > { %v2376_v44 = vpop.f32.mrb[31].mxu0  ;;  %v2413_v48 = vpop.f32.mrb[29].mxu1 }
 0x137   : > { %v1432_v45 = vadd.f32 %v2374_v41, %v1367_v49  ;;  %v2377_v47 = vadd.f32 %v2376_v44, %v2375_v42  ;;  %v2414_v50 = vadd.f32 %v2413_v48, %v2412_v46  ;;  %v2415_v51 = vpop.f32.mrb[30].mxu1  ;;  %v2221_v49 = vld [vmem:[%s3126_s3] ss:$0 sm:$0xff] }
 0x138   : > { %v2416_v53 = vpop.f32.mrb[31].mxu1  ;;  %v1787_v42 = vld [vmem:[%s3128_s5] sm:$0x3] }
 0x139   : > { %v1435_v36 = vadd.f32 %v2377_v47, %v1370_v52  ;;  %v2417_v38 = vadd.f32 %v2416_v53, %v2415_v51  ;;  %v1497_v54 = vadd.f32 %v2414_v50, %v1432_v45  ;;  %v1843_v45 = vld [vmem:[%s3046_s24] sm:$0xff]  ;;  %v1844_v50 = vld [vmem:[%s3046_s24 + $0x8] sm:$0xff] }
 0x13a   : > { %v1851_v53 = vunpack.c.l.bf16 %v1843_v45 }
 0x13b   : > { %v2448_v55 = vpop.f32.mrb[32].mxu0  ;;  %v1500_v59 = vadd.f32 %v2417_v38, %v1435_v36 }
 0x13c   : > { %v1546_v57 = vadd.f32 %v2448_v55, %v1481_v21  ;;  %v1537_v58 = vpop.f32.mrb[33].mxu0  ;;  %v1852_v55 = vunpack.c.h.bf16 %v1843_v45 }
 0x13d   : > { %v1538_v61 = vadd.f32 %v1537_v58, %v1473_v5  ;;  %v2449_v62 = vpop.f32.mrb[34].mxu0 }
 0x13e   : > { %v1577_v52 = vmul.f32 %v2220_v56, %v1546_v57  ;;  %v1549_v63 = vadd.f32 %v2449_v62, %v1484_v27  ;;  %v1540_v0 = vpop.f32.mrb[35].mxu0 }
 0x13f   : > { %v1575_v1 = vmul.f32 %v2220_v56, %v1538_v61  ;;  %v1541_v2 = vadd.f32 %v1540_v0, %v1476_v11 }
 0x140   : > { %v1592_v3 = vadd.f32 %v2221_v49, %v1577_v52  ;;  %v1578_v4 = vmul.f32 %v2220_v56, %v1549_v63  ;;  %v1854_v52 = vunpack.c.h.bf16 %v1844_v50 }
 0x141   : > { %v1590_v6 = vadd.f32 %v2221_v49, %v1575_v1  ;;  %v1576_v7 = vmul.f32 %v2220_v56, %v1541_v2 }
 0x142   : > { %v1593_v9 = vadd.f32 %v2221_v49, %v1578_v4  ;;  %v1600_v14 = vmax.f32 %v1592_v3, 0.0  ;;  %v1845_v3 = vld [vmem:[%s3046_s24 + $0x10] sm:$0xff] }
 0x143   : > { %v1591_v12 = vadd.f32 %v2221_v49, %v1576_v7  ;;  %v2452_v13 = vpop.f32.mrb[36].mxu0  ;;  %v1598_v17 = vmax.f32 %v1590_v6, 0.0 }
 0x144   : > { %v1601_v15 = vmax.f32 %v1593_v9, 0.0  ;;  %v1562_v16 = vadd.f32 %v2452_v13, %v1497_v54  ;;  %v1553_v8 = vpop.f32.mrb[37].mxu0  ;;  %v1846_v13 = vld [vmem:[%s3046_s24 + $0x18] sm:$0xff] }
 0x145   : > { %v1599_v18 = vmax.f32 %v1591_v12, 0.0  ;;  %v1554_v5 = vadd.f32 %v1553_v8, %v1489_v39  ;;  %v2453_v19 = vpop.f32.mrb[38].mxu0  ;;  %v1789_v39 = vlaneseq }
 0x146   : > { %v1581_v10 = vmul.f32 %v2220_v56, %v1562_v16  ;;  %v1565_v20 = vadd.f32 %v2453_v19, %v1500_v59  ;;  %v1556_v21 = vpop.f32.mrb[39].mxu0  ;;  %v1607_v23 = vpack.c.bf16 %v1601_v15, %v1600_v14  ;;  %v1853_v59 = vunpack.c.l.bf16 %v1844_v50 }
 0x147   : > { %v1606_v11 = vpack.c.bf16 %v1599_v18, %v1598_v17  ;;  %v1579_v25 = vmul.f32 %v2220_v56, %v1554_v5  ;;  %v1557_v26 = vadd.f32 %v1556_v21, %v1492_v43  ;;  %v1790_v40 = vshrl.u32 %v1789_v39, 7  ;;  %v1848_v39 = vld [vmem:[%s3046_s24 + $0x28] sm:$0xff] }
 0x148   : > { %v1596_v27 = vadd.f32 %v2221_v49, %v1581_v10  ;;  %v1582_v28 = vmul.f32 %v2220_v56, %v1565_v20  ;;  %v1855_v16 = vunpack.c.l.bf16 %v1845_v3  ;;  %v1856_v19 = vunpack.c.h.bf16 %v1845_v3 }
 0x149   : > { %v1594_v29 = vadd.f32 %v2221_v49, %v1579_v25  ;;  %v1580_v30 = vmul.f32 %v2220_v56, %v1557_v26  ;;  %1747 = vmatmul.mubr.bf16.vlgmr.msra.gmra.mrb[32].mxu1 %v1606_v11  ;;  %v1791_v41 = vsub.s32 0, %v1790_v40  ;;  %v1795_v43 = vsub.s32 1, %v1790_v40 }
 0x14a   : > { %v1597_v31 = vadd.f32 %v2221_v49, %v1582_v28  ;;  %1756 = vmatprep.mubr.bf16.mxu1 %v2652_v60  ;;  %v1604_v22 = vmax.f32 %v1596_v27, 0.0  ;;  %v1858_v28 = vunpack.c.h.bf16 %v1846_v13 }
 0x14b   : > { %v1595_v32 = vadd.f32 %v2221_v49, %v1580_v30  ;;  %v1602_v34 = vmax.f32 %v1594_v29, 0.0  ;;  %v3051_v44 = vrot.slane %v1787_v42, %v1791_v41  ;;  %v3054_v46 = vrot.slane %v1787_v42, %v1795_v43 }
 0x14c   : > { %v1605_v33 = vmax.f32 %v1597_v31, 0.0 }
 0x14d   : > { %v1603_v35 = vmax.f32 %v1595_v32, 0.0 }
 0x14e   : > { %v1609_v24 = vpack.c.bf16 %v1605_v33, %v1604_v22  ;;  %v1847_v22 = vld [vmem:[%s3046_s24 + $0x20] sm:$0xff] }
 0x14f   : > { %v1608_v37 = vpack.c.bf16 %v1603_v35, %v1602_v34  ;;  %v1859_v42 = vunpack.c.l.bf16 %v1847_v22  ;;  %v1860_v50 = vunpack.c.h.bf16 %v1847_v22 }
 0x151   : > { %1757 = vmatmul.mubr.bf16.gmra.mrb[36].mxu1 %v1607_v23  ;;  %v1857_v23 = vunpack.c.l.bf16 %v1846_v13 }
 0x152   : > { %1766 = vmatprep.mubr.bf16.mxu1 %v2652_v60 }
 0x159   : > { %1767 = vmatmul.mubr.bf16.gmra.mrb[40].mxu1 %v1608_v37 }
 0x15a   : > { %1776 = vmatprep.mubr.bf16.mxu1 %v2652_v60  ;;  %v1815_v60 = vld [vmem:[%s3129_s6] sm:$0x3] }
 0x15b   : > { %v3056_v47 = vrot.slane %v1815_v60, %v1791_v41  ;;  %v3058_v36 = vrot.slane %v1815_v60, %v1795_v43 }
 0x161   : > { %1777 = vmatmul.mubr.bf16.gmra.mrb[44].mxu1 %v1609_v24 }
 0x21c   : > { %v1748_v48 = vpop.f32.mrb[32].mxu1 }
 0x21d   : > { %v1799_v51 = vmul.f32 %v3051_v44, %v1748_v48  ;;  %v1750_v38 = vpop.f32.mrb[33].mxu1 }
 0x21e   : > { %v1800_v54 = vmul.f32 %v3054_v46, %v1750_v38  ;;  %v1752_v56 = vpop.f32.mrb[34].mxu1 }
 0x21f   : > { %v1827_v57 = vadd.f32 %v3056_v47, %v1799_v51  ;;  %v1801_v58 = vmul.f32 %v3051_v44, %v1752_v56  ;;  %v1754_v49 = vpop.f32.mrb[35].mxu1 }
 0x220   : > { %v1828_v61 = vadd.f32 %v3058_v36, %v1800_v54  ;;  %v1802_v62 = vmul.f32 %v3054_v46, %v1754_v49  ;;  %v1861_v54 = vunpack.c.l.bf16 %v1848_v39 }
 0x221   : > { %v1867_v63 = vadd.f32 %v1851_v53, %v1827_v57  ;;  %v1829_v0 = vadd.f32 %v3056_v47, %v1801_v58 }
 0x222   : > { %v1868_v1 = vadd.f32 %v1852_v55, %v1828_v61  ;;  %v1830_v2 = vadd.f32 %v3058_v36, %v1802_v62 }
 0x223   : > { %v1883_v4 = vmax.f32 %v1867_v63, 0.0  ;;  %v1869_v6 = vadd.f32 %v1853_v59, %v1829_v0  ;;  %v1862_v59 = vunpack.c.h.bf16 %v1848_v39  ;;  %v1849_v63 = vld [vmem:[%s3046_s24 + $0x30] sm:$0xff] }
 0x224   : > { %v1884_v7 = vmax.f32 %v1868_v1, 0.0  ;;  %v1870_v9 = vadd.f32 %v1854_v52, %v1830_v2  ;;  %v1758_v12 = vpop.f32.mrb[36].mxu1 }
 0x225   : > { %v1885_v14 = vmax.f32 %v1869_v6, 0.0  ;;  %v1803_v15 = vmul.f32 %v3051_v44, %v1758_v12  ;;  %v1760_v8 = vpop.f32.mrb[37].mxu1  ;;  %v1850_v6 = vld [vmem:[%s3046_s24 + $0x38] sm:$0xff]  ;;  %v1863_v12 = vunpack.c.l.bf16 %v1849_v63 }
 0x226   : > { %v2250_v17 = vpack.c.bf16 %v1884_v7, %v1883_v4  ;;  %v1886_v18 = vmax.f32 %v1870_v9, 0.0  ;;  %v1804_v5 = vmul.f32 %v3054_v46, %v1760_v8  ;;  %v1762_v10 = vpop.f32.mrb[38].mxu1  ;;  %v1864_v8 = vunpack.c.h.bf16 %v1849_v63 }
 0x227   : > { %v1831_v20 = vadd.f32 %v3056_v47, %v1803_v15  ;;  %v1805_v21 = vmul.f32 %v3051_v44, %v1762_v10  ;;  %v1764_v11 = vpop.f32.mrb[39].mxu1 }
 0x228   : > { %1947 = vst [vmem:[%s3076_s10] sm:$0xff] %v2250_v17  ;;  %v2251_v25 = vpack.c.bf16 %v1886_v18, %v1885_v14  ;;  %v1832_v26 = vadd.f32 %v3058_v36, %v1804_v5  ;;  %v1806_v27 = vmul.f32 %v3054_v46, %v1764_v11  ;;  %v1866_v11 = vunpack.c.h.bf16 %v1850_v6 }
 0x229   : > { %v1871_v29 = vadd.f32 %v1855_v16, %v1831_v20  ;;  %v1833_v30 = vadd.f32 %v3056_v47, %v1805_v21 }
 0x22a   : > { %1948 = vst [vmem:[%s3076_s10 + $0x8] sm:$0xff] %v2251_v25  ;;  %v1872_v31 = vadd.f32 %v1856_v19, %v1832_v26  ;;  %v1834_v32 = vadd.f32 %v3058_v36, %v1806_v27  ;;  %v1865_v19 = vunpack.c.l.bf16 %v1850_v6 }
 0x22b   : > { %v1887_v33 = vmax.f32 %v1871_v29, 0.0  ;;  %v1873_v34 = vadd.f32 %v1857_v23, %v1833_v30 }
 0x22c   : > { %v1888_v35 = vmax.f32 %v1872_v31, 0.0  ;;  %v1874_v24 = vadd.f32 %v1858_v28, %v1834_v32  ;;  %v1768_v37 = vpop.f32.mrb[40].mxu1 }
 0x22d   : > { %v1889_v40 = vmax.f32 %v1873_v34, 0.0  ;;  %v1807_v41 = vmul.f32 %v3051_v44, %v1768_v37  ;;  %v1770_v43 = vpop.f32.mrb[41].mxu1 }
 0x22e   : > { %v2252_v60 = vpack.c.bf16 %v1888_v35, %v1887_v33  ;;  %v1890_v45 = vmax.f32 %v1874_v24, 0.0  ;;  %v1808_v48 = vmul.f32 %v3054_v46, %v1770_v43  ;;  %v1772_v51 = vpop.f32.mrb[42].mxu1 }
 0x22f   : > { %v1835_v53 = vadd.f32 %v3056_v47, %v1807_v41  ;;  %v1809_v38 = vmul.f32 %v3051_v44, %v1772_v51  ;;  %v1774_v55 = vpop.f32.mrb[43].mxu1 }
 0x230   : > { %1949 = vst [vmem:[%s3076_s10 + $0x10] sm:$0xff] %v2252_v60  ;;  %v2253_v56 = vpack.c.bf16 %v1890_v45, %v1889_v40  ;;  %v1836_v57 = vadd.f32 %v3058_v36, %v1808_v48  ;;  %v1810_v58 = vmul.f32 %v3054_v46, %v1774_v55 }
 0x231   : > { %v1875_v49 = vadd.f32 %v1859_v42, %v1835_v53  ;;  %v1837_v61 = vadd.f32 %v3056_v47, %v1809_v38 }
 0x232   : > { %1950 = vst [vmem:[%s3076_s10 + $0x18] sm:$0xff] %v2253_v56  ;;  %v1876_v62 = vadd.f32 %v1860_v50, %v1836_v57  ;;  %v1838_v52 = vadd.f32 %v3058_v36, %v1810_v58 }
 0x233   : > { %v1891_v0 = vmax.f32 %v1875_v49, 0.0  ;;  %v1877_v1 = vadd.f32 %v1861_v54, %v1837_v61 }
 0x234   : > { %v1892_v2 = vmax.f32 %v1876_v62, 0.0  ;;  %v1878_v3 = vadd.f32 %v1862_v59, %v1838_v52  ;;  %v1778_v4 = vpop.f32.mrb[44].mxu1 }
 0x235   : > { %v1893_v7 = vmax.f32 %v1877_v1, 0.0  ;;  %v1811_v9 = vmul.f32 %v3051_v44, %v1778_v4  ;;  %v1780_v13 = vpop.f32.mrb[45].mxu1 }
 0x236   : > { %v2254_v14 = vpack.c.bf16 %v1892_v2, %v1891_v0  ;;  %v1894_v15 = vmax.f32 %v1878_v3, 0.0  ;;  %v1812_v16 = vmul.f32 %v3054_v46, %v1780_v13  ;;  %v1782_v17 = vpop.f32.mrb[46].mxu1 }
 0x237   : > { %v1839_v18 = vadd.f32 %v3056_v47, %v1811_v9  ;;  %v1813_v5 = vmul.f32 %v3051_v44, %v1782_v17  ;;  %v1784_v10 = vpop.f32.mrb[47].mxu1 }
 0x238   : > { %1951 = vst [vmem:[%s3076_s10 + $0x20] sm:$0xff] %v2254_v14  ;;  %v2255_v20 = vpack.c.bf16 %v1894_v15, %v1893_v7  ;;  %v1840_v21 = vadd.f32 %v3058_v36, %v1812_v16  ;;  %v1814_v23 = vmul.f32 %v3054_v46, %v1784_v10 }
 0x239   : > { %v1879_v25 = vadd.f32 %v1863_v12, %v1839_v18  ;;  %v1841_v26 = vadd.f32 %v3056_v47, %v1813_v5 }
 0x23a   : > { %1952 = vst [vmem:[%s3076_s10 + $0x28] sm:$0xff] %v2255_v20  ;;  %v1880_v27 = vadd.f32 %v1864_v8, %v1840_v21  ;;  %v1842_v28 = vadd.f32 %v3058_v36, %v1814_v23 }
 0x23b   : > { %v1895_v29 = vmax.f32 %v1879_v25, 0.0  ;;  %v1881_v44 = vadd.f32 %v1865_v19, %v1841_v26 }
 0x23c   : > { %v1896_v30 = vmax.f32 %v1880_v27, 0.0  ;;  %v1882_v31 = vadd.f32 %v1866_v11, %v1842_v28 }
 0x23d   : > { %v1897_v32 = vmax.f32 %v1881_v44, 0.0 }
 0x23e   : > { %v2256_v22 = vpack.c.bf16 %v1896_v30, %v1895_v29  ;;  %v1898_v33 = vmax.f32 %v1882_v31, 0.0 }
 0x240   : > { %1953 = vst [vmem:[%s3076_s10 + $0x30] sm:$0xff] %v2256_v22  ;;  %v2257_v34 = vpack.c.bf16 %v1898_v33, %v1897_v32 }
 0x242   : > { %1954 = vst [vmem:[%s3076_s10 + $0x38] sm:$0xff] %v2257_v34 }
 0x243 PF: > { %s18_s29 = sadd.s32 1, %s2650_s29   ;;  %s3132_s27 = smov %s2646_s28 }
 0x244   : > { %p15_p5 = scmp.ge.s32.totalorder %s18_s29, 4   ;;  %s3133_s28 = smov %s3135_s30 }
 0x246   :  { %17 = sbr.rel (!%p15_p5) target bundleno = 2 (0x2), region = 98 }

// kernel: resnext50_encoder.36
= control target key start
LH: loop header
LB: loop body
LE: loop exit
PB: predicated region body
PF: predicated region fallthrough
CT: control target
= control target key end

     0   :  { %s992_s15 = smov 0   ;;  %s994_s16 = smov 0   ;;  %s1093_s0 = inlined_call_operand.vmem [shape: bf16[128,256], index: 0, kind: input, shape index: {}]   ;;  %s1094_s1 = inlined_call_operand.vmem [shape: bf16[256,128], index: 1, kind: input, shape index: {}]   ;;  %s1095_s2 = inlined_call_operand.vmem [shape: f32[1,128], index: 2, kind: input, shape index: {}]   ;;  %s1096_s3 = inlined_call_operand.vmem [shape: f32[1,128], index: 3, kind: input, shape index: {}]   ;;  %s1097_s4 = inlined_call_operand.vmem [shape: bf16[128,128], index: 4, kind: output, shape index: {}]  }
   0x1   :  { %s996_s17 = smov 0  }
   0x2 LB: > { %s33_s18 = sadd.s32 1, %s961_s16  ;;  %p761_p0 = scmp.ge.s32.totalorder %s965_s17, 1  ;;  %s965_s17 = sphi %s996_s17, %s14_s17   ;;  %s961_s16 = sphi %s994_s16, %s1099_s16   ;;  %s957_s15 = sphi %s992_s15, %s1098_s15  }
   0x3   : > { %p35_p1 = scmp.ge.s32.totalorder %s33_s18, 2  ;;  %p224_p2 = scmp.lt.s32.totalorder %s965_s17, 3 }
   0x5   : > { %s1101_s18 = smov (%p35_p1, %s33_s18), 0  ;;  %p225_p3 = pnand %p761_p0, %p224_p2 }
   0x6   : > { %v915_v0 = vld [vmem:[%s1094_s1 + $0x40] sm:$0xff] (!%p225_p3)   ;;  %s762_s21 = sshll.u32 (!%p225_p3), %s957_s15, 3  ;;  %v917_v2 = vld [vmem:[%s1094_s1 + $0x48] sm:$0xff] (!%p225_p3)   ;;  %v919_v4 = vld [vmem:[%s1094_s1 + $0x50] sm:$0xff] (!%p225_p3)  }
   0x7   : > { %228 = sbr.rel (%p225_p3) target bundleno = 274 (0x112), region = 36  ;;  %v916_v1 = vld [vmem:[%s1094_s1] sm:$0xff] (!%p225_p3)   ;;  %835 = vmatprep.subr.bf16.mxu0 (!%p225_p3), %v915_v0  ;;  %875 = vmatprep.subr.bf16.mxu1 (!%p225_p3), %v915_v0  ;;  %v918_v3 = vld [vmem:[%s1094_s1 + $0x8] sm:$0xff] (!%p225_p3)   ;;  %p274_p4 = scmp.lt.s32.totalorder (!%p225_p3), %s762_s21, 15  ;;  %v920_v5 = vld [vmem:[%s1094_s1 + $0x10] sm:$0xff] (!%p225_p3)  }
   0x8   : > { %836 = vmatpush3.bf16.msra.mxu0 (!%p225_p3), %v916_v1  ;;  %883 = vmatpush3.bf16.msra.mxu1 (!%p225_p3), %v916_v1  ;;  %v921_v6 = vld [vmem:[%s1094_s1 + $0x58] sm:$0xff] (!%p225_p3)   ;;  %v923_v8 = vld [vmem:[%s1094_s1 + $0x60] sm:$0xff] (!%p225_p3)   ;;  %v925_v10 = vld [vmem:[%s1094_s1 + $0x68] sm:$0xff] (!%p225_p3)  }
   0x9   : > { %837 = vmatprep.subr.bf16.mxu0 (!%p225_p3), %v917_v2  ;;  %876 = vmatprep.subr.bf16.mxu1 (!%p225_p3), %v917_v2  ;;  %v922_v7 = vld [vmem:[%s1094_s1 + $0x18] sm:$0xff] (!%p225_p3)   ;;  %v924_v9 = vld [vmem:[%s1094_s1 + $0x20] sm:$0xff] (!%p225_p3)   ;;  %v926_v13 = vld [vmem:[%s1094_s1 + $0x28] sm:$0xff] (!%p225_p3)  }
   0xa   : > { %v927_v14 = vld [vmem:[%s1094_s1 + $0x70] sm:$0xff] (!%p225_p3)   ;;  %v929_v16 = vld [vmem:[%s1094_s1 + $0x78] sm:$0xff] (!%p225_p3)   ;;  %v791_v27 = vld [vmem:[%s1095_s2] ss:$0 sm:$0xff] (!%p225_p3) }
   0xb   : > { %v928_v15 = vld [vmem:[%s1094_s1 + $0x30] sm:$0xff] (!%p225_p3)   ;;  %v930_v17 = vld [vmem:[%s1094_s1 + $0x38] sm:$0xff] (!%p225_p3)   ;;  %v792_v33 = vld [vmem:[%s1096_s3] ss:$0 sm:$0xff] (!%p225_p3) }
   0xc   : > { %838 = vmatpush3.bf16.msra.mxu0 (!%p225_p3), %v918_v3  ;;  %884 = vmatpush3.bf16.msra.mxu1 (!%p225_p3), %v918_v3 }
   0xd   : > { %839 = vmatprep.subr.bf16.mxu0 (!%p225_p3), %v919_v4  ;;  %877 = vmatprep.subr.bf16.mxu1 (!%p225_p3), %v919_v4 }
   0xe   : > { %s1103_s21 = smov (!%p274_p4, %s762_s21), 15 }
   0xf   : > { %s803_s10 = sshll.u32 %s1103_s21, 3  ;;  %s766_s12 = sshll.u32 %s1103_s21, 2 }
  0x10   : > { %840 = vmatpush3.bf16.msra.mxu0 %v920_v5  ;;  %885 = vmatpush3.bf16.msra.mxu1 %v920_v5  ;;  %s1043_s15 = scalar_lea.vmem %s1093_s0, %s803_s10 }
  0x11   : > { %841 = vmatprep.subr.bf16.mxu0 %v921_v6  ;;  %878 = vmatprep.subr.bf16.mxu1 %v921_v6  ;;  %v933_v11 = vld [vmem:[%s1043_s15 + $0x4] ss:$8 sps:$4 sm:$0xff]   ;;  %v931_v18 = vld [vmem:[%s1043_s15] ss:$8 sps:$4 sm:$0xff]   ;;  %v937_v20 = vld [vmem:[%s1043_s15 + $0x14] ss:$8 sps:$4 sm:$0xff]  }
  0x12   : > { %v936_v12 = vld [vmem:[%s1043_s15 + $0x24] ss:$8 sps:$4 sm:$0xff]   ;;  %517 = vmatprep.mubr.bf16.mxu0 %v933_v11  ;;  %v934_v19 = vld [vmem:[%s1043_s15 + $0x20] ss:$8 sps:$4 sm:$0xff]   ;;  %v939_v21 = vld [vmem:[%s1043_s15 + $0x34] ss:$8 sps:$4 sm:$0xff]  }
  0x13   : > { %533 = vmatprep.mubr.bf16.mxu1 %v936_v12  ;;  %v941_v22 = vld [vmem:[%s1043_s15 + $0x10] ss:$8 sps:$4 sm:$0xff]  }
  0x14   : > { %842 = vmatpush3.bf16.msra.mxu0 %v922_v7  ;;  %886 = vmatpush3.bf16.msra.mxu1 %v922_v7  ;;  %v942_v23 = vld [vmem:[%s1043_s15 + $0x30] ss:$8 sps:$4 sm:$0xff]   ;;  %s306_s15 = scalar_lea.vmem %s1097_s4, %s766_s12 }
  0x15   : > { %843 = vmatprep.subr.bf16.mxu0 %v923_v8  ;;  %879 = vmatprep.subr.bf16.mxu1 %v923_v8 }
  0x18   : > { %844 = vmatpush3.bf16.msra.mxu0 %v924_v9  ;;  %887 = vmatpush3.bf16.msra.mxu1 %v924_v9 }
  0x19   : > { %845 = vmatprep.subr.bf16.mxu0 %v925_v10  ;;  %880 = vmatprep.subr.bf16.mxu1 %v925_v10 }
  0x1c   : > { %846 = vmatpush3.bf16.msra.mxu0 %v926_v13  ;;  %888 = vmatpush3.bf16.msra.mxu1 %v926_v13 }
  0x1d   : > { %847 = vmatprep.subr.bf16.mxu0 %v927_v14  ;;  %881 = vmatprep.subr.bf16.mxu1 %v927_v14 }
  0x20   : > { %848 = vmatpush3.bf16.msra.mxu0 %v928_v15  ;;  %889 = vmatpush3.bf16.msra.mxu1 %v928_v15 }
  0x21   : > { %849 = vmatprep.subr.bf16.mxu0 %v929_v16  ;;  %882 = vmatprep.subr.bf16.mxu1 %v929_v16 }
  0x24   : > { %850 = vmatpush3.bf16.msra.mxu0 %v930_v17  ;;  %890 = vmatpush3.bf16.msra.mxu1 %v930_v17 }
  0x27   : > { %518 = vmatmul.mubr.bf16.vlgmr.msra.gmra.mrb[0].mxu0 %v931_v18  ;;  %534 = vmatmul.mubr.bf16.vlgmr.msra.gmra.mrb[0].mxu1 %v934_v19 }
  0x28   : > { %525 = vmatprep.mubr.bf16.mxu0 %v937_v20  ;;  %541 = vmatprep.mubr.bf16.mxu1 %v939_v21 }
  0x2f   : > { %526 = vmatmul.mubr.bf16.gmra.mrb[4].mxu0 %v941_v22  ;;  %542 = vmatmul.mubr.bf16.gmra.mrb[4].mxu1 %v942_v23 }
  0xfa   : > { %v851_v24 = vpop.f32.mrb[0].mxu0  ;;  %v863_v25 = vpop.f32.mrb[0].mxu1 }
  0xfb   : > { %v852_v26 = vpop.f32.mrb[1].mxu0  ;;  %v864_v28 = vpop.f32.mrb[1].mxu1 }
  0xfc   : > { %v853_v29 = vadd.f32 %v852_v26, %v851_v24  ;;  %v865_v30 = vadd.f32 %v864_v28, %v863_v25  ;;  %v854_v31 = vpop.f32.mrb[2].mxu0  ;;  %v866_v32 = vpop.f32.mrb[2].mxu1 }
  0xfd   : > { %v855_v34 = vpop.f32.mrb[3].mxu0  ;;  %v867_v35 = vpop.f32.mrb[3].mxu1 }
  0xfe   : > { %v557_v36 = vmul.f32 %v853_v29, %v791_v27  ;;  %v561_v37 = vmul.f32 %v865_v30, %v791_v27  ;;  %v856_v38 = vadd.f32 %v855_v34, %v854_v31  ;;  %v868_v39 = vadd.f32 %v867_v35, %v866_v32 }
 0x100   : > { %v572_v40 = vadd.f32 %v792_v33, %v557_v36  ;;  %v576_v41 = vadd.f32 %v792_v33, %v561_v37  ;;  %v558_v42 = vmul.f32 %v856_v38, %v791_v27  ;;  %v562_v43 = vmul.f32 %v868_v39, %v791_v27 }
 0x102   : > { %v573_v44 = vadd.f32 %v792_v33, %v558_v42  ;;  %v577_v45 = vadd.f32 %v792_v33, %v562_v43  ;;  %v857_v46 = vpop.f32.mrb[4].mxu0  ;;  %v869_v47 = vpop.f32.mrb[4].mxu1  ;;  %v580_v48 = vmax.f32 %v572_v40, 0.0  ;;  %v584_v49 = vmax.f32 %v576_v41, 0.0 }
 0x103   : > { %v858_v50 = vpop.f32.mrb[5].mxu0  ;;  %v870_v51 = vpop.f32.mrb[5].mxu1 }
 0x104   : > { %v581_v52 = vmax.f32 %v573_v44, 0.0  ;;  %v585_v53 = vmax.f32 %v577_v45, 0.0  ;;  %v859_v54 = vadd.f32 %v858_v50, %v857_v46  ;;  %v871_v55 = vadd.f32 %v870_v51, %v869_v47  ;;  %v860_v56 = vpop.f32.mrb[6].mxu0  ;;  %v872_v57 = vpop.f32.mrb[6].mxu1 }
 0x105   : > { %v861_v58 = vpop.f32.mrb[7].mxu0  ;;  %v873_v59 = vpop.f32.mrb[7].mxu1 }
 0x106   : > { %v815_v60 = vpack.c.bf16 %v581_v52, %v580_v48  ;;  %v825_v61 = vpack.c.bf16 %v585_v53, %v584_v49  ;;  %v559_v62 = vmul.f32 %v859_v54, %v791_v27  ;;  %v563_v63 = vmul.f32 %v871_v55, %v791_v27 }
 0x107   : > { %v862_v0 = vadd.f32 %v861_v58, %v860_v56  ;;  %v874_v1 = vadd.f32 %v873_v59, %v872_v57 }
 0x108   : > { %816 = vst [vmem:[%s306_s15] sm:$0xff] %v815_v60   ;;  %833 = vst [vmem:[%s306_s15 + $0x10] sm:$0xff] %v825_v61   ;;  %v574_v2 = vadd.f32 %v792_v33, %v559_v62  ;;  %v578_v3 = vadd.f32 %v792_v33, %v563_v63 }
 0x109   : > { %v560_v4 = vmul.f32 %v862_v0, %v791_v27  ;;  %v564_v5 = vmul.f32 %v874_v1, %v791_v27 }
 0x10a   : > { %v582_v8 = vmax.f32 %v574_v2, 0.0  ;;  %v586_v9 = vmax.f32 %v578_v3, 0.0 }
 0x10b   : > { %v575_v6 = vadd.f32 %v792_v33, %v560_v4  ;;  %v579_v7 = vadd.f32 %v792_v33, %v564_v5 }
 0x10d   : > { %v583_v10 = vmax.f32 %v575_v6, 0.0  ;;  %v587_v11 = vmax.f32 %v579_v7, 0.0 }
 0x10f   : > { %v820_v12 = vpack.c.bf16 %v583_v10, %v582_v8  ;;  %v830_v13 = vpack.c.bf16 %v587_v11, %v586_v9 }
 0x111   : > { %832 = vst [vmem:[%s306_s15 + $0x8] sm:$0xff] %v820_v12   ;;  %834 = vst [vmem:[%s306_s15 + $0x18] sm:$0xff] %v830_v13  }
 0x112 PF: > { %s14_s17 = sadd.s32 1, %s965_s17   ;;  %s1098_s15 = smov %s961_s16 }
 0x113   : > { %p11_p5 = scmp.ge.s32.totalorder %s14_s17, 4   ;;  %s1099_s16 = smov %s1101_s18 }
 0x115   :  { %13 = sbr.rel (!%p11_p5) target bundleno = 2 (0x2), region = 75 }

// kernel: resnext50_encoder.40
= control target key start
LH: loop header
LB: loop body
LE: loop exit
PB: predicated region body
PF: predicated region fallthrough
CT: control target
= control target key end

     0   :  { %s1149_s15 = smov 0   ;;  %s1151_s16 = smov 0   ;;  %s1344_s0 = inlined_call_operand.vmem [shape: bf16[128,256], index: 0, kind: input, shape index: {}]   ;;  %s1345_s1 = inlined_call_operand.vmem [shape: bf16[256,256], index: 1, kind: input, shape index: {}]   ;;  %s1346_s2 = inlined_call_operand.vmem [shape: f32[1,256], index: 2, kind: input, shape index: {}]   ;;  %s1347_s3 = inlined_call_operand.vmem [shape: f32[1,256], index: 3, kind: input, shape index: {}]   ;;  %s1348_s4 = inlined_call_operand.vmem [shape: bf16[128,256], index: 4, kind: output, shape index: {}]  }
   0x1   :  { %s1153_s17 = smov 0  }
   0x2 LB: > { %s33_s18 = sadd.s32 1, %s1118_s16  ;;  %p917_p0 = scmp.ge.s32.totalorder %s1122_s17, 1  ;;  %s1122_s17 = sphi %s1153_s17, %s14_s17   ;;  %s1118_s16 = sphi %s1151_s16, %s1350_s16   ;;  %s1114_s15 = sphi %s1149_s15, %s1349_s15  }
   0x3   : > { %p35_p1 = scmp.ge.s32.totalorder %s33_s18, 2  ;;  %p231_p2 = scmp.lt.s32.totalorder %s1122_s17, 3 }
   0x5   : > { %s1352_s18 = smov (%p35_p1, %s33_s18), 0  ;;  %p232_p3 = pnand %p917_p0, %p231_p2 }
   0x6   : > { %v1040_v0 = vld [vmem:[%s1345_s1 + $0x4] ss:$8 sps:$4 sm:$0xff] (!%p232_p3)   ;;  %v1042_v1 = vld [vmem:[%s1345_s1] ss:$8 sps:$4 sm:$0xff] (!%p232_p3)   ;;  %v1043_v2 = vld [vmem:[%s1345_s1 + $0x14] ss:$8 sps:$4 sm:$0xff] (!%p232_p3)   ;;  %v646_v40 = vlaneseq (!%p232_p3) }
   0x7   : > { %235 = sbr.rel (%p232_p3) target bundleno = 304 (0x130), region = 36  ;;  %571 = vmatprep.subr.bf16.mxu0 (!%p232_p3), %v1040_v0  ;;  %984 = vmatprep.subr.bf16.mxu1 (!%p232_p3), %v1040_v0  ;;  %v1045_v3 = vld [vmem:[%s1345_s1 + $0x10] ss:$8 sps:$4 sm:$0xff] (!%p232_p3)   ;;  %v1046_v4 = vld [vmem:[%s1345_s1 + $0x24] ss:$8 sps:$4 sm:$0xff] (!%p232_p3)   ;;  %s918_s29 = sshll.u32 (!%p232_p3), %s1114_s15, 3 }
   0x8   : > { %572 = vmatpush1.bf16.msra.mxu0 (!%p232_p3), %v1042_v1  ;;  %1000 = vmatpush1.bf16.msra.mxu1 (!%p232_p3), %v1042_v1  ;;  %v1048_v5 = vld [vmem:[%s1345_s1 + $0x20] ss:$8 sps:$4 sm:$0xff] (!%p232_p3)   ;;  %v1049_v6 = vld [vmem:[%s1345_s1 + $0x34] ss:$8 sps:$4 sm:$0xff] (!%p232_p3)   ;;  %p287_p4 = scmp.lt.s32.totalorder (!%p232_p3), %s918_s29, 15  ;;  %v647_v41 = vshrl.u32 (!%p232_p3), %v646_v40, 7 }
   0x9   : > { %573 = vmatprep.subr.bf16.mxu0 (!%p232_p3), %v1043_v2  ;;  %985 = vmatprep.subr.bf16.mxu1 (!%p232_p3), %v1043_v2  ;;  %v1051_v7 = vld [vmem:[%s1345_s1 + $0x30] ss:$8 sps:$4 sm:$0xff] (!%p232_p3)   ;;  %v1052_v8 = vld [vmem:[%s1345_s1 + $0x44] ss:$8 sps:$4 sm:$0xff] (!%p232_p3)   ;;  %v1054_v9 = vld [vmem:[%s1345_s1 + $0x40] ss:$8 sps:$4 sm:$0xff] (!%p232_p3)  }
   0xa   : > { %v1055_v10 = vld [vmem:[%s1345_s1 + $0x54] ss:$8 sps:$4 sm:$0xff] (!%p232_p3)   ;;  %v1057_v11 = vld [vmem:[%s1345_s1 + $0x50] ss:$8 sps:$4 sm:$0xff] (!%p232_p3)   ;;  %v1058_v12 = vld [vmem:[%s1345_s1 + $0x64] ss:$8 sps:$4 sm:$0xff] (!%p232_p3)  }
   0xb   : > { %v1060_v14 = vld [vmem:[%s1345_s1 + $0x60] ss:$8 sps:$4 sm:$0xff] (!%p232_p3)   ;;  %v1061_v16 = vld [vmem:[%s1345_s1 + $0x74] ss:$8 sps:$4 sm:$0xff] (!%p232_p3)   ;;  %v1063_v17 = vld [vmem:[%s1345_s1 + $0x70] ss:$8 sps:$4 sm:$0xff] (!%p232_p3)  }
   0xc   : > { %574 = vmatpush1.bf16.msra.mxu0 (!%p232_p3), %v1045_v3  ;;  %1001 = vmatpush1.bf16.msra.mxu1 (!%p232_p3), %v1045_v3  ;;  %v1064_v18 = vld [vmem:[%s1345_s1 + $0x84] ss:$8 sps:$4 sm:$0xff] (!%p232_p3)   ;;  %v1066_v19 = vld [vmem:[%s1345_s1 + $0x80] ss:$8 sps:$4 sm:$0xff] (!%p232_p3)   ;;  %v1067_v20 = vld [vmem:[%s1345_s1 + $0x94] ss:$8 sps:$4 sm:$0xff] (!%p232_p3)  }
   0xd   : > { %575 = vmatprep.subr.bf16.mxu0 (!%p232_p3), %v1046_v4  ;;  %986 = vmatprep.subr.bf16.mxu1 (!%p232_p3), %v1046_v4  ;;  %v1069_v21 = vld [vmem:[%s1345_s1 + $0x90] ss:$8 sps:$4 sm:$0xff] (!%p232_p3)   ;;  %v1070_v22 = vld [vmem:[%s1345_s1 + $0xa4] ss:$8 sps:$4 sm:$0xff] (!%p232_p3)   ;;  %v1072_v23 = vld [vmem:[%s1345_s1 + $0xa0] ss:$8 sps:$4 sm:$0xff] (!%p232_p3)  }
   0xe   : > { %s1354_s29 = smov (!%p287_p4, %s918_s29), 15  ;;  %v1073_v24 = vld [vmem:[%s1345_s1 + $0xb4] ss:$8 sps:$4 sm:$0xff]   ;;  %v1075_v25 = vld [vmem:[%s1345_s1 + $0xb0] ss:$8 sps:$4 sm:$0xff]   ;;  %v648_v42 = vsub.s32 0, %v647_v41 }
   0xf   : > { %s974_s19 = sshll.u32 %s1354_s29, 3  ;;  %v1076_v26 = vld [vmem:[%s1345_s1 + $0xc4] ss:$8 sps:$4 sm:$0xff]   ;;  %v1078_v27 = vld [vmem:[%s1345_s1 + $0xc0] ss:$8 sps:$4 sm:$0xff]   ;;  %v652_v44 = vsub.s32 1, %v647_v41 }
  0x10   : > { %576 = vmatpush1.bf16.msra.mxu0 %v1048_v5  ;;  %1002 = vmatpush1.bf16.msra.mxu1 %v1048_v5  ;;  %s1214_s24 = scalar_lea.vmem %s1344_s0, %s974_s19  ;;  %v1079_v28 = vld [vmem:[%s1345_s1 + $0xd4] ss:$8 sps:$4 sm:$0xff]   ;;  %v1081_v29 = vld [vmem:[%s1345_s1 + $0xd0] ss:$8 sps:$4 sm:$0xff]   ;;  %v1082_v30 = vld [vmem:[%s1345_s1 + $0xe4] ss:$8 sps:$4 sm:$0xff]   ;;  %s1313_s5 = scalar_lea.vmem %s1348_s4, %s974_s19 }
  0x11   : > { %577 = vmatprep.subr.bf16.mxu0 %v1049_v6  ;;  %987 = vmatprep.subr.bf16.mxu1 %v1049_v6  ;;  %v1090_v13 = vld [vmem:[%s1214_s24 + $0x4] ss:$8 sps:$4 sm:$0xff]   ;;  %v1084_v31 = vld [vmem:[%s1345_s1 + $0xe0] ss:$8 sps:$4 sm:$0xff]   ;;  %v1085_v32 = vld [vmem:[%s1345_s1 + $0xf4] ss:$8 sps:$4 sm:$0xff]  }
  0x12   : > { %v1093_v15 = vld [vmem:[%s1214_s24 + $0x24] ss:$8 sps:$4 sm:$0xff]   ;;  %603 = vmatprep.mubr.bf16.mxu0 %v1090_v13  ;;  %v1087_v33 = vld [vmem:[%s1345_s1 + $0xf0] ss:$8 sps:$4 sm:$0xff]   ;;  %v1088_v34 = vld [vmem:[%s1214_s24] ss:$8 sps:$4 sm:$0xff]  }
  0x13   : > { %623 = vmatprep.mubr.bf16.mxu1 %v1093_v15  ;;  %v1091_v35 = vld [vmem:[%s1214_s24 + $0x20] ss:$8 sps:$4 sm:$0xff]   ;;  %v1094_v36 = vld [vmem:[%s1214_s24 + $0x14] ss:$8 sps:$4 sm:$0xff]   ;;  %v1098_v38 = vld [vmem:[%s1214_s24 + $0x10] ss:$8 sps:$4 sm:$0xff]  }
  0x14   : > { %578 = vmatpush1.bf16.msra.mxu0 %v1051_v7  ;;  %1003 = vmatpush1.bf16.msra.mxu1 %v1051_v7  ;;  %v1096_v37 = vld [vmem:[%s1214_s24 + $0x34] ss:$8 sps:$4 sm:$0xff]   ;;  %v1099_v39 = vld [vmem:[%s1214_s24 + $0x30] ss:$8 sps:$4 sm:$0xff]   ;;  %v644_v43 = vld [vmem:[%s1346_s2] sm:$0x3] }
  0x15   : > { %579 = vmatprep.subr.bf16.mxu0 %v1052_v8  ;;  %988 = vmatprep.subr.bf16.mxu1 %v1052_v8  ;;  %v672_v45 = vld [vmem:[%s1347_s3] sm:$0x3]  ;;  %v649_v46 = vrot.slane %v644_v43, %v648_v42  ;;  %v1290_v47 = vrot.slane %v644_v43, %v652_v44 }
  0x16   : > { %v1292_v48 = vrot.slane %v672_v45, %v648_v42  ;;  %v1294_v51 = vrot.slane %v672_v45, %v652_v44 }
  0x18   : > { %580 = vmatpush1.bf16.msra.mxu0 %v1054_v9  ;;  %1004 = vmatpush1.bf16.msra.mxu1 %v1054_v9 }
  0x19   : > { %581 = vmatprep.subr.bf16.mxu0 %v1055_v10  ;;  %989 = vmatprep.subr.bf16.mxu1 %v1055_v10 }
  0x1c   : > { %582 = vmatpush1.bf16.msra.mxu0 %v1057_v11  ;;  %1005 = vmatpush1.bf16.msra.mxu1 %v1057_v11 }
  0x1d   : > { %583 = vmatprep.subr.bf16.mxu0 %v1058_v12  ;;  %990 = vmatprep.subr.bf16.mxu1 %v1058_v12 }
  0x20   : > { %584 = vmatpush1.bf16.msra.mxu0 %v1060_v14  ;;  %1006 = vmatpush1.bf16.msra.mxu1 %v1060_v14 }
  0x21   : > { %585 = vmatprep.subr.bf16.mxu0 %v1061_v16  ;;  %991 = vmatprep.subr.bf16.mxu1 %v1061_v16 }
  0x24   : > { %586 = vmatpush1.bf16.msra.mxu0 %v1063_v17  ;;  %1007 = vmatpush1.bf16.msra.mxu1 %v1063_v17 }
  0x25   : > { %587 = vmatprep.subr.bf16.mxu0 %v1064_v18  ;;  %992 = vmatprep.subr.bf16.mxu1 %v1064_v18 }
  0x28   : > { %588 = vmatpush1.bf16.msra.mxu0 %v1066_v19  ;;  %1008 = vmatpush1.bf16.msra.mxu1 %v1066_v19 }
  0x29   : > { %589 = vmatprep.subr.bf16.mxu0 %v1067_v20  ;;  %993 = vmatprep.subr.bf16.mxu1 %v1067_v20 }
  0x2c   : > { %590 = vmatpush1.bf16.msra.mxu0 %v1069_v21  ;;  %1009 = vmatpush1.bf16.msra.mxu1 %v1069_v21 }
  0x2d   : > { %591 = vmatprep.subr.bf16.mxu0 %v1070_v22  ;;  %994 = vmatprep.subr.bf16.mxu1 %v1070_v22 }
  0x30   : > { %592 = vmatpush1.bf16.msra.mxu0 %v1072_v23  ;;  %1010 = vmatpush1.bf16.msra.mxu1 %v1072_v23 }
  0x31   : > { %593 = vmatprep.subr.bf16.mxu0 %v1073_v24  ;;  %995 = vmatprep.subr.bf16.mxu1 %v1073_v24 }
  0x34   : > { %594 = vmatpush1.bf16.msra.mxu0 %v1075_v25  ;;  %1011 = vmatpush1.bf16.msra.mxu1 %v1075_v25 }
  0x35   : > { %595 = vmatprep.subr.bf16.mxu0 %v1076_v26  ;;  %996 = vmatprep.subr.bf16.mxu1 %v1076_v26 }
  0x38   : > { %596 = vmatpush1.bf16.msra.mxu0 %v1078_v27  ;;  %1012 = vmatpush1.bf16.msra.mxu1 %v1078_v27 }
  0x39   : > { %597 = vmatprep.subr.bf16.mxu0 %v1079_v28  ;;  %997 = vmatprep.subr.bf16.mxu1 %v1079_v28 }
  0x3c   : > { %598 = vmatpush1.bf16.msra.mxu0 %v1081_v29  ;;  %1013 = vmatpush1.bf16.msra.mxu1 %v1081_v29 }
  0x3d   : > { %599 = vmatprep.subr.bf16.mxu0 %v1082_v30  ;;  %998 = vmatprep.subr.bf16.mxu1 %v1082_v30 }
  0x40   : > { %600 = vmatpush1.bf16.msra.mxu0 %v1084_v31  ;;  %1014 = vmatpush1.bf16.msra.mxu1 %v1084_v31 }
  0x41   : > { %601 = vmatprep.subr.bf16.mxu0 %v1085_v32  ;;  %999 = vmatprep.subr.bf16.mxu1 %v1085_v32 }
  0x44   : > { %602 = vmatpush1.bf16.msra.mxu0 %v1087_v33  ;;  %1015 = vmatpush1.bf16.msra.mxu1 %v1087_v33 }
  0x47   : > { %604 = vmatmul.mubr.bf16.vlgmr.msra.gmra.mrb[0].mxu0 %v1088_v34  ;;  %624 = vmatmul.mubr.bf16.vlgmr.msra.gmra.mrb[0].mxu1 %v1091_v35 }
  0x48   : > { %613 = vmatprep.mubr.bf16.mxu0 %v1094_v36  ;;  %633 = vmatprep.mubr.bf16.mxu1 %v1096_v37 }
  0x4f   : > { %614 = vmatmul.mubr.bf16.gmra.mrb[4].mxu0 %v1098_v38  ;;  %634 = vmatmul.mubr.bf16.gmra.mrb[4].mxu1 %v1099_v39 }
 0x11a   : > { %v605_v49 = vpop.f32.mrb[0].mxu0  ;;  %v625_v50 = vpop.f32.mrb[0].mxu1 }
 0x11b   : > { %v656_v52 = vmul.f32 %v649_v46, %v605_v49  ;;  %v664_v53 = vmul.f32 %v649_v46, %v625_v50  ;;  %v607_v54 = vpop.f32.mrb[1].mxu0  ;;  %v627_v55 = vpop.f32.mrb[1].mxu1 }
 0x11c   : > { %v657_v56 = vmul.f32 %v1290_v47, %v607_v54  ;;  %v665_v57 = vmul.f32 %v1290_v47, %v627_v55  ;;  %v609_v58 = vpop.f32.mrb[2].mxu0  ;;  %v629_v59 = vpop.f32.mrb[2].mxu1 }
 0x11d   : > { %v684_v60 = vadd.f32 %v1292_v48, %v656_v52  ;;  %v692_v61 = vadd.f32 %v1292_v48, %v664_v53  ;;  %v658_v62 = vmul.f32 %v649_v46, %v609_v58  ;;  %v666_v63 = vmul.f32 %v649_v46, %v629_v59  ;;  %v611_v0 = vpop.f32.mrb[3].mxu0  ;;  %v631_v1 = vpop.f32.mrb[3].mxu1 }
 0x11e   : > { %v685_v2 = vadd.f32 %v1294_v51, %v657_v56  ;;  %v693_v3 = vadd.f32 %v1294_v51, %v665_v57  ;;  %v659_v4 = vmul.f32 %v1290_v47, %v611_v0  ;;  %v667_v5 = vmul.f32 %v1290_v47, %v631_v1 }
 0x11f   : > { %v700_v6 = vmax.f32 %v684_v60, 0.0  ;;  %v708_v7 = vmax.f32 %v692_v61, 0.0  ;;  %v686_v8 = vadd.f32 %v1292_v48, %v658_v62  ;;  %v694_v9 = vadd.f32 %v1292_v48, %v666_v63 }
 0x120   : > { %v701_v10 = vmax.f32 %v685_v2, 0.0  ;;  %v709_v11 = vmax.f32 %v693_v3, 0.0  ;;  %v687_v12 = vadd.f32 %v1294_v51, %v659_v4  ;;  %v695_v13 = vadd.f32 %v1294_v51, %v667_v5 }
 0x121   : > { %v702_v14 = vmax.f32 %v686_v8, 0.0  ;;  %v710_v15 = vmax.f32 %v694_v9, 0.0 }
 0x122   : > { %v976_v16 = vpack.c.bf16 %v701_v10, %v700_v6  ;;  %v980_v17 = vpack.c.bf16 %v709_v11, %v708_v7  ;;  %v703_v18 = vmax.f32 %v687_v12, 0.0  ;;  %v711_v19 = vmax.f32 %v695_v13, 0.0  ;;  %v615_v20 = vpop.f32.mrb[4].mxu0  ;;  %v635_v21 = vpop.f32.mrb[4].mxu1 }
 0x123   : > { %v660_v22 = vmul.f32 %v649_v46, %v615_v20  ;;  %v668_v23 = vmul.f32 %v649_v46, %v635_v21  ;;  %v617_v24 = vpop.f32.mrb[5].mxu0  ;;  %v637_v25 = vpop.f32.mrb[5].mxu1 }
 0x124   : > { %764 = vst [vmem:[%s1313_s5] sm:$0xff] %v976_v16  ;;  %768 = vst [vmem:[%s1313_s5 + $0x20] sm:$0xff] %v980_v17  ;;  %v977_v26 = vpack.c.bf16 %v703_v18, %v702_v14  ;;  %v981_v27 = vpack.c.bf16 %v711_v19, %v710_v15  ;;  %v661_v28 = vmul.f32 %v1290_v47, %v617_v24  ;;  %v619_v30 = vpop.f32.mrb[6].mxu0  ;;  %v639_v31 = vpop.f32.mrb[6].mxu1 }
 0x125   : > { %v669_v29 = vmul.f32 %v1290_v47, %v637_v25  ;;  %v688_v32 = vadd.f32 %v1292_v48, %v660_v22  ;;  %v696_v33 = vadd.f32 %v1292_v48, %v668_v23  ;;  %v662_v34 = vmul.f32 %v649_v46, %v619_v30  ;;  %v621_v36 = vpop.f32.mrb[7].mxu0  ;;  %v641_v37 = vpop.f32.mrb[7].mxu1 }
 0x126   : > { %v670_v35 = vmul.f32 %v649_v46, %v639_v31  ;;  %765 = vst [vmem:[%s1313_s5 + $0x8] sm:$0xff] %v977_v26  ;;  %769 = vst [vmem:[%s1313_s5 + $0x28] sm:$0xff] %v981_v27  ;;  %v689_v38 = vadd.f32 %v1294_v51, %v661_v28  ;;  %v663_v40 = vmul.f32 %v1290_v47, %v621_v36 }
 0x127   : > { %v697_v39 = vadd.f32 %v1294_v51, %v669_v29  ;;  %v671_v41 = vmul.f32 %v1290_v47, %v641_v37  ;;  %v704_v42 = vmax.f32 %v688_v32, 0.0  ;;  %v712_v43 = vmax.f32 %v696_v33, 0.0 }
 0x128   : > { %v690_v44 = vadd.f32 %v1292_v48, %v662_v34  ;;  %v698_v45 = vadd.f32 %v1292_v48, %v670_v35  ;;  %v705_v46 = vmax.f32 %v689_v38, 0.0  ;;  %v691_v50 = vadd.f32 %v1294_v51, %v663_v40 }
 0x129   : > { %v713_v49 = vmax.f32 %v697_v39, 0.0  ;;  %v699_v52 = vadd.f32 %v1294_v51, %v671_v41 }
 0x12a   : > { %v706_v53 = vmax.f32 %v690_v44, 0.0  ;;  %v714_v54 = vmax.f32 %v698_v45, 0.0  ;;  %v978_v55 = vpack.c.bf16 %v705_v46, %v704_v42  ;;  %v707_v47 = vmax.f32 %v691_v50, 0.0 }
 0x12b   : > { %v982_v56 = vpack.c.bf16 %v713_v49, %v712_v43  ;;  %v715_v57 = vmax.f32 %v699_v52, 0.0 }
 0x12c   : > { %766 = vst [vmem:[%s1313_s5 + $0x10] sm:$0xff] %v978_v55  ;;  %v979_v58 = vpack.c.bf16 %v707_v47, %v706_v53 }
 0x12d   : > { %770 = vst [vmem:[%s1313_s5 + $0x30] sm:$0xff] %v982_v56  ;;  %v983_v59 = vpack.c.bf16 %v715_v57, %v714_v54 }
 0x12e   : > { %767 = vst [vmem:[%s1313_s5 + $0x18] sm:$0xff] %v979_v58 }
 0x12f   : > { %771 = vst [vmem:[%s1313_s5 + $0x38] sm:$0xff] %v983_v59 }
 0x130 PF: > { %s14_s17 = sadd.s32 1, %s1122_s17   ;;  %s1349_s15 = smov %s1118_s16 }
 0x131   : > { %p11_p5 = scmp.ge.s32.totalorder %s14_s17, 4   ;;  %s1350_s16 = smov %s1352_s18 }
 0x133   :  { %13 = sbr.rel (!%p11_p5) target bundleno = 2 (0x2), region = 75 }

// kernel: resnext50_encoder.41
= control target key start
LH: loop header
LB: loop body
LE: loop exit
PB: predicated region body
PF: predicated region fallthrough
CT: control target
= control target key end

     0   :  { %s1198_s15 = smov 0   ;;  %s1200_s16 = smov 0   ;;  %s1437_s0 = inlined_call_operand.vmem [shape: bf16[32,256], index: 0, kind: input, shape index: {}]   ;;  %s1438_s1 = inlined_call_operand.vmem [shape: bf16[256,512], index: 1, kind: input, shape index: {}]   ;;  %s1439_s2 = inlined_call_operand.vmem [shape: f32[1,512], index: 2, kind: input, shape index: {}]   ;;  %s1440_s3 = inlined_call_operand.vmem [shape: f32[1,512], index: 3, kind: input, shape index: {}]   ;;  %s1441_s4 = inlined_call_operand.vmem [shape: bf16[32,512], index: 4, kind: output, shape index: {}]  }
   0x1   :  { %s1202_s17 = smov 0   ;;  %s1204_s18 = smov 0  }
   0x2   :  { %s1206_s19 = smov 0   ;;  %s1208_s20 = smov 0  }
   0x3   :  { %s1210_s21 = smov 0   ;;  %s1212_s22 = smov 0  }
   0x4   :  { %s1214_s23 = smov 0  }
   0x5 LB: > { %s915_s24 = sadd.s32 4294967295, %s1171_s23   ;;  %s29_s25 = sadd.s32 1, %s1163_s21  ;;  %s1171_s23 = sphi %s1214_s23, %s14_s23   ;;  %s1167_s22 = sphi %s1212_s22, %s1450_s22   ;;  %s1163_s21 = sphi %s1210_s21, %s1449_s21   ;;  %s1159_s20 = sphi %s1208_s20, %s1448_s20   ;;  %s1155_s19 = sphi %s1206_s19, %s1447_s19   ;;  %s1151_s18 = sphi %s1204_s18, %s1446_s18   ;;  %s1147_s17 = sphi %s1202_s17, %s1445_s17   ;;  %s1143_s16 = sphi %s1200_s16, %s1444_s16   ;;  %s1139_s15 = sphi %s1198_s15, %s1443_s15  }
   0x6   : > { %p31_p0 = scmp.ge.s32.totalorder %s29_s25, 2  ;;  %s33_s26 = sadd.s32 1, %s1167_s22 }
   0x7   : > { %s70_s27 = sadd.s32 1, %s1151_s18  ;;  %p77_p1 = scmp.ne.s32.totalorder %s1151_s18, %s1147_s17 }
   0x8   : > { %s1452_s25 = smov (%p31_p0, %s29_s25), 0  ;;  %s1454_s26 = smov (!%p31_p0, %s33_s26), %s1167_s22 }
   0x9   : > { %s66_s28 = ssub.s32 %s1163_s21, %s1452_s25  ;;  %p78_p2 = scmp.eq.s32.totalorder %s1171_s23, 0 }
   0xa   : > { %p35_p3 = scmp.ge.s32.totalorder %s1454_s26, 2  ;;  %p68_p4 = scmp.eq.s32.totalorder %s66_s28, 0 }
   0xb   : > { %p79_p5 = por %p78_p2, %p77_p1  ;;  %s150_s29 = sadd.s32 1, %s1143_s16 }
   0xc   : > { %s1456_s26 = smov (%p35_p3, %s1454_s26), 0  ;;  %p160_p6 = scmp.ne.s32.totalorder %s1143_s16, %s1139_s15 }
   0xd   : > { %s1259_s30 = scalar_select %p68_p4, %s1151_s18, %s70_s27  }
   0xe   : > { %s145_s5 = ssub.s32 %s1167_s22, %s1456_s26  ;;  %p161_p7 = scmp.eq.s32.totalorder %s915_s24, 3 }
   0xf   : > { %s147_s6 = sor.u32 %s145_s5, %s66_s28  ;;  %p918_p10 = scmp.ge.s32.totalorder %s1171_s23, 4 }
  0x10   : > { %p148_p8 = scmp.eq.s32.totalorder %s147_s6, 0  ;;  %p1265_p9 = por %p161_p7, %p160_p6 }
  0x11   : > { %183 = sbr.rel (%p918_p10) target bundleno = 44 (0x2c), region = 16 }
  0x12   : > { %s1270_s8 = scalar_select %p148_p8, %s1143_s16, %s150_s29  }
  0x18   : > { %201 = sbr.rel (!%p79_p5) target bundleno = 44 (0x2c), region = 24  ;;  %s203_s9 = sand.u32 (%p79_p5), 1, %s1151_s18  }
  0x19   : > { %s973_s10 = sshll.u32 (%p79_p5), %s1163_s21, 3  ;;  %s919_s11 = sshll.u32 (%p79_p5), %s203_s9, 8 }
  0x1a   : > { %s1278_s14 = scalar_lea.vmem (%p79_p5), %s1438_s1, %s973_s10  ;;  %s1283_s24 = scalar_lea.vmem (%p79_p5), [#allocation2], %s919_s11 }
  0x1b   : > { %v301_v0 = vld [vmem:[%s1278_s14] sm:$0xff] (%p79_p5)  ;;  %v303_v1 = vld [vmem:[%s1278_s14 + $0x10] sm:$0xff] (%p79_p5) }
  0x1c   : > { %v305_v2 = vld [vmem:[%s1278_s14 + $0x20] sm:$0xff] (%p79_p5)  ;;  %302 = vst [vmem:[%s1283_s24] sm:$0xff] (%p79_p5), %v301_v0  ;;  %304 = vst [vmem:[%s1283_s24 + $0x8] sm:$0xff] (%p79_p5), %v303_v1  ;;  %v307_v3 = vld [vmem:[%s1278_s14 + $0x30] sm:$0xff] (%p79_p5) }
  0x1d   : > { %306 = vst [vmem:[%s1283_s24 + $0x10] sm:$0xff] (%p79_p5), %v305_v2  ;;  %v309_v4 = vld [vmem:[%s1278_s14 + $0x40] sm:$0xff] (%p79_p5)  ;;  %v311_v5 = vld [vmem:[%s1278_s14 + $0x50] sm:$0xff] (%p79_p5)  ;;  %308 = vst [vmem:[%s1283_s24 + $0x18] sm:$0xff] (%p79_p5), %v307_v3 }
  0x1e   : > { %310 = vst [vmem:[%s1283_s24 + $0x20] sm:$0xff] (%p79_p5), %v309_v4  ;;  %312 = vst [vmem:[%s1283_s24 + $0x28] sm:$0xff] (%p79_p5), %v311_v5  ;;  %v313_v6 = vld [vmem:[%s1278_s14 + $0x60] sm:$0xff] (%p79_p5)  ;;  %v315_v7 = vld [vmem:[%s1278_s14 + $0x70] sm:$0xff] (%p79_p5) }
  0x1f   : > { %v317_v8 = vld [vmem:[%s1278_s14 + $0x80] sm:$0xff]  ;;  %314 = vst [vmem:[%s1283_s24 + $0x30] sm:$0xff] %v313_v6  ;;  %316 = vst [vmem:[%s1283_s24 + $0x38] sm:$0xff] %v315_v7  ;;  %v319_v9 = vld [vmem:[%s1278_s14 + $0x90] sm:$0xff] }
  0x20   : > { %318 = vst [vmem:[%s1283_s24 + $0x40] sm:$0xff] %v317_v8  ;;  %v321_v10 = vld [vmem:[%s1278_s14 + $0xa0] sm:$0xff]  ;;  %v323_v11 = vld [vmem:[%s1278_s14 + $0xb0] sm:$0xff]  ;;  %320 = vst [vmem:[%s1283_s24 + $0x48] sm:$0xff] %v319_v9 }
  0x21   : > { %322 = vst [vmem:[%s1283_s24 + $0x50] sm:$0xff] %v321_v10  ;;  %324 = vst [vmem:[%s1283_s24 + $0x58] sm:$0xff] %v323_v11  ;;  %v325_v12 = vld [vmem:[%s1278_s14 + $0xc0] sm:$0xff]  ;;  %v327_v13 = vld [vmem:[%s1278_s14 + $0xd0] sm:$0xff] }
  0x22   : > { %v329_v14 = vld [vmem:[%s1278_s14 + $0xe0] sm:$0xff]  ;;  %326 = vst [vmem:[%s1283_s24 + $0x60] sm:$0xff] %v325_v12  ;;  %328 = vst [vmem:[%s1283_s24 + $0x68] sm:$0xff] %v327_v13  ;;  %v331_v15 = vld [vmem:[%s1278_s14 + $0xf0] sm:$0xff] }
  0x23   : > { %330 = vst [vmem:[%s1283_s24 + $0x70] sm:$0xff] %v329_v14  ;;  %v333_v16 = vld [vmem:[%s1278_s14 + $0x100] sm:$0xff]  ;;  %v335_v17 = vld [vmem:[%s1278_s14 + $0x110] sm:$0xff]  ;;  %332 = vst [vmem:[%s1283_s24 + $0x78] sm:$0xff] %v331_v15 }
  0x24   : > { %334 = vst [vmem:[%s1283_s24 + $0x80] sm:$0xff] %v333_v16  ;;  %336 = vst [vmem:[%s1283_s24 + $0x88] sm:$0xff] %v335_v17  ;;  %v337_v18 = vld [vmem:[%s1278_s14 + $0x120] sm:$0xff]  ;;  %v339_v19 = vld [vmem:[%s1278_s14 + $0x130] sm:$0xff] }
  0x25   : > { %v341_v20 = vld [vmem:[%s1278_s14 + $0x140] sm:$0xff]  ;;  %338 = vst [vmem:[%s1283_s24 + $0x90] sm:$0xff] %v337_v18  ;;  %340 = vst [vmem:[%s1283_s24 + $0x98] sm:$0xff] %v339_v19  ;;  %v343_v21 = vld [vmem:[%s1278_s14 + $0x150] sm:$0xff] }
  0x26   : > { %342 = vst [vmem:[%s1283_s24 + $0xa0] sm:$0xff] %v341_v20  ;;  %v345_v22 = vld [vmem:[%s1278_s14 + $0x160] sm:$0xff]  ;;  %v347_v23 = vld [vmem:[%s1278_s14 + $0x170] sm:$0xff]  ;;  %344 = vst [vmem:[%s1283_s24 + $0xa8] sm:$0xff] %v343_v21 }
  0x27   : > { %346 = vst [vmem:[%s1283_s24 + $0xb0] sm:$0xff] %v345_v22  ;;  %348 = vst [vmem:[%s1283_s24 + $0xb8] sm:$0xff] %v347_v23  ;;  %v349_v24 = vld [vmem:[%s1278_s14 + $0x180] sm:$0xff]  ;;  %v351_v25 = vld [vmem:[%s1278_s14 + $0x190] sm:$0xff] }
  0x28   : > { %v353_v26 = vld [vmem:[%s1278_s14 + $0x1a0] sm:$0xff]  ;;  %350 = vst [vmem:[%s1283_s24 + $0xc0] sm:$0xff] %v349_v24  ;;  %352 = vst [vmem:[%s1283_s24 + $0xc8] sm:$0xff] %v351_v25  ;;  %v355_v27 = vld [vmem:[%s1278_s14 + $0x1b0] sm:$0xff] }
  0x29   : > { %354 = vst [vmem:[%s1283_s24 + $0xd0] sm:$0xff] %v353_v26  ;;  %v357_v28 = vld [vmem:[%s1278_s14 + $0x1c0] sm:$0xff]  ;;  %v359_v29 = vld [vmem:[%s1278_s14 + $0x1d0] sm:$0xff]  ;;  %356 = vst [vmem:[%s1283_s24 + $0xd8] sm:$0xff] %v355_v27 }
  0x2a   : > { %358 = vst [vmem:[%s1283_s24 + $0xe0] sm:$0xff] %v357_v28  ;;  %360 = vst [vmem:[%s1283_s24 + $0xe8] sm:$0xff] %v359_v29  ;;  %v361_v30 = vld [vmem:[%s1278_s14 + $0x1e0] sm:$0xff]  ;;  %v363_v31 = vld [vmem:[%s1278_s14 + $0x1f0] sm:$0xff] }
  0x2b   : > { %362 = vst [vmem:[%s1283_s24 + $0xf0] sm:$0xff] %v361_v30  ;;  %364 = vst [vmem:[%s1283_s24 + $0xf8] sm:$0xff] %v363_v31 }
  0x2c PF: > { %p922_p11 = scmp.ge.s32.totalorder %s1171_s23, 1  ;;  %p385_p12 = scmp.lt.s32.totalorder %s1171_s23, 5 }
  0x2e   : > { %p386_p13 = pnand %p922_p11, %p385_p12 }
  0x2f   : > { %s392_s27 = sand.u32 (!%p386_p13), 1, %s1147_s17   ;;  %s925_s17 = sshll.u32 (!%p386_p13), %s1159_s20, 1  ;;  %v709_v2 = vlaneseq (!%p386_p13) }
  0x30   : > { %389 = sbr.rel (%p386_p13) target bundleno = 345 (0x159), region = 70  ;;  %s923_s28 = sshll.u32 (!%p386_p13), %s392_s27, 8 }
  0x31   : > { %s1349_s29 = scalar_lea.vmem (!%p386_p13), [#allocation2], %s923_s28  ;;  %p436_p0 = scmp.lt.s32.totalorder (!%p386_p13), %s925_s17, 3  ;;  %v710_v3 = vshrl.u32 (!%p386_p13), %v709_v2, 7 }
  0x32   : > { %v1050_v32 = vld [vmem:[%s1349_s29 + $0x4] ss:$8 sps:$4 sm:$0xff] (!%p386_p13)   ;;  %v1052_v33 = vld [vmem:[%s1349_s29] ss:$8 sps:$4 sm:$0xff] (!%p386_p13)   ;;  %v1053_v34 = vld [vmem:[%s1349_s29 + $0x14] ss:$8 sps:$4 sm:$0xff] (!%p386_p13)  }
  0x33   : > { %664 = vmatprep.subr.bf16.mxu0 (!%p386_p13), %v1050_v32  ;;  %v1055_v35 = vld [vmem:[%s1349_s29 + $0x10] ss:$8 sps:$4 sm:$0xff] (!%p386_p13)   ;;  %v1056_v36 = vld [vmem:[%s1349_s29 + $0x24] ss:$8 sps:$4 sm:$0xff] (!%p386_p13)   ;;  %v1058_v37 = vld [vmem:[%s1349_s29 + $0x20] ss:$8 sps:$4 sm:$0xff] (!%p386_p13)  }
  0x34   : > { %665 = vmatpush1.bf16.msra.mxu0 (!%p386_p13), %v1052_v33  ;;  %v1059_v38 = vld [vmem:[%s1349_s29 + $0x34] ss:$8 sps:$4 sm:$0xff] (!%p386_p13)   ;;  %v1061_v39 = vld [vmem:[%s1349_s29 + $0x30] ss:$8 sps:$4 sm:$0xff] (!%p386_p13)   ;;  %v1062_v40 = vld [vmem:[%s1349_s29 + $0x44] ss:$8 sps:$4 sm:$0xff] (!%p386_p13)  }
  0x35   : > { %666 = vmatprep.subr.bf16.mxu0 (!%p386_p13), %v1053_v34  ;;  %v1064_v41 = vld [vmem:[%s1349_s29 + $0x40] ss:$8 sps:$4 sm:$0xff] (!%p386_p13)   ;;  %v1065_v42 = vld [vmem:[%s1349_s29 + $0x54] ss:$8 sps:$4 sm:$0xff] (!%p386_p13)   ;;  %v1067_v43 = vld [vmem:[%s1349_s29 + $0x50] ss:$8 sps:$4 sm:$0xff] (!%p386_p13)  }
  0x36   : > { %v1068_v44 = vld [vmem:[%s1349_s29 + $0x64] ss:$8 sps:$4 sm:$0xff] (!%p386_p13)   ;;  %v1070_v46 = vld [vmem:[%s1349_s29 + $0x60] ss:$8 sps:$4 sm:$0xff] (!%p386_p13)   ;;  %v1071_v47 = vld [vmem:[%s1349_s29 + $0x74] ss:$8 sps:$4 sm:$0xff] (!%p386_p13)  }
  0x37   : > { %s1458_s17 = smov (!%p436_p0, %s925_s17), 3  ;;  %v1073_v48 = vld [vmem:[%s1349_s29 + $0x70] ss:$8 sps:$4 sm:$0xff]   ;;  %v1074_v49 = vld [vmem:[%s1349_s29 + $0x84] ss:$8 sps:$4 sm:$0xff]   ;;  %s1392_s11 = sshll.u32 %s1155_s19, 1 }
  0x38   : > { %667 = vmatpush1.bf16.msra.mxu0 %v1055_v35  ;;  %s974_s5 = sshll.u32 %s1458_s17, 3  ;;  %v1076_v50 = vld [vmem:[%s1349_s29 + $0x80] ss:$8 sps:$4 sm:$0xff]   ;;  %v1077_v51 = vld [vmem:[%s1349_s29 + $0x94] ss:$8 sps:$4 sm:$0xff]   ;;  %p449_p1 = scmp.lt.s32.totalorder %s1392_s11, 3 }
  0x39   : > { %668 = vmatprep.subr.bf16.mxu0 %v1056_v36  ;;  %s1367_s10 = scalar_lea.vmem %s1437_s0, %s974_s5  ;;  %v1079_v52 = vld [vmem:[%s1349_s29 + $0x90] ss:$8 sps:$4 sm:$0xff]   ;;  %v1080_v53 = vld [vmem:[%s1349_s29 + $0xa4] ss:$8 sps:$4 sm:$0xff]   ;;  %v1082_v54 = vld [vmem:[%s1349_s29 + $0xa0] ss:$8 sps:$4 sm:$0xff]  }
  0x3a   : > { %v1100_v45 = vld [vmem:[%s1367_s10 + $0x4] ss:$8 sps:$4 sm:$0xff]   ;;  %v1083_v55 = vld [vmem:[%s1349_s29 + $0xb4] ss:$8 sps:$4 sm:$0xff]   ;;  %v1085_v56 = vld [vmem:[%s1349_s29 + $0xb0] ss:$8 sps:$4 sm:$0xff]  }
  0x3b   : > { %696 = vmatprep.mubr.bf16.mxu0 %v1100_v45  ;;  %v1086_v57 = vld [vmem:[%s1349_s29 + $0xc4] ss:$8 sps:$4 sm:$0xff]   ;;  %v1088_v58 = vld [vmem:[%s1349_s29 + $0xc0] ss:$8 sps:$4 sm:$0xff]   ;;  %v1089_v59 = vld [vmem:[%s1349_s29 + $0xd4] ss:$8 sps:$4 sm:$0xff]  }
  0x3c   : > { %669 = vmatpush1.bf16.msra.mxu0 %v1058_v37  ;;  %v1091_v60 = vld [vmem:[%s1349_s29 + $0xd0] ss:$8 sps:$4 sm:$0xff]   ;;  %v1092_v61 = vld [vmem:[%s1349_s29 + $0xe4] ss:$8 sps:$4 sm:$0xff]   ;;  %v1094_v62 = vld [vmem:[%s1349_s29 + $0xe0] ss:$8 sps:$4 sm:$0xff]  }
  0x3d   : > { %670 = vmatprep.subr.bf16.mxu0 %v1059_v38  ;;  %v1095_v63 = vld [vmem:[%s1349_s29 + $0xf4] ss:$8 sps:$4 sm:$0xff]   ;;  %v1097_v0 = vld [vmem:[%s1349_s29 + $0xf0] ss:$8 sps:$4 sm:$0xff]   ;;  %v1098_v1 = vld [vmem:[%s1367_s10] ss:$8 sps:$4 sm:$0xff]  }
  0x3e   : > { %s450_s12 = scalar_select %p449_p1, %s1392_s11, 3  ;;  %v711_v4 = vsub.s32 0, %v710_v3  ;;  %v715_v6 = vsub.s32 1, %v710_v3 }
  0x3f   : > { %s431_s19 = sand.u32 1, %s1139_s15   ;;  %s977_s15 = sshll.u32 (%p1265_p9), %s1159_s20, 3 }
  0x40   : > { %671 = vmatpush1.bf16.msra.mxu0 %v1061_v39  ;;  %s451_s24 = scalar_lea.vmem %s1439_s2, %s450_s12  ;;  %s456_s29 = scalar_lea.vmem %s1440_s3, %s450_s12 }
  0x41   : > { %672 = vmatprep.subr.bf16.mxu0 %v1062_v40  ;;  %v707_v5 = vld [vmem:[%s451_s24] sm:$0x3]  ;;  %s924_s17 = sshll.u32 %s431_s19, 4  ;;  %s763_s6 = sadd.s32 (%p1265_p9), %s977_s15, %s1392_s11 }
  0x42   : > { %v723_v7 = vld [vmem:[%s456_s29] sm:$0x3]  ;;  %v712_v8 = vrot.slane %v707_v5, %v711_v4  ;;  %v716_v9 = vrot.slane %v707_v5, %v715_v6  ;;  %s433_s5 = scalar_lea.vmem [#allocation3], %s924_s17  ;;  %s970_s9 = sshll.u32 (%p1265_p9), %s763_s6, 2 }
  0x43   : > { %v728_v10 = vrot.slane %v723_v7, %v711_v4  ;;  %v732_v12 = vrot.slane %v723_v7, %v715_v6  ;;  %s765_s13 = scalar_lea.vmem (%p1265_p9), %s1441_s4, %s970_s9 }
  0x44   : > { %673 = vmatpush1.bf16.msra.mxu0 %v1064_v41 }
  0x45   : > { %674 = vmatprep.subr.bf16.mxu0 %v1065_v42 }
  0x48   : > { %675 = vmatpush1.bf16.msra.mxu0 %v1067_v43 }
  0x49   : > { %676 = vmatprep.subr.bf16.mxu0 %v1068_v44 }
  0x4c   : > { %677 = vmatpush1.bf16.msra.mxu0 %v1070_v46 }
  0x4d   : > { %678 = vmatprep.subr.bf16.mxu0 %v1071_v47 }
  0x50   : > { %679 = vmatpush1.bf16.msra.mxu0 %v1073_v48 }
  0x51   : > { %680 = vmatprep.subr.bf16.mxu0 %v1074_v49 }
  0x54   : > { %681 = vmatpush1.bf16.msra.mxu0 %v1076_v50 }
  0x55   : > { %682 = vmatprep.subr.bf16.mxu0 %v1077_v51 }
  0x58   : > { %683 = vmatpush1.bf16.msra.mxu0 %v1079_v52 }
  0x59   : > { %684 = vmatprep.subr.bf16.mxu0 %v1080_v53 }
  0x5c   : > { %685 = vmatpush1.bf16.msra.mxu0 %v1082_v54 }
  0x5d   : > { %686 = vmatprep.subr.bf16.mxu0 %v1083_v55 }
  0x60   : > { %687 = vmatpush1.bf16.msra.mxu0 %v1085_v56 }
  0x61   : > { %688 = vmatprep.subr.bf16.mxu0 %v1086_v57 }
  0x64   : > { %689 = vmatpush1.bf16.msra.mxu0 %v1088_v58 }
  0x65   : > { %690 = vmatprep.subr.bf16.mxu0 %v1089_v59 }
  0x68   : > { %691 = vmatpush1.bf16.msra.mxu0 %v1091_v60 }
  0x69   : > { %692 = vmatprep.subr.bf16.mxu0 %v1092_v61 }
  0x6c   : > { %693 = vmatpush1.bf16.msra.mxu0 %v1094_v62 }
  0x6d   : > { %694 = vmatprep.subr.bf16.mxu0 %v1095_v63 }
  0x70   : > { %695 = vmatpush1.bf16.msra.mxu0 %v1097_v0 }
  0x73   : > { %697 = vmatmul.mubr.bf16.vlgmr.msra.gmra.mrb[0].mxu0 %v1098_v1 }
 0x146   : > { %v698_v11 = vpop.f32.mrb[0].mxu0 }
 0x147   : > { %v719_v13 = vmul.f32 %v712_v8, %v698_v11  ;;  %v700_v14 = vpop.f32.mrb[1].mxu0 }
 0x148   : > { %v720_v15 = vmul.f32 %v716_v9, %v700_v14  ;;  %v702_v16 = vpop.f32.mrb[2].mxu0 }
 0x149   : > { %v735_v17 = vadd.f32 %v728_v10, %v719_v13  ;;  %v721_v18 = vmul.f32 %v712_v8, %v702_v16  ;;  %v704_v19 = vpop.f32.mrb[3].mxu0 }
 0x14a   : > { %v736_v20 = vadd.f32 %v732_v12, %v720_v15  ;;  %v722_v21 = vmul.f32 %v716_v9, %v704_v19  ;;  %759 = sbr.rel (!%p1265_p9) target bundleno = 345 (0x159), region = 78 }
 0x14b   : > { %v737_v22 = vadd.f32 %v728_v10, %v721_v18 }
 0x14c   : > { %v975_v23 = vpack.c.bf16 %v736_v20, %v735_v17  ;;  %v738_v24 = vadd.f32 %v732_v12, %v722_v21 }
 0x14e   : > { %751 = vst [vmem:[%s433_s5] sm:$0xff] %v975_v23  ;;  %v976_v25 = vpack.c.bf16 %v738_v24, %v737_v22 }
 0x150   : > { %752 = vst [vmem:[%s433_s5 + $0x8] sm:$0xff] %v976_v25 }
 0x155   : > { %v795_v26 = vld [vmem:[%s433_s5] sm:$0xff] }
 0x156   : > { %796 = vst [vmem:[%s765_s13] sm:$0xff] %v795_v26 }
 0x157   : > { %v797_v27 = vld [vmem:[%s433_s5 + $0x8] sm:$0xff] }
 0x158   : > { %798 = vst [vmem:[%s765_s13 + $0x10] sm:$0xff] %v797_v27 }
 0x159 PF: > { %s14_s23 = sadd.s32 1, %s1171_s23   ;;  %s1443_s15 = smov %s1143_s16 }
 0x15a   : > { %p11_p2 = scmp.ge.s32.totalorder %s14_s23, 6   ;;  %s1444_s16 = smov %s1270_s8 }
 0x15b   : > { %s1445_s17 = smov %s1151_s18  ;;  %s1446_s18 = smov %s1259_s30 }
 0x15c   : > { %s1447_s19 = smov %s1163_s21  ;;  %s1448_s20 = smov %s1167_s22 }
 0x15d   : > { %s1449_s21 = smov %s1452_s25  ;;  %s1450_s22 = smov %s1456_s26 }
 0x15e   :  { %13 = sbr.rel (!%p11_p2) target bundleno = 5 (0x5), region = 156 }

// kernel: resnext50_encoder.42
= control target key start
LH: loop header
LB: loop body
LE: loop exit
PB: predicated region body
PF: predicated region fallthrough
CT: control target
= control target key end

     0   :  { %s4586_s0 = inlined_call_operand.vmem [shape: bf16[32,2304], index: 0, kind: input, shape index: {}]   ;;  %s4587_s1 = inlined_call_operand.vmem [shape: bf16[2,1152,128], index: 1, kind: input, shape index: {}]   ;;  %s4588_s2 = inlined_call_operand.vmem [shape: f32[1,256], index: 2, kind: input, shape index: {}]   ;;  %s4589_s3 = inlined_call_operand.vmem [shape: f32[1,256], index: 3, kind: input, shape index: {}]   ;;  %s4590_s4 = inlined_call_operand.vmem [shape: bf16[256,512], index: 4, kind: input, shape index: {}]   ;;  %s4591_s5 = inlined_call_operand.vmem [shape: f32[1,512], index: 5, kind: input, shape index: {}]   ;;  %s4592_s6 = inlined_call_operand.vmem [shape: f32[1,512], index: 6, kind: input, shape index: {}]   ;;  %s4593_s7 = inlined_call_operand.vmem [shape: bf16[32,512], index: 7, kind: input, shape index: {}]   ;;  %s4594_s8 = inlined_call_operand.vmem [shape: bf16[32,512], index: 8, kind: output, shape index: {}]  }
   0x1   :  { %4600 = sst [smem:[#allocation12_spill]] %s4590_s4 }
   0x2   :  { %4601 = sst [smem:[#allocation13_spill]] %s4593_s7 }
   0x3   :  { %s3820_s27 = smov 0   ;;  %s3822_s28 = smov 0  }
   0x4   :  { %s3824_s29 = smov 0   ;;  %s3826_s30 = smov 0  }
   0x5   :  { %s3828_s9 = smov 0   ;;  %s3830_s10 = smov 0  }
   0x6   :  { %s3832_s11 = smov 0   ;;  %s3834_s12 = smov 0  }
   0x7   :  { %s3836_s13 = smov 0  }
   0x8 LB: > { %4602 = sst [smem:[#allocation6_spill]] %s3751_s30  ;;  %s2797_s14 = sadd.s32 4294967295, %s3771_s13   ;;  %s3771_s13 = sphi %s3836_s13, %s18_s13   ;;  %s3767_s12 = sphi %s3834_s12, %s4618_s12   ;;  %s3763_s11 = sphi %s3832_s11, %s4617_s11   ;;  %s3759_s10 = sphi %s3830_s10, %s4616_s10   ;;  %s3755_s9 = sphi %s3828_s9, %s4615_s9   ;;  %s3751_s30 = sphi %s3826_s30, %s4614_s30   ;;  %s3747_s29 = sphi %s3824_s29, %s4613_s29   ;;  %s3743_s28 = sphi %s3822_s28, %s4620_s28   ;;  %s3739_s27 = sphi %s3820_s27, %s4619_s27  }
   0x9   : > { %4603 = sst [smem:[#allocation7_spill]] %s3763_s11  ;;  %s27_s15 = sadd.s32 1, %s3763_s11 }
   0xa   : > { %4604 = sst [smem:[#allocation8_spill]] %s3767_s12  ;;  %p28_p0 = scmp.ge.s32.totalorder %s27_s15, 2 }
   0xb   : > { %s30_s16 = sadd.s32 1, %s3767_s12  ;;  %s126_s17 = sadd.s32 1, %s3751_s30 }
   0xc   : > { %p133_p1 = scmp.ne.s32.totalorder %s3751_s30, %s3747_s29  ;;  %s4622_s15 = smov (%p28_p0, %s27_s15), 0 }
   0xd   : > { %4605 = sst [smem:[#allocation9_spill]] %s4622_s15  ;;  %s4624_s16 = smov (!%p28_p0, %s30_s16), %s3767_s12 }
   0xe   : > { %s123_s18 = ssub.s32 %s3763_s11, %s4622_s15  ;;  %p134_p2 = scmp.eq.s32.totalorder %s3771_s13, 0 }
   0xf   : > { %p32_p3 = scmp.ge.s32.totalorder %s4624_s16, 2  ;;  %p124_p4 = scmp.eq.s32.totalorder %s123_s18, 0 }
  0x10   : > { %p3877_p5 = por %p134_p2, %p133_p1  ;;  %s206_s20 = sadd.s32 1, %s3743_s28 }
  0x11   : > { %s4626_s16 = smov (%p32_p3, %s4624_s16), 0  ;;  %p213_p6 = scmp.ne.s32.totalorder %s3743_s28, %s3739_s27 }
  0x12   : > { %4607 = sst [smem:[#allocation10_spill]] %s4626_s16  ;;  %s201_s22 = ssub.s32 %s3767_s12, %s4626_s16 }
  0x13   : > { %s3885_s21 = scalar_select %p124_p4, %s3751_s30, %s126_s17  }
  0x14   : > { %s203_s23 = sor.u32 %s201_s22, %s123_s18  ;;  %p245_p7 = scmp.eq.s32.totalorder %s2797_s14, 3 }
  0x15   : > { %4608 = sst [smem:[#allocation11_spill]] %s3885_s21  ;;  %p204_p8 = scmp.eq.s32.totalorder %s203_s23, 0 }
  0x16   : > { %p3891_p9 = por %p213_p6, %p134_p2  ;;  %p3895_p10 = por %p245_p7, %p213_p6 }
  0x17   : > { %s3900_s26 = scalar_select %p204_p8, %s3743_s28, %s206_s20  }
  0x18   : > { %p2800_p11 = scmp.ge.s32.totalorder %s3771_s13, 4 }
  0x1a   : > { %276 = sbr.rel (%p2800_p11) target bundleno = 70 (0x46), region = 28 }
  0x21   : > { %289 = sbr.rel (!%p3877_p5) target bundleno = 59 (0x3b), region = 36  ;;  %s291_s14 = sand.u32 (%p3877_p5), 1, %s3751_s30  }
  0x22   : > { %s3169_s17 = sshll.u32 (%p3877_p5), %s3763_s11, 3  ;;  %s2801_s18 = sshll.u32 (%p3877_p5), %s291_s14, 8 }
  0x23   : > { %s4611_s4 = sld [smem:[#allocation12_spill]] (%p3877_p5)  ;;  %s3915_s19 = scalar_lea.vmem (%p3877_p5), [#allocation3], %s2801_s18 }
  0x29   : > { %s3910_s16 = scalar_lea.vmem %s4611_s4, %s3169_s17 }
  0x2a   : > { %v386_v0 = vld [vmem:[%s3910_s16] sm:$0xff]  ;;  %v388_v1 = vld [vmem:[%s3910_s16 + $0x10] sm:$0xff] }
  0x2b   : > { %v390_v2 = vld [vmem:[%s3910_s16 + $0x20] sm:$0xff]  ;;  %387 = vst [vmem:[%s3915_s19] sm:$0xff] %v386_v0  ;;  %389 = vst [vmem:[%s3915_s19 + $0x8] sm:$0xff] %v388_v1  ;;  %v392_v3 = vld [vmem:[%s3910_s16 + $0x30] sm:$0xff] }
  0x2c   : > { %391 = vst [vmem:[%s3915_s19 + $0x10] sm:$0xff] %v390_v2  ;;  %v394_v4 = vld [vmem:[%s3910_s16 + $0x40] sm:$0xff]  ;;  %v396_v5 = vld [vmem:[%s3910_s16 + $0x50] sm:$0xff]  ;;  %393 = vst [vmem:[%s3915_s19 + $0x18] sm:$0xff] %v392_v3 }
  0x2d   : > { %395 = vst [vmem:[%s3915_s19 + $0x20] sm:$0xff] %v394_v4  ;;  %397 = vst [vmem:[%s3915_s19 + $0x28] sm:$0xff] %v396_v5  ;;  %v398_v6 = vld [vmem:[%s3910_s16 + $0x60] sm:$0xff]  ;;  %v400_v7 = vld [vmem:[%s3910_s16 + $0x70] sm:$0xff] }
  0x2e   : > { %v402_v8 = vld [vmem:[%s3910_s16 + $0x80] sm:$0xff]  ;;  %399 = vst [vmem:[%s3915_s19 + $0x30] sm:$0xff] %v398_v6  ;;  %401 = vst [vmem:[%s3915_s19 + $0x38] sm:$0xff] %v400_v7  ;;  %v404_v9 = vld [vmem:[%s3910_s16 + $0x90] sm:$0xff] }
  0x2f   : > { %403 = vst [vmem:[%s3915_s19 + $0x40] sm:$0xff] %v402_v8  ;;  %v406_v10 = vld [vmem:[%s3910_s16 + $0xa0] sm:$0xff]  ;;  %v408_v11 = vld [vmem:[%s3910_s16 + $0xb0] sm:$0xff]  ;;  %405 = vst [vmem:[%s3915_s19 + $0x48] sm:$0xff] %v404_v9 }
  0x30   : > { %407 = vst [vmem:[%s3915_s19 + $0x50] sm:$0xff] %v406_v10  ;;  %409 = vst [vmem:[%s3915_s19 + $0x58] sm:$0xff] %v408_v11  ;;  %v410_v12 = vld [vmem:[%s3910_s16 + $0xc0] sm:$0xff]  ;;  %v412_v13 = vld [vmem:[%s3910_s16 + $0xd0] sm:$0xff] }
  0x31   : > { %v414_v14 = vld [vmem:[%s3910_s16 + $0xe0] sm:$0xff]  ;;  %411 = vst [vmem:[%s3915_s19 + $0x60] sm:$0xff] %v410_v12  ;;  %413 = vst [vmem:[%s3915_s19 + $0x68] sm:$0xff] %v412_v13  ;;  %v416_v15 = vld [vmem:[%s3910_s16 + $0xf0] sm:$0xff] }
  0x32   : > { %415 = vst [vmem:[%s3915_s19 + $0x70] sm:$0xff] %v414_v14  ;;  %v418_v16 = vld [vmem:[%s3910_s16 + $0x100] sm:$0xff]  ;;  %v420_v17 = vld [vmem:[%s3910_s16 + $0x110] sm:$0xff]  ;;  %417 = vst [vmem:[%s3915_s19 + $0x78] sm:$0xff] %v416_v15 }
  0x33   : > { %419 = vst [vmem:[%s3915_s19 + $0x80] sm:$0xff] %v418_v16  ;;  %421 = vst [vmem:[%s3915_s19 + $0x88] sm:$0xff] %v420_v17  ;;  %v422_v18 = vld [vmem:[%s3910_s16 + $0x120] sm:$0xff]  ;;  %v424_v19 = vld [vmem:[%s3910_s16 + $0x130] sm:$0xff] }
  0x34   : > { %v426_v20 = vld [vmem:[%s3910_s16 + $0x140] sm:$0xff]  ;;  %423 = vst [vmem:[%s3915_s19 + $0x90] sm:$0xff] %v422_v18  ;;  %425 = vst [vmem:[%s3915_s19 + $0x98] sm:$0xff] %v424_v19  ;;  %v428_v21 = vld [vmem:[%s3910_s16 + $0x150] sm:$0xff] }
  0x35   : > { %427 = vst [vmem:[%s3915_s19 + $0xa0] sm:$0xff] %v426_v20  ;;  %v430_v22 = vld [vmem:[%s3910_s16 + $0x160] sm:$0xff]  ;;  %v432_v23 = vld [vmem:[%s3910_s16 + $0x170] sm:$0xff]  ;;  %429 = vst [vmem:[%s3915_s19 + $0xa8] sm:$0xff] %v428_v21 }
  0x36   : > { %431 = vst [vmem:[%s3915_s19 + $0xb0] sm:$0xff] %v430_v22  ;;  %433 = vst [vmem:[%s3915_s19 + $0xb8] sm:$0xff] %v432_v23  ;;  %v434_v24 = vld [vmem:[%s3910_s16 + $0x180] sm:$0xff]  ;;  %v436_v25 = vld [vmem:[%s3910_s16 + $0x190] sm:$0xff] }
  0x37   : > { %v438_v26 = vld [vmem:[%s3910_s16 + $0x1a0] sm:$0xff]  ;;  %435 = vst [vmem:[%s3915_s19 + $0xc0] sm:$0xff] %v434_v24  ;;  %437 = vst [vmem:[%s3915_s19 + $0xc8] sm:$0xff] %v436_v25  ;;  %v440_v27 = vld [vmem:[%s3910_s16 + $0x1b0] sm:$0xff] }
  0x38   : > { %439 = vst [vmem:[%s3915_s19 + $0xd0] sm:$0xff] %v438_v26  ;;  %v442_v28 = vld [vmem:[%s3910_s16 + $0x1c0] sm:$0xff]  ;;  %v444_v29 = vld [vmem:[%s3910_s16 + $0x1d0] sm:$0xff]  ;;  %441 = vst [vmem:[%s3915_s19 + $0xd8] sm:$0xff] %v440_v27 }
  0x39   : > { %443 = vst [vmem:[%s3915_s19 + $0xe0] sm:$0xff] %v442_v28  ;;  %445 = vst [vmem:[%s3915_s19 + $0xe8] sm:$0xff] %v444_v29  ;;  %v446_v30 = vld [vmem:[%s3910_s16 + $0x1e0] sm:$0xff]  ;;  %v448_v31 = vld [vmem:[%s3910_s16 + $0x1f0] sm:$0xff] }
  0x3a   : > { %447 = vst [vmem:[%s3915_s19 + $0xf0] sm:$0xff] %v446_v30  ;;  %449 = vst [vmem:[%s3915_s19 + $0xf8] sm:$0xff] %v448_v31 }
  0x3b PF: > { %471 = sbr.rel (!%p3891_p9) target bundleno = 70 (0x46), region = 82  ;;  %s473_s20 = sand.u32 (%p3891_p9), 1, %s3743_s28  }
  0x3c   : > { %s2806_s14 = sshll.u32 (%p3891_p9), %s3763_s11, 1  ;;  %s2804_s17 = sshll.u32 (%p3891_p9), %s473_s20, 4 }
  0x3d   : > { %s3170_s18 = sshll.u32 (%p3891_p9), %s3767_s12, 3  ;;  %s4612_s7 = sld [smem:[#allocation13_spill]] (%p3891_p9) }
  0x3e   : > { %s479_s22 = sadd.s32 (%p3891_p9), %s3170_s18, %s2806_s14  ;;  %s475_s16 = scalar_lea.vmem (%p3891_p9), [#allocation4], %s2804_s17 }
  0x3f   : > { %s2808_s23 = sshll.u32 (%p3891_p9), %s479_s22, 2 }
  0x43   : > { %s481_s21 = scalar_lea.vmem %s4612_s7, %s2808_s23 }
  0x44   : > { %v511_v32 = vld [vmem:[%s481_s21] sm:$0xff]  ;;  %v513_v33 = vld [vmem:[%s481_s21 + $0x10] sm:$0xff] }
  0x45   : > { %512 = vst [vmem:[%s475_s16] sm:$0xff] %v511_v32  ;;  %514 = vst [vmem:[%s475_s16 + $0x8] sm:$0xff] %v513_v33 }
  0x46 PF: > { %p2809_p12 = scmp.ge.s32.totalorder %s3771_s13, 1  ;;  %p519_p13 = scmp.lt.s32.totalorder %s3771_s13, 5 }
  0x48   : > { %p520_p0 = pnand %p2809_p12, %p519_p13 }
  0x49   : > { %s526_s24 = sand.u32 (!%p520_p0), 1, %s3747_s29   ;;  %s533_s4 = sand.u32 (!%p520_p0), 1, %s3739_s27  }
  0x4a   : > { %523 = sbr.rel (%p520_p0) target bundleno = 774 (0x306), region = 120  ;;  %s2810_s15 = sshll.u32 (!%p520_p0), %s526_s24, 8 }
  0x4b   : > { %s3990_s19 = sshll.u32 (!%p520_p0), %s533_s4, 4  ;;  %s2813_s21 = sshll.u32 (!%p520_p0), %s3759_s10, 1 }
  0x4c   : > { %p584_p1 = scmp.lt.s32.totalorder (!%p520_p0), %s2813_s21, 3  ;;  %s3994_s20 = sshll.u32 (!%p520_p0), %s3755_s9, 1 }
  0x4d   : > { %p592_p2 = scmp.lt.s32.totalorder (!%p520_p0), %s3994_s20, 3  ;;  %s4013_s12 = scalar_lea.vmem (!%p520_p0), [#allocation3], %s2810_s15 }
  0x4e   : > { %s535_s11 = scalar_lea.vmem (!%p520_p0), [#allocation4], %s3990_s19  ;;  %s4017_s30 = scalar_lea.vmem (!%p520_p0), [#allocation5], %s3990_s19 }
  0x4f   : > { %p2817_p3 = scmp.ne.s32.totalorder (!%p520_p0), %s3755_s9, 0 }
  0x51   : > { %s4628_s21 = smov (!%p584_p1, %s2813_s21), 3  ;;  %609 = sbr.rel (%p2817_p3) target bundleno = 475 (0x1db), region = 132 }
  0x52   : > { %s3998_s14 = scalar_select %p592_p2, %s3994_s20, 3 }
  0x53   : > { %s3408_s17 = smul.u32 72, %s4628_s21  ;;  %v3483_v34 = vld [vmem:[%s4587_s1 + $0x40] sm:$0xff] (!%p2817_p3)   ;;  %v3487_v38 = vld [vmem:[%s4587_s1 + $0x48] sm:$0xff] (!%p2817_p3)   ;;  %v3491_v42 = vld [vmem:[%s4587_s1 + $0x50] sm:$0xff] (!%p2817_p3)   ;;  %vm3774_vm0 = vmmov (!%p2817_p3), 0  }
  0x54   : > { %s594_s18 = scalar_lea.vmem %s4591_s5, %s3998_s14  ;;  %s599_s16 = scalar_lea.vmem %s4592_s6, %s3998_s14  ;;  %v3484_v35 = vld [vmem:[%s4587_s1 + $0xc0] sm:$0xff] (!%p2817_p3)   ;;  %3174 = vmatprep.subr.bf16.mxu0 (!%p2817_p3), %v3483_v34  ;;  %v3488_v39 = vld [vmem:[%s4587_s1 + $0xc8] sm:$0xff] (!%p2817_p3)   ;;  %v3492_v43 = vld [vmem:[%s4587_s1 + $0xd0] sm:$0xff] (!%p2817_p3)  }
  0x55   : > { %s4011_s7 = scalar_lea.vmem %s4586_s0, %s3408_s17  ;;  %v3485_v36 = vld [vmem:[%s4587_s1] sm:$0xff] (!%p2817_p3)   ;;  %3196 = vmatprep.subr.bf16.mxu1 (!%p2817_p3), %v3484_v35  ;;  %v3489_v40 = vld [vmem:[%s4587_s1 + $0x8] sm:$0xff] (!%p2817_p3)   ;;  %v3493_v44 = vld [vmem:[%s4587_s1 + $0x10] sm:$0xff] (!%p2817_p3)  }
  0x56   : > { %v3486_v37 = vld [vmem:[%s4587_s1 + $0x80] sm:$0xff] (!%p2817_p3)   ;;  %3175 = vmatpush3.bf16.msra.mxu0 (!%p2817_p3), %v3485_v36  ;;  %v3490_v41 = vld [vmem:[%s4587_s1 + $0x88] sm:$0xff] (!%p2817_p3)   ;;  %v3494_v45 = vld [vmem:[%s4587_s1 + $0x90] sm:$0xff] (!%p2817_p3)  }
  0x57   : > { %3197 = vmatpush3.bf16.msra.mxu1 (!%p2817_p3), %v3486_v37  ;;  %3176 = vmatprep.subr.bf16.mxu0 (!%p2817_p3), %v3487_v38  ;;  %v3495_v46 = vld [vmem:[%s4587_s1 + $0x58] sm:$0xff] (!%p2817_p3)   ;;  %v3499_v50 = vld [vmem:[%s4587_s1 + $0x60] sm:$0xff] (!%p2817_p3)   ;;  %v3503_v54 = vld [vmem:[%s4587_s1 + $0x68] sm:$0xff] (!%p2817_p3)  }
  0x58   : > { %3198 = vmatprep.subr.bf16.mxu1 %v3488_v39  ;;  %v3496_v47 = vld [vmem:[%s4587_s1 + $0xd8] sm:$0xff]   ;;  %v3500_v51 = vld [vmem:[%s4587_s1 + $0xe0] sm:$0xff]   ;;  %v3504_v55 = vld [vmem:[%s4587_s1 + $0xe8] sm:$0xff]  }
  0x59   : > { %v3497_v48 = vld [vmem:[%s4587_s1 + $0x18] sm:$0xff]   ;;  %v3501_v52 = vld [vmem:[%s4587_s1 + $0x20] sm:$0xff]   ;;  %v3505_v56 = vld [vmem:[%s4587_s1 + $0x28] sm:$0xff]  }
  0x5a   : > { %3177 = vmatpush3.bf16.msra.mxu0 %v3489_v40  ;;  %v3498_v49 = vld [vmem:[%s4587_s1 + $0x98] sm:$0xff]   ;;  %v3502_v53 = vld [vmem:[%s4587_s1 + $0xa0] sm:$0xff]   ;;  %v3506_v57 = vld [vmem:[%s4587_s1 + $0xa8] sm:$0xff]   ;;  %v3773_v40 = vmov 0.0  }
  0x5b   : > { %3199 = vmatpush3.bf16.msra.mxu1 %v3490_v41  ;;  %3178 = vmatprep.subr.bf16.mxu0 %v3491_v42  ;;  %v3507_v58 = vld [vmem:[%s4587_s1 + $0x70] sm:$0xff]   ;;  %v3511_v62 = vld [vmem:[%s4587_s1 + $0x78] sm:$0xff]   ;;  %v3515_v2 = vld [vmem:[%s4011_s7] ss:$72 sps:$4 sm:$0xff]  }
  0x5c   : > { %3200 = vmatprep.subr.bf16.mxu1 %v3492_v43  ;;  %v3508_v59 = vld [vmem:[%s4587_s1 + $0xf0] sm:$0xff]   ;;  %v3512_v63 = vld [vmem:[%s4587_s1 + $0xf8] sm:$0xff]   ;;  %v3517_v3 = vld [vmem:[%s4011_s7 + $0x4] ss:$72 sps:$4 sm:$0xff]  }
  0x5d   : > { %v3509_v60 = vld [vmem:[%s4587_s1 + $0x30] sm:$0xff]   ;;  %v3513_v0 = vld [vmem:[%s4587_s1 + $0x38] sm:$0xff]   ;;  %1274 = vmatprep.mubr.bf16.mxu0 %v3517_v3  ;;  %v3521_v6 = vld [vmem:[%s4587_s1 + $0x140] sm:$0xff]  }
  0x5e   : > { %3179 = vmatpush3.bf16.msra.mxu0 %v3493_v44  ;;  %v3510_v61 = vld [vmem:[%s4587_s1 + $0xb0] sm:$0xff]   ;;  %v3514_v1 = vld [vmem:[%s4587_s1 + $0xb8] sm:$0xff]   ;;  %v3522_v7 = vld [vmem:[%s4587_s1 + $0x100] sm:$0xff]  }
  0x5f   : > { %3201 = vmatpush3.bf16.msra.mxu1 %v3494_v45  ;;  %3180 = vmatprep.subr.bf16.mxu0 %v3495_v46  ;;  %v3518_v4 = vld [vmem:[%s4011_s7 + $0x8] ss:$72 sps:$4 sm:$0xff]   ;;  %v3520_v5 = vld [vmem:[%s4011_s7 + $0xc] ss:$72 sps:$4 sm:$0xff]   ;;  %v3523_v8 = vld [vmem:[%s4587_s1 + $0x1c0] sm:$0xff]  }
  0x60   : > { %3202 = vmatprep.subr.bf16.mxu1 %v3496_v47  ;;  %1315 = vmatprep.mubr.bf16.mxu1 %v3520_v5  ;;  %v3524_v9 = vld [vmem:[%s4587_s1 + $0x180] sm:$0xff]   ;;  %v3525_v10 = vld [vmem:[%s4587_s1 + $0x148] sm:$0xff]   ;;  %v3529_v14 = vld [vmem:[%s4587_s1 + $0x150] sm:$0xff]  }
  0x61   : > { %v3526_v11 = vld [vmem:[%s4587_s1 + $0x108] sm:$0xff]   ;;  %v3530_v15 = vld [vmem:[%s4587_s1 + $0x110] sm:$0xff]   ;;  %v3533_v18 = vld [vmem:[%s4587_s1 + $0x158] sm:$0xff]  }
  0x62   : > { %3181 = vmatpush3.bf16.msra.mxu0 %v3497_v48  ;;  %v3527_v12 = vld [vmem:[%s4587_s1 + $0x1c8] sm:$0xff]   ;;  %v3531_v16 = vld [vmem:[%s4587_s1 + $0x1d0] sm:$0xff]   ;;  %v3534_v19 = vld [vmem:[%s4587_s1 + $0x118] sm:$0xff]  }
  0x63   : > { %3203 = vmatpush3.bf16.msra.mxu1 %v3498_v49  ;;  %3182 = vmatprep.subr.bf16.mxu0 %v3499_v50  ;;  %v3528_v13 = vld [vmem:[%s4587_s1 + $0x188] sm:$0xff]   ;;  %v3532_v17 = vld [vmem:[%s4587_s1 + $0x190] sm:$0xff]   ;;  %v3535_v20 = vld [vmem:[%s4587_s1 + $0x1d8] sm:$0xff]  }
  0x64   : > { %3204 = vmatprep.subr.bf16.mxu1 %v3500_v51  ;;  %v3536_v21 = vld [vmem:[%s4587_s1 + $0x198] sm:$0xff]   ;;  %v3537_v22 = vld [vmem:[%s4587_s1 + $0x160] sm:$0xff]   ;;  %v3541_v26 = vld [vmem:[%s4587_s1 + $0x168] sm:$0xff]  }
  0x65   : > { %v3538_v23 = vld [vmem:[%s4587_s1 + $0x120] sm:$0xff]   ;;  %v3542_v27 = vld [vmem:[%s4587_s1 + $0x128] sm:$0xff]   ;;  %v3545_v30 = vld [vmem:[%s4587_s1 + $0x170] sm:$0xff]  }
  0x66   : > { %3183 = vmatpush3.bf16.msra.mxu0 %v3501_v52  ;;  %v3539_v24 = vld [vmem:[%s4587_s1 + $0x1e0] sm:$0xff]   ;;  %v3543_v28 = vld [vmem:[%s4587_s1 + $0x1e8] sm:$0xff]   ;;  %v3546_v31 = vld [vmem:[%s4587_s1 + $0x130] sm:$0xff]  }
  0x67   : > { %3205 = vmatpush3.bf16.msra.mxu1 %v3502_v53  ;;  %3184 = vmatprep.subr.bf16.mxu0 %v3503_v54  ;;  %v3540_v25 = vld [vmem:[%s4587_s1 + $0x1a0] sm:$0xff]   ;;  %v3544_v29 = vld [vmem:[%s4587_s1 + $0x1a8] sm:$0xff]   ;;  %v3547_v32 = vld [vmem:[%s4587_s1 + $0x1f0] sm:$0xff]  }
  0x68   : > { %3206 = vmatprep.subr.bf16.mxu1 %v3504_v55  ;;  %v3548_v33 = vld [vmem:[%s4587_s1 + $0x1b0] sm:$0xff]   ;;  %v3549_v34 = vld [vmem:[%s4587_s1 + $0x178] sm:$0xff]   ;;  %v3559_v43 = vld [vmem:[%s4587_s1 + $0x200] sm:$0xff]  }
  0x69   : > { %v3550_v35 = vld [vmem:[%s4587_s1 + $0x138] sm:$0xff]   ;;  %v3560_v44 = vld [vmem:[%s4587_s1 + $0x280] sm:$0xff]   ;;  %v3562_v46 = vld [vmem:[%s4587_s1 + $0x208] sm:$0xff]  }
  0x6a   : > { %3185 = vmatpush3.bf16.msra.mxu0 %v3505_v56  ;;  %v3551_v36 = vld [vmem:[%s4587_s1 + $0x1f8] sm:$0xff]   ;;  %v3561_v45 = vld [vmem:[%s4587_s1 + $0x240] sm:$0xff]   ;;  %v3563_v47 = vld [vmem:[%s4587_s1 + $0x288] sm:$0xff]  }
  0x6b   : > { %3207 = vmatpush3.bf16.msra.mxu1 %v3506_v57  ;;  %3186 = vmatprep.subr.bf16.mxu0 %v3507_v58  ;;  %v3552_v37 = vld [vmem:[%s4011_s7 + $0x10] ss:$72 sps:$4 sm:$0xff]   ;;  %v3554_v38 = vld [vmem:[%s4011_s7 + $0x14] ss:$72 sps:$4 sm:$0xff]   ;;  %v3564_v48 = vld [vmem:[%s4587_s1 + $0x248] sm:$0xff]  }
  0x6c   : > { %3208 = vmatprep.subr.bf16.mxu1 %v3508_v59  ;;  %v3555_v39 = vld [vmem:[%s4587_s1 + $0x1b8] sm:$0xff]   ;;  %v3565_v49 = vld [vmem:[%s4587_s1 + $0x210] sm:$0xff]   ;;  %v3572_v55 = vld [vmem:[%s4587_s1 + $0x2a0] sm:$0xff]  }
  0x6d   : > { %v3556_v41 = vld [vmem:[%s4011_s7 + $0x18] ss:$72 sps:$4 sm:$0xff]   ;;  %v3558_v42 = vld [vmem:[%s4011_s7 + $0x1c] ss:$72 sps:$4 sm:$0xff]   ;;  %v3566_v50 = vld [vmem:[%s4587_s1 + $0x290] sm:$0xff]  }
  0x6e   : > { %3187 = vmatpush3.bf16.msra.mxu0 %v3509_v60  ;;  %v3567_v51 = vld [vmem:[%s4587_s1 + $0x250] sm:$0xff]   ;;  %v3568_v52 = vld [vmem:[%s4587_s1 + $0x218] sm:$0xff]   ;;  %v3571_v56 = vld [vmem:[%s4587_s1 + $0x220] sm:$0xff]  }
  0x6f   : > { %3209 = vmatpush3.bf16.msra.mxu1 %v3510_v61  ;;  %3188 = vmatprep.subr.bf16.mxu0 %v3511_v62  ;;  %v3569_v53 = vld [vmem:[%s4587_s1 + $0x298] sm:$0xff]   ;;  %v3573_v57 = vld [vmem:[%s4587_s1 + $0x260] sm:$0xff]   ;;  %v3575_v58 = vld [vmem:[%s4587_s1 + $0x2a8] sm:$0xff]  }
  0x70   : > { %3210 = vmatprep.subr.bf16.mxu1 %v3512_v63  ;;  %v3570_v54 = vld [vmem:[%s4587_s1 + $0x258] sm:$0xff]   ;;  %v3574_v59 = vld [vmem:[%s4587_s1 + $0x228] sm:$0xff]   ;;  %v3578_v61 = vld [vmem:[%s4587_s1 + $0x2b0] sm:$0xff]  }
  0x71   : > { %v3576_v60 = vld [vmem:[%s4587_s1 + $0x268] sm:$0xff]   ;;  %v3577_v62 = vld [vmem:[%s4587_s1 + $0x230] sm:$0xff]  }
  0x72   : > { %3189 = vmatpush3.bf16.msra.mxu0 %v3513_v0  ;;  %v3579_v63 = vld [vmem:[%s4587_s1 + $0x270] sm:$0xff]   ;;  %v3580_v0 = vld [vmem:[%s4587_s1 + $0x238] sm:$0xff]   ;;  %v3583_v3 = vld [vmem:[%s4011_s7 + $0x20] ss:$72 sps:$4 sm:$0xff]  }
  0x73   : > { %3211 = vmatpush3.bf16.msra.mxu1 %v3514_v1  ;;  %3218 = vmatprep.subr.bf16.mxu0 %v3521_v6  ;;  %v3581_v1 = vld [vmem:[%s4587_s1 + $0x2b8] sm:$0xff]   ;;  %v3588_v5 = vld [vmem:[%s4011_s7 + $0x28] ss:$72 sps:$4 sm:$0xff]   ;;  %v3585_v6 = vld [vmem:[%s4587_s1 + $0x2c0] sm:$0xff]  }
  0x74   : > { %3240 = vmatprep.subr.bf16.mxu1 %v3523_v8  ;;  %v3586_v8 = vld [vmem:[%s4011_s7 + $0x24] ss:$72 sps:$4 sm:$0xff]  }
  0x75   : > { %1275 = vmatmul.mubr.bf16.vlgmr.msra.gmra.mrb[0].mxu0 %v3515_v2  ;;  %v3582_v2 = vld [vmem:[%s4587_s1 + $0x278] sm:$0xff]  }
  0x76   : > { %1316 = vmatmul.mubr.bf16.vlgmr.msra.gmra.mrb[0].mxu1 %v3518_v4  ;;  %3219 = vmatpush3.bf16.msra.mxu0 %v3522_v7  ;;  %v3584_v4 = vld [vmem:[%s4587_s1 + $0x300] sm:$0xff]  }
  0x77   : > { %3241 = vmatpush3.bf16.msra.mxu1 %v3524_v9  ;;  %3220 = vmatprep.subr.bf16.mxu0 %v3525_v10  ;;  %v3589_v7 = vld [vmem:[%s4587_s1 + $0x380] sm:$0xff]   ;;  %v3591_v9 = vld [vmem:[%s4587_s1 + $0x308] sm:$0xff]  }
  0x78   : > { %3242 = vmatprep.subr.bf16.mxu1 %v3527_v12  ;;  %1356 = vmatprep.mubr.bf16.mxu0 %v3554_v38  ;;  %v3590_v10 = vld [vmem:[%s4587_s1 + $0x340] sm:$0xff]   ;;  %v3592_v12 = vld [vmem:[%s4587_s1 + $0x2c8] sm:$0xff]  }
  0x79   : > { %1397 = vmatprep.mubr.bf16.mxu1 %v3558_v42  ;;  %v3618_v38 = vld [vmem:[%s4011_s7 + $0x2c] ss:$72 sps:$4 sm:$0xff]  }
  0x7a   : > { %3221 = vmatpush3.bf16.msra.mxu0 %v3526_v11  ;;  %v3593_v11 = vld [vmem:[%s4587_s1 + $0x388] sm:$0xff]   ;;  %v3623_v42 = vld [vmem:[%s4011_s7 + $0x34] ss:$72 sps:$4 sm:$0xff]  }
  0x7b   : > { %3243 = vmatpush3.bf16.msra.mxu1 %v3528_v13  ;;  %3222 = vmatprep.subr.bf16.mxu0 %v3529_v14  ;;  %v3595_v13 = vld [vmem:[%s4587_s1 + $0x310] sm:$0xff]   ;;  %v3594_v14 = vld [vmem:[%s4587_s1 + $0x348] sm:$0xff]  }
  0x7c   : > { %3244 = vmatprep.subr.bf16.mxu1 %v3531_v16  ;;  %v3596_v16 = vld [vmem:[%s4587_s1 + $0x2d0] sm:$0xff]  }
  0x7e   : > { %3223 = vmatpush3.bf16.msra.mxu0 %v3530_v15  ;;  %v3597_v15 = vld [vmem:[%s4587_s1 + $0x390] sm:$0xff]  }
  0x7f   : > { %3245 = vmatpush3.bf16.msra.mxu1 %v3532_v17  ;;  %3224 = vmatprep.subr.bf16.mxu0 %v3533_v18  ;;  %v3599_v17 = vld [vmem:[%s4587_s1 + $0x318] sm:$0xff]   ;;  %v3598_v18 = vld [vmem:[%s4587_s1 + $0x350] sm:$0xff]  }
  0x80   : > { %3246 = vmatprep.subr.bf16.mxu1 %v3535_v20  ;;  %v3600_v20 = vld [vmem:[%s4587_s1 + $0x2d8] sm:$0xff]  }
  0x82   : > { %3225 = vmatpush3.bf16.msra.mxu0 %v3534_v19  ;;  %v3601_v19 = vld [vmem:[%s4587_s1 + $0x398] sm:$0xff]  }
  0x83   : > { %3247 = vmatpush3.bf16.msra.mxu1 %v3536_v21  ;;  %3226 = vmatprep.subr.bf16.mxu0 %v3537_v22  ;;  %v3603_v21 = vld [vmem:[%s4587_s1 + $0x320] sm:$0xff]   ;;  %v3602_v22 = vld [vmem:[%s4587_s1 + $0x358] sm:$0xff]  }
  0x84   : > { %3248 = vmatprep.subr.bf16.mxu1 %v3539_v24  ;;  %v3604_v24 = vld [vmem:[%s4587_s1 + $0x2e0] sm:$0xff]  }
  0x86   : > { %3227 = vmatpush3.bf16.msra.mxu0 %v3538_v23  ;;  %v3605_v23 = vld [vmem:[%s4587_s1 + $0x3a0] sm:$0xff]  }
  0x87   : > { %3249 = vmatpush3.bf16.msra.mxu1 %v3540_v25  ;;  %3228 = vmatprep.subr.bf16.mxu0 %v3541_v26  ;;  %v3607_v25 = vld [vmem:[%s4587_s1 + $0x328] sm:$0xff]   ;;  %v3606_v26 = vld [vmem:[%s4587_s1 + $0x360] sm:$0xff]  }
  0x88   : > { %3250 = vmatprep.subr.bf16.mxu1 %v3543_v28  ;;  %v3608_v28 = vld [vmem:[%s4587_s1 + $0x2e8] sm:$0xff]  }
  0x8a   : > { %3229 = vmatpush3.bf16.msra.mxu0 %v3542_v27  ;;  %v3609_v27 = vld [vmem:[%s4587_s1 + $0x3a8] sm:$0xff]  }
  0x8b   : > { %3251 = vmatpush3.bf16.msra.mxu1 %v3544_v29  ;;  %3230 = vmatprep.subr.bf16.mxu0 %v3545_v30  ;;  %v3611_v29 = vld [vmem:[%s4587_s1 + $0x330] sm:$0xff]   ;;  %v3610_v30 = vld [vmem:[%s4587_s1 + $0x368] sm:$0xff]  }
  0x8c   : > { %3252 = vmatprep.subr.bf16.mxu1 %v3547_v32  ;;  %v3612_v32 = vld [vmem:[%s4587_s1 + $0x2f0] sm:$0xff]  }
  0x8e   : > { %3231 = vmatpush3.bf16.msra.mxu0 %v3546_v31  ;;  %v3613_v31 = vld [vmem:[%s4587_s1 + $0x3b0] sm:$0xff]  }
  0x8f   : > { %3253 = vmatpush3.bf16.msra.mxu1 %v3548_v33  ;;  %3232 = vmatprep.subr.bf16.mxu0 %v3549_v34  ;;  %v3615_v33 = vld [vmem:[%s4587_s1 + $0x338] sm:$0xff]   ;;  %v3614_v34 = vld [vmem:[%s4587_s1 + $0x370] sm:$0xff]  }
  0x90   : > { %3254 = vmatprep.subr.bf16.mxu1 %v3551_v36  ;;  %v3620_v36 = vld [vmem:[%s4011_s7 + $0x30] ss:$72 sps:$4 sm:$0xff]  }
  0x92   : > { %3233 = vmatpush3.bf16.msra.mxu0 %v3550_v35  ;;  %v3617_v35 = vld [vmem:[%s4587_s1 + $0x3b8] sm:$0xff]  }
  0x93   : > { %3368 = vmatprep.subr.bf16.mxu0 %v3773_v40  ;;  %3255 = vmatpush3.bf16.msra.mxu1 %v3555_v39  ;;  %v3622_v39 = vld [vmem:[%s4587_s1 + $0x400] sm:$0xff]  }
  0x94   : > { %3271 = vmatprep.subr.bf16.mxu1 %v3560_v44  ;;  %v3626_v44 = vld [vmem:[%s4587_s1 + $0x3c0] sm:$0xff]  }
  0x95   : > { %1357 = vmatmul.mubr.bf16.vlgmr.msra.gmra.mrb[4].mxu0 %v3552_v37  ;;  %v3616_v37 = vld [vmem:[%s4587_s1 + $0x2f8] sm:$0xff]  }
  0x96   : > { %3384 = vmatprep.mubr.msk.bf16.mxu0 %vm3774_vm0, %v3773_v40  ;;  %3369 = vmatpush3.bf16.msra.mxu0 %v3559_v43  ;;  %v3625_v43 = vld [vmem:[%s4011_s7 + $0x38] ss:$72 sps:$4 sm:$0xff]  }
  0x97   : > { %1398 = vmatmul.mubr.bf16.vlgmr.msra.gmra.mrb[4].mxu1 %v3556_v41  ;;  %3370 = vmatprep.subr.bf16.mxu0 %v3773_v40  ;;  %v3621_v41 = vld [vmem:[%s4587_s1 + $0x378] sm:$0xff]  }
  0x98   : > { %3272 = vmatpush3.bf16.msra.mxu1 %v3561_v45  ;;  %2134 = vmatprep.mubr.bf16.mxu1 %v3588_v5  ;;  %v3627_v45 = vld [vmem:[%s4587_s1 + $0x440] sm:$0xff]  }
  0x99   : > { %3273 = vmatprep.subr.bf16.mxu1 %v3563_v47  ;;  %v3629_v47 = vld [vmem:[%s4587_s1 + $0x3c8] sm:$0xff]  }
  0x9a   : > { %3371 = vmatpush3.bf16.msra.mxu0 %v3562_v46  ;;  %v3628_v46 = vld [vmem:[%s4587_s1 + $0x408] sm:$0xff]  }
  0x9b   : > { %3372 = vmatprep.subr.bf16.mxu0 %v3773_v40  ;;  %v3652_v5 = vld [vmem:[%s4011_s7 + $0x44] ss:$72 sps:$4 sm:$0xff]  }
  0x9c   : > { %3274 = vmatpush3.bf16.msra.mxu1 %v3564_v48  ;;  %v3631_v48 = vld [vmem:[%s4587_s1 + $0x410] sm:$0xff]  }
  0x9d   : > { %3275 = vmatprep.subr.bf16.mxu1 %v3566_v50  ;;  %v3632_v50 = vld [vmem:[%s4587_s1 + $0x3d0] sm:$0xff]  }
  0x9e   : > { %3373 = vmatpush3.bf16.msra.mxu0 %v3565_v49  ;;  %v3630_v49 = vld [vmem:[%s4587_s1 + $0x448] sm:$0xff]  }
  0x9f   : > { %3374 = vmatprep.subr.bf16.mxu0 %v3773_v40 }
  0xa0   : > { %3276 = vmatpush3.bf16.msra.mxu1 %v3567_v51  ;;  %v3634_v51 = vld [vmem:[%s4587_s1 + $0x418] sm:$0xff]  }
  0xa1   : > { %3277 = vmatprep.subr.bf16.mxu1 %v3569_v53  ;;  %v3635_v53 = vld [vmem:[%s4587_s1 + $0x3d8] sm:$0xff]  }
  0xa2   : > { %3375 = vmatpush3.bf16.msra.mxu0 %v3568_v52  ;;  %v3633_v52 = vld [vmem:[%s4587_s1 + $0x450] sm:$0xff]  }
  0xa3   : > { %3376 = vmatprep.subr.bf16.mxu0 %v3773_v40 }
  0xa4   : > { %3278 = vmatpush3.bf16.msra.mxu1 %v3570_v54  ;;  %v3637_v54 = vld [vmem:[%s4587_s1 + $0x420] sm:$0xff]  }
  0xa5   : > { %3279 = vmatprep.subr.bf16.mxu1 %v3572_v55  ;;  %v3636_v55 = vld [vmem:[%s4587_s1 + $0x458] sm:$0xff]  }
  0xa6   : > { %3377 = vmatpush3.bf16.msra.mxu0 %v3571_v56  ;;  %v3638_v56 = vld [vmem:[%s4587_s1 + $0x3e0] sm:$0xff]  }
  0xa7   : > { %3378 = vmatprep.subr.bf16.mxu0 %v3773_v40 }
  0xa8   : > { %3280 = vmatpush3.bf16.msra.mxu1 %v3573_v57  ;;  %v3640_v57 = vld [vmem:[%s4587_s1 + $0x428] sm:$0xff]  }
  0xa9   : > { %3281 = vmatprep.subr.bf16.mxu1 %v3575_v58  ;;  %v3639_v58 = vld [vmem:[%s4587_s1 + $0x460] sm:$0xff]  }
  0xaa   : > { %3379 = vmatpush3.bf16.msra.mxu0 %v3574_v59  ;;  %v3641_v59 = vld [vmem:[%s4587_s1 + $0x3e8] sm:$0xff]  }
  0xab   : > { %3380 = vmatprep.subr.bf16.mxu0 %v3773_v40 }
  0xac   : > { %3282 = vmatpush3.bf16.msra.mxu1 %v3576_v60  ;;  %v3643_v60 = vld [vmem:[%s4587_s1 + $0x430] sm:$0xff]  }
  0xad   : > { %3283 = vmatprep.subr.bf16.mxu1 %v3578_v61  ;;  %v3642_v61 = vld [vmem:[%s4587_s1 + $0x468] sm:$0xff]  }
  0xae   : > { %3381 = vmatpush3.bf16.msra.mxu0 %v3577_v62  ;;  %v3650_v62 = vld [vmem:[%s4011_s7 + $0x40] ss:$72 sps:$4 sm:$0xff]  }
  0xaf   : > { %3382 = vmatprep.subr.bf16.mxu0 %v3773_v40 }
  0xb0   : > { %3284 = vmatpush3.bf16.msra.mxu1 %v3579_v63  ;;  %v3644_v63 = vld [vmem:[%s4587_s1 + $0x3f0] sm:$0xff]  }
  0xb1   : > { %3285 = vmatprep.subr.bf16.mxu1 %v3581_v1  ;;  %v3645_v1 = vld [vmem:[%s4587_s1 + $0x470] sm:$0xff]  }
  0xb2   : > { %3383 = vmatpush3.bf16.msra.mxu0 %v3580_v0  ;;  %v3646_v0 = vld [vmem:[%s4587_s1 + $0x438] sm:$0xff]  }
  0xb3   : > { %3293 = vmatprep.subr.bf16.mxu0 %v3584_v4  ;;  %v3648_v4 = vld [vmem:[%s4011_s7 + $0x3c] ss:$72 sps:$4 sm:$0xff]  }
  0xb4   : > { %3286 = vmatpush3.bf16.msra.mxu1 %v3582_v2  ;;  %v3647_v2 = vld [vmem:[%s4587_s1 + $0x3f8] sm:$0xff]  }
  0xb5   : > { %3385 = vmatmul.mubr.bf16.vlgmr.msra.gmra.mrb[8].mxu0 %v3583_v3  ;;  %3315 = vmatprep.subr.bf16.mxu1 %v3589_v7  ;;  %v3651_v3 = vld [vmem:[%s4587_s1 + $0x478] sm:$0xff]  }
  0xb6   : > { %3294 = vmatpush3.bf16.msra.mxu0 %v3585_v6  ;;  %2175 = vmatprep.mubr.bf16.mxu0 %v3620_v36  ;;  %v2899_v36 = vld [vmem:[%s4588_s2] ss:$0 sm:$0xff] }
  0xb7   : > { %2135 = vmatmul.mubr.bf16.vlgmr.msra.gmra.mrb[8].mxu1 %v3586_v8  ;;  %3295 = vmatprep.subr.bf16.mxu0 %v3591_v9 }
  0xb8   : > { %3316 = vmatpush3.bf16.msra.mxu1 %v3590_v10  ;;  %2216 = vmatprep.mubr.bf16.mxu1 %v3625_v43 }
  0xb9   : > { %3317 = vmatprep.subr.bf16.mxu1 %v3593_v11 }
  0xba   : > { %3296 = vmatpush3.bf16.msra.mxu0 %v3592_v12 }
  0xbb   : > { %3297 = vmatprep.subr.bf16.mxu0 %v3595_v13 }
  0xbc   : > { %3318 = vmatpush3.bf16.msra.mxu1 %v3594_v14 }
  0xbd   : > { %3319 = vmatprep.subr.bf16.mxu1 %v3597_v15 }
  0xbe   : > { %3298 = vmatpush3.bf16.msra.mxu0 %v3596_v16 }
  0xbf   : > { %3299 = vmatprep.subr.bf16.mxu0 %v3599_v17 }
  0xc0   : > { %3320 = vmatpush3.bf16.msra.mxu1 %v3598_v18 }
  0xc1   : > { %3321 = vmatprep.subr.bf16.mxu1 %v3601_v19 }
  0xc2   : > { %3300 = vmatpush3.bf16.msra.mxu0 %v3600_v20 }
  0xc3   : > { %3301 = vmatprep.subr.bf16.mxu0 %v3603_v21 }
  0xc4   : > { %3322 = vmatpush3.bf16.msra.mxu1 %v3602_v22 }
  0xc5   : > { %3323 = vmatprep.subr.bf16.mxu1 %v3605_v23 }
  0xc6   : > { %3302 = vmatpush3.bf16.msra.mxu0 %v3604_v24 }
  0xc7   : > { %3303 = vmatprep.subr.bf16.mxu0 %v3607_v25 }
  0xc8   : > { %3324 = vmatpush3.bf16.msra.mxu1 %v3606_v26 }
  0xc9   : > { %3325 = vmatprep.subr.bf16.mxu1 %v3609_v27 }
  0xca   : > { %3304 = vmatpush3.bf16.msra.mxu0 %v3608_v28 }
  0xcb   : > { %3305 = vmatprep.subr.bf16.mxu0 %v3611_v29 }
  0xcc   : > { %3326 = vmatpush3.bf16.msra.mxu1 %v3610_v30 }
  0xcd   : > { %3327 = vmatprep.subr.bf16.mxu1 %v3613_v31 }
  0xce   : > { %3306 = vmatpush3.bf16.msra.mxu0 %v3612_v32 }
  0xcf   : > { %3307 = vmatprep.subr.bf16.mxu0 %v3615_v33 }
  0xd0   : > { %3328 = vmatpush3.bf16.msra.mxu1 %v3614_v34 }
  0xd1   : > { %3329 = vmatprep.subr.bf16.mxu1 %v3617_v35 }
  0xd2   : > { %3308 = vmatpush3.bf16.msra.mxu0 %v3616_v37 }
  0xd3   : > { %3337 = vmatprep.subr.bf16.mxu0 %v3622_v39  ;;  %v2900_v39 = vld [vmem:[%s4589_s3] ss:$0 sm:$0xff] }
  0xd4   : > { %3330 = vmatpush3.bf16.msra.mxu1 %v3621_v41 }
  0xd5   : > { %2176 = vmatmul.mubr.bf16.vlgmr.msra.gmra.mrb[12].mxu0 %v3618_v38  ;;  %3388 = vmatprep.subr.bf16.mxu1 %v3773_v40 }
  0xd6   : > { %3338 = vmatpush3.bf16.msra.mxu0 %v3626_v44  ;;  %2257 = vmatprep.mubr.bf16.mxu0 %v3650_v62 }
  0xd7   : > { %2217 = vmatmul.mubr.bf16.vlgmr.msra.gmra.mrb[12].mxu1 %v3623_v42  ;;  %3339 = vmatprep.subr.bf16.mxu0 %v3628_v46 }
  0xd8   : > { %3389 = vmatpush3.bf16.msra.mxu1 %v3627_v45  ;;  %3404 = vmatprep.mubr.msk.bf16.mxu1 %vm3774_vm0, %v3773_v40 }
  0xd9   : > { %3390 = vmatprep.subr.bf16.mxu1 %v3773_v40 }
  0xda   : > { %3340 = vmatpush3.bf16.msra.mxu0 %v3629_v47 }
  0xdb   : > { %3341 = vmatprep.subr.bf16.mxu0 %v3631_v48 }
  0xdc   : > { %3391 = vmatpush3.bf16.msra.mxu1 %v3630_v49 }
  0xdd   : > { %3392 = vmatprep.subr.bf16.mxu1 %v3773_v40 }
  0xde   : > { %3342 = vmatpush3.bf16.msra.mxu0 %v3632_v50 }
  0xdf   : > { %3343 = vmatprep.subr.bf16.mxu0 %v3634_v51 }
  0xe0   : > { %3393 = vmatpush3.bf16.msra.mxu1 %v3633_v52 }
  0xe1   : > { %3394 = vmatprep.subr.bf16.mxu1 %v3773_v40 }
  0xe2   : > { %3344 = vmatpush3.bf16.msra.mxu0 %v3635_v53 }
  0xe3   : > { %3345 = vmatprep.subr.bf16.mxu0 %v3637_v54 }
  0xe4   : > { %3395 = vmatpush3.bf16.msra.mxu1 %v3636_v55 }
  0xe5   : > { %3396 = vmatprep.subr.bf16.mxu1 %v3773_v40 }
  0xe6   : > { %3346 = vmatpush3.bf16.msra.mxu0 %v3638_v56 }
  0xe7   : > { %3347 = vmatprep.subr.bf16.mxu0 %v3640_v57 }
  0xe8   : > { %3397 = vmatpush3.bf16.msra.mxu1 %v3639_v58 }
  0xe9   : > { %3398 = vmatprep.subr.bf16.mxu1 %v3773_v40 }
  0xea   : > { %3348 = vmatpush3.bf16.msra.mxu0 %v3641_v59 }
  0xeb   : > { %3349 = vmatprep.subr.bf16.mxu0 %v3643_v60 }
  0xec   : > { %3399 = vmatpush3.bf16.msra.mxu1 %v3642_v61 }
  0xed   : > { %3400 = vmatprep.subr.bf16.mxu1 %v3773_v40 }
  0xee   : > { %3350 = vmatpush3.bf16.msra.mxu0 %v3644_v63 }
  0xef   : > { %3351 = vmatprep.subr.bf16.mxu0 %v3646_v0 }
  0xf0   : > { %3401 = vmatpush3.bf16.msra.mxu1 %v3645_v1 }
  0xf1   : > { %3402 = vmatprep.subr.bf16.mxu1 %v3773_v40 }
  0xf2   : > { %3352 = vmatpush3.bf16.msra.mxu0 %v3647_v2 }
  0xf4   : > { %3403 = vmatpush3.bf16.msra.mxu1 %v3651_v3 }
  0xf5   : > { %2258 = vmatmul.mubr.bf16.vlgmr.msra.gmra.mrb[16].mxu0 %v3648_v4 }
  0xf7   : > { %3405 = vmatmul.mubr.bf16.vlgmr.msra.gmra.mrb[16].mxu1 %v3652_v5 }
 0x148   : > { %v3190_v6 = vpop.f32.mrb[0].mxu0 }
 0x149   : > { %v3212_v7 = vpop.f32.mrb[0].mxu1  ;;  %v3191_v8 = vpop.f32.mrb[1].mxu0 }
 0x14a   : > { %v3192_v9 = vadd.f32 %v3191_v8, %v3190_v6  ;;  %v3213_v10 = vpop.f32.mrb[1].mxu1  ;;  %v3193_v11 = vpop.f32.mrb[2].mxu0 }
 0x14b   : > { %v3214_v12 = vadd.f32 %v3213_v10, %v3212_v7  ;;  %v3215_v13 = vpop.f32.mrb[2].mxu1  ;;  %v3194_v14 = vpop.f32.mrb[3].mxu0 }
 0x14c   : > { %v3195_v15 = vadd.f32 %v3194_v14, %v3193_v11  ;;  %v3216_v16 = vpop.f32.mrb[3].mxu1 }
 0x14d   : > { %v1318_v17 = vadd.f32 %v3214_v12, %v3192_v9  ;;  %v3217_v18 = vadd.f32 %v3216_v16, %v3215_v13 }
 0x14f   : > { %v1321_v40 = vadd.f32 %v3217_v18, %v3195_v15 }
 0x168   : > { %v3234_v19 = vpop.f32.mrb[4].mxu0 }
 0x169   : > { %v3235_v20 = vpop.f32.mrb[5].mxu0 }
 0x16a   : > { %v3236_v21 = vadd.f32 %v3235_v20, %v3234_v19  ;;  %v3237_v22 = vpop.f32.mrb[6].mxu0  ;;  %v3256_v23 = vpop.f32.mrb[4].mxu1 }
 0x16b   : > { %v3238_v24 = vpop.f32.mrb[7].mxu0  ;;  %v3257_v27 = vpop.f32.mrb[5].mxu1 }
 0x16c   : > { %v1359_v25 = vadd.f32 %v3236_v21, %v1318_v17  ;;  %v3239_v26 = vadd.f32 %v3238_v24, %v3237_v22  ;;  %v3258_v28 = vadd.f32 %v3257_v27, %v3256_v23  ;;  %v3259_v29 = vpop.f32.mrb[6].mxu1  ;;  %v3127_v22 = vld [vmem:[%s4589_s3 + $0x1] ss:$0 sm:$0xff] }
 0x16d   : > { %v3260_v31 = vpop.f32.mrb[7].mxu1 }
 0x16e   : > { %v1362_v30 = vadd.f32 %v3239_v26, %v1321_v40  ;;  %v3261_v32 = vadd.f32 %v3260_v31, %v3259_v29  ;;  %v1400_v33 = vadd.f32 %v3258_v28, %v1359_v25  ;;  %v3126_v40 = vld [vmem:[%s4588_s2 + $0x1] ss:$0 sm:$0xff] }
 0x170   : > { %v1403_v34 = vadd.f32 %v3261_v32, %v1362_v30 }
 0x188   : > { %v1440_v35 = vpop.f32.mrb[8].mxu0 }
 0x189   : > { %v1441_v37 = vadd.f32 %v1440_v35, %v1400_v33  ;;  %v3386_v38 = vpop.f32.mrb[9].mxu0 }
 0x18a   : > { %v1443_v41 = vpop.f32.mrb[10].mxu0  ;;  %v3287_v42 = vpop.f32.mrb[8].mxu1 }
 0x18b   : > { %v1454_v43 = vmul.f32 %v2899_v36, %v1441_v37  ;;  %v1444_v44 = vadd.f32 %v1443_v41, %v1403_v34  ;;  %v3387_v45 = vpop.f32.mrb[11].mxu0  ;;  %v3288_v46 = vpop.f32.mrb[9].mxu1 }
 0x18c   : > { %v3289_v47 = vadd.f32 %v3288_v46, %v3287_v42  ;;  %v3290_v48 = vpop.f32.mrb[10].mxu1 }
 0x18d   : > { %v1463_v49 = vadd.f32 %v2900_v39, %v1454_v43  ;;  %v1455_v50 = vmul.f32 %v2899_v36, %v1444_v44  ;;  %v3291_v51 = vpop.f32.mrb[11].mxu1 }
 0x18e   : > { %v3292_v52 = vadd.f32 %v3291_v51, %v3290_v48 }
 0x18f   : > { %v1464_v53 = vadd.f32 %v2900_v39, %v1455_v50  ;;  %v1465_v54 = vmax.f32 %v1463_v49, 0.0 }
 0x191   : > { %v1466_v55 = vmax.f32 %v1464_v53, 0.0 }
 0x193   : > { %v1467_v56 = vpack.c.bf16 %v1466_v55, %v1465_v54 }
 0x195   : > { %1468 = vst [vmem:[#allocation2] sm:$0xff] %v1467_v56 }
 0x1a8   : > { %v3309_v57 = vpop.f32.mrb[12].mxu0 }
 0x1a9   : > { %v3310_v58 = vpop.f32.mrb[13].mxu0 }
 0x1aa   : > { %v3311_v59 = vadd.f32 %v3310_v58, %v3309_v57  ;;  %v3312_v60 = vpop.f32.mrb[14].mxu0  ;;  %v3331_v61 = vpop.f32.mrb[12].mxu1 }
 0x1ab   : > { %v3313_v62 = vpop.f32.mrb[15].mxu0  ;;  %v3332_v63 = vpop.f32.mrb[13].mxu1 }
 0x1ac   : > { %v2178_v0 = vadd.f32 %v3311_v59, %v3289_v47  ;;  %v3314_v1 = vadd.f32 %v3313_v62, %v3312_v60  ;;  %v3333_v2 = vadd.f32 %v3332_v63, %v3331_v61  ;;  %v3334_v3 = vpop.f32.mrb[14].mxu1 }
 0x1ad   : > { %v3335_v4 = vpop.f32.mrb[15].mxu1 }
 0x1ae   : > { %v2181_v5 = vadd.f32 %v3314_v1, %v3292_v52  ;;  %v2219_v6 = vadd.f32 %v3333_v2, %v2178_v0  ;;  %v3336_v7 = vadd.f32 %v3335_v4, %v3334_v3 }
 0x1b0   : > { %v2222_v8 = vadd.f32 %v3336_v7, %v2181_v5 }
 0x1c8   : > { %v3353_v9 = vpop.f32.mrb[16].mxu0 }
 0x1c9   : > { %v3354_v10 = vpop.f32.mrb[17].mxu0 }
 0x1ca   : > { %v3355_v11 = vadd.f32 %v3354_v10, %v3353_v9  ;;  %v3356_v12 = vpop.f32.mrb[18].mxu0  ;;  %v2300_v13 = vpop.f32.mrb[16].mxu1 }
 0x1cb   : > { %v3357_v14 = vpop.f32.mrb[19].mxu0  ;;  %v3406_v15 = vpop.f32.mrb[17].mxu1 }
 0x1cc   : > { %v2260_v16 = vadd.f32 %v3355_v11, %v2219_v6  ;;  %v3358_v17 = vadd.f32 %v3357_v14, %v3356_v12  ;;  %v2303_v18 = vpop.f32.mrb[18].mxu1 }
 0x1cd   : > { %v3407_v19 = vpop.f32.mrb[19].mxu1 }
 0x1ce   : > { %v2301_v20 = vadd.f32 %v2300_v13, %v2260_v16  ;;  %v2263_v21 = vadd.f32 %v3358_v17, %v2222_v8 }
 0x1d0   : > { %v2314_v23 = vmul.f32 %v3126_v40, %v2301_v20  ;;  %v2304_v24 = vadd.f32 %v2303_v18, %v2263_v21 }
 0x1d2   : > { %v2323_v25 = vadd.f32 %v3127_v22, %v2314_v23  ;;  %v2315_v26 = vmul.f32 %v3126_v40, %v2304_v24 }
 0x1d4   : > { %v2324_v27 = vadd.f32 %v3127_v22, %v2315_v26  ;;  %v2325_v28 = vmax.f32 %v2323_v25, 0.0 }
 0x1d6   : > { %v2326_v29 = vmax.f32 %v2324_v27, 0.0 }
 0x1d8   : > { %v2327_v30 = vpack.c.bf16 %v2326_v29, %v2325_v28 }
 0x1da   : > { %2328 = vst [vmem:[#allocation2 + $0x8] sm:$0xff] %v2327_v30 }
 0x1db PF: > { %v3653_v31 = vld [vmem:[%s4013_s12 + $0x4] ss:$8 sps:$4 sm:$0xff]   ;;  %v3655_v32 = vld [vmem:[%s4013_s12] ss:$8 sps:$4 sm:$0xff]   ;;  %v3656_v33 = vld [vmem:[%s4013_s12 + $0x14] ss:$8 sps:$4 sm:$0xff]   ;;  %v2568_v2 = vlaneseq }
 0x1dc   : > { %2523 = vmatprep.subr.bf16.mxu0 %v3653_v31  ;;  %v3658_v34 = vld [vmem:[%s4013_s12 + $0x10] ss:$8 sps:$4 sm:$0xff]   ;;  %v3659_v35 = vld [vmem:[%s4013_s12 + $0x24] ss:$8 sps:$4 sm:$0xff]   ;;  %v3661_v36 = vld [vmem:[%s4013_s12 + $0x20] ss:$8 sps:$4 sm:$0xff]  }
 0x1dd   : > { %2524 = vmatpush1.bf16.msra.mxu0 %v3655_v32  ;;  %v3662_v37 = vld [vmem:[%s4013_s12 + $0x34] ss:$8 sps:$4 sm:$0xff]   ;;  %v3664_v38 = vld [vmem:[%s4013_s12 + $0x30] ss:$8 sps:$4 sm:$0xff]   ;;  %v3665_v39 = vld [vmem:[%s4013_s12 + $0x44] ss:$8 sps:$4 sm:$0xff]  }
 0x1de   : > { %2525 = vmatprep.subr.bf16.mxu0 %v3656_v33  ;;  %v3667_v41 = vld [vmem:[%s4013_s12 + $0x40] ss:$8 sps:$4 sm:$0xff]   ;;  %v3668_v42 = vld [vmem:[%s4013_s12 + $0x54] ss:$8 sps:$4 sm:$0xff]   ;;  %v3670_v43 = vld [vmem:[%s4013_s12 + $0x50] ss:$8 sps:$4 sm:$0xff]  }
 0x1df   : > { %v3671_v44 = vld [vmem:[%s4013_s12 + $0x64] ss:$8 sps:$4 sm:$0xff]   ;;  %v3673_v46 = vld [vmem:[%s4013_s12 + $0x60] ss:$8 sps:$4 sm:$0xff]   ;;  %v3674_v47 = vld [vmem:[%s4013_s12 + $0x74] ss:$8 sps:$4 sm:$0xff]  }
 0x1e0   : > { %v3676_v48 = vld [vmem:[%s4013_s12 + $0x70] ss:$8 sps:$4 sm:$0xff]   ;;  %v3677_v49 = vld [vmem:[%s4013_s12 + $0x84] ss:$8 sps:$4 sm:$0xff]   ;;  %v3679_v50 = vld [vmem:[%s4013_s12 + $0x80] ss:$8 sps:$4 sm:$0xff]  }
 0x1e1   : > { %2526 = vmatpush1.bf16.msra.mxu0 %v3658_v34  ;;  %v2330_v45 = vld [vmem:[#allocation2 + $0x8] sm:$0xff]  ;;  %v3683_v53 = vld [vmem:[%s4013_s12 + $0xa4] ss:$8 sps:$4 sm:$0xff]   ;;  %v3685_v54 = vld [vmem:[%s4013_s12 + $0xa0] ss:$8 sps:$4 sm:$0xff]   ;;  %v2569_v3 = vshrl.u32 %v2568_v2, 7 }
 0x1e2   : > { %2527 = vmatprep.subr.bf16.mxu0 %v3659_v35  ;;  %2555 = vmatprep.mubr.bf16.mxu0 %v2330_v45  ;;  %v3680_v51 = vld [vmem:[%s4013_s12 + $0x94] ss:$8 sps:$4 sm:$0xff]   ;;  %v3682_v52 = vld [vmem:[%s4013_s12 + $0x90] ss:$8 sps:$4 sm:$0xff]   ;;  %v3689_v57 = vld [vmem:[%s4013_s12 + $0xc4] ss:$8 sps:$4 sm:$0xff]  }
 0x1e3   : > { %v3686_v55 = vld [vmem:[%s4013_s12 + $0xb4] ss:$8 sps:$4 sm:$0xff]   ;;  %v3688_v56 = vld [vmem:[%s4013_s12 + $0xb0] ss:$8 sps:$4 sm:$0xff]   ;;  %v3691_v58 = vld [vmem:[%s4013_s12 + $0xc0] ss:$8 sps:$4 sm:$0xff]  }
 0x1e4   : > { %v3692_v59 = vld [vmem:[%s4013_s12 + $0xd4] ss:$8 sps:$4 sm:$0xff]   ;;  %v3694_v60 = vld [vmem:[%s4013_s12 + $0xd0] ss:$8 sps:$4 sm:$0xff]   ;;  %v3695_v61 = vld [vmem:[%s4013_s12 + $0xe4] ss:$8 sps:$4 sm:$0xff]  }
 0x1e5   : > { %2528 = vmatpush1.bf16.msra.mxu0 %v3661_v36  ;;  %v3697_v62 = vld [vmem:[%s4013_s12 + $0xe0] ss:$8 sps:$4 sm:$0xff]   ;;  %v3698_v63 = vld [vmem:[%s4013_s12 + $0xf4] ss:$8 sps:$4 sm:$0xff]   ;;  %v3700_v0 = vld [vmem:[%s4013_s12 + $0xf0] ss:$8 sps:$4 sm:$0xff]  }
 0x1e6   : > { %2529 = vmatprep.subr.bf16.mxu0 %v3662_v37  ;;  %v2329_v1 = vld [vmem:[#allocation2] sm:$0xff]  ;;  %v2570_v4 = vsub.s32 0, %v2569_v3  ;;  %v2574_v6 = vsub.s32 1, %v2569_v3  ;;  %v2599_v14 = vld [vmem:[%s535_s11 + $0x8] sm:$0xff] }
 0x1e7   : > { %v2566_v5 = vld [vmem:[%s594_s18] sm:$0x3]  ;;  %v2602_v22 = vunpack.c.l.bf16 %v2599_v14  ;;  %v2603_v26 = vunpack.c.h.bf16 %v2599_v14 }
 0x1e8   : > { %v2582_v7 = vld [vmem:[%s599_s16] sm:$0x3]  ;;  %v2571_v8 = vrot.slane %v2566_v5, %v2570_v4  ;;  %v2575_v10 = vrot.slane %v2566_v5, %v2574_v6 }
 0x1e9   : > { %2530 = vmatpush1.bf16.msra.mxu0 %v3664_v38  ;;  %v2598_v9 = vld [vmem:[%s535_s11] sm:$0xff]  ;;  %v2587_v11 = vrot.slane %v2582_v7, %v2570_v4  ;;  %v2591_v13 = vrot.slane %v2582_v7, %v2574_v6  ;;  %s3173_s11 = sshll.u32 (%p3895_p10), %s3759_s10, 3 }
 0x1ea   : > { %2531 = vmatprep.subr.bf16.mxu0 %v3665_v39  ;;  %v2600_v16 = vunpack.c.l.bf16 %v2598_v9  ;;  %v2601_v40 = vunpack.c.h.bf16 %v2598_v9  ;;  %s2636_s12 = sadd.s32 (%p3895_p10), %s3173_s11, %s3994_s20 }
 0x1eb   : > { %s3166_s19 = sshll.u32 (%p3895_p10), %s2636_s12, 2 }
 0x1ec   : > { %s2638_s16 = scalar_lea.vmem (%p3895_p10), %s4594_s8, %s3166_s19 }
 0x1ed   : > { %2532 = vmatpush1.bf16.msra.mxu0 %v3667_v41 }
 0x1ee   : > { %2533 = vmatprep.subr.bf16.mxu0 %v3668_v42 }
 0x1f1   : > { %2534 = vmatpush1.bf16.msra.mxu0 %v3670_v43 }
 0x1f2   : > { %2535 = vmatprep.subr.bf16.mxu0 %v3671_v44 }
 0x1f5   : > { %2536 = vmatpush1.bf16.msra.mxu0 %v3673_v46 }
 0x1f6   : > { %2537 = vmatprep.subr.bf16.mxu0 %v3674_v47 }
 0x1f9   : > { %2538 = vmatpush1.bf16.msra.mxu0 %v3676_v48 }
 0x1fa   : > { %2539 = vmatprep.subr.bf16.mxu0 %v3677_v49 }
 0x1fd   : > { %2540 = vmatpush1.bf16.msra.mxu0 %v3679_v50 }
 0x1fe   : > { %2541 = vmatprep.subr.bf16.mxu0 %v3680_v51 }
 0x201   : > { %2542 = vmatpush1.bf16.msra.mxu0 %v3682_v52 }
 0x202   : > { %2543 = vmatprep.subr.bf16.mxu0 %v3683_v53 }
 0x205   : > { %2544 = vmatpush1.bf16.msra.mxu0 %v3685_v54 }
 0x206   : > { %2545 = vmatprep.subr.bf16.mxu0 %v3686_v55 }
 0x209   : > { %2546 = vmatpush1.bf16.msra.mxu0 %v3688_v56 }
 0x20a   : > { %2547 = vmatprep.subr.bf16.mxu0 %v3689_v57 }
 0x20d   : > { %2548 = vmatpush1.bf16.msra.mxu0 %v3691_v58 }
 0x20e   : > { %2549 = vmatprep.subr.bf16.mxu0 %v3692_v59 }
 0x211   : > { %2550 = vmatpush1.bf16.msra.mxu0 %v3694_v60 }
 0x212   : > { %2551 = vmatprep.subr.bf16.mxu0 %v3695_v61 }
 0x215   : > { %2552 = vmatpush1.bf16.msra.mxu0 %v3697_v62 }
 0x216   : > { %2553 = vmatprep.subr.bf16.mxu0 %v3698_v63 }
 0x219   : > { %2554 = vmatpush1.bf16.msra.mxu0 %v3700_v0 }
 0x21c   : > { %2556 = vmatmul.mubr.bf16.vlgmr.msra.gmra.mrb[0].mxu0 %v2329_v1 }
 0x2ef   : > { %v2557_v12 = vpop.f32.mrb[0].mxu0 }
 0x2f0   : > { %v2578_v15 = vmul.f32 %v2571_v8, %v2557_v12  ;;  %v2559_v17 = vpop.f32.mrb[1].mxu0 }
 0x2f1   : > { %v2579_v18 = vmul.f32 %v2575_v10, %v2559_v17  ;;  %v2561_v19 = vpop.f32.mrb[2].mxu0 }
 0x2f2   : > { %v2594_v20 = vadd.f32 %v2587_v11, %v2578_v15  ;;  %v2580_v21 = vmul.f32 %v2571_v8, %v2561_v19  ;;  %v2563_v23 = vpop.f32.mrb[3].mxu0 }
 0x2f3   : > { %v2595_v24 = vadd.f32 %v2591_v13, %v2579_v18  ;;  %v2581_v25 = vmul.f32 %v2575_v10, %v2563_v23 }
 0x2f4   : > { %v2604_v27 = vadd.f32 %v2600_v16, %v2594_v20  ;;  %v2596_v28 = vadd.f32 %v2587_v11, %v2580_v21 }
 0x2f5   : > { %v2605_v29 = vadd.f32 %v2601_v40, %v2595_v24  ;;  %v2597_v30 = vadd.f32 %v2591_v13, %v2581_v25 }
 0x2f6   : > { %v2608_v31 = vmax.f32 %v2604_v27, 0.0  ;;  %v2606_v32 = vadd.f32 %v2602_v22, %v2596_v28 }
 0x2f7   : > { %v2609_v33 = vmax.f32 %v2605_v29, 0.0  ;;  %v2607_v34 = vadd.f32 %v2603_v26, %v2597_v30  ;;  %2632 = sbr.rel (!%p3895_p10) target bundleno = 774 (0x306), region = 136 }
 0x2f8   : > { %v2610_v35 = vmax.f32 %v2606_v32, 0.0 }
 0x2f9   : > { %v3171_v36 = vpack.c.bf16 %v2609_v33, %v2608_v31  ;;  %v2611_v37 = vmax.f32 %v2607_v34, 0.0 }
 0x2fb   : > { %2624 = vst [vmem:[%s4017_s30] sm:$0xff] %v3171_v36  ;;  %v3172_v38 = vpack.c.bf16 %v2611_v37, %v2610_v35 }
 0x2fd   : > { %2625 = vst [vmem:[%s4017_s30 + $0x8] sm:$0xff] %v3172_v38 }
 0x302   : > { %v2668_v39 = vld [vmem:[%s4017_s30] sm:$0xff] }
 0x303   : > { %2669 = vst [vmem:[%s2638_s16] sm:$0xff] %v2668_v39 }
 0x304   : > { %v2670_v41 = vld [vmem:[%s4017_s30 + $0x8] sm:$0xff] }
 0x305   : > { %2671 = vst [vmem:[%s2638_s16 + $0x10] sm:$0xff] %v2670_v41 }
 0x306 PF: > { %s18_s13 = sadd.s32 1, %s3771_s13   ;;  %s4613_s29 = sld [smem:[#allocation6_spill]] }
 0x307   : > { %p15_p4 = scmp.ge.s32.totalorder %s18_s13, 6   ;;  %s4614_s30 = sld [smem:[#allocation11_spill]] }
 0x308   : > { %s4615_s9 = sld [smem:[#allocation7_spill]]  ;;  %s4616_s10 = sld [smem:[#allocation8_spill]] }
 0x309   : > { %s4617_s11 = sld [smem:[#allocation9_spill]]  ;;  %s4618_s12 = sld [smem:[#allocation10_spill]] }
 0x30a   : > { %s4619_s27 = smov %s3743_s28  ;;  %s4620_s28 = smov %s3900_s26 }
 0x30b   :  { %17 = sbr.rel (!%p15_p4) target bundleno = 8 (0x8), region = 223 }

// kernel: resnext50_encoder.43
= control target key start
LH: loop header
LB: loop body
LE: loop exit
PB: predicated region body
PF: predicated region fallthrough
CT: control target
= control target key end

     0   :  { %s1282_s15 = smov 0   ;;  %s1284_s16 = smov 0   ;;  %s1526_s0 = inlined_call_operand.vmem [shape: bf16[32,512], index: 0, kind: input, shape index: {}]   ;;  %s1527_s1 = inlined_call_operand.vmem [shape: bf16[512,256], index: 1, kind: input, shape index: {}]   ;;  %s1528_s2 = inlined_call_operand.vmem [shape: f32[1,256], index: 2, kind: input, shape index: {}]   ;;  %s1529_s3 = inlined_call_operand.vmem [shape: f32[1,256], index: 3, kind: input, shape index: {}]   ;;  %s1530_s4 = inlined_call_operand.vmem [shape: bf16[32,256], index: 4, kind: output, shape index: {}]  }
   0x1   :  { %s1286_s17 = smov 0  }
   0x2 LB: > { %s33_s18 = sadd.s32 1, %s1251_s16  ;;  %p1020_p0 = scmp.ge.s32.totalorder %s1255_s17, 1  ;;  %s1255_s17 = sphi %s1286_s17, %s14_s17   ;;  %s1251_s16 = sphi %s1284_s16, %s1532_s16   ;;  %s1247_s15 = sphi %s1282_s15, %s1531_s15  }
   0x3   : > { %p35_p1 = scmp.ge.s32.totalorder %s33_s18, 2  ;;  %p231_p2 = scmp.lt.s32.totalorder %s1255_s17, 3 }
   0x5   : > { %s1534_s18 = smov (%p35_p1, %s33_s18), 0  ;;  %p232_p3 = pnand %p1020_p0, %p231_p2 }
   0x6   : > { %v1131_v0 = vld [vmem:[%s1527_s1 + $0x4] ss:$8 sps:$4 sm:$0xff] (!%p232_p3)   ;;  %v1135_v2 = vld [vmem:[%s1527_s1] ss:$8 sps:$4 sm:$0xff] (!%p232_p3)   ;;  %v1137_v4 = vld [vmem:[%s1527_s1 + $0x14] ss:$8 sps:$4 sm:$0xff] (!%p232_p3)  }
   0x7   : > { %235 = sbr.rel (%p232_p3) target bundleno = 298 (0x12a), region = 36  ;;  %v1133_v1 = vld [vmem:[%s1527_s1 + $0x104] ss:$8 sps:$4 sm:$0xff] (!%p232_p3)   ;;  %739 = vmatprep.subr.bf16.mxu1 (!%p232_p3), %v1131_v0  ;;  %v1136_v3 = vld [vmem:[%s1527_s1 + $0x100] ss:$8 sps:$4 sm:$0xff] (!%p232_p3)   ;;  %s1021_s9 = sshll.u32 (!%p232_p3), %s1247_s15, 1 }
   0x8   : > { %782 = vmatprep.subr.bf16.mxu0 (!%p232_p3), %v1133_v1  ;;  %740 = vmatpush1.bf16.msra.mxu1 (!%p232_p3), %v1135_v2  ;;  %v1139_v5 = vld [vmem:[%s1527_s1 + $0x114] ss:$8 sps:$4 sm:$0xff] (!%p232_p3)   ;;  %v1141_v6 = vld [vmem:[%s1527_s1 + $0x10] ss:$8 sps:$4 sm:$0xff] (!%p232_p3)   ;;  %v1143_v8 = vld [vmem:[%s1527_s1 + $0x24] ss:$8 sps:$4 sm:$0xff] (!%p232_p3)  }
   0x9   : > { %783 = vmatpush1.bf16.msra.mxu0 (!%p232_p3), %v1136_v3  ;;  %741 = vmatprep.subr.bf16.mxu1 (!%p232_p3), %v1137_v4  ;;  %v1142_v7 = vld [vmem:[%s1527_s1 + $0x110] ss:$8 sps:$4 sm:$0xff] (!%p232_p3)   ;;  %v1145_v9 = vld [vmem:[%s1527_s1 + $0x124] ss:$8 sps:$4 sm:$0xff] (!%p232_p3)   ;;  %v1147_v10 = vld [vmem:[%s1527_s1 + $0x20] ss:$8 sps:$4 sm:$0xff] (!%p232_p3)   ;;  %v827_v4 = vlaneseq (!%p232_p3) }
   0xa   : > { %784 = vmatprep.subr.bf16.mxu0 (!%p232_p3), %v1139_v5  ;;  %v1148_v11 = vld [vmem:[%s1527_s1 + $0x120] ss:$8 sps:$4 sm:$0xff] (!%p232_p3)   ;;  %v1149_v12 = vld [vmem:[%s1527_s1 + $0x34] ss:$8 sps:$4 sm:$0xff] (!%p232_p3)   ;;  %v1153_v14 = vld [vmem:[%s1527_s1 + $0x30] ss:$8 sps:$4 sm:$0xff] (!%p232_p3)  }
   0xb   : > { %v1151_v13 = vld [vmem:[%s1527_s1 + $0x134] ss:$8 sps:$4 sm:$0xff] (!%p232_p3)   ;;  %v1154_v15 = vld [vmem:[%s1527_s1 + $0x130] ss:$8 sps:$4 sm:$0xff] (!%p232_p3)   ;;  %v1155_v16 = vld [vmem:[%s1527_s1 + $0x44] ss:$8 sps:$4 sm:$0xff] (!%p232_p3)  }
   0xc   : > { %742 = vmatpush1.bf16.msra.mxu1 (!%p232_p3), %v1141_v6  ;;  %v1157_v17 = vld [vmem:[%s1527_s1 + $0x144] ss:$8 sps:$4 sm:$0xff] (!%p232_p3)   ;;  %v1159_v18 = vld [vmem:[%s1527_s1 + $0x40] ss:$8 sps:$4 sm:$0xff] (!%p232_p3)   ;;  %v1161_v20 = vld [vmem:[%s1527_s1 + $0x54] ss:$8 sps:$4 sm:$0xff] (!%p232_p3)  }
   0xd   : > { %785 = vmatpush1.bf16.msra.mxu0 (!%p232_p3), %v1142_v7  ;;  %743 = vmatprep.subr.bf16.mxu1 (!%p232_p3), %v1143_v8  ;;  %v1160_v19 = vld [vmem:[%s1527_s1 + $0x140] ss:$8 sps:$4 sm:$0xff] (!%p232_p3)   ;;  %v1163_v21 = vld [vmem:[%s1527_s1 + $0x154] ss:$8 sps:$4 sm:$0xff] (!%p232_p3)   ;;  %v1165_v22 = vld [vmem:[%s1527_s1 + $0x50] ss:$8 sps:$4 sm:$0xff] (!%p232_p3)  }
   0xe   : > { %786 = vmatprep.subr.bf16.mxu0 %v1145_v9  ;;  %v1166_v23 = vld [vmem:[%s1527_s1 + $0x150] ss:$8 sps:$4 sm:$0xff]   ;;  %v1167_v24 = vld [vmem:[%s1527_s1 + $0x64] ss:$8 sps:$4 sm:$0xff]   ;;  %v1171_v26 = vld [vmem:[%s1527_s1 + $0x60] ss:$8 sps:$4 sm:$0xff]  }
   0xf   : > { %v1169_v25 = vld [vmem:[%s1527_s1 + $0x164] ss:$8 sps:$4 sm:$0xff]   ;;  %v1172_v27 = vld [vmem:[%s1527_s1 + $0x160] ss:$8 sps:$4 sm:$0xff]   ;;  %v1173_v28 = vld [vmem:[%s1527_s1 + $0x74] ss:$8 sps:$4 sm:$0xff]  }
  0x10   : > { %744 = vmatpush1.bf16.msra.mxu1 %v1147_v10  ;;  %v1175_v29 = vld [vmem:[%s1527_s1 + $0x174] ss:$8 sps:$4 sm:$0xff]   ;;  %v1177_v30 = vld [vmem:[%s1527_s1 + $0x70] ss:$8 sps:$4 sm:$0xff]   ;;  %v1179_v32 = vld [vmem:[%s1527_s1 + $0x84] ss:$8 sps:$4 sm:$0xff]  }
  0x11   : > { %787 = vmatpush1.bf16.msra.mxu0 %v1148_v11  ;;  %745 = vmatprep.subr.bf16.mxu1 %v1149_v12  ;;  %v1178_v31 = vld [vmem:[%s1527_s1 + $0x170] ss:$8 sps:$4 sm:$0xff]   ;;  %v1181_v33 = vld [vmem:[%s1527_s1 + $0x184] ss:$8 sps:$4 sm:$0xff]   ;;  %p287_p4 = scmp.lt.s32.totalorder %s1021_s9, 3  ;;  %v828_v5 = vshrl.u32 %v827_v4, 7 }
  0x12   : > { %788 = vmatprep.subr.bf16.mxu0 %v1151_v13  ;;  %v1183_v34 = vld [vmem:[%s1527_s1 + $0x80] ss:$8 sps:$4 sm:$0xff]   ;;  %v1185_v36 = vld [vmem:[%s1527_s1 + $0x94] ss:$8 sps:$4 sm:$0xff]   ;;  %v1189_v38 = vld [vmem:[%s1527_s1 + $0x90] ss:$8 sps:$4 sm:$0xff]  }
  0x13   : > { %v1184_v35 = vld [vmem:[%s1527_s1 + $0x180] ss:$8 sps:$4 sm:$0xff]   ;;  %v1187_v37 = vld [vmem:[%s1527_s1 + $0x194] ss:$8 sps:$4 sm:$0xff]   ;;  %s1536_s9 = smov (!%p287_p4, %s1021_s9), 3  ;;  %v829_v6 = vsub.s32 0, %v828_v5 }
  0x14   : > { %746 = vmatpush1.bf16.msra.mxu1 %v1153_v14  ;;  %v1190_v39 = vld [vmem:[%s1527_s1 + $0x190] ss:$8 sps:$4 sm:$0xff]   ;;  %v1191_v40 = vld [vmem:[%s1527_s1 + $0xa4] ss:$8 sps:$4 sm:$0xff]   ;;  %s1099_s12 = sshll.u32 %s1536_s9, 4  ;;  %v833_v8 = vsub.s32 1, %v828_v5 }
  0x15   : > { %789 = vmatpush1.bf16.msra.mxu0 %v1154_v15  ;;  %747 = vmatprep.subr.bf16.mxu1 %v1155_v16  ;;  %v1193_v41 = vld [vmem:[%s1527_s1 + $0x1a4] ss:$8 sps:$4 sm:$0xff]   ;;  %v1195_v42 = vld [vmem:[%s1527_s1 + $0xa0] ss:$8 sps:$4 sm:$0xff]   ;;  %v1197_v44 = vld [vmem:[%s1527_s1 + $0xb4] ss:$8 sps:$4 sm:$0xff]   ;;  %s1444_s24 = scalar_lea.vmem %s1526_s0, %s1099_s12 }
  0x16   : > { %790 = vmatprep.subr.bf16.mxu0 %v1157_v17  ;;  %v1196_v43 = vld [vmem:[%s1527_s1 + $0x1a0] ss:$8 sps:$4 sm:$0xff]   ;;  %v1199_v45 = vld [vmem:[%s1527_s1 + $0x1b4] ss:$8 sps:$4 sm:$0xff]   ;;  %v1201_v46 = vld [vmem:[%s1527_s1 + $0xb0] ss:$8 sps:$4 sm:$0xff]  }
  0x17   : > { %v1229_v47 = vld [vmem:[%s1444_s24 + $0x4] ss:$16 sps:$4 sm:$0xff]   ;;  %v1202_v48 = vld [vmem:[%s1527_s1 + $0x1b0] ss:$8 sps:$4 sm:$0xff]   ;;  %v1232_v51 = vld [vmem:[%s1444_s24 + $0xc] ss:$16 sps:$4 sm:$0xff]  }
  0x18   : > { %748 = vmatpush1.bf16.msra.mxu1 %v1159_v18  ;;  %v1203_v49 = vld [vmem:[%s1527_s1 + $0xc4] ss:$8 sps:$4 sm:$0xff]   ;;  %771 = vmatprep.mubr.bf16.mxu1 %v1229_v47  ;;  %v1207_v52 = vld [vmem:[%s1527_s1 + $0xc0] ss:$8 sps:$4 sm:$0xff]   ;;  %v1209_v54 = vld [vmem:[%s1527_s1 + $0xd4] ss:$8 sps:$4 sm:$0xff]  }
  0x19   : > { %791 = vmatpush1.bf16.msra.mxu0 %v1160_v19  ;;  %749 = vmatprep.subr.bf16.mxu1 %v1161_v20  ;;  %v1205_v50 = vld [vmem:[%s1527_s1 + $0x1c4] ss:$8 sps:$4 sm:$0xff]   ;;  %v1208_v53 = vld [vmem:[%s1527_s1 + $0x1c0] ss:$8 sps:$4 sm:$0xff]   ;;  %v1211_v55 = vld [vmem:[%s1527_s1 + $0x1d4] ss:$8 sps:$4 sm:$0xff]  }
  0x1a   : > { %792 = vmatprep.subr.bf16.mxu0 %v1163_v21  ;;  %814 = vmatprep.mubr.bf16.mxu0 %v1232_v51  ;;  %v1213_v56 = vld [vmem:[%s1527_s1 + $0xd0] ss:$8 sps:$4 sm:$0xff]   ;;  %v1215_v58 = vld [vmem:[%s1527_s1 + $0xe4] ss:$8 sps:$4 sm:$0xff]   ;;  %v1219_v60 = vld [vmem:[%s1527_s1 + $0xe0] ss:$8 sps:$4 sm:$0xff]  }
  0x1b   : > { %v1214_v57 = vld [vmem:[%s1527_s1 + $0x1d0] ss:$8 sps:$4 sm:$0xff]   ;;  %v1217_v59 = vld [vmem:[%s1527_s1 + $0x1e4] ss:$8 sps:$4 sm:$0xff]   ;;  %v1220_v61 = vld [vmem:[%s1527_s1 + $0x1e0] ss:$8 sps:$4 sm:$0xff]  }
  0x1c   : > { %750 = vmatpush1.bf16.msra.mxu1 %v1165_v22  ;;  %v1221_v62 = vld [vmem:[%s1527_s1 + $0xf4] ss:$8 sps:$4 sm:$0xff]   ;;  %v1225_v0 = vld [vmem:[%s1527_s1 + $0xf0] ss:$8 sps:$4 sm:$0xff]   ;;  %v825_v7 = vld [vmem:[%s1528_s2] sm:$0x3] }
  0x1d   : > { %793 = vmatpush1.bf16.msra.mxu0 %v1166_v23  ;;  %751 = vmatprep.subr.bf16.mxu1 %v1167_v24  ;;  %v1223_v63 = vld [vmem:[%s1527_s1 + $0x1f4] ss:$8 sps:$4 sm:$0xff]   ;;  %v1226_v1 = vld [vmem:[%s1527_s1 + $0x1f0] ss:$8 sps:$4 sm:$0xff]   ;;  %v841_v9 = vld [vmem:[%s1529_s3] sm:$0x3]  ;;  %v830_v10 = vrot.slane %v825_v7, %v829_v6  ;;  %v834_v13 = vrot.slane %v825_v7, %v833_v8 }
  0x1e   : > { %794 = vmatprep.subr.bf16.mxu0 %v1169_v25  ;;  %v1227_v2 = vld [vmem:[%s1444_s24] ss:$16 sps:$4 sm:$0xff]   ;;  %v1230_v3 = vld [vmem:[%s1444_s24 + $0x8] ss:$16 sps:$4 sm:$0xff]   ;;  %v846_v15 = vrot.slane %v841_v9, %v829_v6  ;;  %v850_v19 = vrot.slane %v841_v9, %v833_v8  ;;  %s1100_s24 = sshll.u32 %s1536_s9, 3 }
  0x1f   : > { %s328_s27 = scalar_lea.vmem %s1530_s4, %s1100_s24 }
  0x20   : > { %752 = vmatpush1.bf16.msra.mxu1 %v1171_v26 }
  0x21   : > { %795 = vmatpush1.bf16.msra.mxu0 %v1172_v27  ;;  %753 = vmatprep.subr.bf16.mxu1 %v1173_v28 }
  0x22   : > { %796 = vmatprep.subr.bf16.mxu0 %v1175_v29 }
  0x24   : > { %754 = vmatpush1.bf16.msra.mxu1 %v1177_v30 }
  0x25   : > { %797 = vmatpush1.bf16.msra.mxu0 %v1178_v31  ;;  %755 = vmatprep.subr.bf16.mxu1 %v1179_v32 }
  0x26   : > { %798 = vmatprep.subr.bf16.mxu0 %v1181_v33 }
  0x28   : > { %756 = vmatpush1.bf16.msra.mxu1 %v1183_v34 }
  0x29   : > { %799 = vmatpush1.bf16.msra.mxu0 %v1184_v35  ;;  %757 = vmatprep.subr.bf16.mxu1 %v1185_v36 }
  0x2a   : > { %800 = vmatprep.subr.bf16.mxu0 %v1187_v37 }
  0x2c   : > { %758 = vmatpush1.bf16.msra.mxu1 %v1189_v38 }
  0x2d   : > { %801 = vmatpush1.bf16.msra.mxu0 %v1190_v39  ;;  %759 = vmatprep.subr.bf16.mxu1 %v1191_v40 }
  0x2e   : > { %802 = vmatprep.subr.bf16.mxu0 %v1193_v41 }
  0x30   : > { %760 = vmatpush1.bf16.msra.mxu1 %v1195_v42 }
  0x31   : > { %803 = vmatpush1.bf16.msra.mxu0 %v1196_v43  ;;  %761 = vmatprep.subr.bf16.mxu1 %v1197_v44 }
  0x32   : > { %804 = vmatprep.subr.bf16.mxu0 %v1199_v45 }
  0x34   : > { %762 = vmatpush1.bf16.msra.mxu1 %v1201_v46 }
  0x35   : > { %805 = vmatpush1.bf16.msra.mxu0 %v1202_v48  ;;  %763 = vmatprep.subr.bf16.mxu1 %v1203_v49 }
  0x36   : > { %806 = vmatprep.subr.bf16.mxu0 %v1205_v50 }
  0x38   : > { %764 = vmatpush1.bf16.msra.mxu1 %v1207_v52 }
  0x39   : > { %807 = vmatpush1.bf16.msra.mxu0 %v1208_v53  ;;  %765 = vmatprep.subr.bf16.mxu1 %v1209_v54 }
  0x3a   : > { %808 = vmatprep.subr.bf16.mxu0 %v1211_v55 }
  0x3c   : > { %766 = vmatpush1.bf16.msra.mxu1 %v1213_v56 }
  0x3d   : > { %809 = vmatpush1.bf16.msra.mxu0 %v1214_v57  ;;  %767 = vmatprep.subr.bf16.mxu1 %v1215_v58 }
  0x3e   : > { %810 = vmatprep.subr.bf16.mxu0 %v1217_v59 }
  0x40   : > { %768 = vmatpush1.bf16.msra.mxu1 %v1219_v60 }
  0x41   : > { %811 = vmatpush1.bf16.msra.mxu0 %v1220_v61  ;;  %769 = vmatprep.subr.bf16.mxu1 %v1221_v62 }
  0x42   : > { %812 = vmatprep.subr.bf16.mxu0 %v1223_v63 }
  0x44   : > { %770 = vmatpush1.bf16.msra.mxu1 %v1225_v0 }
  0x45   : > { %813 = vmatpush1.bf16.msra.mxu0 %v1226_v1 }
  0x47   : > { %772 = vmatmul.mubr.bf16.vlgmr.msra.gmra.mrb[0].mxu1 %v1227_v2 }
  0x48   : > { %815 = vmatmul.mubr.bf16.vlgmr.msra.gmra.mrb[0].mxu0 %v1230_v3 }
 0x11a   : > { %v773_v11 = vpop.f32.mrb[0].mxu1 }
 0x11b   : > { %v816_v12 = vpop.f32.mrb[0].mxu0  ;;  %v775_v16 = vpop.f32.mrb[1].mxu1 }
 0x11c   : > { %v817_v14 = vadd.f32 %v816_v12, %v773_v11  ;;  %v818_v17 = vpop.f32.mrb[1].mxu0  ;;  %v777_v20 = vpop.f32.mrb[2].mxu1 }
 0x11d   : > { %v819_v18 = vadd.f32 %v818_v17, %v775_v16  ;;  %v820_v21 = vpop.f32.mrb[2].mxu0  ;;  %v779_v24 = vpop.f32.mrb[3].mxu1 }
 0x11e   : > { %v837_v22 = vmul.f32 %v830_v10, %v817_v14  ;;  %v821_v23 = vadd.f32 %v820_v21, %v777_v20  ;;  %v822_v25 = vpop.f32.mrb[3].mxu0 }
 0x11f   : > { %v838_v26 = vmul.f32 %v834_v13, %v819_v18  ;;  %v823_v27 = vadd.f32 %v822_v25, %v779_v24 }
 0x120   : > { %v853_v28 = vadd.f32 %v846_v15, %v837_v22  ;;  %v839_v29 = vmul.f32 %v830_v10, %v821_v23 }
 0x121   : > { %v854_v30 = vadd.f32 %v850_v19, %v838_v26  ;;  %v840_v31 = vmul.f32 %v834_v13, %v823_v27 }
 0x122   : > { %v857_v32 = vmax.f32 %v853_v28, 0.0  ;;  %v855_v33 = vadd.f32 %v846_v15, %v839_v29 }
 0x123   : > { %v858_v34 = vmax.f32 %v854_v30, 0.0  ;;  %v856_v35 = vadd.f32 %v850_v19, %v840_v31 }
 0x124   : > { %v859_v36 = vmax.f32 %v855_v33, 0.0 }
 0x125   : > { %v1101_v37 = vpack.c.bf16 %v858_v34, %v857_v32  ;;  %v860_v38 = vmax.f32 %v856_v35, 0.0 }
 0x127   : > { %873 = vst [vmem:[%s328_s27] sm:$0xff] %v1101_v37  ;;  %v1102_v39 = vpack.c.bf16 %v860_v38, %v859_v36 }
 0x129   : > { %874 = vst [vmem:[%s328_s27 + $0x8] sm:$0xff] %v1102_v39 }
 0x12a PF: > { %s14_s17 = sadd.s32 1, %s1255_s17   ;;  %s1531_s15 = smov %s1251_s16 }
 0x12b   : > { %p11_p5 = scmp.ge.s32.totalorder %s14_s17, 4   ;;  %s1532_s16 = smov %s1534_s18 }
 0x12d   :  { %13 = sbr.rel (!%p11_p5) target bundleno = 2 (0x2), region = 75 }

// kernel: resnext50_encoder.49
= control target key start
LH: loop header
LB: loop body
LE: loop exit
PB: predicated region body
PF: predicated region fallthrough
CT: control target
= control target key end

     0   :  { %s1666_s15 = smov 0   ;;  %s1668_s16 = smov 0   ;;  %s2003_s0 = inlined_call_operand.vmem [shape: bf16[32,512], index: 0, kind: input, shape index: {}]   ;;  %s2004_s1 = inlined_call_operand.vmem [shape: bf16[512,512], index: 1, kind: input, shape index: {}]   ;;  %s2005_s2 = inlined_call_operand.vmem [shape: f32[1,512], index: 2, kind: input, shape index: {}]   ;;  %s2006_s3 = inlined_call_operand.vmem [shape: f32[1,512], index: 3, kind: input, shape index: {}]   ;;  %s2007_s4 = inlined_call_operand.vmem [shape: bf16[32,512], index: 4, kind: output, shape index: {}]  }
   0x1   :  { %s1670_s17 = smov 0   ;;  %s1672_s18 = smov 0  }
   0x2   :  { %s1674_s19 = smov 0   ;;  %s1676_s20 = smov 0  }
   0x3   :  { %s1678_s21 = smov 0   ;;  %s1680_s22 = smov 0  }
   0x4   :  { %s1682_s23 = smov 0  }
   0x5 LB: > { %s1294_s24 = sadd.s32 4294967295, %s1639_s23   ;;  %s29_s25 = sadd.s32 1, %s1631_s21  ;;  %s1639_s23 = sphi %s1682_s23, %s14_s23   ;;  %s1635_s22 = sphi %s1680_s22, %s2016_s22   ;;  %s1631_s21 = sphi %s1678_s21, %s2015_s21   ;;  %s1627_s20 = sphi %s1676_s20, %s2014_s20   ;;  %s1623_s19 = sphi %s1674_s19, %s2013_s19   ;;  %s1619_s18 = sphi %s1672_s18, %s2012_s18   ;;  %s1615_s17 = sphi %s1670_s17, %s2011_s17   ;;  %s1611_s16 = sphi %s1668_s16, %s2010_s16   ;;  %s1607_s15 = sphi %s1666_s15, %s2009_s15  }
   0x6   : > { %p31_p0 = scmp.ge.s32.totalorder %s29_s25, 2  ;;  %s33_s26 = sadd.s32 1, %s1635_s22 }
   0x7   : > { %s70_s27 = sadd.s32 1, %s1619_s18  ;;  %p77_p1 = scmp.ne.s32.totalorder %s1619_s18, %s1615_s17 }
   0x8   : > { %s2018_s25 = smov (%p31_p0, %s29_s25), 0  ;;  %s2020_s26 = smov (!%p31_p0, %s33_s26), %s1635_s22 }
   0x9   : > { %s66_s28 = ssub.s32 %s1631_s21, %s2018_s25  ;;  %p78_p2 = scmp.eq.s32.totalorder %s1639_s23, 0 }
   0xa   : > { %p35_p3 = scmp.ge.s32.totalorder %s2020_s26, 2  ;;  %p68_p4 = scmp.eq.s32.totalorder %s66_s28, 0 }
   0xb   : > { %p79_p5 = por %p78_p2, %p77_p1  ;;  %s150_s29 = sadd.s32 1, %s1611_s16 }
   0xc   : > { %s2022_s26 = smov (%p35_p3, %s2020_s26), 0  ;;  %p160_p6 = scmp.ne.s32.totalorder %s1611_s16, %s1607_s15 }
   0xd   : > { %s1727_s30 = scalar_select %p68_p4, %s1619_s18, %s70_s27  }
   0xe   : > { %s145_s5 = ssub.s32 %s1635_s22, %s2022_s26  ;;  %p161_p7 = scmp.eq.s32.totalorder %s1294_s24, 3 }
   0xf   : > { %s147_s6 = sor.u32 %s145_s5, %s66_s28  ;;  %p1297_p10 = scmp.ge.s32.totalorder %s1639_s23, 4 }
  0x10   : > { %p148_p8 = scmp.eq.s32.totalorder %s147_s6, 0  ;;  %p1733_p9 = por %p161_p7, %p160_p6 }
  0x11   : > { %183 = sbr.rel (%p1297_p10) target bundleno = 60 (0x3c), region = 16 }
  0x12   : > { %s1738_s8 = scalar_select %p148_p8, %s1611_s16, %s150_s29  }
  0x18   : > { %201 = sbr.rel (!%p79_p5) target bundleno = 60 (0x3c), region = 24  ;;  %s203_s9 = sand.u32 (%p79_p5), 1, %s1619_s18  }
  0x19   : > { %s1386_s10 = sshll.u32 (%p79_p5), %s1631_s21, 3  ;;  %s1298_s11 = sshll.u32 (%p79_p5), %s203_s9, 9 }
  0x1a   : > { %s1746_s14 = scalar_lea.vmem (%p79_p5), %s2004_s1, %s1386_s10  ;;  %s1751_s24 = scalar_lea.vmem (%p79_p5), [#allocation2], %s1298_s11 }
  0x1b   : > { %v365_v0 = vld [vmem:[%s1746_s14] sm:$0xff] (%p79_p5)  ;;  %v367_v1 = vld [vmem:[%s1746_s14 + $0x10] sm:$0xff] (%p79_p5) }
  0x1c   : > { %v369_v2 = vld [vmem:[%s1746_s14 + $0x20] sm:$0xff] (%p79_p5)  ;;  %366 = vst [vmem:[%s1751_s24] sm:$0xff] (%p79_p5), %v365_v0  ;;  %368 = vst [vmem:[%s1751_s24 + $0x8] sm:$0xff] (%p79_p5), %v367_v1  ;;  %v371_v3 = vld [vmem:[%s1746_s14 + $0x30] sm:$0xff] (%p79_p5) }
  0x1d   : > { %370 = vst [vmem:[%s1751_s24 + $0x10] sm:$0xff] (%p79_p5), %v369_v2  ;;  %v373_v4 = vld [vmem:[%s1746_s14 + $0x40] sm:$0xff] (%p79_p5)  ;;  %v375_v5 = vld [vmem:[%s1746_s14 + $0x50] sm:$0xff] (%p79_p5)  ;;  %372 = vst [vmem:[%s1751_s24 + $0x18] sm:$0xff] (%p79_p5), %v371_v3 }
  0x1e   : > { %374 = vst [vmem:[%s1751_s24 + $0x20] sm:$0xff] (%p79_p5), %v373_v4  ;;  %376 = vst [vmem:[%s1751_s24 + $0x28] sm:$0xff] (%p79_p5), %v375_v5  ;;  %v377_v6 = vld [vmem:[%s1746_s14 + $0x60] sm:$0xff] (%p79_p5)  ;;  %v379_v7 = vld [vmem:[%s1746_s14 + $0x70] sm:$0xff] (%p79_p5) }
  0x1f   : > { %v381_v8 = vld [vmem:[%s1746_s14 + $0x80] sm:$0xff]  ;;  %378 = vst [vmem:[%s1751_s24 + $0x30] sm:$0xff] %v377_v6  ;;  %380 = vst [vmem:[%s1751_s24 + $0x38] sm:$0xff] %v379_v7  ;;  %v383_v9 = vld [vmem:[%s1746_s14 + $0x90] sm:$0xff] }
  0x20   : > { %382 = vst [vmem:[%s1751_s24 + $0x40] sm:$0xff] %v381_v8  ;;  %v385_v10 = vld [vmem:[%s1746_s14 + $0xa0] sm:$0xff]  ;;  %v387_v11 = vld [vmem:[%s1746_s14 + $0xb0] sm:$0xff]  ;;  %384 = vst [vmem:[%s1751_s24 + $0x48] sm:$0xff] %v383_v9 }
  0x21   : > { %386 = vst [vmem:[%s1751_s24 + $0x50] sm:$0xff] %v385_v10  ;;  %388 = vst [vmem:[%s1751_s24 + $0x58] sm:$0xff] %v387_v11  ;;  %v389_v12 = vld [vmem:[%s1746_s14 + $0xc0] sm:$0xff]  ;;  %v391_v13 = vld [vmem:[%s1746_s14 + $0xd0] sm:$0xff] }
  0x22   : > { %v393_v14 = vld [vmem:[%s1746_s14 + $0xe0] sm:$0xff]  ;;  %390 = vst [vmem:[%s1751_s24 + $0x60] sm:$0xff] %v389_v12  ;;  %392 = vst [vmem:[%s1751_s24 + $0x68] sm:$0xff] %v391_v13  ;;  %v395_v15 = vld [vmem:[%s1746_s14 + $0xf0] sm:$0xff] }
  0x23   : > { %394 = vst [vmem:[%s1751_s24 + $0x70] sm:$0xff] %v393_v14  ;;  %v397_v16 = vld [vmem:[%s1746_s14 + $0x100] sm:$0xff]  ;;  %v399_v17 = vld [vmem:[%s1746_s14 + $0x110] sm:$0xff]  ;;  %396 = vst [vmem:[%s1751_s24 + $0x78] sm:$0xff] %v395_v15 }
  0x24   : > { %398 = vst [vmem:[%s1751_s24 + $0x80] sm:$0xff] %v397_v16  ;;  %400 = vst [vmem:[%s1751_s24 + $0x88] sm:$0xff] %v399_v17  ;;  %v401_v18 = vld [vmem:[%s1746_s14 + $0x120] sm:$0xff]  ;;  %v403_v19 = vld [vmem:[%s1746_s14 + $0x130] sm:$0xff] }
  0x25   : > { %v405_v20 = vld [vmem:[%s1746_s14 + $0x140] sm:$0xff]  ;;  %402 = vst [vmem:[%s1751_s24 + $0x90] sm:$0xff] %v401_v18  ;;  %404 = vst [vmem:[%s1751_s24 + $0x98] sm:$0xff] %v403_v19  ;;  %v407_v21 = vld [vmem:[%s1746_s14 + $0x150] sm:$0xff] }
  0x26   : > { %406 = vst [vmem:[%s1751_s24 + $0xa0] sm:$0xff] %v405_v20  ;;  %v409_v22 = vld [vmem:[%s1746_s14 + $0x160] sm:$0xff]  ;;  %v411_v23 = vld [vmem:[%s1746_s14 + $0x170] sm:$0xff]  ;;  %408 = vst [vmem:[%s1751_s24 + $0xa8] sm:$0xff] %v407_v21 }
  0x27   : > { %410 = vst [vmem:[%s1751_s24 + $0xb0] sm:$0xff] %v409_v22  ;;  %412 = vst [vmem:[%s1751_s24 + $0xb8] sm:$0xff] %v411_v23  ;;  %v413_v24 = vld [vmem:[%s1746_s14 + $0x180] sm:$0xff]  ;;  %v415_v25 = vld [vmem:[%s1746_s14 + $0x190] sm:$0xff] }
  0x28   : > { %v417_v26 = vld [vmem:[%s1746_s14 + $0x1a0] sm:$0xff]  ;;  %414 = vst [vmem:[%s1751_s24 + $0xc0] sm:$0xff] %v413_v24  ;;  %416 = vst [vmem:[%s1751_s24 + $0xc8] sm:$0xff] %v415_v25  ;;  %v419_v27 = vld [vmem:[%s1746_s14 + $0x1b0] sm:$0xff] }
  0x29   : > { %418 = vst [vmem:[%s1751_s24 + $0xd0] sm:$0xff] %v417_v26  ;;  %v421_v28 = vld [vmem:[%s1746_s14 + $0x1c0] sm:$0xff]  ;;  %v423_v29 = vld [vmem:[%s1746_s14 + $0x1d0] sm:$0xff]  ;;  %420 = vst [vmem:[%s1751_s24 + $0xd8] sm:$0xff] %v419_v27 }
  0x2a   : > { %422 = vst [vmem:[%s1751_s24 + $0xe0] sm:$0xff] %v421_v28  ;;  %424 = vst [vmem:[%s1751_s24 + $0xe8] sm:$0xff] %v423_v29  ;;  %v425_v30 = vld [vmem:[%s1746_s14 + $0x1e0] sm:$0xff]  ;;  %v427_v31 = vld [vmem:[%s1746_s14 + $0x1f0] sm:$0xff] }
  0x2b   : > { %v429_v32 = vld [vmem:[%s1746_s14 + $0x200] sm:$0xff]  ;;  %426 = vst [vmem:[%s1751_s24 + $0xf0] sm:$0xff] %v425_v30  ;;  %428 = vst [vmem:[%s1751_s24 + $0xf8] sm:$0xff] %v427_v31  ;;  %v431_v33 = vld [vmem:[%s1746_s14 + $0x210] sm:$0xff] }
  0x2c   : > { %430 = vst [vmem:[%s1751_s24 + $0x100] sm:$0xff] %v429_v32  ;;  %v433_v34 = vld [vmem:[%s1746_s14 + $0x220] sm:$0xff]  ;;  %v435_v35 = vld [vmem:[%s1746_s14 + $0x230] sm:$0xff]  ;;  %432 = vst [vmem:[%s1751_s24 + $0x108] sm:$0xff] %v431_v33 }
  0x2d   : > { %434 = vst [vmem:[%s1751_s24 + $0x110] sm:$0xff] %v433_v34  ;;  %436 = vst [vmem:[%s1751_s24 + $0x118] sm:$0xff] %v435_v35  ;;  %v437_v36 = vld [vmem:[%s1746_s14 + $0x240] sm:$0xff]  ;;  %v439_v37 = vld [vmem:[%s1746_s14 + $0x250] sm:$0xff] }
  0x2e   : > { %v441_v38 = vld [vmem:[%s1746_s14 + $0x260] sm:$0xff]  ;;  %438 = vst [vmem:[%s1751_s24 + $0x120] sm:$0xff] %v437_v36  ;;  %440 = vst [vmem:[%s1751_s24 + $0x128] sm:$0xff] %v439_v37  ;;  %v443_v39 = vld [vmem:[%s1746_s14 + $0x270] sm:$0xff] }
  0x2f   : > { %442 = vst [vmem:[%s1751_s24 + $0x130] sm:$0xff] %v441_v38  ;;  %v445_v40 = vld [vmem:[%s1746_s14 + $0x280] sm:$0xff]  ;;  %v447_v41 = vld [vmem:[%s1746_s14 + $0x290] sm:$0xff]  ;;  %444 = vst [vmem:[%s1751_s24 + $0x138] sm:$0xff] %v443_v39 }
  0x30   : > { %446 = vst [vmem:[%s1751_s24 + $0x140] sm:$0xff] %v445_v40  ;;  %448 = vst [vmem:[%s1751_s24 + $0x148] sm:$0xff] %v447_v41  ;;  %v449_v42 = vld [vmem:[%s1746_s14 + $0x2a0] sm:$0xff]  ;;  %v451_v43 = vld [vmem:[%s1746_s14 + $0x2b0] sm:$0xff] }
  0x31   : > { %v453_v44 = vld [vmem:[%s1746_s14 + $0x2c0] sm:$0xff]  ;;  %450 = vst [vmem:[%s1751_s24 + $0x150] sm:$0xff] %v449_v42  ;;  %452 = vst [vmem:[%s1751_s24 + $0x158] sm:$0xff] %v451_v43  ;;  %v455_v45 = vld [vmem:[%s1746_s14 + $0x2d0] sm:$0xff] }
  0x32   : > { %454 = vst [vmem:[%s1751_s24 + $0x160] sm:$0xff] %v453_v44  ;;  %v457_v46 = vld [vmem:[%s1746_s14 + $0x2e0] sm:$0xff]  ;;  %v459_v47 = vld [vmem:[%s1746_s14 + $0x2f0] sm:$0xff]  ;;  %456 = vst [vmem:[%s1751_s24 + $0x168] sm:$0xff] %v455_v45 }
  0x33   : > { %458 = vst [vmem:[%s1751_s24 + $0x170] sm:$0xff] %v457_v46  ;;  %460 = vst [vmem:[%s1751_s24 + $0x178] sm:$0xff] %v459_v47  ;;  %v461_v48 = vld [vmem:[%s1746_s14 + $0x300] sm:$0xff]  ;;  %v463_v49 = vld [vmem:[%s1746_s14 + $0x310] sm:$0xff] }
  0x34   : > { %v465_v50 = vld [vmem:[%s1746_s14 + $0x320] sm:$0xff]  ;;  %462 = vst [vmem:[%s1751_s24 + $0x180] sm:$0xff] %v461_v48  ;;  %464 = vst [vmem:[%s1751_s24 + $0x188] sm:$0xff] %v463_v49  ;;  %v467_v51 = vld [vmem:[%s1746_s14 + $0x330] sm:$0xff] }
  0x35   : > { %466 = vst [vmem:[%s1751_s24 + $0x190] sm:$0xff] %v465_v50  ;;  %v469_v52 = vld [vmem:[%s1746_s14 + $0x340] sm:$0xff]  ;;  %v471_v53 = vld [vmem:[%s1746_s14 + $0x350] sm:$0xff]  ;;  %468 = vst [vmem:[%s1751_s24 + $0x198] sm:$0xff] %v467_v51 }
  0x36   : > { %470 = vst [vmem:[%s1751_s24 + $0x1a0] sm:$0xff] %v469_v52  ;;  %472 = vst [vmem:[%s1751_s24 + $0x1a8] sm:$0xff] %v471_v53  ;;  %v473_v54 = vld [vmem:[%s1746_s14 + $0x360] sm:$0xff]  ;;  %v475_v55 = vld [vmem:[%s1746_s14 + $0x370] sm:$0xff] }
  0x37   : > { %v477_v56 = vld [vmem:[%s1746_s14 + $0x380] sm:$0xff]  ;;  %474 = vst [vmem:[%s1751_s24 + $0x1b0] sm:$0xff] %v473_v54  ;;  %476 = vst [vmem:[%s1751_s24 + $0x1b8] sm:$0xff] %v475_v55  ;;  %v479_v57 = vld [vmem:[%s1746_s14 + $0x390] sm:$0xff] }
  0x38   : > { %478 = vst [vmem:[%s1751_s24 + $0x1c0] sm:$0xff] %v477_v56  ;;  %v481_v58 = vld [vmem:[%s1746_s14 + $0x3a0] sm:$0xff]  ;;  %v483_v59 = vld [vmem:[%s1746_s14 + $0x3b0] sm:$0xff]  ;;  %480 = vst [vmem:[%s1751_s24 + $0x1c8] sm:$0xff] %v479_v57 }
  0x39   : > { %482 = vst [vmem:[%s1751_s24 + $0x1d0] sm:$0xff] %v481_v58  ;;  %484 = vst [vmem:[%s1751_s24 + $0x1d8] sm:$0xff] %v483_v59  ;;  %v485_v60 = vld [vmem:[%s1746_s14 + $0x3c0] sm:$0xff]  ;;  %v487_v61 = vld [vmem:[%s1746_s14 + $0x3d0] sm:$0xff] }
  0x3a   : > { %v489_v62 = vld [vmem:[%s1746_s14 + $0x3e0] sm:$0xff]  ;;  %486 = vst [vmem:[%s1751_s24 + $0x1e0] sm:$0xff] %v485_v60  ;;  %488 = vst [vmem:[%s1751_s24 + $0x1e8] sm:$0xff] %v487_v61  ;;  %v491_v63 = vld [vmem:[%s1746_s14 + $0x3f0] sm:$0xff] }
  0x3b   : > { %490 = vst [vmem:[%s1751_s24 + $0x1f0] sm:$0xff] %v489_v62  ;;  %492 = vst [vmem:[%s1751_s24 + $0x1f8] sm:$0xff] %v491_v63 }
  0x3c PF: > { %p1301_p11 = scmp.ge.s32.totalorder %s1639_s23, 1  ;;  %p513_p12 = scmp.lt.s32.totalorder %s1639_s23, 5 }
  0x3e   : > { %p514_p13 = pnand %p1301_p11, %p513_p12 }
  0x3f   : > { %s520_s27 = sand.u32 (!%p514_p13), 1, %s1615_s17   ;;  %s1304_s17 = sshll.u32 (!%p514_p13), %s1627_s20, 1 }
  0x40   : > { %517 = sbr.rel (%p514_p13) target bundleno = 366 (0x16e), region = 70  ;;  %s1302_s28 = sshll.u32 (!%p514_p13), %s520_s27, 9 }
  0x41   : > { %s1881_s29 = scalar_lea.vmem (!%p514_p13), [#allocation2], %s1302_s28  ;;  %p564_p0 = scmp.lt.s32.totalorder (!%p514_p13), %s1304_s17, 3 }
  0x42   : > { %v1467_v0 = vld [vmem:[%s1881_s29 + $0x4] ss:$8 sps:$4 sm:$0xff] (!%p514_p13)   ;;  %v1471_v2 = vld [vmem:[%s1881_s29] ss:$8 sps:$4 sm:$0xff] (!%p514_p13)   ;;  %v1473_v4 = vld [vmem:[%s1881_s29 + $0x14] ss:$8 sps:$4 sm:$0xff] (!%p514_p13)  }
  0x43   : > { %v1469_v1 = vld [vmem:[%s1881_s29 + $0x104] ss:$8 sps:$4 sm:$0xff] (!%p514_p13)   ;;  %996 = vmatprep.subr.bf16.mxu1 (!%p514_p13), %v1467_v0  ;;  %v1472_v3 = vld [vmem:[%s1881_s29 + $0x100] ss:$8 sps:$4 sm:$0xff] (!%p514_p13)   ;;  %v1475_v5 = vld [vmem:[%s1881_s29 + $0x114] ss:$8 sps:$4 sm:$0xff] (!%p514_p13)  }
  0x44   : > { %1039 = vmatprep.subr.bf16.mxu0 (!%p514_p13), %v1469_v1  ;;  %997 = vmatpush1.bf16.msra.mxu1 (!%p514_p13), %v1471_v2  ;;  %v1477_v6 = vld [vmem:[%s1881_s29 + $0x10] ss:$8 sps:$4 sm:$0xff] (!%p514_p13)   ;;  %v1479_v8 = vld [vmem:[%s1881_s29 + $0x24] ss:$8 sps:$4 sm:$0xff] (!%p514_p13)   ;;  %v1483_v10 = vld [vmem:[%s1881_s29 + $0x20] ss:$8 sps:$4 sm:$0xff] (!%p514_p13)  }
  0x45   : > { %1040 = vmatpush1.bf16.msra.mxu0 (!%p514_p13), %v1472_v3  ;;  %998 = vmatprep.subr.bf16.mxu1 (!%p514_p13), %v1473_v4  ;;  %v1478_v7 = vld [vmem:[%s1881_s29 + $0x110] ss:$8 sps:$4 sm:$0xff] (!%p514_p13)   ;;  %v1481_v9 = vld [vmem:[%s1881_s29 + $0x124] ss:$8 sps:$4 sm:$0xff] (!%p514_p13)   ;;  %v1484_v11 = vld [vmem:[%s1881_s29 + $0x120] ss:$8 sps:$4 sm:$0xff] (!%p514_p13)   ;;  %v1084_v4 = vlaneseq (!%p514_p13) }
  0x46   : > { %1041 = vmatprep.subr.bf16.mxu0 (!%p514_p13), %v1475_v5  ;;  %v1485_v12 = vld [vmem:[%s1881_s29 + $0x34] ss:$8 sps:$4 sm:$0xff] (!%p514_p13)   ;;  %v1489_v14 = vld [vmem:[%s1881_s29 + $0x30] ss:$8 sps:$4 sm:$0xff] (!%p514_p13)   ;;  %v1491_v16 = vld [vmem:[%s1881_s29 + $0x44] ss:$8 sps:$4 sm:$0xff] (!%p514_p13)  }
  0x47   : > { %v1487_v13 = vld [vmem:[%s1881_s29 + $0x134] ss:$8 sps:$4 sm:$0xff]   ;;  %v1490_v15 = vld [vmem:[%s1881_s29 + $0x130] ss:$8 sps:$4 sm:$0xff]   ;;  %v1493_v17 = vld [vmem:[%s1881_s29 + $0x144] ss:$8 sps:$4 sm:$0xff]  }
  0x48   : > { %999 = vmatpush1.bf16.msra.mxu1 %v1477_v6  ;;  %v1495_v18 = vld [vmem:[%s1881_s29 + $0x40] ss:$8 sps:$4 sm:$0xff]   ;;  %v1497_v20 = vld [vmem:[%s1881_s29 + $0x54] ss:$8 sps:$4 sm:$0xff]   ;;  %v1501_v22 = vld [vmem:[%s1881_s29 + $0x50] ss:$8 sps:$4 sm:$0xff]  }
  0x49   : > { %1042 = vmatpush1.bf16.msra.mxu0 %v1478_v7  ;;  %1000 = vmatprep.subr.bf16.mxu1 %v1479_v8  ;;  %v1496_v19 = vld [vmem:[%s1881_s29 + $0x140] ss:$8 sps:$4 sm:$0xff]   ;;  %v1499_v21 = vld [vmem:[%s1881_s29 + $0x154] ss:$8 sps:$4 sm:$0xff]   ;;  %v1502_v23 = vld [vmem:[%s1881_s29 + $0x150] ss:$8 sps:$4 sm:$0xff]  }
  0x4a   : > { %1043 = vmatprep.subr.bf16.mxu0 %v1481_v9  ;;  %v1503_v24 = vld [vmem:[%s1881_s29 + $0x64] ss:$8 sps:$4 sm:$0xff]   ;;  %v1507_v26 = vld [vmem:[%s1881_s29 + $0x60] ss:$8 sps:$4 sm:$0xff]   ;;  %v1509_v28 = vld [vmem:[%s1881_s29 + $0x74] ss:$8 sps:$4 sm:$0xff]  }
  0x4b   : > { %v1505_v25 = vld [vmem:[%s1881_s29 + $0x164] ss:$8 sps:$4 sm:$0xff]   ;;  %v1508_v27 = vld [vmem:[%s1881_s29 + $0x160] ss:$8 sps:$4 sm:$0xff]   ;;  %v1511_v29 = vld [vmem:[%s1881_s29 + $0x174] ss:$8 sps:$4 sm:$0xff]  }
  0x4c   : > { %1001 = vmatpush1.bf16.msra.mxu1 %v1483_v10  ;;  %v1513_v30 = vld [vmem:[%s1881_s29 + $0x70] ss:$8 sps:$4 sm:$0xff]   ;;  %v1515_v32 = vld [vmem:[%s1881_s29 + $0x84] ss:$8 sps:$4 sm:$0xff]   ;;  %v1519_v34 = vld [vmem:[%s1881_s29 + $0x80] ss:$8 sps:$4 sm:$0xff]  }
  0x4d   : > { %1044 = vmatpush1.bf16.msra.mxu0 %v1484_v11  ;;  %1002 = vmatprep.subr.bf16.mxu1 %v1485_v12  ;;  %v1514_v31 = vld [vmem:[%s1881_s29 + $0x170] ss:$8 sps:$4 sm:$0xff]   ;;  %v1517_v33 = vld [vmem:[%s1881_s29 + $0x184] ss:$8 sps:$4 sm:$0xff]   ;;  %v1520_v35 = vld [vmem:[%s1881_s29 + $0x180] ss:$8 sps:$4 sm:$0xff]  }
  0x4e   : > { %1045 = vmatprep.subr.bf16.mxu0 %v1487_v13  ;;  %v1521_v36 = vld [vmem:[%s1881_s29 + $0x94] ss:$8 sps:$4 sm:$0xff]   ;;  %s2024_s17 = smov (!%p564_p0, %s1304_s17), 3  ;;  %v1525_v38 = vld [vmem:[%s1881_s29 + $0x90] ss:$8 sps:$4 sm:$0xff]   ;;  %s1958_s11 = sshll.u32 %s1623_s19, 1 }
  0x4f   : > { %v1523_v37 = vld [vmem:[%s1881_s29 + $0x194] ss:$8 sps:$4 sm:$0xff]   ;;  %v1526_v39 = vld [vmem:[%s1881_s29 + $0x190] ss:$8 sps:$4 sm:$0xff]   ;;  %v1527_v40 = vld [vmem:[%s1881_s29 + $0xa4] ss:$8 sps:$4 sm:$0xff]  }
  0x50   : > { %1003 = vmatpush1.bf16.msra.mxu1 %v1489_v14  ;;  %v1529_v41 = vld [vmem:[%s1881_s29 + $0x1a4] ss:$8 sps:$4 sm:$0xff]   ;;  %s1387_s5 = sshll.u32 %s2024_s17, 4  ;;  %v1531_v42 = vld [vmem:[%s1881_s29 + $0xa0] ss:$8 sps:$4 sm:$0xff]   ;;  %p577_p1 = scmp.lt.s32.totalorder %s1958_s11, 3 }
  0x51   : > { %1046 = vmatpush1.bf16.msra.mxu0 %v1490_v15  ;;  %1004 = vmatprep.subr.bf16.mxu1 %v1491_v16  ;;  %v1532_v43 = vld [vmem:[%s1881_s29 + $0x1a0] ss:$8 sps:$4 sm:$0xff]   ;;  %v1533_v44 = vld [vmem:[%s1881_s29 + $0xb4] ss:$8 sps:$4 sm:$0xff]   ;;  %s1932_s10 = scalar_lea.vmem %s2003_s0, %s1387_s5  ;;  %v1537_v46 = vld [vmem:[%s1881_s29 + $0xb0] ss:$8 sps:$4 sm:$0xff]  }
  0x52   : > { %1047 = vmatprep.subr.bf16.mxu0 %v1493_v17  ;;  %v1535_v45 = vld [vmem:[%s1881_s29 + $0x1b4] ss:$8 sps:$4 sm:$0xff]   ;;  %v1538_v48 = vld [vmem:[%s1881_s29 + $0x1b0] ss:$8 sps:$4 sm:$0xff]   ;;  %v1539_v49 = vld [vmem:[%s1881_s29 + $0xc4] ss:$8 sps:$4 sm:$0xff]  }
  0x53   : > { %v1565_v47 = vld [vmem:[%s1932_s10 + $0x4] ss:$16 sps:$4 sm:$0xff]   ;;  %v1568_v51 = vld [vmem:[%s1932_s10 + $0xc] ss:$16 sps:$4 sm:$0xff]   ;;  %v1543_v52 = vld [vmem:[%s1881_s29 + $0xc0] ss:$8 sps:$4 sm:$0xff]  }
  0x54   : > { %1005 = vmatpush1.bf16.msra.mxu1 %v1495_v18  ;;  %v1541_v50 = vld [vmem:[%s1881_s29 + $0x1c4] ss:$8 sps:$4 sm:$0xff]   ;;  %1028 = vmatprep.mubr.bf16.mxu1 %v1565_v47  ;;  %v1544_v53 = vld [vmem:[%s1881_s29 + $0x1c0] ss:$8 sps:$4 sm:$0xff]   ;;  %v1545_v54 = vld [vmem:[%s1881_s29 + $0xd4] ss:$8 sps:$4 sm:$0xff]  }
  0x55   : > { %1048 = vmatpush1.bf16.msra.mxu0 %v1496_v19  ;;  %1006 = vmatprep.subr.bf16.mxu1 %v1497_v20  ;;  %v1547_v55 = vld [vmem:[%s1881_s29 + $0x1d4] ss:$8 sps:$4 sm:$0xff]   ;;  %v1549_v56 = vld [vmem:[%s1881_s29 + $0xd0] ss:$8 sps:$4 sm:$0xff]   ;;  %v1551_v58 = vld [vmem:[%s1881_s29 + $0xe4] ss:$8 sps:$4 sm:$0xff]  }
  0x56   : > { %1049 = vmatprep.subr.bf16.mxu0 %v1499_v21  ;;  %1071 = vmatprep.mubr.bf16.mxu0 %v1568_v51  ;;  %v1550_v57 = vld [vmem:[%s1881_s29 + $0x1d0] ss:$8 sps:$4 sm:$0xff]   ;;  %v1553_v59 = vld [vmem:[%s1881_s29 + $0x1e4] ss:$8 sps:$4 sm:$0xff]   ;;  %v1555_v60 = vld [vmem:[%s1881_s29 + $0xe0] ss:$8 sps:$4 sm:$0xff]  }
  0x57   : > { %v1556_v61 = vld [vmem:[%s1881_s29 + $0x1e0] ss:$8 sps:$4 sm:$0xff]   ;;  %v1557_v62 = vld [vmem:[%s1881_s29 + $0xf4] ss:$8 sps:$4 sm:$0xff]   ;;  %v1561_v0 = vld [vmem:[%s1881_s29 + $0xf0] ss:$8 sps:$4 sm:$0xff]  }
  0x58   : > { %1007 = vmatpush1.bf16.msra.mxu1 %v1501_v22  ;;  %v1559_v63 = vld [vmem:[%s1881_s29 + $0x1f4] ss:$8 sps:$4 sm:$0xff]   ;;  %v1562_v1 = vld [vmem:[%s1881_s29 + $0x1f0] ss:$8 sps:$4 sm:$0xff]   ;;  %s578_s12 = scalar_select %p577_p1, %s1958_s11, 3  ;;  %v1085_v5 = vshrl.u32 %v1084_v4, 7 }
  0x59   : > { %1050 = vmatpush1.bf16.msra.mxu0 %v1502_v23  ;;  %1008 = vmatprep.subr.bf16.mxu1 %v1503_v24  ;;  %v1563_v2 = vld [vmem:[%s1932_s10] ss:$16 sps:$4 sm:$0xff]   ;;  %v1566_v3 = vld [vmem:[%s1932_s10 + $0x8] ss:$16 sps:$4 sm:$0xff]   ;;  %s559_s19 = sand.u32 1, %s1607_s15   ;;  %s1390_s15 = sshll.u32 (%p1733_p9), %s1627_s20, 3 }
  0x5a   : > { %1051 = vmatprep.subr.bf16.mxu0 %v1505_v25  ;;  %s579_s24 = scalar_lea.vmem %s2005_s2, %s578_s12  ;;  %s584_s29 = scalar_lea.vmem %s2006_s3, %s578_s12  ;;  %v1086_v6 = vsub.s32 0, %v1085_v5  ;;  %v1090_v8 = vsub.s32 1, %v1085_v5 }
  0x5b   : > { %v1082_v7 = vld [vmem:[%s579_s24] sm:$0x3]  ;;  %s1303_s17 = sshll.u32 %s559_s19, 4  ;;  %s1142_s6 = sadd.s32 (%p1733_p9), %s1390_s15, %s1958_s11 }
  0x5c   : > { %1009 = vmatpush1.bf16.msra.mxu1 %v1507_v26  ;;  %v1098_v9 = vld [vmem:[%s584_s29] sm:$0x3]  ;;  %v1087_v10 = vrot.slane %v1082_v7, %v1086_v6  ;;  %v1091_v13 = vrot.slane %v1082_v7, %v1090_v8  ;;  %s561_s5 = scalar_lea.vmem [#allocation3], %s1303_s17  ;;  %s1383_s9 = sshll.u32 (%p1733_p9), %s1142_s6, 2 }
  0x5d   : > { %1052 = vmatpush1.bf16.msra.mxu0 %v1508_v27  ;;  %1010 = vmatprep.subr.bf16.mxu1 %v1509_v28  ;;  %v1103_v15 = vrot.slane %v1098_v9, %v1086_v6  ;;  %v1107_v19 = vrot.slane %v1098_v9, %v1090_v8  ;;  %s1144_s13 = scalar_lea.vmem (%p1733_p9), %s2007_s4, %s1383_s9 }
  0x5e   : > { %1053 = vmatprep.subr.bf16.mxu0 %v1511_v29 }
  0x60   : > { %1011 = vmatpush1.bf16.msra.mxu1 %v1513_v30 }
  0x61   : > { %1054 = vmatpush1.bf16.msra.mxu0 %v1514_v31  ;;  %1012 = vmatprep.subr.bf16.mxu1 %v1515_v32 }
  0x62   : > { %1055 = vmatprep.subr.bf16.mxu0 %v1517_v33 }
  0x64   : > { %1013 = vmatpush1.bf16.msra.mxu1 %v1519_v34 }
  0x65   : > { %1056 = vmatpush1.bf16.msra.mxu0 %v1520_v35  ;;  %1014 = vmatprep.subr.bf16.mxu1 %v1521_v36 }
  0x66   : > { %1057 = vmatprep.subr.bf16.mxu0 %v1523_v37 }
  0x68   : > { %1015 = vmatpush1.bf16.msra.mxu1 %v1525_v38 }
  0x69   : > { %1058 = vmatpush1.bf16.msra.mxu0 %v1526_v39  ;;  %1016 = vmatprep.subr.bf16.mxu1 %v1527_v40 }
  0x6a   : > { %1059 = vmatprep.subr.bf16.mxu0 %v1529_v41 }
  0x6c   : > { %1017 = vmatpush1.bf16.msra.mxu1 %v1531_v42 }
  0x6d   : > { %1060 = vmatpush1.bf16.msra.mxu0 %v1532_v43  ;;  %1018 = vmatprep.subr.bf16.mxu1 %v1533_v44 }
  0x6e   : > { %1061 = vmatprep.subr.bf16.mxu0 %v1535_v45 }
  0x70   : > { %1019 = vmatpush1.bf16.msra.mxu1 %v1537_v46 }
  0x71   : > { %1062 = vmatpush1.bf16.msra.mxu0 %v1538_v48  ;;  %1020 = vmatprep.subr.bf16.mxu1 %v1539_v49 }
  0x72   : > { %1063 = vmatprep.subr.bf16.mxu0 %v1541_v50 }
  0x74   : > { %1021 = vmatpush1.bf16.msra.mxu1 %v1543_v52 }
  0x75   : > { %1064 = vmatpush1.bf16.msra.mxu0 %v1544_v53  ;;  %1022 = vmatprep.subr.bf16.mxu1 %v1545_v54 }
  0x76   : > { %1065 = vmatprep.subr.bf16.mxu0 %v1547_v55 }
  0x78   : > { %1023 = vmatpush1.bf16.msra.mxu1 %v1549_v56 }
  0x79   : > { %1066 = vmatpush1.bf16.msra.mxu0 %v1550_v57  ;;  %1024 = vmatprep.subr.bf16.mxu1 %v1551_v58 }
  0x7a   : > { %1067 = vmatprep.subr.bf16.mxu0 %v1553_v59 }
  0x7c   : > { %1025 = vmatpush1.bf16.msra.mxu1 %v1555_v60 }
  0x7d   : > { %1068 = vmatpush1.bf16.msra.mxu0 %v1556_v61  ;;  %1026 = vmatprep.subr.bf16.mxu1 %v1557_v62 }
  0x7e   : > { %1069 = vmatprep.subr.bf16.mxu0 %v1559_v63 }
  0x80   : > { %1027 = vmatpush1.bf16.msra.mxu1 %v1561_v0 }
  0x81   : > { %1070 = vmatpush1.bf16.msra.mxu0 %v1562_v1 }
  0x83   : > { %1029 = vmatmul.mubr.bf16.vlgmr.msra.gmra.mrb[0].mxu1 %v1563_v2 }
  0x84   : > { %1072 = vmatmul.mubr.bf16.vlgmr.msra.gmra.mrb[0].mxu0 %v1566_v3 }
 0x156   : > { %v1030_v11 = vpop.f32.mrb[0].mxu1 }
 0x157   : > { %v1073_v12 = vpop.f32.mrb[0].mxu0  ;;  %v1032_v16 = vpop.f32.mrb[1].mxu1 }
 0x158   : > { %v1074_v14 = vadd.f32 %v1073_v12, %v1030_v11  ;;  %v1075_v17 = vpop.f32.mrb[1].mxu0  ;;  %v1034_v20 = vpop.f32.mrb[2].mxu1 }
 0x159   : > { %v1076_v18 = vadd.f32 %v1075_v17, %v1032_v16  ;;  %v1077_v21 = vpop.f32.mrb[2].mxu0  ;;  %v1036_v24 = vpop.f32.mrb[3].mxu1 }
 0x15a   : > { %v1094_v22 = vmul.f32 %v1087_v10, %v1074_v14  ;;  %v1078_v23 = vadd.f32 %v1077_v21, %v1034_v20  ;;  %v1079_v25 = vpop.f32.mrb[3].mxu0 }
 0x15b   : > { %v1095_v26 = vmul.f32 %v1091_v13, %v1076_v18  ;;  %v1080_v27 = vadd.f32 %v1079_v25, %v1036_v24 }
 0x15c   : > { %v1110_v28 = vadd.f32 %v1103_v15, %v1094_v22  ;;  %v1096_v29 = vmul.f32 %v1087_v10, %v1078_v23 }
 0x15d   : > { %v1111_v30 = vadd.f32 %v1107_v19, %v1095_v26  ;;  %v1097_v31 = vmul.f32 %v1091_v13, %v1080_v27 }
 0x15e   : > { %v1114_v32 = vmax.f32 %v1110_v28, 0.0  ;;  %v1112_v33 = vadd.f32 %v1103_v15, %v1096_v29 }
 0x15f   : > { %v1115_v34 = vmax.f32 %v1111_v30, 0.0  ;;  %v1113_v35 = vadd.f32 %v1107_v19, %v1097_v31  ;;  %1138 = sbr.rel (!%p1733_p9) target bundleno = 366 (0x16e), region = 78 }
 0x160   : > { %v1116_v36 = vmax.f32 %v1112_v33, 0.0 }
 0x161   : > { %v1388_v37 = vpack.c.bf16 %v1115_v34, %v1114_v32  ;;  %v1117_v38 = vmax.f32 %v1113_v35, 0.0 }
 0x163   : > { %1130 = vst [vmem:[%s561_s5] sm:$0xff] %v1388_v37  ;;  %v1389_v39 = vpack.c.bf16 %v1117_v38, %v1116_v36 }
 0x165   : > { %1131 = vst [vmem:[%s561_s5 + $0x8] sm:$0xff] %v1389_v39 }
 0x16a   : > { %v1174_v40 = vld [vmem:[%s561_s5] sm:$0xff] }
 0x16b   : > { %1175 = vst [vmem:[%s1144_s13] sm:$0xff] %v1174_v40 }
 0x16c   : > { %v1176_v41 = vld [vmem:[%s561_s5 + $0x8] sm:$0xff] }
 0x16d   : > { %1177 = vst [vmem:[%s1144_s13 + $0x10] sm:$0xff] %v1176_v41 }
 0x16e PF: > { %s14_s23 = sadd.s32 1, %s1639_s23   ;;  %s2009_s15 = smov %s1611_s16 }
 0x16f   : > { %p11_p2 = scmp.ge.s32.totalorder %s14_s23, 6   ;;  %s2010_s16 = smov %s1738_s8 }
 0x170   : > { %s2011_s17 = smov %s1619_s18  ;;  %s2012_s18 = smov %s1727_s30 }
 0x171   : > { %s2013_s19 = smov %s1631_s21  ;;  %s2014_s20 = smov %s1635_s22 }
 0x172   : > { %s2015_s21 = smov %s2018_s25  ;;  %s2016_s22 = smov %s2022_s26 }
 0x173   :  { %13 = sbr.rel (!%p11_p2) target bundleno = 5 (0x5), region = 156 }

// kernel: resnext50_encoder.50
= control target key start
LH: loop header
LB: loop body
LE: loop exit
PB: predicated region body
PF: predicated region fallthrough
CT: control target
= control target key end

     0   :  { %s1541_s15 = smov 0   ;;  %s1543_s16 = smov 0   ;;  %s1828_s0 = inlined_call_operand.vmem [shape: bf16[8,512], index: 0, kind: input, shape index: {}]   ;;  %s1829_s1 = inlined_call_operand.vmem [shape: bf16[512,1024], index: 1, kind: input, shape index: {}]   ;;  %s1830_s2 = inlined_call_operand.vmem [shape: f32[1,1024], index: 2, kind: input, shape index: {}]   ;;  %s1831_s3 = inlined_call_operand.vmem [shape: f32[1,1024], index: 3, kind: input, shape index: {}]   ;;  %s1832_s4 = inlined_call_operand.vmem [shape: bf16[8,1024], index: 4, kind: output, shape index: {}]  }
   0x1   :  { %s1545_s17 = smov 0   ;;  %s1547_s18 = smov 0  }
   0x2   :  { %s1549_s19 = smov 0  }
   0x3 LB: > { %s29_s20 = sadd.s32 1, %s1510_s18  ;;  %p77_p1 = scmp.ne.s32.totalorder %s1502_s16, %s1498_s15  ;;  %s1514_s19 = sphi %s1549_s19, %s14_s19   ;;  %s1510_s18 = sphi %s1547_s18, %s1836_s18   ;;  %s1506_s17 = sphi %s1545_s17, %s1835_s17   ;;  %s1502_s16 = sphi %s1543_s16, %s1834_s16   ;;  %s1498_s15 = sphi %s1541_s15, %s1833_s15  }
   0x4   : > { %p31_p0 = scmp.ge.s32.totalorder %s29_s20, 4  ;;  %p78_p2 = scmp.eq.s32.totalorder %s1514_s19, 0 }
   0x5   : > { %s70_s22 = sadd.s32 1, %s1502_s16  ;;  %p1251_p5 = scmp.ge.s32.totalorder %s1514_s19, 4 }
   0x6   : > { %s1838_s20 = smov (%p31_p0, %s29_s20), 0  ;;  %p79_p3 = por %p78_p2, %p77_p1 }
   0x7   : > { %s66_s21 = ssub.s32 %s1510_s18, %s1838_s20  ;;  %196 = sbr.rel (%p1251_p5) target bundleno = 82 (0x52), region = 20 }
   0x8   : > { %p68_p4 = scmp.eq.s32.totalorder %s66_s21, 0 }
   0xa   : > { %s1576_s23 = scalar_select %p68_p4, %s1502_s16, %s70_s22  }
   0xe   : > { %199 = sbr.rel (!%p79_p3) target bundleno = 82 (0x52), region = 24  ;;  %s201_s24 = sand.u32 (%p79_p3), 1, %s1502_s16  }
   0xf   : > { %s1332_s25 = sshll.u32 (%p79_p3), %s1510_s18, 3  ;;  %s1252_s26 = sshll.u32 (%p79_p3), %s201_s24, 9 }
  0x10   : > { %s1584_s29 = scalar_lea.vmem (%p79_p3), %s1829_s1, %s1332_s25  ;;  %s1589_s30 = scalar_lea.vmem (%p79_p3), [#allocation2], %s1252_s26 }
  0x11   : > { %v363_v0 = vld [vmem:[%s1584_s29] sm:$0xff] (%p79_p3) }
  0x12   : > { %v365_v1 = vld [vmem:[%s1584_s29 + $0x20] sm:$0xff] (%p79_p3)  ;;  %364 = vst [vmem:[%s1589_s30] sm:$0xff] (%p79_p3), %v363_v0 }
  0x13   : > { %v367_v2 = vld [vmem:[%s1584_s29 + $0x40] sm:$0xff] (%p79_p3)  ;;  %366 = vst [vmem:[%s1589_s30 + $0x8] sm:$0xff] (%p79_p3), %v365_v1 }
  0x14   : > { %368 = vst [vmem:[%s1589_s30 + $0x10] sm:$0xff] (%p79_p3), %v367_v2  ;;  %v369_v3 = vld [vmem:[%s1584_s29 + $0x60] sm:$0xff] (%p79_p3) }
  0x15   : > { %v371_v4 = vld [vmem:[%s1584_s29 + $0x80] sm:$0xff]  ;;  %370 = vst [vmem:[%s1589_s30 + $0x18] sm:$0xff] %v369_v3 }
  0x16   : > { %v373_v5 = vld [vmem:[%s1584_s29 + $0xa0] sm:$0xff]  ;;  %372 = vst [vmem:[%s1589_s30 + $0x20] sm:$0xff] %v371_v4 }
  0x17   : > { %374 = vst [vmem:[%s1589_s30 + $0x28] sm:$0xff] %v373_v5  ;;  %v375_v6 = vld [vmem:[%s1584_s29 + $0xc0] sm:$0xff] }
  0x18   : > { %v377_v7 = vld [vmem:[%s1584_s29 + $0xe0] sm:$0xff]  ;;  %376 = vst [vmem:[%s1589_s30 + $0x30] sm:$0xff] %v375_v6 }
  0x19   : > { %v379_v8 = vld [vmem:[%s1584_s29 + $0x100] sm:$0xff]  ;;  %378 = vst [vmem:[%s1589_s30 + $0x38] sm:$0xff] %v377_v7 }
  0x1a   : > { %380 = vst [vmem:[%s1589_s30 + $0x40] sm:$0xff] %v379_v8  ;;  %v381_v9 = vld [vmem:[%s1584_s29 + $0x120] sm:$0xff] }
  0x1b   : > { %v383_v10 = vld [vmem:[%s1584_s29 + $0x140] sm:$0xff]  ;;  %382 = vst [vmem:[%s1589_s30 + $0x48] sm:$0xff] %v381_v9 }
  0x1c   : > { %v385_v11 = vld [vmem:[%s1584_s29 + $0x160] sm:$0xff]  ;;  %384 = vst [vmem:[%s1589_s30 + $0x50] sm:$0xff] %v383_v10 }
  0x1d   : > { %386 = vst [vmem:[%s1589_s30 + $0x58] sm:$0xff] %v385_v11  ;;  %v387_v12 = vld [vmem:[%s1584_s29 + $0x180] sm:$0xff] }
  0x1e   : > { %v389_v13 = vld [vmem:[%s1584_s29 + $0x1a0] sm:$0xff]  ;;  %388 = vst [vmem:[%s1589_s30 + $0x60] sm:$0xff] %v387_v12 }
  0x1f   : > { %v391_v14 = vld [vmem:[%s1584_s29 + $0x1c0] sm:$0xff]  ;;  %390 = vst [vmem:[%s1589_s30 + $0x68] sm:$0xff] %v389_v13 }
  0x20   : > { %392 = vst [vmem:[%s1589_s30 + $0x70] sm:$0xff] %v391_v14  ;;  %v393_v15 = vld [vmem:[%s1584_s29 + $0x1e0] sm:$0xff] }
  0x21   : > { %v395_v16 = vld [vmem:[%s1584_s29 + $0x200] sm:$0xff]  ;;  %394 = vst [vmem:[%s1589_s30 + $0x78] sm:$0xff] %v393_v15 }
  0x22   : > { %v397_v17 = vld [vmem:[%s1584_s29 + $0x220] sm:$0xff]  ;;  %396 = vst [vmem:[%s1589_s30 + $0x80] sm:$0xff] %v395_v16 }
  0x23   : > { %398 = vst [vmem:[%s1589_s30 + $0x88] sm:$0xff] %v397_v17  ;;  %v399_v18 = vld [vmem:[%s1584_s29 + $0x240] sm:$0xff] }
  0x24   : > { %v401_v19 = vld [vmem:[%s1584_s29 + $0x260] sm:$0xff]  ;;  %400 = vst [vmem:[%s1589_s30 + $0x90] sm:$0xff] %v399_v18 }
  0x25   : > { %v403_v20 = vld [vmem:[%s1584_s29 + $0x280] sm:$0xff]  ;;  %402 = vst [vmem:[%s1589_s30 + $0x98] sm:$0xff] %v401_v19 }
  0x26   : > { %404 = vst [vmem:[%s1589_s30 + $0xa0] sm:$0xff] %v403_v20  ;;  %v405_v21 = vld [vmem:[%s1584_s29 + $0x2a0] sm:$0xff] }
  0x27   : > { %v407_v22 = vld [vmem:[%s1584_s29 + $0x2c0] sm:$0xff]  ;;  %406 = vst [vmem:[%s1589_s30 + $0xa8] sm:$0xff] %v405_v21 }
  0x28   : > { %v409_v23 = vld [vmem:[%s1584_s29 + $0x2e0] sm:$0xff]  ;;  %408 = vst [vmem:[%s1589_s30 + $0xb0] sm:$0xff] %v407_v22 }
  0x29   : > { %410 = vst [vmem:[%s1589_s30 + $0xb8] sm:$0xff] %v409_v23  ;;  %v411_v24 = vld [vmem:[%s1584_s29 + $0x300] sm:$0xff] }
  0x2a   : > { %v413_v25 = vld [vmem:[%s1584_s29 + $0x320] sm:$0xff]  ;;  %412 = vst [vmem:[%s1589_s30 + $0xc0] sm:$0xff] %v411_v24 }
  0x2b   : > { %v415_v26 = vld [vmem:[%s1584_s29 + $0x340] sm:$0xff]  ;;  %414 = vst [vmem:[%s1589_s30 + $0xc8] sm:$0xff] %v413_v25 }
  0x2c   : > { %416 = vst [vmem:[%s1589_s30 + $0xd0] sm:$0xff] %v415_v26  ;;  %v417_v27 = vld [vmem:[%s1584_s29 + $0x360] sm:$0xff] }
  0x2d   : > { %v419_v28 = vld [vmem:[%s1584_s29 + $0x380] sm:$0xff]  ;;  %418 = vst [vmem:[%s1589_s30 + $0xd8] sm:$0xff] %v417_v27 }
  0x2e   : > { %v421_v29 = vld [vmem:[%s1584_s29 + $0x3a0] sm:$0xff]  ;;  %420 = vst [vmem:[%s1589_s30 + $0xe0] sm:$0xff] %v419_v28 }
  0x2f   : > { %422 = vst [vmem:[%s1589_s30 + $0xe8] sm:$0xff] %v421_v29  ;;  %v423_v30 = vld [vmem:[%s1584_s29 + $0x3c0] sm:$0xff] }
  0x30   : > { %v425_v31 = vld [vmem:[%s1584_s29 + $0x3e0] sm:$0xff]  ;;  %424 = vst [vmem:[%s1589_s30 + $0xf0] sm:$0xff] %v423_v30 }
  0x31   : > { %v427_v32 = vld [vmem:[%s1584_s29 + $0x400] sm:$0xff]  ;;  %426 = vst [vmem:[%s1589_s30 + $0xf8] sm:$0xff] %v425_v31 }
  0x32   : > { %428 = vst [vmem:[%s1589_s30 + $0x100] sm:$0xff] %v427_v32  ;;  %v429_v33 = vld [vmem:[%s1584_s29 + $0x420] sm:$0xff] }
  0x33   : > { %v431_v34 = vld [vmem:[%s1584_s29 + $0x440] sm:$0xff]  ;;  %430 = vst [vmem:[%s1589_s30 + $0x108] sm:$0xff] %v429_v33 }
  0x34   : > { %v433_v35 = vld [vmem:[%s1584_s29 + $0x460] sm:$0xff]  ;;  %432 = vst [vmem:[%s1589_s30 + $0x110] sm:$0xff] %v431_v34 }
  0x35   : > { %434 = vst [vmem:[%s1589_s30 + $0x118] sm:$0xff] %v433_v35  ;;  %v435_v36 = vld [vmem:[%s1584_s29 + $0x480] sm:$0xff] }
  0x36   : > { %v437_v37 = vld [vmem:[%s1584_s29 + $0x4a0] sm:$0xff]  ;;  %436 = vst [vmem:[%s1589_s30 + $0x120] sm:$0xff] %v435_v36 }
  0x37   : > { %v439_v38 = vld [vmem:[%s1584_s29 + $0x4c0] sm:$0xff]  ;;  %438 = vst [vmem:[%s1589_s30 + $0x128] sm:$0xff] %v437_v37 }
  0x38   : > { %440 = vst [vmem:[%s1589_s30 + $0x130] sm:$0xff] %v439_v38  ;;  %v441_v39 = vld [vmem:[%s1584_s29 + $0x4e0] sm:$0xff] }
  0x39   : > { %v443_v40 = vld [vmem:[%s1584_s29 + $0x500] sm:$0xff]  ;;  %442 = vst [vmem:[%s1589_s30 + $0x138] sm:$0xff] %v441_v39 }
  0x3a   : > { %v445_v41 = vld [vmem:[%s1584_s29 + $0x520] sm:$0xff]  ;;  %444 = vst [vmem:[%s1589_s30 + $0x140] sm:$0xff] %v443_v40 }
  0x3b   : > { %446 = vst [vmem:[%s1589_s30 + $0x148] sm:$0xff] %v445_v41  ;;  %v447_v42 = vld [vmem:[%s1584_s29 + $0x540] sm:$0xff] }
  0x3c   : > { %v449_v43 = vld [vmem:[%s1584_s29 + $0x560] sm:$0xff]  ;;  %448 = vst [vmem:[%s1589_s30 + $0x150] sm:$0xff] %v447_v42 }
  0x3d   : > { %v451_v44 = vld [vmem:[%s1584_s29 + $0x580] sm:$0xff]  ;;  %450 = vst [vmem:[%s1589_s30 + $0x158] sm:$0xff] %v449_v43 }
  0x3e   : > { %452 = vst [vmem:[%s1589_s30 + $0x160] sm:$0xff] %v451_v44  ;;  %v453_v45 = vld [vmem:[%s1584_s29 + $0x5a0] sm:$0xff] }
  0x3f   : > { %v455_v46 = vld [vmem:[%s1584_s29 + $0x5c0] sm:$0xff]  ;;  %454 = vst [vmem:[%s1589_s30 + $0x168] sm:$0xff] %v453_v45 }
  0x40   : > { %v457_v47 = vld [vmem:[%s1584_s29 + $0x5e0] sm:$0xff]  ;;  %456 = vst [vmem:[%s1589_s30 + $0x170] sm:$0xff] %v455_v46 }
  0x41   : > { %458 = vst [vmem:[%s1589_s30 + $0x178] sm:$0xff] %v457_v47  ;;  %v459_v48 = vld [vmem:[%s1584_s29 + $0x600] sm:$0xff] }
  0x42   : > { %v461_v49 = vld [vmem:[%s1584_s29 + $0x620] sm:$0xff]  ;;  %460 = vst [vmem:[%s1589_s30 + $0x180] sm:$0xff] %v459_v48 }
  0x43   : > { %v463_v50 = vld [vmem:[%s1584_s29 + $0x640] sm:$0xff]  ;;  %462 = vst [vmem:[%s1589_s30 + $0x188] sm:$0xff] %v461_v49 }
  0x44   : > { %464 = vst [vmem:[%s1589_s30 + $0x190] sm:$0xff] %v463_v50  ;;  %v465_v51 = vld [vmem:[%s1584_s29 + $0x660] sm:$0xff] }
  0x45   : > { %v467_v52 = vld [vmem:[%s1584_s29 + $0x680] sm:$0xff]  ;;  %466 = vst [vmem:[%s1589_s30 + $0x198] sm:$0xff] %v465_v51 }
  0x46   : > { %v469_v53 = vld [vmem:[%s1584_s29 + $0x6a0] sm:$0xff]  ;;  %468 = vst [vmem:[%s1589_s30 + $0x1a0] sm:$0xff] %v467_v52 }
  0x47   : > { %470 = vst [vmem:[%s1589_s30 + $0x1a8] sm:$0xff] %v469_v53  ;;  %v471_v54 = vld [vmem:[%s1584_s29 + $0x6c0] sm:$0xff] }
  0x48   : > { %v473_v55 = vld [vmem:[%s1584_s29 + $0x6e0] sm:$0xff]  ;;  %472 = vst [vmem:[%s1589_s30 + $0x1b0] sm:$0xff] %v471_v54 }
  0x49   : > { %v475_v56 = vld [vmem:[%s1584_s29 + $0x700] sm:$0xff]  ;;  %474 = vst [vmem:[%s1589_s30 + $0x1b8] sm:$0xff] %v473_v55 }
  0x4a   : > { %476 = vst [vmem:[%s1589_s30 + $0x1c0] sm:$0xff] %v475_v56  ;;  %v477_v57 = vld [vmem:[%s1584_s29 + $0x720] sm:$0xff] }
  0x4b   : > { %v479_v58 = vld [vmem:[%s1584_s29 + $0x740] sm:$0xff]  ;;  %478 = vst [vmem:[%s1589_s30 + $0x1c8] sm:$0xff] %v477_v57 }
  0x4c   : > { %v481_v59 = vld [vmem:[%s1584_s29 + $0x760] sm:$0xff]  ;;  %480 = vst [vmem:[%s1589_s30 + $0x1d0] sm:$0xff] %v479_v58 }
  0x4d   : > { %482 = vst [vmem:[%s1589_s30 + $0x1d8] sm:$0xff] %v481_v59  ;;  %v483_v60 = vld [vmem:[%s1584_s29 + $0x780] sm:$0xff] }
  0x4e   : > { %v485_v61 = vld [vmem:[%s1584_s29 + $0x7a0] sm:$0xff]  ;;  %484 = vst [vmem:[%s1589_s30 + $0x1e0] sm:$0xff] %v483_v60 }
  0x4f   : > { %v487_v62 = vld [vmem:[%s1584_s29 + $0x7c0] sm:$0xff]  ;;  %486 = vst [vmem:[%s1589_s30 + $0x1e8] sm:$0xff] %v485_v61 }
  0x50   : > { %488 = vst [vmem:[%s1589_s30 + $0x1f0] sm:$0xff] %v487_v62  ;;  %v489_v63 = vld [vmem:[%s1584_s29 + $0x7e0] sm:$0xff] }
  0x51   : > { %490 = vst [vmem:[%s1589_s30 + $0x1f8] sm:$0xff] %v489_v63 }
  0x52 PF: > { %p1255_p6 = scmp.ge.s32.totalorder %s1514_s19, 1  ;;  %p511_p7 = scmp.lt.s32.totalorder %s1514_s19, 5 }
  0x54   : > { %p512_p8 = pnand %p1255_p6, %p511_p7 }
  0x55   : > { %s518_s5 = sand.u32 (!%p512_p8), 1, %s1498_s15   ;;  %v1722_v0 = vld [vmem:[%s1828_s0] sm:$0xff] (!%p512_p8)  ;;  %v1727_v1 = vld [vmem:[%s1828_s0 + $0x8] sm:$0xff] (!%p512_p8)  ;;  %s1257_s12 = sshll.u32 (!%p512_p8), %s1506_s17, 1 }
  0x56   : > { %515 = sbr.rel (%p512_p8) target bundleno = 376 (0x178), region = 70  ;;  %s1256_s10 = sshll.u32 (!%p512_p8), %s518_s5, 9  ;;  %v1262_v2 = vcombine.high (!%p512_p8), %v1722_v0, %v1722_v0  ;;  %v1264_v3 = vcombine.high (!%p512_p8), %v1727_v1, %v1727_v1 }
  0x57   : > { %s1733_s11 = scalar_lea.vmem (!%p512_p8), [#allocation2], %s1256_s10  ;;  %p577_p9 = scmp.lt.s32.totalorder (!%p512_p8), %s1257_s12, 7 }
  0x58   : > { %v1376_v4 = vld [vmem:[%s1733_s11 + $0x4] ss:$8 sps:$4 sm:$0xff] (!%p512_p8)   ;;  %1028 = vmatprep.mubr.bf16.mxu1 (!%p512_p8), %v1262_v2  ;;  %1069 = vmatprep.mubr.bf16.mxu0 (!%p512_p8), %v1264_v3  ;;  %v1380_v6 = vld [vmem:[%s1733_s11] ss:$8 sps:$4 sm:$0xff] (!%p512_p8)   ;;  %v1382_v8 = vld [vmem:[%s1733_s11 + $0x14] ss:$8 sps:$4 sm:$0xff] (!%p512_p8)  }
  0x59   : > { %v1378_v5 = vld [vmem:[%s1733_s11 + $0x104] ss:$8 sps:$4 sm:$0xff] (!%p512_p8)   ;;  %996 = vmatprep.subr.bf16.mxu1 (!%p512_p8), %v1376_v4  ;;  %v1381_v7 = vld [vmem:[%s1733_s11 + $0x100] ss:$8 sps:$4 sm:$0xff] (!%p512_p8)   ;;  %v1384_v9 = vld [vmem:[%s1733_s11 + $0x114] ss:$8 sps:$4 sm:$0xff] (!%p512_p8)  }
  0x5a   : > { %1037 = vmatprep.subr.bf16.mxu0 (!%p512_p8), %v1378_v5  ;;  %997 = vmatpush1.bf16.msra.mxu1 (!%p512_p8), %v1380_v6  ;;  %v1386_v10 = vld [vmem:[%s1733_s11 + $0x10] ss:$8 sps:$4 sm:$0xff] (!%p512_p8)   ;;  %v1388_v12 = vld [vmem:[%s1733_s11 + $0x24] ss:$8 sps:$4 sm:$0xff] (!%p512_p8)   ;;  %v1392_v14 = vld [vmem:[%s1733_s11 + $0x20] ss:$8 sps:$4 sm:$0xff] (!%p512_p8)   ;;  %v1261_v6 = vcombine.low (!%p512_p8), %v1722_v0, %v1722_v0 }
  0x5b   : > { %1038 = vmatpush1.bf16.msra.mxu0 (!%p512_p8), %v1381_v7  ;;  %998 = vmatprep.subr.bf16.mxu1 (!%p512_p8), %v1382_v8  ;;  %v1387_v11 = vld [vmem:[%s1733_s11 + $0x110] ss:$8 sps:$4 sm:$0xff] (!%p512_p8)   ;;  %v1390_v13 = vld [vmem:[%s1733_s11 + $0x124] ss:$8 sps:$4 sm:$0xff] (!%p512_p8)   ;;  %v1393_v15 = vld [vmem:[%s1733_s11 + $0x120] ss:$8 sps:$4 sm:$0xff] (!%p512_p8)   ;;  %v1263_v7 = vcombine.low (!%p512_p8), %v1727_v1, %v1727_v1  ;;  %v1080_v8 = vlaneseq (!%p512_p8) }
  0x5c   : > { %1039 = vmatprep.subr.bf16.mxu0 (!%p512_p8), %v1384_v9  ;;  %v1394_v16 = vld [vmem:[%s1733_s11 + $0x34] ss:$8 sps:$4 sm:$0xff] (!%p512_p8)   ;;  %v1398_v18 = vld [vmem:[%s1733_s11 + $0x30] ss:$8 sps:$4 sm:$0xff] (!%p512_p8)   ;;  %v1400_v20 = vld [vmem:[%s1733_s11 + $0x44] ss:$8 sps:$4 sm:$0xff] (!%p512_p8)  }
  0x5d   : > { %v1396_v17 = vld [vmem:[%s1733_s11 + $0x134] ss:$8 sps:$4 sm:$0xff]   ;;  %v1399_v19 = vld [vmem:[%s1733_s11 + $0x130] ss:$8 sps:$4 sm:$0xff]   ;;  %v1402_v21 = vld [vmem:[%s1733_s11 + $0x144] ss:$8 sps:$4 sm:$0xff]  }
  0x5e   : > { %999 = vmatpush1.bf16.msra.mxu1 %v1386_v10  ;;  %v1404_v22 = vld [vmem:[%s1733_s11 + $0x40] ss:$8 sps:$4 sm:$0xff]   ;;  %v1406_v24 = vld [vmem:[%s1733_s11 + $0x54] ss:$8 sps:$4 sm:$0xff]   ;;  %v1410_v26 = vld [vmem:[%s1733_s11 + $0x50] ss:$8 sps:$4 sm:$0xff]  }
  0x5f   : > { %1040 = vmatpush1.bf16.msra.mxu0 %v1387_v11  ;;  %1000 = vmatprep.subr.bf16.mxu1 %v1388_v12  ;;  %v1405_v23 = vld [vmem:[%s1733_s11 + $0x140] ss:$8 sps:$4 sm:$0xff]   ;;  %v1408_v25 = vld [vmem:[%s1733_s11 + $0x154] ss:$8 sps:$4 sm:$0xff]   ;;  %v1411_v27 = vld [vmem:[%s1733_s11 + $0x150] ss:$8 sps:$4 sm:$0xff]  }
  0x60   : > { %1041 = vmatprep.subr.bf16.mxu0 %v1390_v13  ;;  %v1412_v28 = vld [vmem:[%s1733_s11 + $0x64] ss:$8 sps:$4 sm:$0xff]   ;;  %v1416_v30 = vld [vmem:[%s1733_s11 + $0x60] ss:$8 sps:$4 sm:$0xff]   ;;  %v1418_v32 = vld [vmem:[%s1733_s11 + $0x74] ss:$8 sps:$4 sm:$0xff]  }
  0x61   : > { %v1414_v29 = vld [vmem:[%s1733_s11 + $0x164] ss:$8 sps:$4 sm:$0xff]   ;;  %v1417_v31 = vld [vmem:[%s1733_s11 + $0x160] ss:$8 sps:$4 sm:$0xff]   ;;  %v1420_v33 = vld [vmem:[%s1733_s11 + $0x174] ss:$8 sps:$4 sm:$0xff]  }
  0x62   : > { %1001 = vmatpush1.bf16.msra.mxu1 %v1392_v14  ;;  %v1422_v34 = vld [vmem:[%s1733_s11 + $0x70] ss:$8 sps:$4 sm:$0xff]   ;;  %v1424_v36 = vld [vmem:[%s1733_s11 + $0x84] ss:$8 sps:$4 sm:$0xff]   ;;  %v1428_v38 = vld [vmem:[%s1733_s11 + $0x80] ss:$8 sps:$4 sm:$0xff]  }
  0x63   : > { %1042 = vmatpush1.bf16.msra.mxu0 %v1393_v15  ;;  %1002 = vmatprep.subr.bf16.mxu1 %v1394_v16  ;;  %v1423_v35 = vld [vmem:[%s1733_s11 + $0x170] ss:$8 sps:$4 sm:$0xff]   ;;  %v1426_v37 = vld [vmem:[%s1733_s11 + $0x184] ss:$8 sps:$4 sm:$0xff]   ;;  %v1429_v39 = vld [vmem:[%s1733_s11 + $0x180] ss:$8 sps:$4 sm:$0xff]  }
  0x64   : > { %1043 = vmatprep.subr.bf16.mxu0 %v1396_v17  ;;  %v1430_v40 = vld [vmem:[%s1733_s11 + $0x94] ss:$8 sps:$4 sm:$0xff]   ;;  %v1434_v42 = vld [vmem:[%s1733_s11 + $0x90] ss:$8 sps:$4 sm:$0xff]   ;;  %v1436_v44 = vld [vmem:[%s1733_s11 + $0xa4] ss:$8 sps:$4 sm:$0xff]  }
  0x65   : > { %v1432_v41 = vld [vmem:[%s1733_s11 + $0x194] ss:$8 sps:$4 sm:$0xff]   ;;  %v1435_v43 = vld [vmem:[%s1733_s11 + $0x190] ss:$8 sps:$4 sm:$0xff]   ;;  %v1438_v45 = vld [vmem:[%s1733_s11 + $0x1a4] ss:$8 sps:$4 sm:$0xff]  }
  0x66   : > { %1003 = vmatpush1.bf16.msra.mxu1 %v1398_v18  ;;  %v1440_v46 = vld [vmem:[%s1733_s11 + $0xa0] ss:$8 sps:$4 sm:$0xff]   ;;  %v1442_v48 = vld [vmem:[%s1733_s11 + $0xb4] ss:$8 sps:$4 sm:$0xff]   ;;  %v1446_v50 = vld [vmem:[%s1733_s11 + $0xb0] ss:$8 sps:$4 sm:$0xff]  }
  0x67   : > { %1044 = vmatpush1.bf16.msra.mxu0 %v1399_v19  ;;  %1004 = vmatprep.subr.bf16.mxu1 %v1400_v20  ;;  %v1441_v47 = vld [vmem:[%s1733_s11 + $0x1a0] ss:$8 sps:$4 sm:$0xff]   ;;  %v1444_v49 = vld [vmem:[%s1733_s11 + $0x1b4] ss:$8 sps:$4 sm:$0xff]   ;;  %v1447_v51 = vld [vmem:[%s1733_s11 + $0x1b0] ss:$8 sps:$4 sm:$0xff]  }
  0x68   : > { %1045 = vmatprep.subr.bf16.mxu0 %v1402_v21  ;;  %v1448_v52 = vld [vmem:[%s1733_s11 + $0xc4] ss:$8 sps:$4 sm:$0xff]   ;;  %v1452_v54 = vld [vmem:[%s1733_s11 + $0xc0] ss:$8 sps:$4 sm:$0xff]   ;;  %v1454_v56 = vld [vmem:[%s1733_s11 + $0xd4] ss:$8 sps:$4 sm:$0xff]  }
  0x69   : > { %v1450_v53 = vld [vmem:[%s1733_s11 + $0x1c4] ss:$8 sps:$4 sm:$0xff]   ;;  %v1453_v55 = vld [vmem:[%s1733_s11 + $0x1c0] ss:$8 sps:$4 sm:$0xff]   ;;  %v1456_v57 = vld [vmem:[%s1733_s11 + $0x1d4] ss:$8 sps:$4 sm:$0xff]  }
  0x6a   : > { %1005 = vmatpush1.bf16.msra.mxu1 %v1404_v22  ;;  %v1458_v58 = vld [vmem:[%s1733_s11 + $0xd0] ss:$8 sps:$4 sm:$0xff]   ;;  %v1460_v60 = vld [vmem:[%s1733_s11 + $0xe4] ss:$8 sps:$4 sm:$0xff]   ;;  %v1464_v62 = vld [vmem:[%s1733_s11 + $0xe0] ss:$8 sps:$4 sm:$0xff]  }
  0x6b   : > { %1046 = vmatpush1.bf16.msra.mxu0 %v1405_v23  ;;  %1006 = vmatprep.subr.bf16.mxu1 %v1406_v24  ;;  %v1459_v59 = vld [vmem:[%s1733_s11 + $0x1d0] ss:$8 sps:$4 sm:$0xff]   ;;  %v1462_v61 = vld [vmem:[%s1733_s11 + $0x1e4] ss:$8 sps:$4 sm:$0xff]   ;;  %v1465_v63 = vld [vmem:[%s1733_s11 + $0x1e0] ss:$8 sps:$4 sm:$0xff]  }
  0x6c   : > { %1047 = vmatprep.subr.bf16.mxu0 %v1408_v25  ;;  %v1466_v2 = vld [vmem:[%s1733_s11 + $0xf4] ss:$8 sps:$4 sm:$0xff]   ;;  %v1470_v4 = vld [vmem:[%s1733_s11 + $0xf0] ss:$8 sps:$4 sm:$0xff]   ;;  %s1840_s12 = smov (!%p577_p9, %s1257_s12), 7  ;;  %v1081_v9 = vshrl.u32 %v1080_v8, 7 }
  0x6d   : > { %v1468_v3 = vld [vmem:[%s1733_s11 + $0x1f4] ss:$8 sps:$4 sm:$0xff]   ;;  %v1471_v5 = vld [vmem:[%s1733_s11 + $0x1f0] ss:$8 sps:$4 sm:$0xff]   ;;  %s579_s15 = scalar_lea.vmem %s1830_s2, %s1840_s12  ;;  %s584_s24 = scalar_lea.vmem %s1831_s3, %s1840_s12 }
  0x6e   : > { %1007 = vmatpush1.bf16.msra.mxu1 %v1410_v26  ;;  %v1082_v0 = vsub.s32 0, %v1081_v9  ;;  %v1078_v10 = vld [vmem:[%s579_s15] sm:$0x3]  ;;  %v1086_v1 = vsub.s32 1, %v1081_v9  ;;  %s1260_s17 = sshll.u32 %s1840_s12, 2 }
  0x6f   : > { %1048 = vmatpush1.bf16.msra.mxu0 %v1411_v27  ;;  %1008 = vmatprep.subr.bf16.mxu1 %v1412_v28  ;;  %v1092_v11 = vld [vmem:[%s584_s24] sm:$0x3]  ;;  %s594_s27 = scalar_lea.vmem %s1832_s4, %s1260_s17 }
  0x70   : > { %1049 = vmatprep.subr.bf16.mxu0 %v1414_v29  ;;  %v1083_v12 = vrot.slane %v1078_v10, %v1082_v0  ;;  %v1087_v15 = vrot.slane %v1078_v10, %v1086_v1  ;;  %v1097_v17 = vrot.slane %v1092_v11, %v1082_v0  ;;  %v1101_v21 = vrot.slane %v1092_v11, %v1086_v1 }
  0x72   : > { %1009 = vmatpush1.bf16.msra.mxu1 %v1416_v30 }
  0x73   : > { %1050 = vmatpush1.bf16.msra.mxu0 %v1417_v31  ;;  %1010 = vmatprep.subr.bf16.mxu1 %v1418_v32 }
  0x74   : > { %1051 = vmatprep.subr.bf16.mxu0 %v1420_v33 }
  0x76   : > { %1011 = vmatpush1.bf16.msra.mxu1 %v1422_v34 }
  0x77   : > { %1052 = vmatpush1.bf16.msra.mxu0 %v1423_v35  ;;  %1012 = vmatprep.subr.bf16.mxu1 %v1424_v36 }
  0x78   : > { %1053 = vmatprep.subr.bf16.mxu0 %v1426_v37 }
  0x7a   : > { %1013 = vmatpush1.bf16.msra.mxu1 %v1428_v38 }
  0x7b   : > { %1054 = vmatpush1.bf16.msra.mxu0 %v1429_v39  ;;  %1014 = vmatprep.subr.bf16.mxu1 %v1430_v40 }
  0x7c   : > { %1055 = vmatprep.subr.bf16.mxu0 %v1432_v41 }
  0x7e   : > { %1015 = vmatpush1.bf16.msra.mxu1 %v1434_v42 }
  0x7f   : > { %1056 = vmatpush1.bf16.msra.mxu0 %v1435_v43  ;;  %1016 = vmatprep.subr.bf16.mxu1 %v1436_v44 }
  0x80   : > { %1057 = vmatprep.subr.bf16.mxu0 %v1438_v45 }
  0x82   : > { %1017 = vmatpush1.bf16.msra.mxu1 %v1440_v46 }
  0x83   : > { %1058 = vmatpush1.bf16.msra.mxu0 %v1441_v47  ;;  %1018 = vmatprep.subr.bf16.mxu1 %v1442_v48 }
  0x84   : > { %1059 = vmatprep.subr.bf16.mxu0 %v1444_v49 }
  0x86   : > { %1019 = vmatpush1.bf16.msra.mxu1 %v1446_v50 }
  0x87   : > { %1060 = vmatpush1.bf16.msra.mxu0 %v1447_v51  ;;  %1020 = vmatprep.subr.bf16.mxu1 %v1448_v52 }
  0x88   : > { %1061 = vmatprep.subr.bf16.mxu0 %v1450_v53 }
  0x8a   : > { %1021 = vmatpush1.bf16.msra.mxu1 %v1452_v54 }
  0x8b   : > { %1062 = vmatpush1.bf16.msra.mxu0 %v1453_v55  ;;  %1022 = vmatprep.subr.bf16.mxu1 %v1454_v56 }
  0x8c   : > { %1063 = vmatprep.subr.bf16.mxu0 %v1456_v57 }
  0x8e   : > { %1023 = vmatpush1.bf16.msra.mxu1 %v1458_v58 }
  0x8f   : > { %1064 = vmatpush1.bf16.msra.mxu0 %v1459_v59  ;;  %1024 = vmatprep.subr.bf16.mxu1 %v1460_v60 }
  0x90   : > { %1065 = vmatprep.subr.bf16.mxu0 %v1462_v61 }
  0x92   : > { %1025 = vmatpush1.bf16.msra.mxu1 %v1464_v62 }
  0x93   : > { %1066 = vmatpush1.bf16.msra.mxu0 %v1465_v63  ;;  %1026 = vmatprep.subr.bf16.mxu1 %v1466_v2 }
  0x94   : > { %1067 = vmatprep.subr.bf16.mxu0 %v1468_v3 }
  0x96   : > { %1027 = vmatpush1.bf16.msra.mxu1 %v1470_v4 }
  0x97   : > { %1068 = vmatpush1.bf16.msra.mxu0 %v1471_v5 }
  0x99   : > { %1029 = vmatmul.mubr.bf16.vlgmr.msra.gmra.mrb[0].mxu1 %v1261_v6 }
  0x9a   : > { %1070 = vmatmul.mubr.bf16.vlgmr.msra.gmra.mrb[0].mxu0 %v1263_v7 }
 0x16c   : > { %v1030_v13 = vpop.f32.mrb[0].mxu1 }
 0x16d   : > { %v1071_v14 = vpop.f32.mrb[0].mxu0  ;;  %v1032_v18 = vpop.f32.mrb[1].mxu1 }
 0x16e   : > { %v1072_v16 = vadd.f32 %v1071_v14, %v1030_v13  ;;  %v1073_v19 = vpop.f32.mrb[1].mxu0  ;;  %v1034_v22 = vpop.f32.mrb[2].mxu1 }
 0x16f   : > { %v1074_v20 = vadd.f32 %v1073_v19, %v1032_v18  ;;  %v1075_v23 = vpop.f32.mrb[2].mxu0  ;;  %v1035_v25 = vpop.f32.mrb[3].mxu1 }
 0x170   : > { %v1090_v24 = vmul.f32 %v1083_v12, %v1072_v16  ;;  %v1076_v26 = vpop.f32.mrb[3].mxu0 }
 0x171   : > { %v1091_v27 = vmul.f32 %v1087_v15, %v1074_v20 }
 0x172   : > { %v1104_v28 = vadd.f32 %v1097_v17, %v1090_v24 }
 0x173   : > { %v1105_v29 = vadd.f32 %v1101_v21, %v1091_v27 }
 0x175   : > { %v1333_v30 = vpack.c.bf16 %v1105_v29, %v1104_v28 }
 0x177   : > { %1114 = vst [vmem:[%s594_s27] sm:$0xff] %v1333_v30 }
 0x178 PF: > { %s14_s19 = sadd.s32 1, %s1514_s19   ;;  %s1833_s15 = smov %s1502_s16 }
 0x179   : > { %p11_p10 = scmp.ge.s32.totalorder %s14_s19, 6   ;;  %s1834_s16 = smov %s1576_s23 }
 0x17a   : > { %s1835_s17 = smov %s1510_s18  ;;  %s1836_s18 = smov %s1838_s20 }
 0x17b   :  { %13 = sbr.rel (!%p11_p10) target bundleno = 3 (0x3), region = 118 }

// kernel: resnext50_encoder.51
= control target key start
LH: loop header
LB: loop body
LE: loop exit
PB: predicated region body
PF: predicated region fallthrough
CT: control target
= control target key end

     0   :  { %s6588_s27 = smov 0   ;;  %s6590_s28 = smov 0   ;;  %s7879_s0 = inlined_call_operand.vmem [shape: bf16[8,4608], index: 0, kind: input, shape index: {}]   ;;  %s7880_s1 = inlined_call_operand.vmem [shape: bf16[4,1152,128], index: 1, kind: input, shape index: {}]   ;;  %s7881_s2 = inlined_call_operand.vmem [shape: f32[1,512], index: 2, kind: input, shape index: {}]   ;;  %s7882_s3 = inlined_call_operand.vmem [shape: f32[1,512], index: 3, kind: input, shape index: {}]   ;;  %s7883_s4 = inlined_call_operand.vmem [shape: bf16[512,1024], index: 4, kind: input, shape index: {}]   ;;  %s7884_s5 = inlined_call_operand.vmem [shape: f32[1,1024], index: 5, kind: input, shape index: {}]   ;;  %s7885_s6 = inlined_call_operand.vmem [shape: f32[1,1024], index: 6, kind: input, shape index: {}]   ;;  %s7886_s7 = inlined_call_operand.vmem [shape: bf16[8,1024], index: 7, kind: input, shape index: {}]   ;;  %s7887_s8 = inlined_call_operand.vmem [shape: bf16[8,1024], index: 8, kind: output, shape index: {}]  }
   0x1   :  { %s6592_s29 = smov 0   ;;  %s6594_s30 = smov 0  }
   0x2   :  { %s6596_s9 = smov 0  }
   0x3 LB: > { %s27_s10 = sadd.s32 1, %s6535_s30  ;;  %p133_p1 = scmp.ne.s32.totalorder %s6527_s28, %s6523_s27  ;;  %s6539_s9 = sphi %s6596_s9, %s18_s9   ;;  %s6535_s30 = sphi %s6594_s30, %s7891_s30   ;;  %s6531_s29 = sphi %s6592_s29, %s7890_s29   ;;  %s6527_s28 = sphi %s6590_s28, %s7889_s28   ;;  %s6523_s27 = sphi %s6588_s27, %s7888_s27  }
   0x4   : > { %p28_p0 = scmp.ge.s32.totalorder %s27_s10, 4  ;;  %p134_p2 = scmp.eq.s32.totalorder %s6539_s9, 0 }
   0x5   : > { %s126_s12 = sadd.s32 1, %s6527_s28  ;;  %p4715_p5 = scmp.ge.s32.totalorder %s6539_s9, 4 }
   0x6   : > { %s7893_s10 = smov (%p28_p0, %s27_s10), 0  ;;  %p135_p3 = por %p134_p2, %p133_p1 }
   0x7   : > { %s123_s11 = ssub.s32 %s6535_s30, %s7893_s10  ;;  %284 = sbr.rel (%p4715_p5) target bundleno = 82 (0x52), region = 32 }
   0x8   : > { %p124_p4 = scmp.eq.s32.totalorder %s123_s11, 0 }
   0xa   : > { %s6623_s13 = scalar_select %p124_p4, %s6527_s28, %s126_s12  }
   0xe   : > { %287 = sbr.rel (!%p135_p3) target bundleno = 82 (0x52), region = 36  ;;  %s289_s14 = sand.u32 (%p135_p3), 1, %s6527_s28  }
   0xf   : > { %s5563_s15 = sshll.u32 (%p135_p3), %s6535_s30, 3  ;;  %s4716_s16 = sshll.u32 (%p135_p3), %s289_s14, 9 }
  0x10   : > { %s6631_s19 = scalar_lea.vmem (%p135_p3), %s7883_s4, %s5563_s15  ;;  %s6636_s20 = scalar_lea.vmem (%p135_p3), [#allocation3], %s4716_s16 }
  0x11   : > { %v448_v0 = vld [vmem:[%s6631_s19] sm:$0xff] (%p135_p3) }
  0x12   : > { %v450_v1 = vld [vmem:[%s6631_s19 + $0x20] sm:$0xff] (%p135_p3)  ;;  %449 = vst [vmem:[%s6636_s20] sm:$0xff] (%p135_p3), %v448_v0 }
  0x13   : > { %v452_v2 = vld [vmem:[%s6631_s19 + $0x40] sm:$0xff] (%p135_p3)  ;;  %451 = vst [vmem:[%s6636_s20 + $0x8] sm:$0xff] (%p135_p3), %v450_v1 }
  0x14   : > { %453 = vst [vmem:[%s6636_s20 + $0x10] sm:$0xff] (%p135_p3), %v452_v2  ;;  %v454_v3 = vld [vmem:[%s6631_s19 + $0x60] sm:$0xff] (%p135_p3) }
  0x15   : > { %v456_v4 = vld [vmem:[%s6631_s19 + $0x80] sm:$0xff]  ;;  %455 = vst [vmem:[%s6636_s20 + $0x18] sm:$0xff] %v454_v3 }
  0x16   : > { %v458_v5 = vld [vmem:[%s6631_s19 + $0xa0] sm:$0xff]  ;;  %457 = vst [vmem:[%s6636_s20 + $0x20] sm:$0xff] %v456_v4 }
  0x17   : > { %459 = vst [vmem:[%s6636_s20 + $0x28] sm:$0xff] %v458_v5  ;;  %v460_v6 = vld [vmem:[%s6631_s19 + $0xc0] sm:$0xff] }
  0x18   : > { %v462_v7 = vld [vmem:[%s6631_s19 + $0xe0] sm:$0xff]  ;;  %461 = vst [vmem:[%s6636_s20 + $0x30] sm:$0xff] %v460_v6 }
  0x19   : > { %v464_v8 = vld [vmem:[%s6631_s19 + $0x100] sm:$0xff]  ;;  %463 = vst [vmem:[%s6636_s20 + $0x38] sm:$0xff] %v462_v7 }
  0x1a   : > { %465 = vst [vmem:[%s6636_s20 + $0x40] sm:$0xff] %v464_v8  ;;  %v466_v9 = vld [vmem:[%s6631_s19 + $0x120] sm:$0xff] }
  0x1b   : > { %v468_v10 = vld [vmem:[%s6631_s19 + $0x140] sm:$0xff]  ;;  %467 = vst [vmem:[%s6636_s20 + $0x48] sm:$0xff] %v466_v9 }
  0x1c   : > { %v470_v11 = vld [vmem:[%s6631_s19 + $0x160] sm:$0xff]  ;;  %469 = vst [vmem:[%s6636_s20 + $0x50] sm:$0xff] %v468_v10 }
  0x1d   : > { %471 = vst [vmem:[%s6636_s20 + $0x58] sm:$0xff] %v470_v11  ;;  %v472_v12 = vld [vmem:[%s6631_s19 + $0x180] sm:$0xff] }
  0x1e   : > { %v474_v13 = vld [vmem:[%s6631_s19 + $0x1a0] sm:$0xff]  ;;  %473 = vst [vmem:[%s6636_s20 + $0x60] sm:$0xff] %v472_v12 }
  0x1f   : > { %v476_v14 = vld [vmem:[%s6631_s19 + $0x1c0] sm:$0xff]  ;;  %475 = vst [vmem:[%s6636_s20 + $0x68] sm:$0xff] %v474_v13 }
  0x20   : > { %477 = vst [vmem:[%s6636_s20 + $0x70] sm:$0xff] %v476_v14  ;;  %v478_v15 = vld [vmem:[%s6631_s19 + $0x1e0] sm:$0xff] }
  0x21   : > { %v480_v16 = vld [vmem:[%s6631_s19 + $0x200] sm:$0xff]  ;;  %479 = vst [vmem:[%s6636_s20 + $0x78] sm:$0xff] %v478_v15 }
  0x22   : > { %v482_v17 = vld [vmem:[%s6631_s19 + $0x220] sm:$0xff]  ;;  %481 = vst [vmem:[%s6636_s20 + $0x80] sm:$0xff] %v480_v16 }
  0x23   : > { %483 = vst [vmem:[%s6636_s20 + $0x88] sm:$0xff] %v482_v17  ;;  %v484_v18 = vld [vmem:[%s6631_s19 + $0x240] sm:$0xff] }
  0x24   : > { %v486_v19 = vld [vmem:[%s6631_s19 + $0x260] sm:$0xff]  ;;  %485 = vst [vmem:[%s6636_s20 + $0x90] sm:$0xff] %v484_v18 }
  0x25   : > { %v488_v20 = vld [vmem:[%s6631_s19 + $0x280] sm:$0xff]  ;;  %487 = vst [vmem:[%s6636_s20 + $0x98] sm:$0xff] %v486_v19 }
  0x26   : > { %489 = vst [vmem:[%s6636_s20 + $0xa0] sm:$0xff] %v488_v20  ;;  %v490_v21 = vld [vmem:[%s6631_s19 + $0x2a0] sm:$0xff] }
  0x27   : > { %v492_v22 = vld [vmem:[%s6631_s19 + $0x2c0] sm:$0xff]  ;;  %491 = vst [vmem:[%s6636_s20 + $0xa8] sm:$0xff] %v490_v21 }
  0x28   : > { %v494_v23 = vld [vmem:[%s6631_s19 + $0x2e0] sm:$0xff]  ;;  %493 = vst [vmem:[%s6636_s20 + $0xb0] sm:$0xff] %v492_v22 }
  0x29   : > { %495 = vst [vmem:[%s6636_s20 + $0xb8] sm:$0xff] %v494_v23  ;;  %v496_v24 = vld [vmem:[%s6631_s19 + $0x300] sm:$0xff] }
  0x2a   : > { %v498_v25 = vld [vmem:[%s6631_s19 + $0x320] sm:$0xff]  ;;  %497 = vst [vmem:[%s6636_s20 + $0xc0] sm:$0xff] %v496_v24 }
  0x2b   : > { %v500_v26 = vld [vmem:[%s6631_s19 + $0x340] sm:$0xff]  ;;  %499 = vst [vmem:[%s6636_s20 + $0xc8] sm:$0xff] %v498_v25 }
  0x2c   : > { %501 = vst [vmem:[%s6636_s20 + $0xd0] sm:$0xff] %v500_v26  ;;  %v502_v27 = vld [vmem:[%s6631_s19 + $0x360] sm:$0xff] }
  0x2d   : > { %v504_v28 = vld [vmem:[%s6631_s19 + $0x380] sm:$0xff]  ;;  %503 = vst [vmem:[%s6636_s20 + $0xd8] sm:$0xff] %v502_v27 }
  0x2e   : > { %v506_v29 = vld [vmem:[%s6631_s19 + $0x3a0] sm:$0xff]  ;;  %505 = vst [vmem:[%s6636_s20 + $0xe0] sm:$0xff] %v504_v28 }
  0x2f   : > { %507 = vst [vmem:[%s6636_s20 + $0xe8] sm:$0xff] %v506_v29  ;;  %v508_v30 = vld [vmem:[%s6631_s19 + $0x3c0] sm:$0xff] }
  0x30   : > { %v510_v31 = vld [vmem:[%s6631_s19 + $0x3e0] sm:$0xff]  ;;  %509 = vst [vmem:[%s6636_s20 + $0xf0] sm:$0xff] %v508_v30 }
  0x31   : > { %v512_v32 = vld [vmem:[%s6631_s19 + $0x400] sm:$0xff]  ;;  %511 = vst [vmem:[%s6636_s20 + $0xf8] sm:$0xff] %v510_v31 }
  0x32   : > { %513 = vst [vmem:[%s6636_s20 + $0x100] sm:$0xff] %v512_v32  ;;  %v514_v33 = vld [vmem:[%s6631_s19 + $0x420] sm:$0xff] }
  0x33   : > { %v516_v34 = vld [vmem:[%s6631_s19 + $0x440] sm:$0xff]  ;;  %515 = vst [vmem:[%s6636_s20 + $0x108] sm:$0xff] %v514_v33 }
  0x34   : > { %v518_v35 = vld [vmem:[%s6631_s19 + $0x460] sm:$0xff]  ;;  %517 = vst [vmem:[%s6636_s20 + $0x110] sm:$0xff] %v516_v34 }
  0x35   : > { %519 = vst [vmem:[%s6636_s20 + $0x118] sm:$0xff] %v518_v35  ;;  %v520_v36 = vld [vmem:[%s6631_s19 + $0x480] sm:$0xff] }
  0x36   : > { %v522_v37 = vld [vmem:[%s6631_s19 + $0x4a0] sm:$0xff]  ;;  %521 = vst [vmem:[%s6636_s20 + $0x120] sm:$0xff] %v520_v36 }
  0x37   : > { %v524_v38 = vld [vmem:[%s6631_s19 + $0x4c0] sm:$0xff]  ;;  %523 = vst [vmem:[%s6636_s20 + $0x128] sm:$0xff] %v522_v37 }
  0x38   : > { %525 = vst [vmem:[%s6636_s20 + $0x130] sm:$0xff] %v524_v38  ;;  %v526_v39 = vld [vmem:[%s6631_s19 + $0x4e0] sm:$0xff] }
  0x39   : > { %v528_v40 = vld [vmem:[%s6631_s19 + $0x500] sm:$0xff]  ;;  %527 = vst [vmem:[%s6636_s20 + $0x138] sm:$0xff] %v526_v39 }
  0x3a   : > { %v530_v41 = vld [vmem:[%s6631_s19 + $0x520] sm:$0xff]  ;;  %529 = vst [vmem:[%s6636_s20 + $0x140] sm:$0xff] %v528_v40 }
  0x3b   : > { %531 = vst [vmem:[%s6636_s20 + $0x148] sm:$0xff] %v530_v41  ;;  %v532_v42 = vld [vmem:[%s6631_s19 + $0x540] sm:$0xff] }
  0x3c   : > { %v534_v43 = vld [vmem:[%s6631_s19 + $0x560] sm:$0xff]  ;;  %533 = vst [vmem:[%s6636_s20 + $0x150] sm:$0xff] %v532_v42 }
  0x3d   : > { %v536_v44 = vld [vmem:[%s6631_s19 + $0x580] sm:$0xff]  ;;  %535 = vst [vmem:[%s6636_s20 + $0x158] sm:$0xff] %v534_v43 }
  0x3e   : > { %537 = vst [vmem:[%s6636_s20 + $0x160] sm:$0xff] %v536_v44  ;;  %v538_v45 = vld [vmem:[%s6631_s19 + $0x5a0] sm:$0xff] }
  0x3f   : > { %v540_v46 = vld [vmem:[%s6631_s19 + $0x5c0] sm:$0xff]  ;;  %539 = vst [vmem:[%s6636_s20 + $0x168] sm:$0xff] %v538_v45 }
  0x40   : > { %v542_v47 = vld [vmem:[%s6631_s19 + $0x5e0] sm:$0xff]  ;;  %541 = vst [vmem:[%s6636_s20 + $0x170] sm:$0xff] %v540_v46 }
  0x41   : > { %543 = vst [vmem:[%s6636_s20 + $0x178] sm:$0xff] %v542_v47  ;;  %v544_v48 = vld [vmem:[%s6631_s19 + $0x600] sm:$0xff] }
  0x42   : > { %v546_v49 = vld [vmem:[%s6631_s19 + $0x620] sm:$0xff]  ;;  %545 = vst [vmem:[%s6636_s20 + $0x180] sm:$0xff] %v544_v48 }
  0x43   : > { %v548_v50 = vld [vmem:[%s6631_s19 + $0x640] sm:$0xff]  ;;  %547 = vst [vmem:[%s6636_s20 + $0x188] sm:$0xff] %v546_v49 }
  0x44   : > { %549 = vst [vmem:[%s6636_s20 + $0x190] sm:$0xff] %v548_v50  ;;  %v550_v51 = vld [vmem:[%s6631_s19 + $0x660] sm:$0xff] }
  0x45   : > { %v552_v52 = vld [vmem:[%s6631_s19 + $0x680] sm:$0xff]  ;;  %551 = vst [vmem:[%s6636_s20 + $0x198] sm:$0xff] %v550_v51 }
  0x46   : > { %v554_v53 = vld [vmem:[%s6631_s19 + $0x6a0] sm:$0xff]  ;;  %553 = vst [vmem:[%s6636_s20 + $0x1a0] sm:$0xff] %v552_v52 }
  0x47   : > { %555 = vst [vmem:[%s6636_s20 + $0x1a8] sm:$0xff] %v554_v53  ;;  %v556_v54 = vld [vmem:[%s6631_s19 + $0x6c0] sm:$0xff] }
  0x48   : > { %v558_v55 = vld [vmem:[%s6631_s19 + $0x6e0] sm:$0xff]  ;;  %557 = vst [vmem:[%s6636_s20 + $0x1b0] sm:$0xff] %v556_v54 }
  0x49   : > { %v560_v56 = vld [vmem:[%s6631_s19 + $0x700] sm:$0xff]  ;;  %559 = vst [vmem:[%s6636_s20 + $0x1b8] sm:$0xff] %v558_v55 }
  0x4a   : > { %561 = vst [vmem:[%s6636_s20 + $0x1c0] sm:$0xff] %v560_v56  ;;  %v562_v57 = vld [vmem:[%s6631_s19 + $0x720] sm:$0xff] }
  0x4b   : > { %v564_v58 = vld [vmem:[%s6631_s19 + $0x740] sm:$0xff]  ;;  %563 = vst [vmem:[%s6636_s20 + $0x1c8] sm:$0xff] %v562_v57 }
  0x4c   : > { %v566_v59 = vld [vmem:[%s6631_s19 + $0x760] sm:$0xff]  ;;  %565 = vst [vmem:[%s6636_s20 + $0x1d0] sm:$0xff] %v564_v58 }
  0x4d   : > { %567 = vst [vmem:[%s6636_s20 + $0x1d8] sm:$0xff] %v566_v59  ;;  %v568_v60 = vld [vmem:[%s6631_s19 + $0x780] sm:$0xff] }
  0x4e   : > { %v570_v61 = vld [vmem:[%s6631_s19 + $0x7a0] sm:$0xff]  ;;  %569 = vst [vmem:[%s6636_s20 + $0x1e0] sm:$0xff] %v568_v60 }
  0x4f   : > { %v572_v62 = vld [vmem:[%s6631_s19 + $0x7c0] sm:$0xff]  ;;  %571 = vst [vmem:[%s6636_s20 + $0x1e8] sm:$0xff] %v570_v61 }
  0x50   : > { %573 = vst [vmem:[%s6636_s20 + $0x1f0] sm:$0xff] %v572_v62  ;;  %v574_v63 = vld [vmem:[%s6631_s19 + $0x7e0] sm:$0xff] }
  0x51   : > { %575 = vst [vmem:[%s6636_s20 + $0x1f8] sm:$0xff] %v574_v63 }
  0x52 PF: > { %p4719_p6 = scmp.ge.s32.totalorder %s6539_s9, 1  ;;  %p609_p7 = scmp.lt.s32.totalorder %s6539_s9, 5 }
  0x54   : > { %p610_p8 = pnand %p4719_p6, %p609_p7 }
  0x55   : > { %s616_s21 = sand.u32 (!%p610_p8), 1, %s6523_s27   ;;  %s4721_s22 = sshll.u32 (!%p610_p8), %s6531_s29, 1 }
  0x56   : > { %613 = sbr.rel (%p610_p8) target bundleno = 936 (0x3a8), region = 86  ;;  %s4720_s23 = sshll.u32 (!%p610_p8), %s616_s21, 9 }
  0x57   : > { %p682_p9 = scmp.lt.s32.totalorder (!%p610_p8), %s4721_s22, 7  ;;  %s6788_s21 = scalar_lea.vmem (!%p610_p8), [#allocation3], %s4720_s23 }
  0x58   : > { %p4727_p10 = scmp.ne.s32.totalorder (!%p610_p8), %s6531_s29, 0 }
  0x5d   : > { %s7895_s22 = smov (!%p682_p9, %s4721_s22), 7  ;;  %715 = sbr.rel (%p4727_p10) target bundleno = 644 (0x284), region = 94 }
  0x5e   : > { %s684_s26 = scalar_lea.vmem %s7884_s5, %s7895_s22  ;;  %s689_s14 = scalar_lea.vmem %s7885_s6, %s7895_s22  ;;  %v6077_v0 = vld [vmem:[%s7880_s1 + $0x40] sm:$0xff] (!%p4727_p10)   ;;  %v6081_v4 = vld [vmem:[%s7880_s1 + $0x48] sm:$0xff] (!%p4727_p10)   ;;  %v6085_v8 = vld [vmem:[%s7880_s1 + $0x50] sm:$0xff] (!%p4727_p10)   ;;  %vm6542_vm0 = vmmov (!%p4727_p10), 0  }
  0x5f   : > { %s4724_s15 = sshll.u32 %s7895_s22, 2  ;;  %v6078_v1 = vld [vmem:[%s7880_s1 + $0xc0] sm:$0xff] (!%p4727_p10)   ;;  %5565 = vmatprep.subr.bf16.mxu0 (!%p4727_p10), %v6077_v0  ;;  %v6082_v5 = vld [vmem:[%s7880_s1 + $0xc8] sm:$0xff] (!%p4727_p10)   ;;  %v6086_v9 = vld [vmem:[%s7880_s1 + $0xd0] sm:$0xff] (!%p4727_p10)  }
  0x60   : > { %s6781_s27 = scalar_lea.vmem %s7886_s7, %s4724_s15  ;;  %s6786_s20 = scalar_lea.vmem %s7887_s8, %s4724_s15  ;;  %v6079_v2 = vld [vmem:[%s7880_s1] sm:$0xff] (!%p4727_p10)   ;;  %5587 = vmatprep.subr.bf16.mxu1 (!%p4727_p10), %v6078_v1  ;;  %v6083_v6 = vld [vmem:[%s7880_s1 + $0x8] sm:$0xff] (!%p4727_p10)   ;;  %v6087_v10 = vld [vmem:[%s7880_s1 + $0x10] sm:$0xff] (!%p4727_p10)  }
  0x61   : > { %v6080_v3 = vld [vmem:[%s7880_s1 + $0x80] sm:$0xff] (!%p4727_p10)   ;;  %5566 = vmatpush3.bf16.msra.mxu0 (!%p4727_p10), %v6079_v2  ;;  %v6084_v7 = vld [vmem:[%s7880_s1 + $0x88] sm:$0xff] (!%p4727_p10)   ;;  %v6088_v11 = vld [vmem:[%s7880_s1 + $0x90] sm:$0xff] (!%p4727_p10)  }
  0x62   : > { %5588 = vmatpush3.bf16.msra.mxu1 (!%p4727_p10), %v6080_v3  ;;  %5567 = vmatprep.subr.bf16.mxu0 (!%p4727_p10), %v6081_v4  ;;  %v6089_v12 = vld [vmem:[%s7880_s1 + $0x58] sm:$0xff] (!%p4727_p10)   ;;  %v6093_v16 = vld [vmem:[%s7880_s1 + $0x60] sm:$0xff] (!%p4727_p10)   ;;  %v6097_v20 = vld [vmem:[%s7880_s1 + $0x68] sm:$0xff] (!%p4727_p10)  }
  0x63   : > { %5589 = vmatprep.subr.bf16.mxu1 (!%p4727_p10), %v6082_v5  ;;  %v6090_v13 = vld [vmem:[%s7880_s1 + $0xd8] sm:$0xff] (!%p4727_p10)   ;;  %v6094_v17 = vld [vmem:[%s7880_s1 + $0xe0] sm:$0xff] (!%p4727_p10)   ;;  %v6098_v21 = vld [vmem:[%s7880_s1 + $0xe8] sm:$0xff] (!%p4727_p10)  }
  0x64   : > { %v6091_v14 = vld [vmem:[%s7880_s1 + $0x18] sm:$0xff]   ;;  %v6095_v18 = vld [vmem:[%s7880_s1 + $0x20] sm:$0xff]   ;;  %v6099_v22 = vld [vmem:[%s7880_s1 + $0x28] sm:$0xff]  }
  0x65   : > { %5568 = vmatpush3.bf16.msra.mxu0 %v6083_v6  ;;  %v6092_v15 = vld [vmem:[%s7880_s1 + $0x98] sm:$0xff]   ;;  %v6096_v19 = vld [vmem:[%s7880_s1 + $0xa0] sm:$0xff]   ;;  %v6100_v23 = vld [vmem:[%s7880_s1 + $0xa8] sm:$0xff]  }
  0x66   : > { %5590 = vmatpush3.bf16.msra.mxu1 %v6084_v7  ;;  %5569 = vmatprep.subr.bf16.mxu0 %v6085_v8  ;;  %v6101_v24 = vld [vmem:[%s7880_s1 + $0x70] sm:$0xff]   ;;  %v6105_v28 = vld [vmem:[%s7880_s1 + $0x78] sm:$0xff]   ;;  %v716_v32 = vld [vmem:[%s7879_s0] sm:$0xff] }
  0x67   : > { %5591 = vmatprep.subr.bf16.mxu1 %v6086_v9  ;;  %v6102_v25 = vld [vmem:[%s7880_s1 + $0xf0] sm:$0xff]   ;;  %v6106_v29 = vld [vmem:[%s7880_s1 + $0xf8] sm:$0xff]   ;;  %v717_v33 = vld [vmem:[%s7879_s0 + $0x8] sm:$0xff]  ;;  %v4728_v34 = vcombine.low %v716_v32, %v716_v32  ;;  %v4729_v35 = vcombine.high %v716_v32, %v716_v32 }
  0x68   : > { %v6103_v26 = vld [vmem:[%s7880_s1 + $0x30] sm:$0xff]   ;;  %v6107_v30 = vld [vmem:[%s7880_s1 + $0x38] sm:$0xff]   ;;  %v4730_v36 = vcombine.low %v717_v33, %v717_v33  ;;  %v4731_v37 = vcombine.high %v717_v33, %v717_v33  ;;  %v6113_v38 = vld [vmem:[%s7880_s1 + $0x140] sm:$0xff]  }
  0x69   : > { %5570 = vmatpush3.bf16.msra.mxu0 %v6087_v10  ;;  %v6104_v27 = vld [vmem:[%s7880_s1 + $0xb0] sm:$0xff]   ;;  %v6108_v31 = vld [vmem:[%s7880_s1 + $0xb8] sm:$0xff]   ;;  %v6114_v39 = vld [vmem:[%s7880_s1 + $0x1c0] sm:$0xff]   ;;  %1361 = vmatprep.mubr.bf16.mxu0 %v4729_v35 }
  0x6a   : > { %5592 = vmatpush3.bf16.msra.mxu1 %v6088_v11  ;;  %5571 = vmatprep.subr.bf16.mxu0 %v6089_v12  ;;  %v6115_v40 = vld [vmem:[%s7880_s1 + $0x100] sm:$0xff]   ;;  %v6117_v42 = vld [vmem:[%s7880_s1 + $0x148] sm:$0xff]   ;;  %v6121_v46 = vld [vmem:[%s7880_s1 + $0x150] sm:$0xff]  }
  0x6b   : > { %5593 = vmatprep.subr.bf16.mxu1 %v6090_v13  ;;  %1401 = vmatprep.mubr.bf16.mxu1 %v4731_v37  ;;  %v6116_v41 = vld [vmem:[%s7880_s1 + $0x180] sm:$0xff]   ;;  %v6118_v43 = vld [vmem:[%s7880_s1 + $0x1c8] sm:$0xff]   ;;  %v6122_v47 = vld [vmem:[%s7880_s1 + $0x1d0] sm:$0xff]   ;;  %v6541_v13 = vmov 0.0  }
  0x6c   : > { %v6119_v44 = vld [vmem:[%s7880_s1 + $0x108] sm:$0xff]   ;;  %v6123_v48 = vld [vmem:[%s7880_s1 + $0x110] sm:$0xff]   ;;  %v6125_v50 = vld [vmem:[%s7880_s1 + $0x158] sm:$0xff]  }
  0x6d   : > { %5572 = vmatpush3.bf16.msra.mxu0 %v6091_v14  ;;  %v6120_v45 = vld [vmem:[%s7880_s1 + $0x188] sm:$0xff]   ;;  %v6124_v49 = vld [vmem:[%s7880_s1 + $0x190] sm:$0xff]   ;;  %v6126_v51 = vld [vmem:[%s7880_s1 + $0x1d8] sm:$0xff]  }
  0x6e   : > { %5594 = vmatpush3.bf16.msra.mxu1 %v6092_v15  ;;  %5573 = vmatprep.subr.bf16.mxu0 %v6093_v16  ;;  %v6127_v52 = vld [vmem:[%s7880_s1 + $0x118] sm:$0xff]   ;;  %v6129_v54 = vld [vmem:[%s7880_s1 + $0x160] sm:$0xff]   ;;  %v6133_v58 = vld [vmem:[%s7880_s1 + $0x168] sm:$0xff]  }
  0x6f   : > { %5595 = vmatprep.subr.bf16.mxu1 %v6094_v17  ;;  %v6128_v53 = vld [vmem:[%s7880_s1 + $0x198] sm:$0xff]   ;;  %v6130_v55 = vld [vmem:[%s7880_s1 + $0x1e0] sm:$0xff]   ;;  %v6134_v59 = vld [vmem:[%s7880_s1 + $0x1e8] sm:$0xff]  }
  0x70   : > { %v6131_v56 = vld [vmem:[%s7880_s1 + $0x120] sm:$0xff]   ;;  %v6135_v60 = vld [vmem:[%s7880_s1 + $0x128] sm:$0xff]   ;;  %v6137_v62 = vld [vmem:[%s7880_s1 + $0x170] sm:$0xff]  }
  0x71   : > { %5574 = vmatpush3.bf16.msra.mxu0 %v6095_v18  ;;  %v6132_v57 = vld [vmem:[%s7880_s1 + $0x1a0] sm:$0xff]   ;;  %v6136_v61 = vld [vmem:[%s7880_s1 + $0x1a8] sm:$0xff]   ;;  %v6138_v63 = vld [vmem:[%s7880_s1 + $0x1f0] sm:$0xff]  }
  0x72   : > { %5596 = vmatpush3.bf16.msra.mxu1 %v6096_v19  ;;  %5575 = vmatprep.subr.bf16.mxu0 %v6097_v20  ;;  %v6139_v0 = vld [vmem:[%s7880_s1 + $0x130] sm:$0xff]   ;;  %v6141_v2 = vld [vmem:[%s7880_s1 + $0x178] sm:$0xff]   ;;  %v6149_v12 = vld [vmem:[%s7880_s1 + $0x280] sm:$0xff]  }
  0x73   : > { %5597 = vmatprep.subr.bf16.mxu1 %v6098_v21  ;;  %v6140_v1 = vld [vmem:[%s7880_s1 + $0x1b0] sm:$0xff]   ;;  %v6142_v3 = vld [vmem:[%s7880_s1 + $0x1f8] sm:$0xff]   ;;  %v6150_v14 = vld [vmem:[%s7880_s1 + $0x200] sm:$0xff]  }
  0x74   : > { %v6143_v4 = vld [vmem:[%s7880_s1 + $0x138] sm:$0xff]   ;;  %v718_v6 = vld [vmem:[%s7879_s0 + $0x10] sm:$0xff]  ;;  %v6151_v15 = vld [vmem:[%s7880_s1 + $0x240] sm:$0xff]  }
  0x75   : > { %5576 = vmatpush3.bf16.msra.mxu0 %v6099_v22  ;;  %v6144_v5 = vld [vmem:[%s7880_s1 + $0x1b8] sm:$0xff]   ;;  %v4732_v7 = vcombine.low %v718_v6, %v718_v6  ;;  %v4733_v8 = vcombine.high %v718_v6, %v718_v6  ;;  %v6152_v16 = vld [vmem:[%s7880_s1 + $0x288] sm:$0xff]   ;;  %v6155_v19 = vld [vmem:[%s7880_s1 + $0x290] sm:$0xff]  }
  0x76   : > { %5598 = vmatpush3.bf16.msra.mxu1 %v6100_v23  ;;  %5577 = vmatprep.subr.bf16.mxu0 %v6101_v24  ;;  %v719_v9 = vld [vmem:[%s7879_s0 + $0x18] sm:$0xff]  ;;  %v6153_v17 = vld [vmem:[%s7880_s1 + $0x208] sm:$0xff]   ;;  %v6156_v20 = vld [vmem:[%s7880_s1 + $0x210] sm:$0xff]  }
  0x77   : > { %5599 = vmatprep.subr.bf16.mxu1 %v6102_v25  ;;  %v4734_v10 = vcombine.low %v719_v9, %v719_v9  ;;  %v4735_v11 = vcombine.high %v719_v9, %v719_v9  ;;  %v6154_v18 = vld [vmem:[%s7880_s1 + $0x248] sm:$0xff]   ;;  %v6157_v21 = vld [vmem:[%s7880_s1 + $0x250] sm:$0xff]   ;;  %v6158_v22 = vld [vmem:[%s7880_s1 + $0x298] sm:$0xff]  }
  0x78   : > { %v6159_v23 = vld [vmem:[%s7880_s1 + $0x218] sm:$0xff]   ;;  %v6161_v25 = vld [vmem:[%s7880_s1 + $0x2a0] sm:$0xff]   ;;  %v6168_v32 = vld [vmem:[%s7880_s1 + $0x230] sm:$0xff]  }
  0x79   : > { %5578 = vmatpush3.bf16.msra.mxu0 %v6103_v26  ;;  %v6160_v24 = vld [vmem:[%s7880_s1 + $0x258] sm:$0xff]   ;;  %v6162_v26 = vld [vmem:[%s7880_s1 + $0x220] sm:$0xff]   ;;  %v6169_v33 = vld [vmem:[%s7880_s1 + $0x270] sm:$0xff]  }
  0x7a   : > { %5600 = vmatpush3.bf16.msra.mxu1 %v6104_v27  ;;  %5579 = vmatprep.subr.bf16.mxu0 %v6105_v28  ;;  %v6163_v27 = vld [vmem:[%s7880_s1 + $0x260] sm:$0xff]   ;;  %v6164_v28 = vld [vmem:[%s7880_s1 + $0x2a8] sm:$0xff]   ;;  %v6170_v35 = vld [vmem:[%s7880_s1 + $0x2b8] sm:$0xff]  }
  0x7b   : > { %5601 = vmatprep.subr.bf16.mxu1 %v6106_v29  ;;  %v6165_v29 = vld [vmem:[%s7880_s1 + $0x228] sm:$0xff]   ;;  %v6171_v37 = vld [vmem:[%s7880_s1 + $0x238] sm:$0xff]  }
  0x7c   : > { %v1549_v6 = vld [vmem:[%s7879_s0 + $0x2c] sm:$0xff] }
  0x7d   : > { %5580 = vmatpush3.bf16.msra.mxu0 %v6107_v30  ;;  %v6166_v30 = vld [vmem:[%s7880_s1 + $0x268] sm:$0xff]   ;;  %v4958_v9 = vcombine.high %v1549_v6, %v1549_v6 }
  0x7e   : > { %5602 = vmatpush3.bf16.msra.mxu1 %v6108_v31  ;;  %5609 = vmatprep.subr.bf16.mxu0 %v6113_v38  ;;  %v6167_v31 = vld [vmem:[%s7880_s1 + $0x2b0] sm:$0xff]   ;;  %v6172_v38 = vld [vmem:[%s7880_s1 + $0x278] sm:$0xff]  }
  0x7f   : > { %5631 = vmatprep.subr.bf16.mxu1 %v6114_v39  ;;  %v6176_v39 = vld [vmem:[%s7880_s1 + $0x300] sm:$0xff]  }
  0x80   : > { %1362 = vmatmul.mubr.bf16.vlgmr.msra.gmra.mrb[0].mxu0 %v4728_v34  ;;  %v1548_v34 = vld [vmem:[%s7879_s0 + $0x24] sm:$0xff] }
  0x81   : > { %1402 = vmatmul.mubr.bf16.vlgmr.msra.gmra.mrb[0].mxu1 %v4730_v36  ;;  %5610 = vmatpush3.bf16.msra.mxu0 %v6115_v40  ;;  %v4956_v36 = vcombine.high %v1548_v34, %v1548_v34  ;;  %v6173_v40 = vld [vmem:[%s7879_s0 + $0x20] ss:$0 sps:$4 sm:$0xff]  }
  0x82   : > { %5632 = vmatpush3.bf16.msra.mxu1 %v6116_v41  ;;  %5611 = vmatprep.subr.bf16.mxu0 %v6117_v42  ;;  %v6177_v41 = vld [vmem:[%s7880_s1 + $0x380] sm:$0xff]  }
  0x83   : > { %5633 = vmatprep.subr.bf16.mxu1 %v6118_v43  ;;  %1441 = vmatprep.mubr.bf16.mxu0 %v4733_v8  ;;  %v6178_v42 = vld [vmem:[%s7880_s1 + $0x2c0] sm:$0xff]   ;;  %v4955_v43 = vcombine.low %v1548_v34, %v1548_v34  ;;  %v6205_v8 = vld [vmem:[%s7880_s1 + $0x3b8] sm:$0xff]   ;;  %v6228_v34 = vld [vmem:[%s7880_s1 + $0x3e8] sm:$0xff]  }
  0x84   : > { %1481 = vmatprep.mubr.bf16.mxu1 %v4735_v11  ;;  %v6206_v11 = vld [vmem:[%s7880_s1 + $0x2f8] sm:$0xff]  }
  0x85   : > { %5612 = vmatpush3.bf16.msra.mxu0 %v6119_v44  ;;  %v6179_v44 = vld [vmem:[%s7880_s1 + $0x340] sm:$0xff]  }
  0x86   : > { %5634 = vmatpush3.bf16.msra.mxu1 %v6120_v45  ;;  %5613 = vmatprep.subr.bf16.mxu0 %v6121_v46  ;;  %v6180_v45 = vld [vmem:[%s7880_s1 + $0x308] sm:$0xff]  }
  0x87   : > { %5635 = vmatprep.subr.bf16.mxu1 %v6122_v47  ;;  %v6181_v46 = vld [vmem:[%s7880_s1 + $0x388] sm:$0xff]  }
  0x88   : > { %v6182_v47 = vld [vmem:[%s7880_s1 + $0x2c8] sm:$0xff]  }
  0x89   : > { %5614 = vmatpush3.bf16.msra.mxu0 %v6123_v48  ;;  %v6183_v48 = vld [vmem:[%s7880_s1 + $0x348] sm:$0xff]  }
  0x8a   : > { %5636 = vmatpush3.bf16.msra.mxu1 %v6124_v49  ;;  %5615 = vmatprep.subr.bf16.mxu0 %v6125_v50  ;;  %v6184_v49 = vld [vmem:[%s7880_s1 + $0x310] sm:$0xff]  }
  0x8b   : > { %5637 = vmatprep.subr.bf16.mxu1 %v6126_v51  ;;  %v6185_v50 = vld [vmem:[%s7880_s1 + $0x390] sm:$0xff]  }
  0x8c   : > { %v6186_v51 = vld [vmem:[%s7880_s1 + $0x2d0] sm:$0xff]  }
  0x8d   : > { %5616 = vmatpush3.bf16.msra.mxu0 %v6127_v52  ;;  %v6187_v52 = vld [vmem:[%s7880_s1 + $0x350] sm:$0xff]  }
  0x8e   : > { %5638 = vmatpush3.bf16.msra.mxu1 %v6128_v53  ;;  %5617 = vmatprep.subr.bf16.mxu0 %v6129_v54  ;;  %v6188_v53 = vld [vmem:[%s7880_s1 + $0x318] sm:$0xff]  }
  0x8f   : > { %5639 = vmatprep.subr.bf16.mxu1 %v6130_v55  ;;  %v6189_v54 = vld [vmem:[%s7880_s1 + $0x398] sm:$0xff]  }
  0x90   : > { %v6190_v55 = vld [vmem:[%s7880_s1 + $0x2d8] sm:$0xff]  }
  0x91   : > { %5618 = vmatpush3.bf16.msra.mxu0 %v6131_v56  ;;  %v6191_v56 = vld [vmem:[%s7880_s1 + $0x358] sm:$0xff]  }
  0x92   : > { %5640 = vmatpush3.bf16.msra.mxu1 %v6132_v57  ;;  %5619 = vmatprep.subr.bf16.mxu0 %v6133_v58  ;;  %v6192_v57 = vld [vmem:[%s7880_s1 + $0x320] sm:$0xff]  }
  0x93   : > { %5641 = vmatprep.subr.bf16.mxu1 %v6134_v59  ;;  %v6193_v58 = vld [vmem:[%s7880_s1 + $0x3a0] sm:$0xff]  }
  0x94   : > { %v6194_v59 = vld [vmem:[%s7880_s1 + $0x2e0] sm:$0xff]  }
  0x95   : > { %5620 = vmatpush3.bf16.msra.mxu0 %v6135_v60  ;;  %v6195_v60 = vld [vmem:[%s7880_s1 + $0x360] sm:$0xff]  }
  0x96   : > { %5642 = vmatpush3.bf16.msra.mxu1 %v6136_v61  ;;  %5621 = vmatprep.subr.bf16.mxu0 %v6137_v62  ;;  %v6196_v61 = vld [vmem:[%s7880_s1 + $0x328] sm:$0xff]  }
  0x97   : > { %5643 = vmatprep.subr.bf16.mxu1 %v6138_v63  ;;  %v6197_v62 = vld [vmem:[%s7880_s1 + $0x3a8] sm:$0xff]  }
  0x98   : > { %v6198_v63 = vld [vmem:[%s7880_s1 + $0x2e8] sm:$0xff]  }
  0x99   : > { %5622 = vmatpush3.bf16.msra.mxu0 %v6139_v0  ;;  %v6199_v0 = vld [vmem:[%s7880_s1 + $0x368] sm:$0xff]  }
  0x9a   : > { %5644 = vmatpush3.bf16.msra.mxu1 %v6140_v1  ;;  %5623 = vmatprep.subr.bf16.mxu0 %v6141_v2  ;;  %v6200_v1 = vld [vmem:[%s7880_s1 + $0x330] sm:$0xff]  }
  0x9b   : > { %5645 = vmatprep.subr.bf16.mxu1 %v6142_v3  ;;  %v6201_v2 = vld [vmem:[%s7880_s1 + $0x3b0] sm:$0xff]  }
  0x9c   : > { %v6202_v3 = vld [vmem:[%s7880_s1 + $0x2f0] sm:$0xff]  }
  0x9d   : > { %5624 = vmatpush3.bf16.msra.mxu0 %v6143_v4  ;;  %v6203_v4 = vld [vmem:[%s7880_s1 + $0x370] sm:$0xff]  }
  0x9e   : > { %5646 = vmatpush3.bf16.msra.mxu1 %v6144_v5  ;;  %5953 = vmatprep.subr.bf16.mxu0 %v6541_v13  ;;  %v6204_v5 = vld [vmem:[%s7880_s1 + $0x338] sm:$0xff]  }
  0x9f   : > { %5662 = vmatprep.subr.bf16.mxu1 %v6149_v12  ;;  %v6207_v12 = vld [vmem:[%s7880_s1 + $0x378] sm:$0xff]  }
  0xa0   : > { %1442 = vmatmul.mubr.bf16.vlgmr.msra.gmra.mrb[4].mxu0 %v4732_v7  ;;  %v1550_v7 = vld [vmem:[%s7879_s0 + $0x34] sm:$0xff] }
  0xa1   : > { %1482 = vmatmul.mubr.bf16.vlgmr.msra.gmra.mrb[4].mxu1 %v4734_v10  ;;  %5954 = vmatpush3.bf16.msra.mxu0 %v6150_v14  ;;  %v4960_v10 = vcombine.high %v1550_v7, %v1550_v7  ;;  %v6212_v14 = vld [vmem:[%s7880_s1 + $0x400] sm:$0xff]  }
  0xa2   : > { %5663 = vmatpush3.bf16.msra.mxu1 %v6151_v15  ;;  %5955 = vmatprep.subr.bf16.mxu0 %v6541_v13  ;;  %v4957_v15 = vcombine.low %v1549_v6, %v1549_v6 }
  0xa3   : > { %5664 = vmatprep.subr.bf16.mxu1 %v6152_v16  ;;  %5969 = vmatprep.mubr.msk.bf16.mxu0 %vm6542_vm0, %v6541_v13  ;;  %v4959_v16 = vcombine.low %v1550_v7, %v1550_v7 }
  0xa4   : > { %2194 = vmatprep.mubr.bf16.mxu1 %v4956_v36  ;;  %v6230_v36 = vld [vmem:[%s7880_s1 + $0x430] sm:$0xff]  }
  0xa5   : > { %5956 = vmatpush3.bf16.msra.mxu0 %v6153_v17  ;;  %v6213_v17 = vld [vmem:[%s7880_s1 + $0x3c0] sm:$0xff]  }
  0xa6   : > { %5665 = vmatpush3.bf16.msra.mxu1 %v6154_v18  ;;  %5957 = vmatprep.subr.bf16.mxu0 %v6541_v13  ;;  %v6214_v18 = vld [vmem:[%s7880_s1 + $0x440] sm:$0xff]  }
  0xa7   : > { %5666 = vmatprep.subr.bf16.mxu1 %v6155_v19  ;;  %v6215_v19 = vld [vmem:[%s7880_s1 + $0x408] sm:$0xff]  }
  0xa9   : > { %5958 = vmatpush3.bf16.msra.mxu0 %v6156_v20  ;;  %v6216_v20 = vld [vmem:[%s7880_s1 + $0x3c8] sm:$0xff]  }
  0xaa   : > { %5667 = vmatpush3.bf16.msra.mxu1 %v6157_v21  ;;  %5959 = vmatprep.subr.bf16.mxu0 %v6541_v13  ;;  %v6217_v21 = vld [vmem:[%s7880_s1 + $0x448] sm:$0xff]  }
  0xab   : > { %5668 = vmatprep.subr.bf16.mxu1 %v6158_v22  ;;  %v6218_v22 = vld [vmem:[%s7880_s1 + $0x410] sm:$0xff]  }
  0xad   : > { %5960 = vmatpush3.bf16.msra.mxu0 %v6159_v23  ;;  %v6219_v23 = vld [vmem:[%s7880_s1 + $0x3d0] sm:$0xff]  }
  0xae   : > { %5669 = vmatpush3.bf16.msra.mxu1 %v6160_v24  ;;  %5961 = vmatprep.subr.bf16.mxu0 %v6541_v13  ;;  %v6220_v24 = vld [vmem:[%s7880_s1 + $0x450] sm:$0xff]  }
  0xaf   : > { %5670 = vmatprep.subr.bf16.mxu1 %v6161_v25  ;;  %v6221_v25 = vld [vmem:[%s7880_s1 + $0x418] sm:$0xff]  }
  0xb1   : > { %5962 = vmatpush3.bf16.msra.mxu0 %v6162_v26  ;;  %v6222_v26 = vld [vmem:[%s7880_s1 + $0x3d8] sm:$0xff]  }
  0xb2   : > { %5671 = vmatpush3.bf16.msra.mxu1 %v6163_v27  ;;  %5963 = vmatprep.subr.bf16.mxu0 %v6541_v13  ;;  %v6223_v27 = vld [vmem:[%s7880_s1 + $0x458] sm:$0xff]  }
  0xb3   : > { %5672 = vmatprep.subr.bf16.mxu1 %v6164_v28  ;;  %v6224_v28 = vld [vmem:[%s7880_s1 + $0x420] sm:$0xff]  }
  0xb5   : > { %5964 = vmatpush3.bf16.msra.mxu0 %v6165_v29  ;;  %v6225_v29 = vld [vmem:[%s7880_s1 + $0x3e0] sm:$0xff]  }
  0xb6   : > { %5673 = vmatpush3.bf16.msra.mxu1 %v6166_v30  ;;  %5965 = vmatprep.subr.bf16.mxu0 %v6541_v13  ;;  %v6226_v30 = vld [vmem:[%s7880_s1 + $0x460] sm:$0xff]  }
  0xb7   : > { %5674 = vmatprep.subr.bf16.mxu1 %v6167_v31  ;;  %v6227_v31 = vld [vmem:[%s7880_s1 + $0x428] sm:$0xff]  }
  0xb9   : > { %5966 = vmatpush3.bf16.msra.mxu0 %v6168_v32  ;;  %v1551_v32 = vld [vmem:[%s7879_s0 + $0x3c] sm:$0xff] }
  0xba   : > { %5675 = vmatpush3.bf16.msra.mxu1 %v6169_v33  ;;  %5967 = vmatprep.subr.bf16.mxu0 %v6541_v13  ;;  %v4962_v33 = vcombine.high %v1551_v32, %v1551_v32 }
  0xbb   : > { %5676 = vmatprep.subr.bf16.mxu1 %v6170_v35  ;;  %v6229_v35 = vld [vmem:[%s7880_s1 + $0x468] sm:$0xff]  }
  0xbd   : > { %5968 = vmatpush3.bf16.msra.mxu0 %v6171_v37  ;;  %v6231_v37 = vld [vmem:[%s7880_s1 + $0x3f0] sm:$0xff]  }
  0xbe   : > { %5677 = vmatpush3.bf16.msra.mxu1 %v6172_v38  ;;  %5684 = vmatprep.subr.bf16.mxu0 %v6176_v39  ;;  %v6232_v38 = vld [vmem:[%s7880_s1 + $0x470] sm:$0xff]   ;;  %v6233_v39 = vld [vmem:[%s7880_s1 + $0x438] sm:$0xff]  }
  0xbf   : > { %5706 = vmatprep.subr.bf16.mxu1 %v6177_v41  ;;  %v6235_v41 = vld [vmem:[%s7880_s1 + $0x478] sm:$0xff]  }
  0xc0   : > { %5970 = vmatmul.mubr.bf16.vlgmr.msra.gmra.mrb[8].mxu0 %v6173_v40  ;;  %v6234_v40 = vld [vmem:[%s7880_s1 + $0x3f8] sm:$0xff]  }
  0xc1   : > { %2195 = vmatmul.mubr.bf16.vlgmr.msra.gmra.mrb[8].mxu1 %v4955_v43  ;;  %5685 = vmatpush3.bf16.msra.mxu0 %v6178_v42  ;;  %v6238_v42 = vld [vmem:[%s7880_s1 + $0x4c0] sm:$0xff]  }
  0xc2   : > { %5707 = vmatpush3.bf16.msra.mxu1 %v6179_v44  ;;  %5686 = vmatprep.subr.bf16.mxu0 %v6180_v45  ;;  %v6239_v43 = vld [vmem:[%s7880_s1 + $0x540] sm:$0xff]  }
  0xc3   : > { %5708 = vmatprep.subr.bf16.mxu1 %v6181_v46  ;;  %2234 = vmatprep.mubr.bf16.mxu0 %v4958_v9  ;;  %v6240_v44 = vld [vmem:[%s7879_s0 + $0x44] ss:$0 sps:$4 sm:$0xff]   ;;  %v4961_v46 = vcombine.low %v1551_v32, %v1551_v32  ;;  %v6264_v9 = vld [vmem:[%s7880_s1 + $0x570] sm:$0xff]   ;;  %v6289_v32 = vld [vmem:[%s7880_s1 + $0x658] sm:$0xff]  }
  0xc4   : > { %2274 = vmatprep.mubr.bf16.mxu1 %v4960_v10  ;;  %v6241_v45 = vld [vmem:[%s7880_s1 + $0x480] sm:$0xff]   ;;  %v6265_v10 = vld [vmem:[%s7880_s1 + $0x4b0] sm:$0xff]  }
  0xc5   : > { %5687 = vmatpush3.bf16.msra.mxu0 %v6182_v47  ;;  %v6242_v47 = vld [vmem:[%s7880_s1 + $0x500] sm:$0xff]  }
  0xc6   : > { %5709 = vmatpush3.bf16.msra.mxu1 %v6183_v48  ;;  %5688 = vmatprep.subr.bf16.mxu0 %v6184_v49  ;;  %v6243_v48 = vld [vmem:[%s7880_s1 + $0x4c8] sm:$0xff]  }
  0xc7   : > { %5710 = vmatprep.subr.bf16.mxu1 %v6185_v50  ;;  %v6244_v49 = vld [vmem:[%s7880_s1 + $0x548] sm:$0xff]  }
  0xc8   : > { %v6245_v50 = vld [vmem:[%s7880_s1 + $0x488] sm:$0xff]  }
  0xc9   : > { %5689 = vmatpush3.bf16.msra.mxu0 %v6186_v51  ;;  %v6246_v51 = vld [vmem:[%s7880_s1 + $0x508] sm:$0xff]  }
  0xca   : > { %5711 = vmatpush3.bf16.msra.mxu1 %v6187_v52  ;;  %5690 = vmatprep.subr.bf16.mxu0 %v6188_v53  ;;  %v6247_v52 = vld [vmem:[%s7880_s1 + $0x4d0] sm:$0xff]  }
  0xcb   : > { %5712 = vmatprep.subr.bf16.mxu1 %v6189_v54  ;;  %v6248_v53 = vld [vmem:[%s7880_s1 + $0x550] sm:$0xff]  }
  0xcc   : > { %v6249_v54 = vld [vmem:[%s7880_s1 + $0x490] sm:$0xff]  }
  0xcd   : > { %5691 = vmatpush3.bf16.msra.mxu0 %v6190_v55  ;;  %v6250_v55 = vld [vmem:[%s7880_s1 + $0x510] sm:$0xff]  }
  0xce   : > { %5713 = vmatpush3.bf16.msra.mxu1 %v6191_v56  ;;  %5692 = vmatprep.subr.bf16.mxu0 %v6192_v57  ;;  %v6251_v56 = vld [vmem:[%s7880_s1 + $0x4d8] sm:$0xff]  }
  0xcf   : > { %5714 = vmatprep.subr.bf16.mxu1 %v6193_v58  ;;  %v6252_v57 = vld [vmem:[%s7880_s1 + $0x558] sm:$0xff]  }
  0xd0   : > { %v6253_v58 = vld [vmem:[%s7880_s1 + $0x498] sm:$0xff]  }
  0xd1   : > { %5693 = vmatpush3.bf16.msra.mxu0 %v6194_v59  ;;  %v6254_v59 = vld [vmem:[%s7880_s1 + $0x518] sm:$0xff]  }
  0xd2   : > { %5715 = vmatpush3.bf16.msra.mxu1 %v6195_v60  ;;  %5694 = vmatprep.subr.bf16.mxu0 %v6196_v61  ;;  %v6255_v60 = vld [vmem:[%s7880_s1 + $0x4e0] sm:$0xff]  }
  0xd3   : > { %5716 = vmatprep.subr.bf16.mxu1 %v6197_v62  ;;  %v6256_v61 = vld [vmem:[%s7880_s1 + $0x560] sm:$0xff]  }
  0xd4   : > { %v6257_v62 = vld [vmem:[%s7880_s1 + $0x4a0] sm:$0xff]  }
  0xd5   : > { %5695 = vmatpush3.bf16.msra.mxu0 %v6198_v63  ;;  %v6258_v63 = vld [vmem:[%s7880_s1 + $0x520] sm:$0xff]  }
  0xd6   : > { %5717 = vmatpush3.bf16.msra.mxu1 %v6199_v0  ;;  %5696 = vmatprep.subr.bf16.mxu0 %v6200_v1  ;;  %v6259_v0 = vld [vmem:[%s7880_s1 + $0x4e8] sm:$0xff]  }
  0xd7   : > { %5718 = vmatprep.subr.bf16.mxu1 %v6201_v2  ;;  %v6260_v1 = vld [vmem:[%s7880_s1 + $0x568] sm:$0xff]  }
  0xd8   : > { %v6261_v2 = vld [vmem:[%s7880_s1 + $0x4a8] sm:$0xff]  }
  0xd9   : > { %5697 = vmatpush3.bf16.msra.mxu0 %v6202_v3  ;;  %v2381_v3 = vld [vmem:[%s7879_s0 + $0x48] sm:$0xff] }
  0xda   : > { %5719 = vmatpush3.bf16.msra.mxu1 %v6203_v4  ;;  %5698 = vmatprep.subr.bf16.mxu0 %v6204_v5  ;;  %v2382_v4 = vld [vmem:[%s7879_s0 + $0x50] sm:$0xff]  ;;  %v6262_v5 = vld [vmem:[%s7880_s1 + $0x528] sm:$0xff]   ;;  %v5183_v6 = vcombine.high %v2381_v3, %v2381_v3 }
  0xdb   : > { %5720 = vmatprep.subr.bf16.mxu1 %v6205_v8  ;;  %v5185_v7 = vcombine.high %v2382_v4, %v2382_v4  ;;  %v6263_v8 = vld [vmem:[%s7880_s1 + $0x4f0] sm:$0xff]  }
  0xdd   : > { %5699 = vmatpush3.bf16.msra.mxu0 %v6206_v11  ;;  %v6266_v11 = vld [vmem:[%s7880_s1 + $0x530] sm:$0xff]  }
  0xde   : > { %5721 = vmatpush3.bf16.msra.mxu1 %v6207_v12  ;;  %5728 = vmatprep.subr.bf16.mxu0 %v6212_v14  ;;  %v6267_v12 = vld [vmem:[%s7880_s1 + $0x4f8] sm:$0xff]  }
  0xdf   : > { %5973 = vmatprep.subr.bf16.mxu1 %v6541_v13  ;;  %v6268_v14 = vld [vmem:[%s7880_s1 + $0x578] sm:$0xff]  }
  0xe0   : > { %2235 = vmatmul.mubr.bf16.vlgmr.msra.gmra.mrb[12].mxu0 %v4957_v15  ;;  %v6269_v15 = vld [vmem:[%s7880_s1 + $0x4b8] sm:$0xff]  }
  0xe1   : > { %2275 = vmatmul.mubr.bf16.vlgmr.msra.gmra.mrb[12].mxu1 %v4959_v16  ;;  %5729 = vmatpush3.bf16.msra.mxu0 %v6213_v17  ;;  %v6270_v16 = vld [vmem:[%s7880_s1 + $0x538] sm:$0xff]   ;;  %v6275_v17 = vld [vmem:[%s7880_s1 + $0x5c0] sm:$0xff]  }
  0xe2   : > { %5974 = vmatpush3.bf16.msra.mxu1 %v6214_v18  ;;  %5730 = vmatprep.subr.bf16.mxu0 %v6215_v19  ;;  %v6277_v18 = vld [vmem:[%s7880_s1 + $0x640] sm:$0xff]  }
  0xe3   : > { %5975 = vmatprep.subr.bf16.mxu1 %v6541_v13  ;;  %5989 = vmatprep.mubr.msk.bf16.mxu1 %vm6542_vm0, %v6541_v13  ;;  %v6276_v19 = vld [vmem:[%s7880_s1 + $0x580] sm:$0xff]  }
  0xe4   : > { %2314 = vmatprep.mubr.bf16.mxu0 %v4962_v33  ;;  %v6288_v33 = vld [vmem:[%s7880_s1 + $0x598] sm:$0xff]  }
  0xe5   : > { %5731 = vmatpush3.bf16.msra.mxu0 %v6216_v20  ;;  %v5182_v20 = vcombine.low %v2381_v3, %v2381_v3  ;;  %v6320_v3 = vld [vmem:[%s7880_s1 + $0x698] sm:$0xff]  }
  0xe6   : > { %5976 = vmatpush3.bf16.msra.mxu1 %v6217_v21  ;;  %5732 = vmatprep.subr.bf16.mxu0 %v6218_v22  ;;  %v5184_v21 = vcombine.low %v2382_v4, %v2382_v4  ;;  %v6278_v22 = vld [vmem:[%s7880_s1 + $0x600] sm:$0xff]   ;;  %v6322_v4 = vld [vmem:[%s7880_s1 + $0x6d8] sm:$0xff]  }
  0xe7   : > { %5977 = vmatprep.subr.bf16.mxu1 %v6541_v13 }
  0xe9   : > { %5733 = vmatpush3.bf16.msra.mxu0 %v6219_v23  ;;  %v6279_v23 = vld [vmem:[%s7880_s1 + $0x5c8] sm:$0xff]  }
  0xea   : > { %5978 = vmatpush3.bf16.msra.mxu1 %v6220_v24  ;;  %5734 = vmatprep.subr.bf16.mxu0 %v6221_v25  ;;  %v6281_v24 = vld [vmem:[%s7880_s1 + $0x648] sm:$0xff]  }
  0xeb   : > { %5979 = vmatprep.subr.bf16.mxu1 %v6541_v13  ;;  %v6280_v25 = vld [vmem:[%s7880_s1 + $0x588] sm:$0xff]  }
  0xed   : > { %5735 = vmatpush3.bf16.msra.mxu0 %v6222_v26  ;;  %v6282_v26 = vld [vmem:[%s7880_s1 + $0x608] sm:$0xff]  }
  0xee   : > { %5980 = vmatpush3.bf16.msra.mxu1 %v6223_v27  ;;  %5736 = vmatprep.subr.bf16.mxu0 %v6224_v28  ;;  %v6283_v27 = vld [vmem:[%s7880_s1 + $0x5d0] sm:$0xff]  }
  0xef   : > { %5981 = vmatprep.subr.bf16.mxu1 %v6541_v13  ;;  %v6285_v28 = vld [vmem:[%s7880_s1 + $0x650] sm:$0xff]  }
  0xf1   : > { %5737 = vmatpush3.bf16.msra.mxu0 %v6225_v29  ;;  %v6284_v29 = vld [vmem:[%s7880_s1 + $0x590] sm:$0xff]  }
  0xf2   : > { %5982 = vmatpush3.bf16.msra.mxu1 %v6226_v30  ;;  %5738 = vmatprep.subr.bf16.mxu0 %v6227_v31  ;;  %v6286_v30 = vld [vmem:[%s7880_s1 + $0x610] sm:$0xff]   ;;  %v6287_v31 = vld [vmem:[%s7880_s1 + $0x5d8] sm:$0xff]  }
  0xf3   : > { %5983 = vmatprep.subr.bf16.mxu1 %v6541_v13 }
  0xf5   : > { %5739 = vmatpush3.bf16.msra.mxu0 %v6228_v34  ;;  %v6290_v34 = vld [vmem:[%s7880_s1 + $0x618] sm:$0xff]  }
  0xf6   : > { %5984 = vmatpush3.bf16.msra.mxu1 %v6229_v35  ;;  %5740 = vmatprep.subr.bf16.mxu0 %v6230_v36  ;;  %v6291_v35 = vld [vmem:[%s7880_s1 + $0x5e0] sm:$0xff]  }
  0xf7   : > { %5985 = vmatprep.subr.bf16.mxu1 %v6541_v13  ;;  %v6293_v36 = vld [vmem:[%s7880_s1 + $0x660] sm:$0xff]  }
  0xf9   : > { %5741 = vmatpush3.bf16.msra.mxu0 %v6231_v37  ;;  %v6292_v37 = vld [vmem:[%s7880_s1 + $0x5a0] sm:$0xff]  }
  0xfa   : > { %5986 = vmatpush3.bf16.msra.mxu1 %v6232_v38  ;;  %5742 = vmatprep.subr.bf16.mxu0 %v6233_v39  ;;  %v6294_v38 = vld [vmem:[%s7880_s1 + $0x620] sm:$0xff]   ;;  %v6295_v39 = vld [vmem:[%s7880_s1 + $0x5e8] sm:$0xff]  }
  0xfb   : > { %5987 = vmatprep.subr.bf16.mxu1 %v6541_v13 }
  0xfd   : > { %5743 = vmatpush3.bf16.msra.mxu0 %v6234_v40  ;;  %v6297_v40 = vld [vmem:[%s7880_s1 + $0x668] sm:$0xff]  }
  0xfe   : > { %5988 = vmatpush3.bf16.msra.mxu1 %v6235_v41  ;;  %5759 = vmatprep.subr.bf16.mxu0 %v6238_v42  ;;  %v2383_v41 = vld [vmem:[%s7879_s0 + $0x58] sm:$0xff]  ;;  %v6296_v42 = vld [vmem:[%s7880_s1 + $0x5a8] sm:$0xff]  }
  0xff   : > { %5781 = vmatprep.subr.bf16.mxu1 %v6239_v43  ;;  %v6298_v43 = vld [vmem:[%s7880_s1 + $0x628] sm:$0xff]  }
 0x100   : > { %2315 = vmatmul.mubr.bf16.vlgmr.msra.gmra.mrb[16].mxu0 %v4961_v46  ;;  %v6299_v46 = vld [vmem:[%s7880_s1 + $0x5f0] sm:$0xff]  }
 0x101   : > { %5990 = vmatmul.mubr.bf16.vlgmr.msra.gmra.mrb[16].mxu1 %v6240_v44  ;;  %5760 = vmatpush3.bf16.msra.mxu0 %v6241_v45  ;;  %v5187_v44 = vcombine.high %v2383_v41, %v2383_v41  ;;  %v2384_v45 = vld [vmem:[%s7879_s0 + $0x60] sm:$0xff] }
 0x102   : > { %5782 = vmatpush3.bf16.msra.mxu1 %v6242_v47  ;;  %5761 = vmatprep.subr.bf16.mxu0 %v6243_v48  ;;  %v5189_v47 = vcombine.high %v2384_v45, %v2384_v45  ;;  %v6301_v48 = vld [vmem:[%s7880_s1 + $0x670] sm:$0xff]  }
 0x103   : > { %5783 = vmatprep.subr.bf16.mxu1 %v6244_v49  ;;  %3027 = vmatprep.mubr.bf16.mxu0 %v5183_v6  ;;  %v6300_v49 = vld [vmem:[%s7880_s1 + $0x5b0] sm:$0xff]  }
 0x104   : > { %3067 = vmatprep.mubr.bf16.mxu1 %v5185_v7  ;;  %v3214_v6 = vld [vmem:[%s7879_s0 + $0x6c] sm:$0xff]  ;;  %v6323_v7 = vld [vmem:[%s7880_s1 + $0x6a0] sm:$0xff]  }
 0x105   : > { %5762 = vmatpush3.bf16.msra.mxu0 %v6245_v50  ;;  %v6302_v50 = vld [vmem:[%s7880_s1 + $0x630] sm:$0xff]  }
 0x106   : > { %5784 = vmatpush3.bf16.msra.mxu1 %v6246_v51  ;;  %5763 = vmatprep.subr.bf16.mxu0 %v6247_v52  ;;  %v6303_v51 = vld [vmem:[%s7880_s1 + $0x5f8] sm:$0xff]  }
 0x107   : > { %5785 = vmatprep.subr.bf16.mxu1 %v6248_v53  ;;  %v6305_v52 = vld [vmem:[%s7880_s1 + $0x678] sm:$0xff]  }
 0x108   : > { %v6304_v53 = vld [vmem:[%s7880_s1 + $0x5b8] sm:$0xff]  }
 0x109   : > { %5764 = vmatpush3.bf16.msra.mxu0 %v6249_v54  ;;  %v6308_v54 = vld [vmem:[%s7880_s1 + $0x638] sm:$0xff]  }
 0x10a   : > { %5786 = vmatpush3.bf16.msra.mxu1 %v6250_v55  ;;  %5765 = vmatprep.subr.bf16.mxu0 %v6251_v56  ;;  %v6312_v55 = vld [vmem:[%s7880_s1 + $0x700] sm:$0xff]   ;;  %v5186_v56 = vcombine.low %v2383_v41, %v2383_v41  ;;  %v6346_v41 = vld [vmem:[%s7880_s1 + $0x790] sm:$0xff]  }
 0x10b   : > { %5787 = vmatprep.subr.bf16.mxu1 %v6252_v57  ;;  %v5188_v57 = vcombine.low %v2384_v45, %v2384_v45  ;;  %v6350_v45 = vld [vmem:[%s7880_s1 + $0x798] sm:$0xff]  }
 0x10d   : > { %5766 = vmatpush3.bf16.msra.mxu0 %v6253_v58  ;;  %v6311_v58 = vld [vmem:[%s7880_s1 + $0x680] sm:$0xff]  }
 0x10e   : > { %5788 = vmatpush3.bf16.msra.mxu1 %v6254_v59  ;;  %5767 = vmatprep.subr.bf16.mxu0 %v6255_v60  ;;  %v6313_v59 = vld [vmem:[%s7880_s1 + $0x6c0] sm:$0xff]   ;;  %v6315_v60 = vld [vmem:[%s7880_s1 + $0x708] sm:$0xff]  }
 0x10f   : > { %5789 = vmatprep.subr.bf16.mxu1 %v6256_v61  ;;  %v6314_v61 = vld [vmem:[%s7880_s1 + $0x688] sm:$0xff]  }
 0x111   : > { %5768 = vmatpush3.bf16.msra.mxu0 %v6257_v62  ;;  %v6316_v62 = vld [vmem:[%s7880_s1 + $0x6c8] sm:$0xff]  }
 0x112   : > { %5790 = vmatpush3.bf16.msra.mxu1 %v6258_v63  ;;  %5769 = vmatprep.subr.bf16.mxu0 %v6259_v0  ;;  %v6318_v63 = vld [vmem:[%s7880_s1 + $0x710] sm:$0xff]  }
 0x113   : > { %5791 = vmatprep.subr.bf16.mxu1 %v6260_v1  ;;  %v6317_v0 = vld [vmem:[%s7880_s1 + $0x690] sm:$0xff]  }
 0x114   : > { %v6319_v1 = vld [vmem:[%s7880_s1 + $0x6d0] sm:$0xff]  }
 0x115   : > { %5770 = vmatpush3.bf16.msra.mxu0 %v6261_v2  ;;  %v6321_v2 = vld [vmem:[%s7880_s1 + $0x718] sm:$0xff]  }
 0x116   : > { %5792 = vmatpush3.bf16.msra.mxu1 %v6262_v5  ;;  %5771 = vmatprep.subr.bf16.mxu0 %v6263_v8  ;;  %v6324_v5 = vld [vmem:[%s7880_s1 + $0x720] sm:$0xff]   ;;  %v5410_v8 = vcombine.high %v3214_v6, %v3214_v6 }
 0x117   : > { %5793 = vmatprep.subr.bf16.mxu1 %v6264_v9  ;;  %v6325_v9 = vld [vmem:[%s7880_s1 + $0x6e0] sm:$0xff]  }
 0x119   : > { %5772 = vmatpush3.bf16.msra.mxu0 %v6265_v10  ;;  %v6327_v10 = vld [vmem:[%s7880_s1 + $0x728] sm:$0xff]  }
 0x11a   : > { %5794 = vmatpush3.bf16.msra.mxu1 %v6266_v11  ;;  %5773 = vmatprep.subr.bf16.mxu0 %v6267_v12  ;;  %v6326_v11 = vld [vmem:[%s7880_s1 + $0x6a8] sm:$0xff]  }
 0x11b   : > { %5795 = vmatprep.subr.bf16.mxu1 %v6268_v14  ;;  %v6328_v12 = vld [vmem:[%s7880_s1 + $0x6e8] sm:$0xff]  }
 0x11d   : > { %5774 = vmatpush3.bf16.msra.mxu0 %v6269_v15 }
 0x11e   : > { %5796 = vmatpush3.bf16.msra.mxu1 %v6270_v16  ;;  %5803 = vmatprep.subr.bf16.mxu0 %v6275_v17  ;;  %v6330_v16 = vld [vmem:[%s7880_s1 + $0x730] sm:$0xff]  }
 0x11f   : > { %5825 = vmatprep.subr.bf16.mxu1 %v6277_v18 }
 0x120   : > { %3028 = vmatmul.mubr.bf16.vlgmr.msra.gmra.mrb[20].mxu0 %v5182_v20 }
 0x121   : > { %3068 = vmatmul.mubr.bf16.vlgmr.msra.gmra.mrb[20].mxu1 %v5184_v21  ;;  %5804 = vmatpush3.bf16.msra.mxu0 %v6276_v19 }
 0x122   : > { %5826 = vmatpush3.bf16.msra.mxu1 %v6278_v22  ;;  %5805 = vmatprep.subr.bf16.mxu0 %v6279_v23  ;;  %v6329_v23 = vld [vmem:[%s7880_s1 + $0x6b0] sm:$0xff]  }
 0x123   : > { %5827 = vmatprep.subr.bf16.mxu1 %v6281_v24  ;;  %3107 = vmatprep.mubr.bf16.mxu0 %v5187_v44  ;;  %v6331_v24 = vld [vmem:[%s7880_s1 + $0x6f0] sm:$0xff]  }
 0x124   : > { %3147 = vmatprep.mubr.bf16.mxu1 %v5189_v47  ;;  %v6349_v44 = vld [vmem:[%s7880_s1 + $0x7d0] sm:$0xff]   ;;  %v6351_v47 = vld [vmem:[%s7880_s1 + $0x758] sm:$0xff]  }
 0x125   : > { %5806 = vmatpush3.bf16.msra.mxu0 %v6280_v25 }
 0x126   : > { %5828 = vmatpush3.bf16.msra.mxu1 %v6282_v26  ;;  %5807 = vmatprep.subr.bf16.mxu0 %v6283_v27 }
 0x127   : > { %5829 = vmatprep.subr.bf16.mxu1 %v6285_v28  ;;  %v6333_v28 = vld [vmem:[%s7880_s1 + $0x738] sm:$0xff]  }
 0x129   : > { %5808 = vmatpush3.bf16.msra.mxu0 %v6284_v29  ;;  %v6332_v29 = vld [vmem:[%s7880_s1 + $0x6b8] sm:$0xff]  }
 0x12a   : > { %5830 = vmatpush3.bf16.msra.mxu1 %v6286_v30  ;;  %5809 = vmatprep.subr.bf16.mxu0 %v6287_v31  ;;  %v6334_v30 = vld [vmem:[%s7880_s1 + $0x6f8] sm:$0xff]   ;;  %v6336_v31 = vld [vmem:[%s7880_s1 + $0x780] sm:$0xff]  }
 0x12b   : > { %5831 = vmatprep.subr.bf16.mxu1 %v6289_v32  ;;  %v6335_v32 = vld [vmem:[%s7879_s0 + $0x68] ss:$0 sps:$4 sm:$0xff]  }
 0x12d   : > { %5810 = vmatpush3.bf16.msra.mxu0 %v6288_v33  ;;  %v6340_v33 = vld [vmem:[%s7880_s1 + $0x800] sm:$0xff]  }
 0x12e   : > { %5832 = vmatpush3.bf16.msra.mxu1 %v6290_v34  ;;  %5811 = vmatprep.subr.bf16.mxu0 %v6291_v35  ;;  %v6337_v34 = vld [vmem:[%s7880_s1 + $0x740] sm:$0xff]   ;;  %v5409_v35 = vcombine.low %v3214_v6, %v3214_v6 }
 0x12f   : > { %5833 = vmatprep.subr.bf16.mxu1 %v6293_v36  ;;  %v6341_v36 = vld [vmem:[%s7880_s1 + $0x7c0] sm:$0xff]  }
 0x131   : > { %5812 = vmatpush3.bf16.msra.mxu0 %v6292_v37  ;;  %v6342_v37 = vld [vmem:[%s7880_s1 + $0x788] sm:$0xff]  }
 0x132   : > { %5834 = vmatpush3.bf16.msra.mxu1 %v6294_v38  ;;  %5813 = vmatprep.subr.bf16.mxu0 %v6295_v39  ;;  %v6344_v38 = vld [vmem:[%s7880_s1 + $0x808] sm:$0xff]  }
 0x133   : > { %5835 = vmatprep.subr.bf16.mxu1 %v6297_v40  ;;  %v6343_v39 = vld [vmem:[%s7880_s1 + $0x748] sm:$0xff]  }
 0x134   : > { %v6345_v40 = vld [vmem:[%s7880_s1 + $0x7c8] sm:$0xff]  }
 0x135   : > { %5814 = vmatpush3.bf16.msra.mxu0 %v6296_v42  ;;  %v6348_v42 = vld [vmem:[%s7880_s1 + $0x810] sm:$0xff]  }
 0x136   : > { %5836 = vmatpush3.bf16.msra.mxu1 %v6298_v43  ;;  %5815 = vmatprep.subr.bf16.mxu0 %v6299_v46  ;;  %v6347_v43 = vld [vmem:[%s7880_s1 + $0x750] sm:$0xff]   ;;  %v6352_v46 = vld [vmem:[%s7880_s1 + $0x818] sm:$0xff]  }
 0x137   : > { %5837 = vmatprep.subr.bf16.mxu1 %v6301_v48  ;;  %v6353_v48 = vld [vmem:[%s7880_s1 + $0x7d8] sm:$0xff]  }
 0x139   : > { %5816 = vmatpush3.bf16.msra.mxu0 %v6300_v49  ;;  %v6354_v49 = vld [vmem:[%s7880_s1 + $0x7a0] sm:$0xff]  }
 0x13a   : > { %5838 = vmatpush3.bf16.msra.mxu1 %v6302_v50  ;;  %5817 = vmatprep.subr.bf16.mxu0 %v6303_v51  ;;  %v3215_v50 = vld [vmem:[%s7879_s0 + $0x74] sm:$0xff]  ;;  %v6356_v51 = vld [vmem:[%s7880_s1 + $0x820] sm:$0xff]  }
 0x13b   : > { %5839 = vmatprep.subr.bf16.mxu1 %v6305_v52  ;;  %v5412_v52 = vcombine.high %v3215_v50, %v3215_v50 }
 0x13d   : > { %5818 = vmatpush3.bf16.msra.mxu0 %v6304_v53  ;;  %v6355_v53 = vld [vmem:[%s7880_s1 + $0x760] sm:$0xff]  }
 0x13e   : > { %5840 = vmatpush3.bf16.msra.mxu1 %v6308_v54  ;;  %5993 = vmatprep.subr.bf16.mxu0 %v6541_v13  ;;  %v3216_v54 = vld [vmem:[%s7879_s0 + $0x7c] sm:$0xff] }
 0x13f   : > { %5856 = vmatprep.subr.bf16.mxu1 %v6312_v55  ;;  %v6357_v55 = vld [vmem:[%s7880_s1 + $0x7e0] sm:$0xff]  }
 0x140   : > { %3108 = vmatmul.mubr.bf16.vlgmr.msra.gmra.mrb[24].mxu0 %v5186_v56  ;;  %v5414_v56 = vcombine.high %v3216_v54, %v3216_v54 }
 0x141   : > { %3148 = vmatmul.mubr.bf16.vlgmr.msra.gmra.mrb[24].mxu1 %v5188_v57  ;;  %5994 = vmatpush3.bf16.msra.mxu0 %v6311_v58  ;;  %v6358_v57 = vld [vmem:[%s7880_s1 + $0x7a8] sm:$0xff]  }
 0x142   : > { %5857 = vmatpush3.bf16.msra.mxu1 %v6313_v59  ;;  %5995 = vmatprep.subr.bf16.mxu0 %v6541_v13  ;;  %v6360_v58 = vld [vmem:[%s7880_s1 + $0x828] sm:$0xff]  }
 0x143   : > { %5858 = vmatprep.subr.bf16.mxu1 %v6315_v60  ;;  %6009 = vmatprep.mubr.msk.bf16.mxu0 %vm6542_vm0, %v6541_v13  ;;  %v6359_v59 = vld [vmem:[%s7880_s1 + $0x768] sm:$0xff]  }
 0x144   : > { %3860 = vmatprep.mubr.bf16.mxu1 %v5410_v8  ;;  %v6361_v60 = vld [vmem:[%s7880_s1 + $0x7e8] sm:$0xff]  }
 0x145   : > { %5996 = vmatpush3.bf16.msra.mxu0 %v6314_v61  ;;  %v6362_v61 = vld [vmem:[%s7880_s1 + $0x7b0] sm:$0xff]  }
 0x146   : > { %5859 = vmatpush3.bf16.msra.mxu1 %v6316_v62  ;;  %5997 = vmatprep.subr.bf16.mxu0 %v6541_v13  ;;  %v6364_v62 = vld [vmem:[%s7880_s1 + $0x830] sm:$0xff]  }
 0x147   : > { %5860 = vmatprep.subr.bf16.mxu1 %v6318_v63 }
 0x149   : > { %5998 = vmatpush3.bf16.msra.mxu0 %v6317_v0 }
 0x14a   : > { %5861 = vmatpush3.bf16.msra.mxu1 %v6319_v1  ;;  %5999 = vmatprep.subr.bf16.mxu0 %v6541_v13  ;;  %v6363_v1 = vld [vmem:[%s7880_s1 + $0x770] sm:$0xff]  }
 0x14b   : > { %5862 = vmatprep.subr.bf16.mxu1 %v6321_v2  ;;  %v6365_v2 = vld [vmem:[%s7880_s1 + $0x7f0] sm:$0xff]  }
 0x14d   : > { %6000 = vmatpush3.bf16.msra.mxu0 %v6320_v3 }
 0x14e   : > { %5863 = vmatpush3.bf16.msra.mxu1 %v6322_v4  ;;  %6001 = vmatprep.subr.bf16.mxu0 %v6541_v13 }
 0x14f   : > { %5864 = vmatprep.subr.bf16.mxu1 %v6324_v5 }
 0x151   : > { %6002 = vmatpush3.bf16.msra.mxu0 %v6323_v7 }
 0x152   : > { %5865 = vmatpush3.bf16.msra.mxu1 %v6325_v9  ;;  %6003 = vmatprep.subr.bf16.mxu0 %v6541_v13 }
 0x153   : > { %v5581_v14 = vpop.f32.mrb[0].mxu0  ;;  %5866 = vmatprep.subr.bf16.mxu1 %v6327_v10 }
 0x154   : > { %v5603_v15 = vpop.f32.mrb[0].mxu1  ;;  %v5582_v17 = vpop.f32.mrb[1].mxu0 }
 0x155   : > { %v5604_v18 = vpop.f32.mrb[1].mxu1  ;;  %v5583_v19 = vadd.f32 %v5582_v17, %v5581_v14  ;;  %v5584_v21 = vpop.f32.mrb[2].mxu0  ;;  %6004 = vmatpush3.bf16.msra.mxu0 %v6326_v11  ;;  %v6366_v11 = vld [vmem:[%s7880_s1 + $0x7b8] sm:$0xff]  }
 0x156   : > { %v5605_v20 = vadd.f32 %v5604_v18, %v5603_v15  ;;  %v5606_v22 = vpop.f32.mrb[2].mxu1  ;;  %v5585_v25 = vpop.f32.mrb[3].mxu0  ;;  %5867 = vmatpush3.bf16.msra.mxu1 %v6328_v12  ;;  %6005 = vmatprep.subr.bf16.mxu0 %v6541_v13  ;;  %v6368_v12 = vld [vmem:[%s7880_s1 + $0x838] sm:$0xff]   ;;  %v6372_v18 = vld [vmem:[%s7880_s1 + $0x880] sm:$0xff]  }
 0x157   : > { %v5607_v26 = vpop.f32.mrb[3].mxu1  ;;  %5868 = vmatprep.subr.bf16.mxu1 %v6330_v16  ;;  %v6367_v15 = vld [vmem:[%s7880_s1 + $0x778] sm:$0xff]   ;;  %v6375_v21 = vld [vmem:[%s7880_s1 + $0x840] sm:$0xff]   ;;  %v6379_v25 = vld [vmem:[%s7880_s1 + $0x8c8] sm:$0xff]  }
 0x158   : > { %v7551_v27 = vadd.f32 %v5605_v20, %v5583_v19  ;;  %v6371_v16 = vld [vmem:[%s7880_s1 + $0x7f8] sm:$0xff]   ;;  %v5411_v19 = vcombine.low %v3215_v50, %v3215_v50  ;;  %v5413_v20 = vcombine.low %v3216_v54, %v3216_v54  ;;  %v6376_v22 = vld [vmem:[%s7880_s1 + $0x8c0] sm:$0xff]   ;;  %v6380_v26 = vld [vmem:[%s7880_s1 + $0x890] sm:$0xff]  }
 0x159   : > { %6006 = vmatpush3.bf16.msra.mxu0 %v6329_v23  ;;  %v6377_v23 = vld [vmem:[%s7880_s1 + $0x888] sm:$0xff]  }
 0x15a   : > { %5869 = vmatpush3.bf16.msra.mxu1 %v6331_v24  ;;  %6007 = vmatprep.subr.bf16.mxu0 %v6541_v13  ;;  %v6378_v24 = vld [vmem:[%s7880_s1 + $0x848] sm:$0xff]  }
 0x15b   : > { %5870 = vmatprep.subr.bf16.mxu1 %v6333_v28 }
 0x15d   : > { %6008 = vmatpush3.bf16.msra.mxu0 %v6332_v29  ;;  %v6381_v29 = vld [vmem:[%s7880_s1 + $0x850] sm:$0xff]  }
 0x15e   : > { %5871 = vmatpush3.bf16.msra.mxu1 %v6334_v30  ;;  %5878 = vmatprep.subr.bf16.mxu0 %v6336_v31  ;;  %v6382_v30 = vld [vmem:[%s7880_s1 + $0x8d0] sm:$0xff]   ;;  %v6383_v31 = vld [vmem:[%s7880_s1 + $0x898] sm:$0xff]  }
 0x15f   : > { %5900 = vmatprep.subr.bf16.mxu1 %v6340_v33  ;;  %v6385_v33 = vld [vmem:[%s7880_s1 + $0x8d8] sm:$0xff]  }
 0x160   : > { %6010 = vmatmul.mubr.bf16.vlgmr.msra.gmra.mrb[28].mxu0 %v6335_v32  ;;  %v6384_v32 = vld [vmem:[%s7880_s1 + $0x858] sm:$0xff]  }
 0x161   : > { %3861 = vmatmul.mubr.bf16.vlgmr.msra.gmra.mrb[28].mxu1 %v5409_v35  ;;  %5879 = vmatpush3.bf16.msra.mxu0 %v6337_v34  ;;  %v6386_v34 = vld [vmem:[%s7880_s1 + $0x8a0] sm:$0xff]  }
 0x162   : > { %5901 = vmatpush3.bf16.msra.mxu1 %v6341_v36  ;;  %5880 = vmatprep.subr.bf16.mxu0 %v6342_v37  ;;  %v6387_v35 = vld [vmem:[%s7880_s1 + $0x860] sm:$0xff]   ;;  %v6389_v37 = vld [vmem:[%s7880_s1 + $0x8a8] sm:$0xff]  }
 0x163   : > { %5902 = vmatprep.subr.bf16.mxu1 %v6344_v38  ;;  %3900 = vmatprep.mubr.bf16.mxu0 %v5412_v52  ;;  %v6388_v36 = vld [vmem:[%s7880_s1 + $0x8e0] sm:$0xff]   ;;  %v6390_v38 = vld [vmem:[%s7880_s1 + $0x868] sm:$0xff]   ;;  %v6394_v52 = vld [vmem:[%s7880_s1 + $0x8f0] sm:$0xff]  }
 0x164   : > { %3940 = vmatprep.mubr.bf16.mxu1 %v5414_v56  ;;  %v6395_v56 = vld [vmem:[%s7880_s1 + $0x8b8] sm:$0xff]  }
 0x165   : > { %5881 = vmatpush3.bf16.msra.mxu0 %v6343_v39  ;;  %v6391_v39 = vld [vmem:[%s7880_s1 + $0x8e8] sm:$0xff]  }
 0x166   : > { %5903 = vmatpush3.bf16.msra.mxu1 %v6345_v40  ;;  %5882 = vmatprep.subr.bf16.mxu0 %v6346_v41  ;;  %v6392_v40 = vld [vmem:[%s7880_s1 + $0x8b0] sm:$0xff]  }
 0x167   : > { %5904 = vmatprep.subr.bf16.mxu1 %v6348_v42  ;;  %v4809_v42 = vld [vmem:[%s7881_s2] ss:$0 sm:$0xff] }
 0x169   : > { %5883 = vmatpush3.bf16.msra.mxu0 %v6347_v43 }
 0x16a   : > { %5905 = vmatpush3.bf16.msra.mxu1 %v6349_v44  ;;  %5884 = vmatprep.subr.bf16.mxu0 %v6350_v45 }
 0x16b   : > { %5906 = vmatprep.subr.bf16.mxu1 %v6352_v46 }
 0x16d   : > { %5885 = vmatpush3.bf16.msra.mxu0 %v6351_v47  ;;  %v4810_v47 = vld [vmem:[%s7882_s3] ss:$0 sm:$0xff] }
 0x16e   : > { %5907 = vmatpush3.bf16.msra.mxu1 %v6353_v48  ;;  %5886 = vmatprep.subr.bf16.mxu0 %v6354_v49 }
 0x16f   : > { %5908 = vmatprep.subr.bf16.mxu1 %v6356_v51  ;;  %v6393_v51 = vld [vmem:[%s7880_s1 + $0x870] sm:$0xff]  }
 0x171   : > { %5887 = vmatpush3.bf16.msra.mxu0 %v6355_v53 }
 0x172   : > { %5909 = vmatpush3.bf16.msra.mxu1 %v6357_v55  ;;  %5888 = vmatprep.subr.bf16.mxu0 %v6358_v57 }
 0x173   : > { %5910 = vmatprep.subr.bf16.mxu1 %v6360_v58  ;;  %v5625_v63 = vpop.f32.mrb[4].mxu0  ;;  %v6396_v58 = vld [vmem:[%s7880_s1 + $0x878] sm:$0xff]  }
 0x174   : > { %v5647_v0 = vpop.f32.mrb[4].mxu1  ;;  %v5626_v3 = vpop.f32.mrb[5].mxu0 }
 0x175   : > { %v5648_v4 = vpop.f32.mrb[5].mxu1  ;;  %v5627_v5 = vadd.f32 %v5626_v3, %v5625_v63  ;;  %v5628_v6 = vpop.f32.mrb[6].mxu0  ;;  %5889 = vmatpush3.bf16.msra.mxu0 %v6359_v59  ;;  %v6399_v59 = vld [vmem:[%s7880_s1 + $0x8f8] sm:$0xff]   ;;  %v6400_v63 = vld [vmem:[%s7879_s0 + $0x8c] ss:$0 sps:$4 sm:$0xff]  }
 0x176   : > { %v5649_v7 = vadd.f32 %v5648_v4, %v5647_v0  ;;  %5911 = vmatpush3.bf16.msra.mxu1 %v6361_v60  ;;  %v5650_v8 = vpop.f32.mrb[6].mxu1  ;;  %v5629_v9 = vpop.f32.mrb[7].mxu0  ;;  %5890 = vmatprep.subr.bf16.mxu0 %v6362_v61 }
 0x177   : > { %v5651_v10 = vpop.f32.mrb[7].mxu1  ;;  %5912 = vmatprep.subr.bf16.mxu1 %v6364_v62  ;;  %v1444_v14 = vadd.f32 %v5627_v5, %v7551_v27  ;;  %v7696_v27 = vld [vmem:[%s7879_s0 + $0x84] sm:$0xff] }
 0x178   : > { %v5416_v28 = vcombine.high %v7696_v27, %v7696_v27  ;;  %v5415_v62 = vcombine.low %v7696_v27, %v7696_v27 }
 0x179   : > { %5891 = vmatpush3.bf16.msra.mxu0 %v6363_v1  ;;  %v1484_v17 = vadd.f32 %v5649_v7, %v1444_v14 }
 0x17a   : > { %5913 = vmatpush3.bf16.msra.mxu1 %v6365_v2  ;;  %5892 = vmatprep.subr.bf16.mxu0 %v6366_v11 }
 0x17b   : > { %5914 = vmatprep.subr.bf16.mxu1 %v6368_v12 }
 0x17d   : > { %5893 = vmatpush3.bf16.msra.mxu0 %v6367_v15 }
 0x17e   : > { %5915 = vmatpush3.bf16.msra.mxu1 %v6371_v16  ;;  %5922 = vmatprep.subr.bf16.mxu0 %v6372_v18 }
 0x17f   : > { %6013 = vmatprep.subr.bf16.mxu1 %v6541_v13 }
 0x180   : > { %3901 = vmatmul.mubr.bf16.vlgmr.msra.gmra.mrb[32].mxu0 %v5411_v19 }
 0x181   : > { %3941 = vmatmul.mubr.bf16.vlgmr.msra.gmra.mrb[32].mxu1 %v5413_v20  ;;  %5923 = vmatpush3.bf16.msra.mxu0 %v6375_v21 }
 0x182   : > { %6014 = vmatpush3.bf16.msra.mxu1 %v6376_v22  ;;  %5924 = vmatprep.subr.bf16.mxu0 %v6377_v23  ;;  %v5036_v22 = vld [vmem:[%s7881_s2 + $0x1] ss:$0 sm:$0xff] }
 0x183   : > { %6015 = vmatprep.subr.bf16.mxu1 %v6541_v13  ;;  %6029 = vmatprep.mubr.msk.bf16.mxu1 %vm6542_vm0, %v6541_v13 }
 0x184   : > { %3980 = vmatprep.mubr.bf16.mxu0 %v5416_v28 }
 0x185   : > { %5925 = vmatpush3.bf16.msra.mxu0 %v6378_v24  ;;  %v5037_v24 = vld [vmem:[%s7882_s3 + $0x1] ss:$0 sm:$0xff] }
 0x186   : > { %6016 = vmatpush3.bf16.msra.mxu1 %v6379_v25  ;;  %5926 = vmatprep.subr.bf16.mxu0 %v6380_v26 }
 0x187   : > { %6017 = vmatprep.subr.bf16.mxu1 %v6541_v13 }
 0x189   : > { %5927 = vmatpush3.bf16.msra.mxu0 %v6381_v29 }
 0x18a   : > { %6018 = vmatpush3.bf16.msra.mxu1 %v6382_v30  ;;  %5928 = vmatprep.subr.bf16.mxu0 %v6383_v31 }
 0x18b   : > { %6019 = vmatprep.subr.bf16.mxu1 %v6541_v13 }
 0x18d   : > { %5929 = vmatpush3.bf16.msra.mxu0 %v6384_v32 }
 0x18e   : > { %6020 = vmatpush3.bf16.msra.mxu1 %v6385_v33  ;;  %5930 = vmatprep.subr.bf16.mxu0 %v6386_v34 }
 0x18f   : > { %6021 = vmatprep.subr.bf16.mxu1 %v6541_v13 }
 0x191   : > { %5931 = vmatpush3.bf16.msra.mxu0 %v6387_v35 }
 0x192   : > { %6022 = vmatpush3.bf16.msra.mxu1 %v6388_v36  ;;  %5932 = vmatprep.subr.bf16.mxu0 %v6389_v37 }
 0x193   : > { %6023 = vmatprep.subr.bf16.mxu1 %v6541_v13  ;;  %v1523_v41 = vpop.f32.mrb[8].mxu0 }
 0x194   : > { %v5678_v43 = vpop.f32.mrb[8].mxu1  ;;  %v1524_v44 = vadd.f32 %v1523_v41, %v1484_v17  ;;  %v5971_v45 = vpop.f32.mrb[9].mxu0 }
 0x195   : > { %v5679_v46 = vpop.f32.mrb[9].mxu1  ;;  %v1526_v48 = vpop.f32.mrb[10].mxu0  ;;  %5933 = vmatpush3.bf16.msra.mxu0 %v6390_v38 }
 0x196   : > { %v5680_v49 = vadd.f32 %v5679_v46, %v5678_v43  ;;  %6024 = vmatpush3.bf16.msra.mxu1 %v6391_v39  ;;  %v5681_v50 = vpop.f32.mrb[10].mxu1  ;;  %v1536_v53 = vmul.f32 %v4809_v42, %v1524_v44  ;;  %v5972_v54 = vpop.f32.mrb[11].mxu0  ;;  %5934 = vmatprep.subr.bf16.mxu0 %v6392_v40 }
 0x197   : > { %v5682_v55 = vpop.f32.mrb[11].mxu1  ;;  %6025 = vmatprep.subr.bf16.mxu1 %v6541_v13 }
 0x198   : > { %v1544_v57 = vadd.f32 %v4810_v47, %v1536_v53  ;;  %v5263_v53 = vld [vmem:[%s7881_s2 + $0x2] ss:$0 sm:$0xff] }
 0x199   : > { %5935 = vmatpush3.bf16.msra.mxu0 %v6393_v51 }
 0x19a   : > { %6026 = vmatpush3.bf16.msra.mxu1 %v6394_v52  ;;  %v1545_v60 = vmax.f32 %v1544_v57, 0.0  ;;  %5936 = vmatprep.subr.bf16.mxu0 %v6395_v56 }
 0x19b   : > { %6027 = vmatprep.subr.bf16.mxu1 %v6541_v13 }
 0x19c   : > { %v1546_v61 = vpack.c.bf16 %v1545_v60, %v1545_v60 }
 0x19d   : > { %5937 = vmatpush3.bf16.msra.mxu0 %v6396_v58  ;;  %v5264_v58 = vld [vmem:[%s7882_s3 + $0x2] ss:$0 sm:$0xff] }
 0x19e   : > { %6028 = vmatpush3.bf16.msra.mxu1 %v6399_v59  ;;  %1547 = vst [vmem:[#allocation2] sm:$0xf] %v1546_v61 }
 0x1a0   : > { %3981 = vmatmul.mubr.bf16.vlgmr.msra.gmra.mrb[36].mxu0 %v5415_v62 }
 0x1a1   : > { %6030 = vmatmul.mubr.bf16.vlgmr.msra.gmra.mrb[36].mxu1 %v6400_v63 }
 0x1b3   : > { %v5700_v0 = vpop.f32.mrb[12].mxu0 }
 0x1b4   : > { %v5722_v1 = vpop.f32.mrb[12].mxu1  ;;  %v5701_v2 = vpop.f32.mrb[13].mxu0 }
 0x1b5   : > { %v5723_v3 = vpop.f32.mrb[13].mxu1  ;;  %v5702_v4 = vadd.f32 %v5701_v2, %v5700_v0  ;;  %v5703_v5 = vpop.f32.mrb[14].mxu0 }
 0x1b6   : > { %v5724_v13 = vadd.f32 %v5723_v3, %v5722_v1  ;;  %v5725_v6 = vpop.f32.mrb[14].mxu1  ;;  %v5704_v7 = vpop.f32.mrb[15].mxu0 }
 0x1b7   : > { %v5726_v8 = vpop.f32.mrb[15].mxu1  ;;  %v2237_v9 = vadd.f32 %v5702_v4, %v5680_v49 }
 0x1b9   : > { %v2277_v10 = vadd.f32 %v5724_v13, %v2237_v9 }
 0x1d3   : > { %v5744_v11 = vpop.f32.mrb[16].mxu0 }
 0x1d4   : > { %v2356_v12 = vpop.f32.mrb[16].mxu1  ;;  %v5745_v14 = vpop.f32.mrb[17].mxu0 }
 0x1d5   : > { %v5991_v15 = vpop.f32.mrb[17].mxu1  ;;  %v5746_v16 = vadd.f32 %v5745_v14, %v5744_v11  ;;  %v5747_v17 = vpop.f32.mrb[18].mxu0 }
 0x1d6   : > { %v2359_v18 = vpop.f32.mrb[18].mxu1  ;;  %v5748_v19 = vpop.f32.mrb[19].mxu0 }
 0x1d7   : > { %v5992_v20 = vpop.f32.mrb[19].mxu1  ;;  %v2317_v21 = vadd.f32 %v5746_v16, %v2277_v10 }
 0x1d9   : > { %v2357_v23 = vadd.f32 %v2356_v12, %v2317_v21 }
 0x1db   : > { %v2369_v25 = vmul.f32 %v5036_v22, %v2357_v23 }
 0x1dd   : > { %v2377_v26 = vadd.f32 %v5037_v24, %v2369_v25 }
 0x1df   : > { %v2378_v27 = vmax.f32 %v2377_v26, 0.0  ;;  %v5490_v26 = vld [vmem:[%s7881_s2 + $0x3] ss:$0 sm:$0xff] }
 0x1e1   : > { %v2379_v28 = vpack.c.bf16 %v2378_v27, %v2378_v27 }
 0x1e3   : > { %2380 = vst [vmem:[#allocation2 + $0x4] sm:$0xf] %v2379_v28  ;;  %v5491_v28 = vld [vmem:[%s7882_s3 + $0x3] ss:$0 sm:$0xff] }
 0x1f3   : > { %v5775_v29 = vpop.f32.mrb[20].mxu0 }
 0x1f4   : > { %v5797_v30 = vpop.f32.mrb[20].mxu1  ;;  %v5776_v31 = vpop.f32.mrb[21].mxu0 }
 0x1f5   : > { %v5798_v32 = vpop.f32.mrb[21].mxu1  ;;  %v5777_v33 = vadd.f32 %v5776_v31, %v5775_v29  ;;  %v5778_v35 = vpop.f32.mrb[22].mxu0 }
 0x1f6   : > { %v5799_v34 = vadd.f32 %v5798_v32, %v5797_v30  ;;  %v5800_v36 = vpop.f32.mrb[22].mxu1  ;;  %v5779_v37 = vpop.f32.mrb[23].mxu0 }
 0x1f7   : > { %v5801_v38 = vpop.f32.mrb[23].mxu1 }
 0x1f8   : > { %v3070_v39 = vadd.f32 %v5799_v34, %v5777_v33 }
 0x213   : > { %v5819_v40 = vpop.f32.mrb[24].mxu0 }
 0x214   : > { %v5841_v41 = vpop.f32.mrb[24].mxu1  ;;  %v5820_v42 = vpop.f32.mrb[25].mxu0 }
 0x215   : > { %v5842_v43 = vpop.f32.mrb[25].mxu1  ;;  %v5821_v44 = vadd.f32 %v5820_v42, %v5819_v40  ;;  %v5822_v45 = vpop.f32.mrb[26].mxu0 }
 0x216   : > { %v5843_v46 = vadd.f32 %v5842_v43, %v5841_v41  ;;  %v5844_v47 = vpop.f32.mrb[26].mxu1  ;;  %v5823_v48 = vpop.f32.mrb[27].mxu0 }
 0x217   : > { %v5845_v49 = vpop.f32.mrb[27].mxu1  ;;  %v3110_v50 = vadd.f32 %v5821_v44, %v3070_v39 }
 0x219   : > { %v3150_v51 = vadd.f32 %v5843_v46, %v3110_v50 }
 0x233   : > { %v3189_v52 = vpop.f32.mrb[28].mxu0 }
 0x234   : > { %v5872_v54 = vpop.f32.mrb[28].mxu1  ;;  %v3190_v55 = vadd.f32 %v3189_v52, %v3150_v51  ;;  %v6011_v56 = vpop.f32.mrb[29].mxu0 }
 0x235   : > { %v5873_v57 = vpop.f32.mrb[29].mxu1  ;;  %v3192_v59 = vpop.f32.mrb[30].mxu0 }
 0x236   : > { %v5874_v60 = vadd.f32 %v5873_v57, %v5872_v54  ;;  %v5875_v61 = vpop.f32.mrb[30].mxu1  ;;  %v3202_v62 = vmul.f32 %v5263_v53, %v3190_v55  ;;  %v6012_v63 = vpop.f32.mrb[31].mxu0 }
 0x237   : > { %v5876_v0 = vpop.f32.mrb[31].mxu1 }
 0x238   : > { %v3210_v1 = vadd.f32 %v5264_v58, %v3202_v62 }
 0x23a   : > { %v3211_v2 = vmax.f32 %v3210_v1, 0.0 }
 0x23c   : > { %v3212_v3 = vpack.c.bf16 %v3211_v2, %v3211_v2 }
 0x23e   : > { %3213 = vst [vmem:[#allocation2 + $0x8] sm:$0xf] %v3212_v3 }
 0x253   : > { %v5894_v4 = vpop.f32.mrb[32].mxu0 }
 0x254   : > { %v5916_v5 = vpop.f32.mrb[32].mxu1  ;;  %v5895_v13 = vpop.f32.mrb[33].mxu0 }
 0x255   : > { %v5917_v6 = vpop.f32.mrb[33].mxu1  ;;  %v5896_v7 = vadd.f32 %v5895_v13, %v5894_v4  ;;  %v5897_v8 = vpop.f32.mrb[34].mxu0 }
 0x256   : > { %v5918_v9 = vadd.f32 %v5917_v6, %v5916_v5  ;;  %v5919_v10 = vpop.f32.mrb[34].mxu1  ;;  %v5898_v11 = vpop.f32.mrb[35].mxu0 }
 0x257   : > { %v5920_v12 = vpop.f32.mrb[35].mxu1  ;;  %v3903_v14 = vadd.f32 %v5896_v7, %v5874_v60 }
 0x259   : > { %v3943_v15 = vadd.f32 %v5918_v9, %v3903_v14 }
 0x273   : > { %v5938_v16 = vpop.f32.mrb[36].mxu0 }
 0x274   : > { %v4022_v17 = vpop.f32.mrb[36].mxu1  ;;  %v5939_v18 = vpop.f32.mrb[37].mxu0 }
 0x275   : > { %v6031_v19 = vpop.f32.mrb[37].mxu1  ;;  %v5940_v20 = vadd.f32 %v5939_v18, %v5938_v16  ;;  %v5941_v21 = vpop.f32.mrb[38].mxu0 }
 0x276   : > { %v4025_v22 = vpop.f32.mrb[38].mxu1  ;;  %v5942_v23 = vpop.f32.mrb[39].mxu0 }
 0x277   : > { %v6032_v24 = vpop.f32.mrb[39].mxu1  ;;  %v3983_v25 = vadd.f32 %v5940_v20, %v3943_v15 }
 0x279   : > { %v4023_v27 = vadd.f32 %v4022_v17, %v3983_v25 }
 0x27b   : > { %v4035_v29 = vmul.f32 %v5490_v26, %v4023_v27 }
 0x27d   : > { %v4043_v30 = vadd.f32 %v5491_v28, %v4035_v29 }
 0x27f   : > { %v4044_v31 = vmax.f32 %v4043_v30, 0.0 }
 0x281   : > { %v4045_v32 = vpack.c.bf16 %v4044_v31, %v4044_v31 }
 0x283   : > { %4046 = vst [vmem:[#allocation2 + $0xc] sm:$0xf] %v4045_v32 }
 0x284 PF: > { %v6401_v33 = vld [vmem:[%s6788_s21 + $0x4] ss:$8 sps:$4 sm:$0xff]   ;;  %v6405_v35 = vld [vmem:[%s6788_s21] ss:$8 sps:$4 sm:$0xff]   ;;  %v6407_v37 = vld [vmem:[%s6788_s21 + $0x14] ss:$8 sps:$4 sm:$0xff]  }
 0x285   : > { %v6403_v34 = vld [vmem:[%s6788_s21 + $0x104] ss:$8 sps:$4 sm:$0xff]   ;;  %4447 = vmatprep.subr.bf16.mxu1 %v6401_v33  ;;  %v6406_v36 = vld [vmem:[%s6788_s21 + $0x100] ss:$8 sps:$4 sm:$0xff]   ;;  %v6409_v38 = vld [vmem:[%s6788_s21 + $0x114] ss:$8 sps:$4 sm:$0xff]  }
 0x286   : > { %4488 = vmatprep.subr.bf16.mxu0 %v6403_v34  ;;  %4448 = vmatpush1.bf16.msra.mxu1 %v6405_v35  ;;  %v6411_v39 = vld [vmem:[%s6788_s21 + $0x10] ss:$8 sps:$4 sm:$0xff]   ;;  %v6413_v41 = vld [vmem:[%s6788_s21 + $0x24] ss:$8 sps:$4 sm:$0xff]   ;;  %v6417_v43 = vld [vmem:[%s6788_s21 + $0x20] ss:$8 sps:$4 sm:$0xff]  }
 0x287   : > { %4489 = vmatpush1.bf16.msra.mxu0 %v6406_v36  ;;  %4449 = vmatprep.subr.bf16.mxu1 %v6407_v37  ;;  %v6412_v40 = vld [vmem:[%s6788_s21 + $0x110] ss:$8 sps:$4 sm:$0xff]   ;;  %v6415_v42 = vld [vmem:[%s6788_s21 + $0x124] ss:$8 sps:$4 sm:$0xff]   ;;  %v6418_v44 = vld [vmem:[%s6788_s21 + $0x120] ss:$8 sps:$4 sm:$0xff]  }
 0x288   : > { %4490 = vmatprep.subr.bf16.mxu0 %v6409_v38  ;;  %v6419_v45 = vld [vmem:[%s6788_s21 + $0x34] ss:$8 sps:$4 sm:$0xff]   ;;  %v6423_v47 = vld [vmem:[%s6788_s21 + $0x30] ss:$8 sps:$4 sm:$0xff]   ;;  %v6425_v49 = vld [vmem:[%s6788_s21 + $0x44] ss:$8 sps:$4 sm:$0xff]  }
 0x289   : > { %v6421_v46 = vld [vmem:[%s6788_s21 + $0x134] ss:$8 sps:$4 sm:$0xff]   ;;  %v6424_v48 = vld [vmem:[%s6788_s21 + $0x130] ss:$8 sps:$4 sm:$0xff]   ;;  %v6427_v50 = vld [vmem:[%s6788_s21 + $0x144] ss:$8 sps:$4 sm:$0xff]  }
 0x28a   : > { %4450 = vmatpush1.bf16.msra.mxu1 %v6411_v39  ;;  %v6429_v51 = vld [vmem:[%s6788_s21 + $0x40] ss:$8 sps:$4 sm:$0xff]   ;;  %v6431_v53 = vld [vmem:[%s6788_s21 + $0x54] ss:$8 sps:$4 sm:$0xff]   ;;  %v6435_v55 = vld [vmem:[%s6788_s21 + $0x50] ss:$8 sps:$4 sm:$0xff]   ;;  %v4531_v39 = vlaneseq }
 0x28b   : > { %4491 = vmatpush1.bf16.msra.mxu0 %v6412_v40  ;;  %4451 = vmatprep.subr.bf16.mxu1 %v6413_v41  ;;  %v6430_v52 = vld [vmem:[%s6788_s21 + $0x140] ss:$8 sps:$4 sm:$0xff]   ;;  %v6433_v54 = vld [vmem:[%s6788_s21 + $0x154] ss:$8 sps:$4 sm:$0xff]   ;;  %v6436_v56 = vld [vmem:[%s6788_s21 + $0x150] ss:$8 sps:$4 sm:$0xff]  }
 0x28c   : > { %4492 = vmatprep.subr.bf16.mxu0 %v6415_v42  ;;  %v6437_v57 = vld [vmem:[%s6788_s21 + $0x64] ss:$8 sps:$4 sm:$0xff]   ;;  %v6441_v59 = vld [vmem:[%s6788_s21 + $0x60] ss:$8 sps:$4 sm:$0xff]   ;;  %v6443_v61 = vld [vmem:[%s6788_s21 + $0x74] ss:$8 sps:$4 sm:$0xff]  }
 0x28d   : > { %v6439_v58 = vld [vmem:[%s6788_s21 + $0x164] ss:$8 sps:$4 sm:$0xff]   ;;  %v6442_v60 = vld [vmem:[%s6788_s21 + $0x160] ss:$8 sps:$4 sm:$0xff]   ;;  %v6445_v62 = vld [vmem:[%s6788_s21 + $0x174] ss:$8 sps:$4 sm:$0xff]  }
 0x28e   : > { %4452 = vmatpush1.bf16.msra.mxu1 %v6417_v43  ;;  %v6447_v63 = vld [vmem:[%s6788_s21 + $0x70] ss:$8 sps:$4 sm:$0xff]   ;;  %v6449_v1 = vld [vmem:[%s6788_s21 + $0x84] ss:$8 sps:$4 sm:$0xff]   ;;  %v6453_v3 = vld [vmem:[%s6788_s21 + $0x80] ss:$8 sps:$4 sm:$0xff]  }
 0x28f   : > { %4493 = vmatpush1.bf16.msra.mxu0 %v6418_v44  ;;  %4453 = vmatprep.subr.bf16.mxu1 %v6419_v45  ;;  %v6448_v0 = vld [vmem:[%s6788_s21 + $0x170] ss:$8 sps:$4 sm:$0xff]   ;;  %v6451_v2 = vld [vmem:[%s6788_s21 + $0x184] ss:$8 sps:$4 sm:$0xff]   ;;  %v6454_v4 = vld [vmem:[%s6788_s21 + $0x180] ss:$8 sps:$4 sm:$0xff]  }
 0x290   : > { %4494 = vmatprep.subr.bf16.mxu0 %v6421_v46  ;;  %v6455_v5 = vld [vmem:[%s6788_s21 + $0x94] ss:$8 sps:$4 sm:$0xff]   ;;  %v6459_v6 = vld [vmem:[%s6788_s21 + $0x90] ss:$8 sps:$4 sm:$0xff]   ;;  %v6461_v8 = vld [vmem:[%s6788_s21 + $0xa4] ss:$8 sps:$4 sm:$0xff]  }
 0x291   : > { %v6457_v13 = vld [vmem:[%s6788_s21 + $0x194] ss:$8 sps:$4 sm:$0xff]   ;;  %v6460_v7 = vld [vmem:[%s6788_s21 + $0x190] ss:$8 sps:$4 sm:$0xff]   ;;  %v6463_v9 = vld [vmem:[%s6788_s21 + $0x1a4] ss:$8 sps:$4 sm:$0xff]  }
 0x292   : > { %4454 = vmatpush1.bf16.msra.mxu1 %v6423_v47  ;;  %v6465_v10 = vld [vmem:[%s6788_s21 + $0xa0] ss:$8 sps:$4 sm:$0xff]   ;;  %v6467_v12 = vld [vmem:[%s6788_s21 + $0xb4] ss:$8 sps:$4 sm:$0xff]   ;;  %v6471_v18 = vld [vmem:[%s6788_s21 + $0xb0] ss:$8 sps:$4 sm:$0xff]  }
 0x293   : > { %4495 = vmatpush1.bf16.msra.mxu0 %v6424_v48  ;;  %4455 = vmatprep.subr.bf16.mxu1 %v6425_v49  ;;  %v6466_v11 = vld [vmem:[%s6788_s21 + $0x1a0] ss:$8 sps:$4 sm:$0xff]   ;;  %v6469_v14 = vld [vmem:[%s6788_s21 + $0x1b4] ss:$8 sps:$4 sm:$0xff]   ;;  %v6472_v19 = vld [vmem:[%s6788_s21 + $0x1b0] ss:$8 sps:$4 sm:$0xff]  }
 0x294   : > { %4496 = vmatprep.subr.bf16.mxu0 %v6427_v50  ;;  %v4047_v15 = vld [vmem:[#allocation2] sm:$0xff]  ;;  %v4048_v17 = vld [vmem:[#allocation2 + $0x8] sm:$0xff]  ;;  %v6473_v21 = vld [vmem:[%s6788_s21 + $0xc4] ss:$8 sps:$4 sm:$0xff]   ;;  %v4532_v40 = vshrl.u32 %v4531_v39, 7 }
 0x295   : > { %v5493_v16 = vcombine.high %v4047_v15, %v4047_v15  ;;  %v5495_v20 = vcombine.high %v4048_v17, %v4048_v17  ;;  %v6475_v22 = vld [vmem:[%s6788_s21 + $0x1c4] ss:$8 sps:$4 sm:$0xff]   ;;  %v6477_v23 = vld [vmem:[%s6788_s21 + $0xc0] ss:$8 sps:$4 sm:$0xff]   ;;  %v6479_v25 = vld [vmem:[%s6788_s21 + $0xd4] ss:$8 sps:$4 sm:$0xff]   ;;  %v5492_v37 = vcombine.low %v4047_v15, %v4047_v15  ;;  %v5494_v38 = vcombine.low %v4048_v17, %v4048_v17 }
 0x296   : > { %4456 = vmatpush1.bf16.msra.mxu1 %v6429_v51  ;;  %v6478_v24 = vld [vmem:[%s6788_s21 + $0x1c0] ss:$8 sps:$4 sm:$0xff]   ;;  %v6481_v26 = vld [vmem:[%s6788_s21 + $0x1d4] ss:$8 sps:$4 sm:$0xff]   ;;  %v6483_v27 = vld [vmem:[%s6788_s21 + $0xd0] ss:$8 sps:$4 sm:$0xff]  }
 0x297   : > { %4497 = vmatpush1.bf16.msra.mxu0 %v6430_v52  ;;  %4457 = vmatprep.subr.bf16.mxu1 %v6431_v53  ;;  %v6484_v28 = vld [vmem:[%s6788_s21 + $0x1d0] ss:$8 sps:$4 sm:$0xff]   ;;  %v6485_v29 = vld [vmem:[%s6788_s21 + $0xe4] ss:$8 sps:$4 sm:$0xff]   ;;  %v6489_v31 = vld [vmem:[%s6788_s21 + $0xe0] ss:$8 sps:$4 sm:$0xff]  }
 0x298   : > { %4498 = vmatprep.subr.bf16.mxu0 %v6433_v54  ;;  %4479 = vmatprep.mubr.bf16.mxu1 %v5493_v16  ;;  %v6487_v30 = vld [vmem:[%s6788_s21 + $0x1e4] ss:$8 sps:$4 sm:$0xff]   ;;  %v6490_v32 = vld [vmem:[%s6788_s21 + $0x1e0] ss:$8 sps:$4 sm:$0xff]   ;;  %v6491_v33 = vld [vmem:[%s6788_s21 + $0xf4] ss:$8 sps:$4 sm:$0xff]  }
 0x299   : > { %4520 = vmatprep.mubr.bf16.mxu0 %v5495_v20  ;;  %v6493_v34 = vld [vmem:[%s6788_s21 + $0x1f4] ss:$8 sps:$4 sm:$0xff]   ;;  %v6495_v35 = vld [vmem:[%s6788_s21 + $0xf0] ss:$8 sps:$4 sm:$0xff]   ;;  %v4533_v41 = vsub.s32 0, %v4532_v40  ;;  %v4537_v43 = vsub.s32 1, %v4532_v40 }
 0x29a   : > { %4458 = vmatpush1.bf16.msra.mxu1 %v6435_v55  ;;  %v6496_v36 = vld [vmem:[%s6788_s21 + $0x1f0] ss:$8 sps:$4 sm:$0xff]  }
 0x29b   : > { %4499 = vmatpush1.bf16.msra.mxu0 %v6436_v56  ;;  %4459 = vmatprep.subr.bf16.mxu1 %v6437_v57  ;;  %v4529_v42 = vld [vmem:[%s684_s26] sm:$0x3] }
 0x29c   : > { %4500 = vmatprep.subr.bf16.mxu0 %v6439_v58  ;;  %v4543_v44 = vld [vmem:[%s689_s14] sm:$0x3]  ;;  %v4534_v45 = vrot.slane %v4529_v42, %v4533_v41  ;;  %v4538_v49 = vrot.slane %v4529_v42, %v4537_v43 }
 0x29d   : > { %v4557_v48 = vld [vmem:[%s6781_s27] sm:$0xff]  ;;  %v4548_v51 = vrot.slane %v4543_v44, %v4533_v41  ;;  %v4552_v55 = vrot.slane %v4543_v44, %v4537_v43 }
 0x29e   : > { %4460 = vmatpush1.bf16.msra.mxu1 %v6441_v59  ;;  %v4558_v59 = vunpack.c.l.bf16 %v4557_v48 }
 0x29f   : > { %4501 = vmatpush1.bf16.msra.mxu0 %v6442_v60  ;;  %4461 = vmatprep.subr.bf16.mxu1 %v6443_v61 }
 0x2a0   : > { %4502 = vmatprep.subr.bf16.mxu0 %v6445_v62 }
 0x2a2   : > { %4462 = vmatpush1.bf16.msra.mxu1 %v6447_v63  ;;  %v4559_v63 = vunpack.c.h.bf16 %v4557_v48 }
 0x2a3   : > { %4503 = vmatpush1.bf16.msra.mxu0 %v6448_v0  ;;  %4463 = vmatprep.subr.bf16.mxu1 %v6449_v1 }
 0x2a4   : > { %4504 = vmatprep.subr.bf16.mxu0 %v6451_v2 }
 0x2a6   : > { %4464 = vmatpush1.bf16.msra.mxu1 %v6453_v3 }
 0x2a7   : > { %4505 = vmatpush1.bf16.msra.mxu0 %v6454_v4  ;;  %4465 = vmatprep.subr.bf16.mxu1 %v6455_v5 }
 0x2a8   : > { %4506 = vmatprep.subr.bf16.mxu0 %v6457_v13 }
 0x2aa   : > { %4466 = vmatpush1.bf16.msra.mxu1 %v6459_v6 }
 0x2ab   : > { %4507 = vmatpush1.bf16.msra.mxu0 %v6460_v7  ;;  %4467 = vmatprep.subr.bf16.mxu1 %v6461_v8 }
 0x2ac   : > { %4508 = vmatprep.subr.bf16.mxu0 %v6463_v9 }
 0x2ae   : > { %4468 = vmatpush1.bf16.msra.mxu1 %v6465_v10 }
 0x2af   : > { %4509 = vmatpush1.bf16.msra.mxu0 %v6466_v11  ;;  %4469 = vmatprep.subr.bf16.mxu1 %v6467_v12 }
 0x2b0   : > { %4510 = vmatprep.subr.bf16.mxu0 %v6469_v14 }
 0x2b2   : > { %4470 = vmatpush1.bf16.msra.mxu1 %v6471_v18 }
 0x2b3   : > { %4511 = vmatpush1.bf16.msra.mxu0 %v6472_v19  ;;  %4471 = vmatprep.subr.bf16.mxu1 %v6473_v21 }
 0x2b4   : > { %4512 = vmatprep.subr.bf16.mxu0 %v6475_v22 }
 0x2b6   : > { %4472 = vmatpush1.bf16.msra.mxu1 %v6477_v23 }
 0x2b7   : > { %4513 = vmatpush1.bf16.msra.mxu0 %v6478_v24  ;;  %4473 = vmatprep.subr.bf16.mxu1 %v6479_v25 }
 0x2b8   : > { %4514 = vmatprep.subr.bf16.mxu0 %v6481_v26 }
 0x2ba   : > { %4474 = vmatpush1.bf16.msra.mxu1 %v6483_v27 }
 0x2bb   : > { %4515 = vmatpush1.bf16.msra.mxu0 %v6484_v28  ;;  %4475 = vmatprep.subr.bf16.mxu1 %v6485_v29 }
 0x2bc   : > { %4516 = vmatprep.subr.bf16.mxu0 %v6487_v30 }
 0x2be   : > { %4476 = vmatpush1.bf16.msra.mxu1 %v6489_v31 }
 0x2bf   : > { %4517 = vmatpush1.bf16.msra.mxu0 %v6490_v32  ;;  %4477 = vmatprep.subr.bf16.mxu1 %v6491_v33 }
 0x2c0   : > { %4518 = vmatprep.subr.bf16.mxu0 %v6493_v34 }
 0x2c2   : > { %4478 = vmatpush1.bf16.msra.mxu1 %v6495_v35 }
 0x2c3   : > { %4519 = vmatpush1.bf16.msra.mxu0 %v6496_v36 }
 0x2c5   : > { %4480 = vmatmul.mubr.bf16.vlgmr.msra.gmra.mrb[0].mxu1 %v5492_v37 }
 0x2c6   : > { %4521 = vmatmul.mubr.bf16.vlgmr.msra.gmra.mrb[0].mxu0 %v5494_v38 }
 0x398   : > { %v4481_v46 = vpop.f32.mrb[0].mxu1 }
 0x399   : > { %v4522_v47 = vpop.f32.mrb[0].mxu0  ;;  %v4483_v52 = vpop.f32.mrb[1].mxu1 }
 0x39a   : > { %v4523_v50 = vadd.f32 %v4522_v47, %v4481_v46  ;;  %v4524_v53 = vpop.f32.mrb[1].mxu0  ;;  %v4485_v56 = vpop.f32.mrb[2].mxu1 }
 0x39b   : > { %v4525_v54 = vadd.f32 %v4524_v53, %v4483_v52  ;;  %v4526_v57 = vpop.f32.mrb[2].mxu0  ;;  %v4486_v60 = vpop.f32.mrb[3].mxu1 }
 0x39c   : > { %v4541_v58 = vmul.f32 %v4534_v45, %v4523_v50  ;;  %v4527_v61 = vpop.f32.mrb[3].mxu0 }
 0x39d   : > { %v4542_v62 = vmul.f32 %v4538_v49, %v4525_v54 }
 0x39e   : > { %v4555_v0 = vadd.f32 %v4548_v51, %v4541_v58 }
 0x39f   : > { %v4556_v1 = vadd.f32 %v4552_v55, %v4542_v62 }
 0x3a0   : > { %v4560_v2 = vadd.f32 %v4558_v59, %v4555_v0 }
 0x3a1   : > { %v4561_v3 = vadd.f32 %v4559_v63, %v4556_v1 }
 0x3a2   : > { %v4562_v4 = vmax.f32 %v4560_v2, 0.0 }
 0x3a3   : > { %v4563_v5 = vmax.f32 %v4561_v3, 0.0 }
 0x3a5   : > { %v5564_v13 = vpack.c.bf16 %v4563_v5, %v4562_v4 }
 0x3a7   : > { %4572 = vst [vmem:[%s6786_s20] sm:$0xff] %v5564_v13 }
 0x3a8 PF: > { %s18_s9 = sadd.s32 1, %s6539_s9   ;;  %s7888_s27 = smov %s6527_s28 }
 0x3a9   : > { %p15_p11 = scmp.ge.s32.totalorder %s18_s9, 6   ;;  %s7889_s28 = smov %s6623_s13 }
 0x3aa   : > { %s7890_s29 = smov %s6535_s30  ;;  %s7891_s30 = smov %s7893_s10 }
 0x3ab   :  { %17 = sbr.rel (!%p15_p11) target bundleno = 3 (0x3), region = 144 }

// kernel: resnext50_encoder.52
= control target key start
LH: loop header
LB: loop body
LE: loop exit
PB: predicated region body
PF: predicated region fallthrough
CT: control target
= control target key end

     0   :  { %s1598_s15 = smov 0   ;;  %s1600_s16 = smov 0   ;;  %s1918_s0 = inlined_call_operand.vmem [shape: bf16[8,1024], index: 0, kind: input, shape index: {}]   ;;  %s1919_s1 = inlined_call_operand.vmem [shape: bf16[1024,512], index: 1, kind: input, shape index: {}]   ;;  %s1920_s2 = inlined_call_operand.vmem [shape: f32[1,512], index: 2, kind: input, shape index: {}]   ;;  %s1921_s3 = inlined_call_operand.vmem [shape: f32[1,512], index: 3, kind: input, shape index: {}]   ;;  %s1922_s4 = inlined_call_operand.vmem [shape: bf16[8,512], index: 4, kind: output, shape index: {}]  }
   0x1   :  { %s1602_s17 = smov 0   ;;  %s1604_s18 = smov 0  }
   0x2   :  { %s1606_s19 = smov 0   ;;  %s1608_s20 = smov 0  }
   0x3   :  { %s1610_s21 = smov 0  }
   0x4 LB: > { %s26_s22 = sadd.s32 1, %s1562_s19  ;;  %s29_s23 = sadd.s32 1, %s1566_s20  ;;  %s1570_s21 = sphi %s1610_s21, %s14_s21   ;;  %s1566_s20 = sphi %s1608_s20, %s1928_s20   ;;  %s1562_s19 = sphi %s1606_s19, %s1927_s19   ;;  %s1558_s18 = sphi %s1604_s18, %s1926_s18   ;;  %s1554_s17 = sphi %s1602_s17, %s1925_s17   ;;  %s1550_s16 = sphi %s1600_s16, %s1924_s16   ;;  %s1546_s15 = sphi %s1598_s15, %s1923_s15  }
   0x5   : > { %p27_p0 = scmp.ge.s32.totalorder %s26_s22, 2  ;;  %p77_p1 = scmp.ne.s32.totalorder %s1550_s16, %s1546_s15 }
   0x6   : > { %p78_p2 = scmp.eq.s32.totalorder %s1570_s21, 0  ;;  %s70_s27 = sadd.s32 1, %s1550_s16 }
   0x7   : > { %s1930_s22 = smov (%p27_p0, %s26_s22), 0  ;;  %s1932_s23 = smov (!%p27_p0, %s29_s23), %s1566_s20 }
   0x8   : > { %p79_p3 = por %p78_p2, %p77_p1  ;;  %p31_p4 = scmp.ge.s32.totalorder %s1932_s23, 2 }
   0x9   : > { %s65_s24 = ssub.s32 %s1562_s19, %s1930_s22  ;;  %p1270_p6 = scmp.ge.s32.totalorder %s1570_s21, 4 }
   0xa   : > { %s1934_s23 = smov (%p31_p4, %s1932_s23), 0 }
   0xb   : > { %s66_s25 = ssub.s32 %s1566_s20, %s1934_s23  ;;  %183 = sbr.rel (%p1270_p6) target bundleno = 57 (0x39), region = 16 }
   0xc   : > { %s67_s26 = sor.u32 %s66_s25, %s65_s24 }
   0xd   : > { %p68_p5 = scmp.eq.s32.totalorder %s67_s26, 0 }
   0xf   : > { %s1649_s28 = scalar_select %p68_p5, %s1550_s16, %s70_s27  }
  0x12   : > { %199 = sbr.rel (!%p79_p3) target bundleno = 57 (0x39), region = 24  ;;  %s201_s29 = sand.u32 (%p79_p3), 1, %s1550_s16  }
  0x13   : > { %s1273_s30 = sshll.u32 (%p79_p3), %s1566_s20, 1  ;;  %s1271_s5 = sshll.u32 (%p79_p3), %s201_s29, 9 }
  0x14   : > { %s1357_s6 = sshll.u32 (%p79_p3), %s1562_s19, 8  ;;  %s1663_s12 = scalar_lea.vmem (%p79_p3), [#allocation3], %s1271_s5 }
  0x15   : > { %s207_s7 = sadd.s32 (%p79_p3), %s1357_s6, %s1273_s30 }
  0x16   : > { %s1275_s8 = sshll.u32 (%p79_p3), %s207_s7, 2 }
  0x17   : > { %s1658_s11 = scalar_lea.vmem (%p79_p3), %s1919_s1, %s1275_s8 }
  0x18   : > { %v363_v0 = vld [vmem:[%s1658_s11] sm:$0xff] (%p79_p3)  ;;  %v365_v1 = vld [vmem:[%s1658_s11 + $0x10] sm:$0xff] (%p79_p3) }
  0x19   : > { %v367_v2 = vld [vmem:[%s1658_s11 + $0x20] sm:$0xff]  ;;  %364 = vst [vmem:[%s1663_s12] sm:$0xff] %v363_v0  ;;  %366 = vst [vmem:[%s1663_s12 + $0x8] sm:$0xff] %v365_v1  ;;  %v369_v3 = vld [vmem:[%s1658_s11 + $0x30] sm:$0xff] }
  0x1a   : > { %368 = vst [vmem:[%s1663_s12 + $0x10] sm:$0xff] %v367_v2  ;;  %v371_v4 = vld [vmem:[%s1658_s11 + $0x40] sm:$0xff]  ;;  %v373_v5 = vld [vmem:[%s1658_s11 + $0x50] sm:$0xff]  ;;  %370 = vst [vmem:[%s1663_s12 + $0x18] sm:$0xff] %v369_v3 }
  0x1b   : > { %372 = vst [vmem:[%s1663_s12 + $0x20] sm:$0xff] %v371_v4  ;;  %374 = vst [vmem:[%s1663_s12 + $0x28] sm:$0xff] %v373_v5  ;;  %v375_v6 = vld [vmem:[%s1658_s11 + $0x60] sm:$0xff]  ;;  %v377_v7 = vld [vmem:[%s1658_s11 + $0x70] sm:$0xff] }
  0x1c   : > { %v379_v8 = vld [vmem:[%s1658_s11 + $0x80] sm:$0xff]  ;;  %376 = vst [vmem:[%s1663_s12 + $0x30] sm:$0xff] %v375_v6  ;;  %378 = vst [vmem:[%s1663_s12 + $0x38] sm:$0xff] %v377_v7  ;;  %v381_v9 = vld [vmem:[%s1658_s11 + $0x90] sm:$0xff] }
  0x1d   : > { %380 = vst [vmem:[%s1663_s12 + $0x40] sm:$0xff] %v379_v8  ;;  %v383_v10 = vld [vmem:[%s1658_s11 + $0xa0] sm:$0xff]  ;;  %v385_v11 = vld [vmem:[%s1658_s11 + $0xb0] sm:$0xff]  ;;  %382 = vst [vmem:[%s1663_s12 + $0x48] sm:$0xff] %v381_v9 }
  0x1e   : > { %384 = vst [vmem:[%s1663_s12 + $0x50] sm:$0xff] %v383_v10  ;;  %386 = vst [vmem:[%s1663_s12 + $0x58] sm:$0xff] %v385_v11  ;;  %v387_v12 = vld [vmem:[%s1658_s11 + $0xc0] sm:$0xff]  ;;  %v389_v13 = vld [vmem:[%s1658_s11 + $0xd0] sm:$0xff] }
  0x1f   : > { %v391_v14 = vld [vmem:[%s1658_s11 + $0xe0] sm:$0xff]  ;;  %388 = vst [vmem:[%s1663_s12 + $0x60] sm:$0xff] %v387_v12  ;;  %390 = vst [vmem:[%s1663_s12 + $0x68] sm:$0xff] %v389_v13  ;;  %v393_v15 = vld [vmem:[%s1658_s11 + $0xf0] sm:$0xff] }
  0x20   : > { %392 = vst [vmem:[%s1663_s12 + $0x70] sm:$0xff] %v391_v14  ;;  %v395_v16 = vld [vmem:[%s1658_s11 + $0x100] sm:$0xff]  ;;  %v397_v17 = vld [vmem:[%s1658_s11 + $0x110] sm:$0xff]  ;;  %394 = vst [vmem:[%s1663_s12 + $0x78] sm:$0xff] %v393_v15 }
  0x21   : > { %396 = vst [vmem:[%s1663_s12 + $0x80] sm:$0xff] %v395_v16  ;;  %398 = vst [vmem:[%s1663_s12 + $0x88] sm:$0xff] %v397_v17  ;;  %v399_v18 = vld [vmem:[%s1658_s11 + $0x120] sm:$0xff]  ;;  %v401_v19 = vld [vmem:[%s1658_s11 + $0x130] sm:$0xff] }
  0x22   : > { %v403_v20 = vld [vmem:[%s1658_s11 + $0x140] sm:$0xff]  ;;  %400 = vst [vmem:[%s1663_s12 + $0x90] sm:$0xff] %v399_v18  ;;  %402 = vst [vmem:[%s1663_s12 + $0x98] sm:$0xff] %v401_v19  ;;  %v405_v21 = vld [vmem:[%s1658_s11 + $0x150] sm:$0xff] }
  0x23   : > { %404 = vst [vmem:[%s1663_s12 + $0xa0] sm:$0xff] %v403_v20  ;;  %v407_v22 = vld [vmem:[%s1658_s11 + $0x160] sm:$0xff]  ;;  %v409_v23 = vld [vmem:[%s1658_s11 + $0x170] sm:$0xff]  ;;  %406 = vst [vmem:[%s1663_s12 + $0xa8] sm:$0xff] %v405_v21 }
  0x24   : > { %408 = vst [vmem:[%s1663_s12 + $0xb0] sm:$0xff] %v407_v22  ;;  %410 = vst [vmem:[%s1663_s12 + $0xb8] sm:$0xff] %v409_v23  ;;  %v411_v24 = vld [vmem:[%s1658_s11 + $0x180] sm:$0xff]  ;;  %v413_v25 = vld [vmem:[%s1658_s11 + $0x190] sm:$0xff] }
  0x25   : > { %v415_v26 = vld [vmem:[%s1658_s11 + $0x1a0] sm:$0xff]  ;;  %412 = vst [vmem:[%s1663_s12 + $0xc0] sm:$0xff] %v411_v24  ;;  %414 = vst [vmem:[%s1663_s12 + $0xc8] sm:$0xff] %v413_v25  ;;  %v417_v27 = vld [vmem:[%s1658_s11 + $0x1b0] sm:$0xff] }
  0x26   : > { %416 = vst [vmem:[%s1663_s12 + $0xd0] sm:$0xff] %v415_v26  ;;  %v419_v28 = vld [vmem:[%s1658_s11 + $0x1c0] sm:$0xff]  ;;  %v421_v29 = vld [vmem:[%s1658_s11 + $0x1d0] sm:$0xff]  ;;  %418 = vst [vmem:[%s1663_s12 + $0xd8] sm:$0xff] %v417_v27 }
  0x27   : > { %420 = vst [vmem:[%s1663_s12 + $0xe0] sm:$0xff] %v419_v28  ;;  %422 = vst [vmem:[%s1663_s12 + $0xe8] sm:$0xff] %v421_v29  ;;  %v423_v30 = vld [vmem:[%s1658_s11 + $0x1e0] sm:$0xff]  ;;  %v425_v31 = vld [vmem:[%s1658_s11 + $0x1f0] sm:$0xff] }
  0x28   : > { %v427_v32 = vld [vmem:[%s1658_s11 + $0x200] sm:$0xff]  ;;  %424 = vst [vmem:[%s1663_s12 + $0xf0] sm:$0xff] %v423_v30  ;;  %426 = vst [vmem:[%s1663_s12 + $0xf8] sm:$0xff] %v425_v31  ;;  %v429_v33 = vld [vmem:[%s1658_s11 + $0x210] sm:$0xff] }
  0x29   : > { %428 = vst [vmem:[%s1663_s12 + $0x100] sm:$0xff] %v427_v32  ;;  %v431_v34 = vld [vmem:[%s1658_s11 + $0x220] sm:$0xff]  ;;  %v433_v35 = vld [vmem:[%s1658_s11 + $0x230] sm:$0xff]  ;;  %430 = vst [vmem:[%s1663_s12 + $0x108] sm:$0xff] %v429_v33 }
  0x2a   : > { %432 = vst [vmem:[%s1663_s12 + $0x110] sm:$0xff] %v431_v34  ;;  %434 = vst [vmem:[%s1663_s12 + $0x118] sm:$0xff] %v433_v35  ;;  %v435_v36 = vld [vmem:[%s1658_s11 + $0x240] sm:$0xff]  ;;  %v437_v37 = vld [vmem:[%s1658_s11 + $0x250] sm:$0xff] }
  0x2b   : > { %v439_v38 = vld [vmem:[%s1658_s11 + $0x260] sm:$0xff]  ;;  %436 = vst [vmem:[%s1663_s12 + $0x120] sm:$0xff] %v435_v36  ;;  %438 = vst [vmem:[%s1663_s12 + $0x128] sm:$0xff] %v437_v37  ;;  %v441_v39 = vld [vmem:[%s1658_s11 + $0x270] sm:$0xff] }
  0x2c   : > { %440 = vst [vmem:[%s1663_s12 + $0x130] sm:$0xff] %v439_v38  ;;  %v443_v40 = vld [vmem:[%s1658_s11 + $0x280] sm:$0xff]  ;;  %v445_v41 = vld [vmem:[%s1658_s11 + $0x290] sm:$0xff]  ;;  %442 = vst [vmem:[%s1663_s12 + $0x138] sm:$0xff] %v441_v39 }
  0x2d   : > { %444 = vst [vmem:[%s1663_s12 + $0x140] sm:$0xff] %v443_v40  ;;  %446 = vst [vmem:[%s1663_s12 + $0x148] sm:$0xff] %v445_v41  ;;  %v447_v42 = vld [vmem:[%s1658_s11 + $0x2a0] sm:$0xff]  ;;  %v449_v43 = vld [vmem:[%s1658_s11 + $0x2b0] sm:$0xff] }
  0x2e   : > { %v451_v44 = vld [vmem:[%s1658_s11 + $0x2c0] sm:$0xff]  ;;  %448 = vst [vmem:[%s1663_s12 + $0x150] sm:$0xff] %v447_v42  ;;  %450 = vst [vmem:[%s1663_s12 + $0x158] sm:$0xff] %v449_v43  ;;  %v453_v45 = vld [vmem:[%s1658_s11 + $0x2d0] sm:$0xff] }
  0x2f   : > { %452 = vst [vmem:[%s1663_s12 + $0x160] sm:$0xff] %v451_v44  ;;  %v455_v46 = vld [vmem:[%s1658_s11 + $0x2e0] sm:$0xff]  ;;  %v457_v47 = vld [vmem:[%s1658_s11 + $0x2f0] sm:$0xff]  ;;  %454 = vst [vmem:[%s1663_s12 + $0x168] sm:$0xff] %v453_v45 }
  0x30   : > { %456 = vst [vmem:[%s1663_s12 + $0x170] sm:$0xff] %v455_v46  ;;  %458 = vst [vmem:[%s1663_s12 + $0x178] sm:$0xff] %v457_v47  ;;  %v459_v48 = vld [vmem:[%s1658_s11 + $0x300] sm:$0xff]  ;;  %v461_v49 = vld [vmem:[%s1658_s11 + $0x310] sm:$0xff] }
  0x31   : > { %v463_v50 = vld [vmem:[%s1658_s11 + $0x320] sm:$0xff]  ;;  %460 = vst [vmem:[%s1663_s12 + $0x180] sm:$0xff] %v459_v48  ;;  %462 = vst [vmem:[%s1663_s12 + $0x188] sm:$0xff] %v461_v49  ;;  %v465_v51 = vld [vmem:[%s1658_s11 + $0x330] sm:$0xff] }
  0x32   : > { %464 = vst [vmem:[%s1663_s12 + $0x190] sm:$0xff] %v463_v50  ;;  %v467_v52 = vld [vmem:[%s1658_s11 + $0x340] sm:$0xff]  ;;  %v469_v53 = vld [vmem:[%s1658_s11 + $0x350] sm:$0xff]  ;;  %466 = vst [vmem:[%s1663_s12 + $0x198] sm:$0xff] %v465_v51 }
  0x33   : > { %468 = vst [vmem:[%s1663_s12 + $0x1a0] sm:$0xff] %v467_v52  ;;  %470 = vst [vmem:[%s1663_s12 + $0x1a8] sm:$0xff] %v469_v53  ;;  %v471_v54 = vld [vmem:[%s1658_s11 + $0x360] sm:$0xff]  ;;  %v473_v55 = vld [vmem:[%s1658_s11 + $0x370] sm:$0xff] }
  0x34   : > { %v475_v56 = vld [vmem:[%s1658_s11 + $0x380] sm:$0xff]  ;;  %472 = vst [vmem:[%s1663_s12 + $0x1b0] sm:$0xff] %v471_v54  ;;  %474 = vst [vmem:[%s1663_s12 + $0x1b8] sm:$0xff] %v473_v55  ;;  %v477_v57 = vld [vmem:[%s1658_s11 + $0x390] sm:$0xff] }
  0x35   : > { %476 = vst [vmem:[%s1663_s12 + $0x1c0] sm:$0xff] %v475_v56  ;;  %v479_v58 = vld [vmem:[%s1658_s11 + $0x3a0] sm:$0xff]  ;;  %v481_v59 = vld [vmem:[%s1658_s11 + $0x3b0] sm:$0xff]  ;;  %478 = vst [vmem:[%s1663_s12 + $0x1c8] sm:$0xff] %v477_v57 }
  0x36   : > { %480 = vst [vmem:[%s1663_s12 + $0x1d0] sm:$0xff] %v479_v58  ;;  %482 = vst [vmem:[%s1663_s12 + $0x1d8] sm:$0xff] %v481_v59  ;;  %v483_v60 = vld [vmem:[%s1658_s11 + $0x3c0] sm:$0xff]  ;;  %v485_v61 = vld [vmem:[%s1658_s11 + $0x3d0] sm:$0xff] }
  0x37   : > { %v487_v62 = vld [vmem:[%s1658_s11 + $0x3e0] sm:$0xff]  ;;  %484 = vst [vmem:[%s1663_s12 + $0x1e0] sm:$0xff] %v483_v60  ;;  %486 = vst [vmem:[%s1663_s12 + $0x1e8] sm:$0xff] %v485_v61  ;;  %v489_v63 = vld [vmem:[%s1658_s11 + $0x3f0] sm:$0xff] }
  0x38   : > { %488 = vst [vmem:[%s1663_s12 + $0x1f0] sm:$0xff] %v487_v62  ;;  %490 = vst [vmem:[%s1663_s12 + $0x1f8] sm:$0xff] %v489_v63 }
  0x39 PF: > { %p1276_p7 = scmp.ge.s32.totalorder %s1570_s21, 1  ;;  %p511_p8 = scmp.lt.s32.totalorder %s1570_s21, 5 }
  0x3b   : > { %p512_p9 = pnand %p1276_p7, %p511_p8 }
  0x3c   : > { %s518_s13 = sand.u32 (!%p512_p9), 1, %s1546_s15   ;;  %s1278_s14 = sshll.u32 (!%p512_p9), %s1554_s17, 2 }
  0x3d   : > { %515 = sbr.rel (%p512_p9) target bundleno = 378 (0x17a), region = 70  ;;  %s1277_s24 = sshll.u32 (!%p512_p9), %s518_s13, 9 }
  0x3e   : > { %p567_p10 = scmp.lt.s32.totalorder (!%p512_p9), %s1278_s14, 7  ;;  %s1280_s25 = sshll.u32 (!%p512_p9), %s1558_s18, 1 }
  0x3f   : > { %p577_p11 = scmp.lt.s32.totalorder (!%p512_p9), %s1280_s25, 3  ;;  %s1816_s13 = scalar_lea.vmem (!%p512_p9), [#allocation3], %s1277_s24 }
  0x40   : > { %p1284_p12 = scmp.ne.s32.totalorder (!%p512_p9), %s1554_s17, 0 }
  0x44   : > { %s1936_s14 = smov (!%p567_p10, %s1278_s14), 7  ;;  %s1938_s25 = smov (!%p577_p11, %s1280_s25), 3 }
  0x45   : > { %s1279_s26 = sshll.u32 %s1936_s14, 2  ;;  %s579_s15 = scalar_lea.vmem %s1920_s2, %s1938_s25  ;;  %v1572_v0 = vmov (!%p1284_p12), 0.0  }
  0x46   : > { %s1798_s30 = scalar_lea.vmem %s1918_s0, %s1279_s26  ;;  %s584_s18 = scalar_lea.vmem %s1921_s3, %s1938_s25  ;;  %600 = vst [vmem:[#allocation2] sm:$0xff] (!%p1284_p12), %v1572_v0  ;;  %601 = vst [vmem:[#allocation2 + $0x8] sm:$0xff] (!%p1284_p12), %v1572_v0 }
  0x47   : > { %s1283_s9 = sshll.u32 %s1938_s25, 2  ;;  %599 = sbr.rel (%p1284_p12) target bundleno = 78 (0x4e), region = 78 }
  0x48   : > { %s1814_s12 = scalar_lea.vmem %s1922_s4, %s1283_s9 }
  0x4e PF: > { %v1416_v1 = vld [vmem:[%s1816_s13 + $0x4] ss:$8 sps:$4 sm:$0xff]   ;;  %v1420_v3 = vld [vmem:[%s1816_s13] ss:$8 sps:$4 sm:$0xff]   ;;  %v1422_v5 = vld [vmem:[%s1816_s13 + $0x14] ss:$8 sps:$4 sm:$0xff]  }
  0x4f   : > { %v1418_v2 = vld [vmem:[%s1816_s13 + $0x104] ss:$8 sps:$4 sm:$0xff]   ;;  %1004 = vmatprep.subr.bf16.mxu0 %v1416_v1  ;;  %v1421_v4 = vld [vmem:[%s1816_s13 + $0x100] ss:$8 sps:$4 sm:$0xff]   ;;  %v1424_v6 = vld [vmem:[%s1816_s13 + $0x114] ss:$8 sps:$4 sm:$0xff]  }
  0x50   : > { %1045 = vmatprep.subr.bf16.mxu1 %v1418_v2  ;;  %1005 = vmatpush1.bf16.msra.mxu0 %v1420_v3  ;;  %v1426_v7 = vld [vmem:[%s1816_s13 + $0x10] ss:$8 sps:$4 sm:$0xff]   ;;  %v1428_v9 = vld [vmem:[%s1816_s13 + $0x24] ss:$8 sps:$4 sm:$0xff]   ;;  %v1432_v11 = vld [vmem:[%s1816_s13 + $0x20] ss:$8 sps:$4 sm:$0xff]  }
  0x51   : > { %1046 = vmatpush1.bf16.msra.mxu1 %v1421_v4  ;;  %1006 = vmatprep.subr.bf16.mxu0 %v1422_v5  ;;  %v1427_v8 = vld [vmem:[%s1816_s13 + $0x110] ss:$8 sps:$4 sm:$0xff]   ;;  %v1430_v10 = vld [vmem:[%s1816_s13 + $0x124] ss:$8 sps:$4 sm:$0xff]   ;;  %v1433_v12 = vld [vmem:[%s1816_s13 + $0x120] ss:$8 sps:$4 sm:$0xff]  }
  0x52   : > { %1047 = vmatprep.subr.bf16.mxu1 %v1424_v6  ;;  %v1434_v13 = vld [vmem:[%s1816_s13 + $0x34] ss:$8 sps:$4 sm:$0xff]   ;;  %v1438_v15 = vld [vmem:[%s1816_s13 + $0x30] ss:$8 sps:$4 sm:$0xff]   ;;  %v1440_v17 = vld [vmem:[%s1816_s13 + $0x44] ss:$8 sps:$4 sm:$0xff]  }
  0x53   : > { %v1436_v14 = vld [vmem:[%s1816_s13 + $0x134] ss:$8 sps:$4 sm:$0xff]   ;;  %v1439_v16 = vld [vmem:[%s1816_s13 + $0x130] ss:$8 sps:$4 sm:$0xff]   ;;  %v1442_v18 = vld [vmem:[%s1816_s13 + $0x144] ss:$8 sps:$4 sm:$0xff]  }
  0x54   : > { %1007 = vmatpush1.bf16.msra.mxu0 %v1426_v7  ;;  %v1444_v19 = vld [vmem:[%s1816_s13 + $0x40] ss:$8 sps:$4 sm:$0xff]   ;;  %v1446_v21 = vld [vmem:[%s1816_s13 + $0x54] ss:$8 sps:$4 sm:$0xff]   ;;  %v1450_v23 = vld [vmem:[%s1816_s13 + $0x50] ss:$8 sps:$4 sm:$0xff]  }
  0x55   : > { %1048 = vmatpush1.bf16.msra.mxu1 %v1427_v8  ;;  %1008 = vmatprep.subr.bf16.mxu0 %v1428_v9  ;;  %v1445_v20 = vld [vmem:[%s1816_s13 + $0x140] ss:$8 sps:$4 sm:$0xff]   ;;  %v1448_v22 = vld [vmem:[%s1816_s13 + $0x154] ss:$8 sps:$4 sm:$0xff]   ;;  %v1451_v24 = vld [vmem:[%s1816_s13 + $0x150] ss:$8 sps:$4 sm:$0xff]  }
  0x56   : > { %1049 = vmatprep.subr.bf16.mxu1 %v1430_v10  ;;  %v1452_v25 = vld [vmem:[%s1816_s13 + $0x64] ss:$8 sps:$4 sm:$0xff]   ;;  %v1456_v27 = vld [vmem:[%s1816_s13 + $0x60] ss:$8 sps:$4 sm:$0xff]   ;;  %v1458_v29 = vld [vmem:[%s1816_s13 + $0x74] ss:$8 sps:$4 sm:$0xff]  }
  0x57   : > { %v1454_v26 = vld [vmem:[%s1816_s13 + $0x164] ss:$8 sps:$4 sm:$0xff]   ;;  %v1457_v28 = vld [vmem:[%s1816_s13 + $0x160] ss:$8 sps:$4 sm:$0xff]   ;;  %v1460_v30 = vld [vmem:[%s1816_s13 + $0x174] ss:$8 sps:$4 sm:$0xff]  }
  0x58   : > { %1009 = vmatpush1.bf16.msra.mxu0 %v1432_v11  ;;  %v1462_v31 = vld [vmem:[%s1816_s13 + $0x70] ss:$8 sps:$4 sm:$0xff]   ;;  %v1464_v33 = vld [vmem:[%s1816_s13 + $0x84] ss:$8 sps:$4 sm:$0xff]   ;;  %v1468_v35 = vld [vmem:[%s1816_s13 + $0x80] ss:$8 sps:$4 sm:$0xff]  }
  0x59   : > { %1050 = vmatpush1.bf16.msra.mxu1 %v1433_v12  ;;  %1010 = vmatprep.subr.bf16.mxu0 %v1434_v13  ;;  %v1463_v32 = vld [vmem:[%s1816_s13 + $0x170] ss:$8 sps:$4 sm:$0xff]   ;;  %v1466_v34 = vld [vmem:[%s1816_s13 + $0x184] ss:$8 sps:$4 sm:$0xff]   ;;  %v1469_v36 = vld [vmem:[%s1816_s13 + $0x180] ss:$8 sps:$4 sm:$0xff]  }
  0x5a   : > { %1051 = vmatprep.subr.bf16.mxu1 %v1436_v14  ;;  %v1470_v37 = vld [vmem:[%s1816_s13 + $0x94] ss:$8 sps:$4 sm:$0xff]   ;;  %v1474_v39 = vld [vmem:[%s1816_s13 + $0x90] ss:$8 sps:$4 sm:$0xff]   ;;  %v1476_v41 = vld [vmem:[%s1816_s13 + $0xa4] ss:$8 sps:$4 sm:$0xff]  }
  0x5b   : > { %v1472_v38 = vld [vmem:[%s1816_s13 + $0x194] ss:$8 sps:$4 sm:$0xff]   ;;  %v1475_v40 = vld [vmem:[%s1816_s13 + $0x190] ss:$8 sps:$4 sm:$0xff]   ;;  %v1478_v42 = vld [vmem:[%s1816_s13 + $0x1a4] ss:$8 sps:$4 sm:$0xff]  }
  0x5c   : > { %1011 = vmatpush1.bf16.msra.mxu0 %v1438_v15  ;;  %v1480_v43 = vld [vmem:[%s1816_s13 + $0xa0] ss:$8 sps:$4 sm:$0xff]   ;;  %v1482_v45 = vld [vmem:[%s1816_s13 + $0xb4] ss:$8 sps:$4 sm:$0xff]   ;;  %v1486_v50 = vld [vmem:[%s1816_s13 + $0xb0] ss:$8 sps:$4 sm:$0xff]  }
  0x5d   : > { %1052 = vmatpush1.bf16.msra.mxu1 %v1439_v16  ;;  %1012 = vmatprep.subr.bf16.mxu0 %v1440_v17  ;;  %v1481_v44 = vld [vmem:[%s1816_s13 + $0x1a0] ss:$8 sps:$4 sm:$0xff]   ;;  %v1484_v46 = vld [vmem:[%s1816_s13 + $0x1b4] ss:$8 sps:$4 sm:$0xff]   ;;  %v1487_v51 = vld [vmem:[%s1816_s13 + $0x1b0] ss:$8 sps:$4 sm:$0xff]  }
  0x5e   : > { %1053 = vmatprep.subr.bf16.mxu1 %v1442_v18  ;;  %v604_v47 = vld [vmem:[%s1798_s30] sm:$0xff]  ;;  %v605_v49 = vld [vmem:[%s1798_s30 + $0x8] sm:$0xff]  ;;  %v1488_v53 = vld [vmem:[%s1816_s13 + $0xc4] ss:$8 sps:$4 sm:$0xff]   ;;  %p1353_p13 = scmp.ne.s32.totalorder %s1554_s17, 1 }
  0x5f   : > { %v1286_v48 = vcombine.high %v604_v47, %v604_v47  ;;  %v1288_v52 = vcombine.high %v605_v49, %v605_v49  ;;  %v1490_v54 = vld [vmem:[%s1816_s13 + $0x1c4] ss:$8 sps:$4 sm:$0xff]   ;;  %v1492_v55 = vld [vmem:[%s1816_s13 + $0xc0] ss:$8 sps:$4 sm:$0xff]   ;;  %v1494_v57 = vld [vmem:[%s1816_s13 + $0xd4] ss:$8 sps:$4 sm:$0xff]   ;;  %v1285_v5 = vcombine.low %v604_v47, %v604_v47  ;;  %v1287_v6 = vcombine.low %v605_v49, %v605_v49 }
  0x60   : > { %1013 = vmatpush1.bf16.msra.mxu0 %v1444_v19  ;;  %v1493_v56 = vld [vmem:[%s1816_s13 + $0x1c0] ss:$8 sps:$4 sm:$0xff]   ;;  %v1496_v58 = vld [vmem:[%s1816_s13 + $0x1d4] ss:$8 sps:$4 sm:$0xff]   ;;  %v1498_v59 = vld [vmem:[%s1816_s13 + $0xd0] ss:$8 sps:$4 sm:$0xff]  }
  0x61   : > { %1054 = vmatpush1.bf16.msra.mxu1 %v1445_v20  ;;  %1014 = vmatprep.subr.bf16.mxu0 %v1446_v21  ;;  %v1499_v60 = vld [vmem:[%s1816_s13 + $0x1d0] ss:$8 sps:$4 sm:$0xff]   ;;  %v1500_v61 = vld [vmem:[%s1816_s13 + $0xe4] ss:$8 sps:$4 sm:$0xff]   ;;  %v1504_v63 = vld [vmem:[%s1816_s13 + $0xe0] ss:$8 sps:$4 sm:$0xff]   ;;  %v1098_v21 = vlaneseq (!%p1353_p13) }
  0x62   : > { %1055 = vmatprep.subr.bf16.mxu1 %v1448_v22  ;;  %1036 = vmatprep.mubr.bf16.mxu0 %v1286_v48  ;;  %v1502_v62 = vld [vmem:[%s1816_s13 + $0x1e4] ss:$8 sps:$4 sm:$0xff]   ;;  %v1505_v0 = vld [vmem:[%s1816_s13 + $0x1e0] ss:$8 sps:$4 sm:$0xff]   ;;  %v1506_v1 = vld [vmem:[%s1816_s13 + $0xf4] ss:$8 sps:$4 sm:$0xff]  }
  0x63   : > { %1077 = vmatprep.mubr.bf16.mxu1 %v1288_v52  ;;  %v1508_v2 = vld [vmem:[%s1816_s13 + $0x1f4] ss:$8 sps:$4 sm:$0xff]   ;;  %v1510_v3 = vld [vmem:[%s1816_s13 + $0xf0] ss:$8 sps:$4 sm:$0xff]   ;;  %v1099_v22 = vshrl.u32 (!%p1353_p13), %v1098_v21, 7 }
  0x64   : > { %1015 = vmatpush1.bf16.msra.mxu0 %v1450_v23  ;;  %v1511_v4 = vld [vmem:[%s1816_s13 + $0x1f0] ss:$8 sps:$4 sm:$0xff]  }
  0x65   : > { %1056 = vmatpush1.bf16.msra.mxu1 %v1451_v24  ;;  %1016 = vmatprep.subr.bf16.mxu0 %v1452_v25  ;;  %v602_v8 = vld [vmem:[#allocation2] sm:$0xff]  ;;  %v603_v12 = vld [vmem:[#allocation2 + $0x8] sm:$0xff]  ;;  %v1100_v25 = vsub.s32 (!%p1353_p13), 0, %v1099_v22 }
  0x66   : > { %1057 = vmatprep.subr.bf16.mxu1 %v1454_v26  ;;  %v1096_v23 = vld [vmem:[%s579_s15] sm:$0x3] (!%p1353_p13)  ;;  %v1104_v26 = vsub.s32 (!%p1353_p13), 1, %v1099_v22 }
  0x67   : > { %v1110_v24 = vld [vmem:[%s584_s18] sm:$0x3] (!%p1353_p13) }
  0x68   : > { %1017 = vmatpush1.bf16.msra.mxu0 %v1456_v27 }
  0x69   : > { %1058 = vmatpush1.bf16.msra.mxu1 %v1457_v28  ;;  %1018 = vmatprep.subr.bf16.mxu0 %v1458_v29  ;;  %v1101_v29 = vrot.slane (!%p1353_p13), %v1096_v23, %v1100_v25 }
  0x6a   : > { %1059 = vmatprep.subr.bf16.mxu1 %v1460_v30  ;;  %v1105_v30 = vrot.slane (!%p1353_p13), %v1096_v23, %v1104_v26 }
  0x6c   : > { %1019 = vmatpush1.bf16.msra.mxu0 %v1462_v31  ;;  %v1115_v31 = vrot.slane (!%p1353_p13), %v1110_v24, %v1100_v25 }
  0x6d   : > { %1060 = vmatpush1.bf16.msra.mxu1 %v1463_v32  ;;  %1020 = vmatprep.subr.bf16.mxu0 %v1464_v33  ;;  %v1119_v32 = vrot.slane (!%p1353_p13), %v1110_v24, %v1104_v26 }
  0x6e   : > { %1061 = vmatprep.subr.bf16.mxu1 %v1466_v34 }
  0x70   : > { %1021 = vmatpush1.bf16.msra.mxu0 %v1468_v35 }
  0x71   : > { %1062 = vmatpush1.bf16.msra.mxu1 %v1469_v36  ;;  %1022 = vmatprep.subr.bf16.mxu0 %v1470_v37 }
  0x72   : > { %1063 = vmatprep.subr.bf16.mxu1 %v1472_v38 }
  0x74   : > { %1023 = vmatpush1.bf16.msra.mxu0 %v1474_v39 }
  0x75   : > { %1064 = vmatpush1.bf16.msra.mxu1 %v1475_v40  ;;  %1024 = vmatprep.subr.bf16.mxu0 %v1476_v41 }
  0x76   : > { %1065 = vmatprep.subr.bf16.mxu1 %v1478_v42 }
  0x78   : > { %1025 = vmatpush1.bf16.msra.mxu0 %v1480_v43 }
  0x79   : > { %1066 = vmatpush1.bf16.msra.mxu1 %v1481_v44  ;;  %1026 = vmatprep.subr.bf16.mxu0 %v1482_v45 }
  0x7a   : > { %1067 = vmatprep.subr.bf16.mxu1 %v1484_v46 }
  0x7c   : > { %1027 = vmatpush1.bf16.msra.mxu0 %v1486_v50 }
  0x7d   : > { %1068 = vmatpush1.bf16.msra.mxu1 %v1487_v51  ;;  %1028 = vmatprep.subr.bf16.mxu0 %v1488_v53 }
  0x7e   : > { %1069 = vmatprep.subr.bf16.mxu1 %v1490_v54 }
  0x80   : > { %1029 = vmatpush1.bf16.msra.mxu0 %v1492_v55 }
  0x81   : > { %1070 = vmatpush1.bf16.msra.mxu1 %v1493_v56  ;;  %1030 = vmatprep.subr.bf16.mxu0 %v1494_v57 }
  0x82   : > { %1071 = vmatprep.subr.bf16.mxu1 %v1496_v58 }
  0x84   : > { %1031 = vmatpush1.bf16.msra.mxu0 %v1498_v59 }
  0x85   : > { %1072 = vmatpush1.bf16.msra.mxu1 %v1499_v60  ;;  %1032 = vmatprep.subr.bf16.mxu0 %v1500_v61 }
  0x86   : > { %1073 = vmatprep.subr.bf16.mxu1 %v1502_v62 }
  0x88   : > { %1033 = vmatpush1.bf16.msra.mxu0 %v1504_v63 }
  0x89   : > { %1074 = vmatpush1.bf16.msra.mxu1 %v1505_v0  ;;  %1034 = vmatprep.subr.bf16.mxu0 %v1506_v1 }
  0x8a   : > { %1075 = vmatprep.subr.bf16.mxu1 %v1508_v2 }
  0x8c   : > { %1035 = vmatpush1.bf16.msra.mxu0 %v1510_v3 }
  0x8d   : > { %1076 = vmatpush1.bf16.msra.mxu1 %v1511_v4 }
  0x8f   : > { %1037 = vmatmul.mubr.bf16.vlgmr.msra.gmra.mrb[0].mxu0 %v1285_v5 }
  0x90   : > { %1078 = vmatmul.mubr.bf16.vlgmr.msra.gmra.mrb[0].mxu1 %v1287_v6 }
 0x162   : > { %v1038_v7 = vpop.f32.mrb[0].mxu0 }
 0x163   : > { %v1079_v9 = vpop.f32.mrb[0].mxu1  ;;  %v1040_v11 = vpop.f32.mrb[1].mxu0  ;;  %1093 = sbr.rel (%p1353_p13) target bundleno = 378 (0x17a), region = 82 }
 0x164   : > { %v1080_v10 = vadd.f32 %v1079_v9, %v1038_v7  ;;  %v1081_v13 = vpop.f32.mrb[1].mxu1  ;;  %v1042_v15 = vpop.f32.mrb[2].mxu0 }
 0x165   : > { %v1082_v14 = vadd.f32 %v1081_v13, %v1040_v11  ;;  %v1083_v16 = vpop.f32.mrb[2].mxu1  ;;  %v1043_v18 = vpop.f32.mrb[3].mxu0 }
 0x166   : > { %v1086_v17 = vadd.f32 %v1080_v10, %v602_v8  ;;  %v1084_v19 = vpop.f32.mrb[3].mxu1 }
 0x167   : > { %v1087_v20 = vadd.f32 %v1082_v14, %v603_v12 }
 0x168   : > { %1088 = vst [vmem:[#allocation2] sm:$0xff] %v1086_v17 }
 0x169   : > { %1089 = vst [vmem:[#allocation2 + $0x8] sm:$0xff] %v1087_v20 }
 0x16f   : > { %v1094_v27 = vld [vmem:[#allocation2] sm:$0xff] }
 0x170   : > { %v1095_v28 = vld [vmem:[#allocation2 + $0x8] sm:$0xff]  ;;  %v1108_v33 = vmul.f32 %v1101_v29, %v1094_v27 }
 0x171   : > { %v1109_v34 = vmul.f32 %v1105_v30, %v1095_v28 }
 0x172   : > { %v1122_v35 = vadd.f32 %v1115_v31, %v1108_v33 }
 0x173   : > { %v1123_v36 = vadd.f32 %v1119_v32, %v1109_v34 }
 0x174   : > { %v1124_v37 = vmax.f32 %v1122_v35, 0.0 }
 0x175   : > { %v1125_v38 = vmax.f32 %v1123_v36, 0.0 }
 0x177   : > { %v1358_v39 = vpack.c.bf16 %v1125_v38, %v1124_v37 }
 0x179   : > { %1134 = vst [vmem:[%s1814_s12] sm:$0xff] %v1358_v39 }
 0x17a PF: > { %s14_s21 = sadd.s32 1, %s1570_s21   ;;  %s1923_s15 = smov %s1550_s16 }
 0x17b   : > { %p11_p0 = scmp.ge.s32.totalorder %s14_s21, 6   ;;  %s1924_s16 = smov %s1649_s28 }
 0x17c   : > { %s1925_s17 = smov %s1562_s19  ;;  %s1926_s18 = smov %s1566_s20 }
 0x17d   : > { %s1927_s19 = smov %s1930_s22  ;;  %s1928_s20 = smov %s1934_s23 }
 0x17e   :  { %13 = sbr.rel (!%p11_p0) target bundleno = 4 (0x4), region = 126 }

</bundles_post_ra>
